<compile_context>
chip_gen: v5e
topology: v5e:2x2
jax: 0.10.0
libtpu: 0.0.40
codegen_flags: <defaults>
</compile_context>

<pallas_src>
import functools

import jax
import jax.numpy as jnp
from jax.experimental import pallas as pl
from jax.experimental.pallas import tpu as pltpu


# --- Config (defaults from the PyTorch Config dataclass) ---------------------
X_DIM = 784
Z_DIM = 20
HIDDEN1 = 512
HIDDEN2 = 256
ZP = 128            # lane-padded latent dim (mean / logvar each occupy ZP lanes)


def _round_up(n, m):
    return ((n + m - 1) // m) * m


def _leaky_relu(x, slope=0.2):
    # single VPU max (valid for 0 < slope < 1)
    return jnp.maximum(x, slope * x)


def _linear(x, w_ref, b_ref):
    # bf16 operands into the MXU, f32 accumulate, f32 bias add.
    # astype is a no-op when x is already bf16 (first layer), a real cast for
    # the f32 intermediates.
    return (
        jnp.dot(x.astype(jnp.bfloat16), w_ref[...],
                preferred_element_type=jnp.float32)
        + b_ref[...]
    )


def vae_kernel(
    # inputs (activations tiled on batch; x/e arrive as bf16)
    x_ref, e_ref,
    # encoder params (VMEM-resident, constant block index)
    we1_ref, be1_ref, we2_ref, be2_ref,
    whead_ref, bhead_ref,          # fused+padded mean|logvar head
    # decoder params
    wd1_ref, bd1_ref, wd2_ref, bd2_ref, wout_ref, bout_ref,
    # outputs
    xout_ref, ml_ref,
):
    x = x_ref[...]                 # bf16, fed to the MXU directly

    # ---- Encoder ----
    h = _leaky_relu(_linear(x, we1_ref, be1_ref))
    h = _leaky_relu(_linear(h, we2_ref, be2_ref))

    # Fused mean/logvar head -> (TB, 2*ZP); mean in [:, :ZP], logvar in [:, ZP:].
    ml = _linear(h, whead_ref, bhead_ref)
    mean_p = ml[:, :ZP]
    logvar_p = ml[:, ZP:]

    # ---- Reparameterize: z = mean + exp(0.5 * logvar) * e ----
    # Padded lanes: logvar = 0 -> std = 1, e = 0 -> z = 0 (inert downstream).
    z = mean_p + jnp.exp(0.5 * logvar_p) * e_ref[...].astype(jnp.float32)

    # ---- Decoder ----  (wd1 has zero rows for the padded latent lanes)
    d = _leaky_relu(_linear(z, wd1_ref, bd1_ref))
    d = _leaky_relu(_linear(d, wd2_ref, bd2_ref))
    x_out = _linear(d, wout_ref, bout_ref)

    xout_ref[...] = x_out
    ml_ref[...] = ml               # lane-dense (TB, 256) store; sliced in wrapper


def _pick_tb(B, tb):
    """Batch tile: multiple of 128 (MXU/sublane clean), >=2 grid steps when
    B > 128 so the "parallel" batch axis can use both v7x TensorCores."""
    half = _round_up(max(1, (B + 1) // 2), 128)
    return max(128, min(tb, half))


def _vmem_limit_bytes(TB, weight_buffers):
    """Scoped-VMEM budget derived from TB instead of a magic constant."""
    bf16, f32 = 2, 4
    # double-buffered activation tiles (inputs + outputs)
    act = 2 * (TB * X_DIM * bf16         # x tile (bf16)
               + TB * ZP * bf16          # e tile (bf16)
               + TB * X_DIM * f32        # x_out tile
               + TB * 2 * ZP * f32)      # ml tile
    weights = (X_DIM * HIDDEN1 + HIDDEN1 * HIDDEN2 + HIDDEN2 * 2 * ZP
               + ZP * HIDDEN2 + HIDDEN2 * HIDDEN1 + HIDDEN1 * X_DIM) * bf16
    weights *= weight_buffers
    # in-flight f32 intermediates (h1, h2, ml, d1, d2)
    inter = TB * (HIDDEN1 + HIDDEN2 + 2 * ZP + HIDDEN2 + HIDDEN1) * f32
    total = act + weights + inter
    limit = int(total * 1.5) + (4 << 20)           # headroom for compiler scratch
    return min(max(limit, 16 << 20), 60 << 20)     # floor 16 MiB, cap for v7x (64 MiB phys)


@functools.partial(jax.jit, static_argnames=("tb",))
def vae_forward(x, e, kparams, tb=256):
    """x: (B, X_DIM) f32, e: (B, Z_DIM) f32, kparams: prepare_params(...) output."""
    B = x.shape[0]
    TB = _pick_tb(B, tb)
    Bp = _round_up(B, TB)
    grid = (Bp // TB,)

    # Cast to bf16 once and pad only when needed (no full materialized copy
    # when B % TB == 0).
    x_bf = x.astype(jnp.bfloat16)
    e_bf = e.astype(jnp.bfloat16)
    if Bp != B:
        xp = jnp.pad(x_bf, ((0, Bp - B), (0, 0)))
    else:
        xp = x_bf
    ep = jnp.pad(e_bf, ((0, Bp - B), (0, ZP - Z_DIM)))

    single_buffer_weights = TB >= 512   # reclaim ~2.3 MB VMEM at big tiles (v7x)

    def act_spec(d):
        return pl.BlockSpec((TB, d), lambda i: (i, 0))

    def const_spec(a):
        # Full-array block, constant index -> stays VMEM-resident across grid steps.
        if single_buffer_weights:
            return pl.BlockSpec(a.shape, lambda i: (0, 0),
                                pipeline_mode=pl.Buffered(1))
        return pl.BlockSpec(a.shape, lambda i: (0, 0))

    in_specs = [act_spec(X_DIM), act_spec(ZP)] + [const_spec(p) for p in kparams]
    out_specs = [act_spec(X_DIM), act_spec(2 * ZP)]

    grid_spec = pltpu.PrefetchScalarGridSpec(
        num_scalar_prefetch=0,
        grid=grid,
        in_specs=in_specs,
        out_specs=out_specs,
    )

    x_out_p, ml_p = pl.pallas_call(
        vae_kernel,
        out_shape=(
            jax.ShapeDtypeStruct((Bp, X_DIM), jnp.float32),
            jax.ShapeDtypeStruct((Bp, 2 * ZP), jnp.float32),
        ),
        grid_spec=grid_spec,
        compiler_params=pltpu.CompilerParams(
            dimension_semantics=("parallel",),   # shards batch tiles across TCs (v7x)
            vmem_limit_bytes=_vmem_limit_bytes(
                TB, weight_buffers=1 if single_buffer_weights else 2),
        ),
    )(xp, ep, *kparams)

    x_out = x_out_p[:B]
    mean = ml_p[:B, :Z_DIM]
    logvar = ml_p[:B, ZP:ZP + Z_DIM]
    return x_out, mean, logvar


# --- Parameter construction ---------------------------------------------------
def init_torch_linear(key, in_dim, out_dim):
    """PyTorch nn.Linear default init: U(-1/sqrt(in), 1/sqrt(in)); torch layout (out, in)."""
    kw, kb = jax.random.split(key)
    bound = 1.0 / (in_dim ** 0.5)
    w = jax.random.uniform(kw, (out_dim, in_dim), jnp.float32, -bound, bound)
    b = jax.random.uniform(kb, (out_dim,), jnp.float32, -bound, bound)
    return w, b


def init_params(key):
    ks = jax.random.split(key, 7)
    we1, be1 = init_torch_linear(ks[0], X_DIM, HIDDEN1)
    we2, be2 = init_torch_linear(ks[1], HIDDEN1, HIDDEN2)
    wm, bm = init_torch_linear(ks[2], HIDDEN2, Z_DIM)
    wl, bl = init_torch_linear(ks[3], HIDDEN2, Z_DIM)
    wd1, bd1 = init_torch_linear(ks[4], Z_DIM, HIDDEN2)
    wd2, bd2 = init_torch_linear(ks[5], HIDDEN2, HIDDEN1)
    wo, bo = init_torch_linear(ks[6], HIDDEN1, X_DIM)
    return (we1, be1, we2, be2, wm, bm, wl, bl, wd1, bd1, wd2, bd2, wo, bo)


def prepare_params(torch_params):
    """PyTorch-style params -> kernel layout: transposed bf16 weights, f32 (1,out)
    biases, fused+lane-padded mean/logvar head, zero-row-padded decoder fc1."""
    (we1, be1, we2, be2, wm, bm, wl, bl,
     wd1, bd1, wd2, bd2, wo, bo) = torch_params

    def w_t(w):  # (out, in) -> (in, out) bf16
        return jnp.asarray(w, jnp.float32).T.astype(jnp.bfloat16)

    def b_row(b):  # (out,) -> (1, out) f32
        return jnp.asarray(b, jnp.float32).reshape(1, -1)

    # Fused + lane-padded head: (HIDDEN2, 2*ZP), mean cols [0:Z), logvar cols [ZP:ZP+Z)
    whead = jnp.zeros((HIDDEN2, 2 * ZP), jnp.float32)
    whead = whead.at[:, :Z_DIM].set(jnp.asarray(wm, jnp.float32).T)
    whead = whead.at[:, ZP:ZP + Z_DIM].set(jnp.asarray(wl, jnp.float32).T)
    whead = whead.astype(jnp.bfloat16)
    bhead = jnp.zeros((1, 2 * ZP), jnp.float32)
    bhead = bhead.at[0, :Z_DIM].set(jnp.asarray(bm, jnp.float32))
    bhead = bhead.at[0, ZP:ZP + Z_DIM].set(jnp.asarray(bl, jnp.float32))

    # Decoder fc1 with zero rows for padded latent lanes: (ZP, HIDDEN2)
    wd1_p = jnp.zeros((ZP, HIDDEN2), jnp.float32)
    wd1_p = wd1_p.at[:Z_DIM, :].set(jnp.asarray(wd1, jnp.float32).T)
    wd1_p = wd1_p.astype(jnp.bfloat16)

    return (
        w_t(we1), b_row(be1),
        w_t(we2), b_row(be2),
        whead, bhead,
        wd1_p, b_row(bd1),
        w_t(wd2), b_row(bd2),
        w_t(wo), b_row(bo),
    )


# --- Pure-JAX reference (same bf16/f32 math as the kernel) --------------------
def reference_forward(x, e, kparams):
    (we1, be1, we2, be2, wh, bh, wd1, bd1, wd2, bd2, wo, bo) = kparams

    def lin(a, w, b):
        return jnp.dot(a.astype(jnp.bfloat16), w,
                       preferred_element_type=jnp.float32) + b

    lrelu = lambda v: jnp.maximum(v, 0.2 * v)
    x_bf = x.astype(jnp.bfloat16)
    ep = jnp.pad(e.astype(jnp.bfloat16), ((0, 0), (0, ZP - Z_DIM)))

    h = lrelu(lin(x_bf, we1, be1))
    h = lrelu(lin(h, we2, be2))
    ml = lin(h, wh, bh)
    mean_p, logvar_p = ml[:, :ZP], ml[:, ZP:]
    z = mean_p + jnp.exp(0.5 * logvar_p) * ep.astype(jnp.float32)
    d = lrelu(lin(z, wd1, bd1))
    d = lrelu(lin(d, wd2, bd2))
    x_out = lin(d, wo, bo)
    return x_out, mean_p[:, :Z_DIM], logvar_p[:, :Z_DIM]


if __name__ == "__main__":
    key = jax.random.PRNGKey(0)
    k_params, k_x, k_noise = jax.random.split(key, 3)

    # batch not a multiple of the tile: exercises batch padding + a 2-step
    # (parallel) grid with the default tb=256 -> TB=128, Bp=256.
    batch = 200
    torch_params = init_params(k_params)
    kparams = prepare_params(torch_params)

    x = jax.random.uniform(k_x, (batch, X_DIM), jnp.float32)       # MNIST-like pixels
    e = jax.random.normal(k_noise, (batch, Z_DIM), jnp.float32)    # reparameterization noise
    # TODO(synk): torch.randn_like draws noise inside forward(); here it is passed
    # in deterministically so the kernel stays a pure function of its inputs.

    x_out, mean, logvar = vae_forward(x, e, kparams)
    jax.block_until_ready((x_out, mean, logvar))

    ref_x_out, ref_mean, ref_logvar = reference_forward(x, e, kparams)
    assert x_out.shape == (batch, X_DIM)
    assert mean.shape == (batch, Z_DIM) and logvar.shape == (batch, Z_DIM)
    assert jnp.allclose(x_out, ref_x_out, atol=1e-2, rtol=1e-2)
    assert jnp.allclose(mean, ref_mean, atol=1e-2, rtol=1e-2)
    assert jnp.allclose(logvar, ref_logvar, atol=1e-2, rtol=1e-2)

    print("KERNEL_OK")
</pallas_src>

<mosaic_0001>
module attributes {stable_mosaic.version = 11 : i64} {
  func.func @vae_kernel(%arg0: i32, %arg1: memref<128x784xbf16, #tpu.memory_space<vmem>>, %arg2: memref<128x128xbf16, #tpu.memory_space<vmem>>, %arg3: memref<784x512xbf16, #tpu.memory_space<vmem>>, %arg4: memref<1x512xf32, #tpu.memory_space<vmem>>, %arg5: memref<512x256xbf16, #tpu.memory_space<vmem>>, %arg6: memref<1x256xf32, #tpu.memory_space<vmem>>, %arg7: memref<256x256xbf16, #tpu.memory_space<vmem>>, %arg8: memref<1x256xf32, #tpu.memory_space<vmem>>, %arg9: memref<128x256xbf16, #tpu.memory_space<vmem>>, %arg10: memref<1x256xf32, #tpu.memory_space<vmem>>, %arg11: memref<256x512xbf16, #tpu.memory_space<vmem>>, %arg12: memref<1x512xf32, #tpu.memory_space<vmem>>, %arg13: memref<512x784xbf16, #tpu.memory_space<vmem>>, %arg14: memref<1x784xf32, #tpu.memory_space<vmem>>, %arg15: memref<128x784xf32, #tpu.memory_space<vmem>>, %arg16: memref<128x256xf32, #tpu.memory_space<vmem>>) attributes {dimension_semantics = [#tpu.dimension_semantics<parallel>], iteration_bounds = array<i64: 2>, scalar_prefetch = 0 : i64, scratch_operands = 0 : i64, tpu.core_type = #tpu.core_type<tc>, window_params = [{transform_indices = @transform_0, window_bounds = array<i64: 128, 784>}, {transform_indices = @transform_1, window_bounds = array<i64: 128, 128>}, {pipeline_mode = #tpu.pipeline_mode<synchronous>, transform_indices = @transform_2, window_bounds = array<i64: 784, 512>}, {pipeline_mode = #tpu.pipeline_mode<synchronous>, transform_indices = @transform_3, window_bounds = array<i64: 1, 512>}, {pipeline_mode = #tpu.pipeline_mode<synchronous>, transform_indices = @transform_4, window_bounds = array<i64: 512, 256>}, {pipeline_mode = #tpu.pipeline_mode<synchronous>, transform_indices = @transform_5, window_bounds = array<i64: 1, 256>}, {pipeline_mode = #tpu.pipeline_mode<synchronous>, transform_indices = @transform_6, window_bounds = array<i64: 256, 256>}, {pipeline_mode = #tpu.pipeline_mode<synchronous>, transform_indices = @transform_7, window_bounds = array<i64: 1, 256>}, {pipeline_mode = #tpu.pipeline_mode<synchronous>, transform_indices = @transform_8, window_bounds = array<i64: 128, 256>}, {pipeline_mode = #tpu.pipeline_mode<synchronous>, transform_indices = @transform_9, window_bounds = array<i64: 1, 256>}, {pipeline_mode = #tpu.pipeline_mode<synchronous>, transform_indices = @transform_10, window_bounds = array<i64: 256, 512>}, {pipeline_mode = #tpu.pipeline_mode<synchronous>, transform_indices = @transform_11, window_bounds = array<i64: 1, 512>}, {pipeline_mode = #tpu.pipeline_mode<synchronous>, transform_indices = @transform_12, window_bounds = array<i64: 512, 784>}, {pipeline_mode = #tpu.pipeline_mode<synchronous>, transform_indices = @transform_13, window_bounds = array<i64: 1, 784>}, {transform_indices = @transform_14, window_bounds = array<i64: 128, 784>}, {transform_indices = @transform_15, window_bounds = array<i64: 128, 256>}]} {
    %c0 = arith.constant 0 : index
    %c0_0 = arith.constant 0 : index
    %0 = vector.load %arg1[%c0, %c0_0] : memref<128x784xbf16, #tpu.memory_space<vmem>>, vector<128x784xbf16>
    %c0_1 = arith.constant 0 : index
    %c0_2 = arith.constant 0 : index
    %1 = vector.load %arg3[%c0_1, %c0_2] : memref<784x512xbf16, #tpu.memory_space<vmem>>, vector<784x512xbf16>
    %cst = arith.constant dense<0.000000e+00> : vector<128x512xf32>
    %2 = tpu.matmul %0, %1, %cst {dimension_numbers = #tpu.dot_dimension_numbers<[1], [0], [0], [1], [0, 0, 1, 1], [], []>} : vector<128x784xbf16>, vector<784x512xbf16>, vector<128x512xf32> -> vector<128x512xf32>
    %c0_3 = arith.constant 0 : index
    %c0_4 = arith.constant 0 : index
    %3 = vector.load %arg4[%c0_3, %c0_4] : memref<1x512xf32, #tpu.memory_space<vmem>>, vector<1x512xf32>
    %4 = vector.broadcast %3 : vector<1x512xf32> to vector<128x512xf32>
    %5 = arith.addf %2, %4 : vector<128x512xf32>
    %cst_5 = arith.constant 2.000000e-01 : f32
    %6 = vector.broadcast %cst_5 : f32 to vector<128x512xf32>
    %7 = arith.mulf %6, %5 : vector<128x512xf32>
    %8 = arith.maximumf %5, %7 : vector<128x512xf32>
    %9 = arith.truncf %8 : vector<128x512xf32> to vector<128x512xbf16>
    %c0_6 = arith.constant 0 : index
    %c0_7 = arith.constant 0 : index
    %10 = vector.load %arg5[%c0_6, %c0_7] : memref<512x256xbf16, #tpu.memory_space<vmem>>, vector<512x256xbf16>
    %cst_8 = arith.constant dense<0.000000e+00> : vector<128x256xf32>
    %11 = tpu.matmul %9, %10, %cst_8 {dimension_numbers = #tpu.dot_dimension_numbers<[1], [0], [0], [1], [0, 0, 1, 1], [], []>} : vector<128x512xbf16>, vector<512x256xbf16>, vector<128x256xf32> -> vector<128x256xf32>
    %c0_9 = arith.constant 0 : index
    %c0_10 = arith.constant 0 : index
    %12 = vector.load %arg6[%c0_9, %c0_10] : memref<1x256xf32, #tpu.memory_space<vmem>>, vector<1x256xf32>
    %13 = vector.broadcast %12 : vector<1x256xf32> to vector<128x256xf32>
    %14 = arith.addf %11, %13 : vector<128x256xf32>
    %cst_11 = arith.constant 2.000000e-01 : f32
    %15 = vector.broadcast %cst_11 : f32 to vector<128x256xf32>
    %16 = arith.mulf %15, %14 : vector<128x256xf32>
    %17 = arith.maximumf %14, %16 : vector<128x256xf32>
    %18 = arith.truncf %17 : vector<128x256xf32> to vector<128x256xbf16>
    %c0_12 = arith.constant 0 : index
    %c0_13 = arith.constant 0 : index
    %19 = vector.load %arg7[%c0_12, %c0_13] : memref<256x256xbf16, #tpu.memory_space<vmem>>, vector<256x256xbf16>
    %cst_14 = arith.constant dense<0.000000e+00> : vector<128x256xf32>
    %20 = tpu.matmul %18, %19, %cst_14 {dimension_numbers = #tpu.dot_dimension_numbers<[1], [0], [0], [1], [0, 0, 1, 1], [], []>} : vector<128x256xbf16>, vector<256x256xbf16>, vector<128x256xf32> -> vector<128x256xf32>
    %c0_15 = arith.constant 0 : index
    %c0_16 = arith.constant 0 : index
    %21 = vector.load %arg8[%c0_15, %c0_16] : memref<1x256xf32, #tpu.memory_space<vmem>>, vector<1x256xf32>
    %22 = vector.broadcast %21 : vector<1x256xf32> to vector<128x256xf32>
    %23 = arith.addf %20, %22 : vector<128x256xf32>
    %24 = vector.extract_strided_slice %23 {offsets = [0, 0], sizes = [128, 128], strides = [1, 1]} : vector<128x256xf32> to vector<128x128xf32>
    %25 = vector.extract_strided_slice %23 {offsets = [0, 128], sizes = [128, 128], strides = [1, 1]} : vector<128x256xf32> to vector<128x128xf32>
    %cst_17 = arith.constant 5.000000e-01 : f32
    %26 = vector.broadcast %cst_17 : f32 to vector<128x128xf32>
    %27 = arith.mulf %26, %25 : vector<128x128xf32>
    %28 = math.exp %27 : vector<128x128xf32>
    %c0_18 = arith.constant 0 : index
    %c0_19 = arith.constant 0 : index
    %29 = vector.load %arg2[%c0_18, %c0_19] : memref<128x128xbf16, #tpu.memory_space<vmem>>, vector<128x128xbf16>
    %30 = arith.extf %29 : vector<128x128xbf16> to vector<128x128xf32>
    %31 = arith.mulf %28, %30 : vector<128x128xf32>
    %32 = arith.addf %24, %31 : vector<128x128xf32>
    %33 = arith.truncf %32 : vector<128x128xf32> to vector<128x128xbf16>
    %c0_20 = arith.constant 0 : index
    %c0_21 = arith.constant 0 : index
    %34 = vector.load %arg9[%c0_20, %c0_21] : memref<128x256xbf16, #tpu.memory_space<vmem>>, vector<128x256xbf16>
    %cst_22 = arith.constant dense<0.000000e+00> : vector<128x256xf32>
    %35 = tpu.matmul %33, %34, %cst_22 {dimension_numbers = #tpu.dot_dimension_numbers<[1], [0], [0], [1], [0, 0, 1, 1], [], []>} : vector<128x128xbf16>, vector<128x256xbf16>, vector<128x256xf32> -> vector<128x256xf32>
    %c0_23 = arith.constant 0 : index
    %c0_24 = arith.constant 0 : index
    %36 = vector.load %arg10[%c0_23, %c0_24] : memref<1x256xf32, #tpu.memory_space<vmem>>, vector<1x256xf32>
    %37 = vector.broadcast %36 : vector<1x256xf32> to vector<128x256xf32>
    %38 = arith.addf %35, %37 : vector<128x256xf32>
    %cst_25 = arith.constant 2.000000e-01 : f32
    %39 = vector.broadcast %cst_25 : f32 to vector<128x256xf32>
    %40 = arith.mulf %39, %38 : vector<128x256xf32>
    %41 = arith.maximumf %38, %40 : vector<128x256xf32>
    %42 = arith.truncf %41 : vector<128x256xf32> to vector<128x256xbf16>
    %c0_26 = arith.constant 0 : index
    %c0_27 = arith.constant 0 : index
    %43 = vector.load %arg11[%c0_26, %c0_27] : memref<256x512xbf16, #tpu.memory_space<vmem>>, vector<256x512xbf16>
    %cst_28 = arith.constant dense<0.000000e+00> : vector<128x512xf32>
    %44 = tpu.matmul %42, %43, %cst_28 {dimension_numbers = #tpu.dot_dimension_numbers<[1], [0], [0], [1], [0, 0, 1, 1], [], []>} : vector<128x256xbf16>, vector<256x512xbf16>, vector<128x512xf32> -> vector<128x512xf32>
    %c0_29 = arith.constant 0 : index
    %c0_30 = arith.constant 0 : index
    %45 = vector.load %arg12[%c0_29, %c0_30] : memref<1x512xf32, #tpu.memory_space<vmem>>, vector<1x512xf32>
    %46 = vector.broadcast %45 : vector<1x512xf32> to vector<128x512xf32>
    %47 = arith.addf %44, %46 : vector<128x512xf32>
    %cst_31 = arith.constant 2.000000e-01 : f32
    %48 = vector.broadcast %cst_31 : f32 to vector<128x512xf32>
    %49 = arith.mulf %48, %47 : vector<128x512xf32>
    %50 = arith.maximumf %47, %49 : vector<128x512xf32>
    %51 = arith.truncf %50 : vector<128x512xf32> to vector<128x512xbf16>
    %c0_32 = arith.constant 0 : index
    %c0_33 = arith.constant 0 : index
    %52 = vector.load %arg13[%c0_32, %c0_33] : memref<512x784xbf16, #tpu.memory_space<vmem>>, vector<512x784xbf16>
    %cst_34 = arith.constant dense<0.000000e+00> : vector<128x784xf32>
    %53 = tpu.matmul %51, %52, %cst_34 {dimension_numbers = #tpu.dot_dimension_numbers<[1], [0], [0], [1], [0, 0, 1, 1], [], []>} : vector<128x512xbf16>, vector<512x784xbf16>, vector<128x784xf32> -> vector<128x784xf32>
    %c0_35 = arith.constant 0 : index
    %c0_36 = arith.constant 0 : index
    %54 = vector.load %arg14[%c0_35, %c0_36] : memref<1x784xf32, #tpu.memory_space<vmem>>, vector<1x784xf32>
    %55 = vector.broadcast %54 : vector<1x784xf32> to vector<128x784xf32>
    %56 = arith.addf %53, %55 : vector<128x784xf32>
    %c0_37 = arith.constant 0 : index
    %c0_38 = arith.constant 0 : index
    %57 = vector.load %arg15[%c0_37, %c0_38] : memref<128x784xf32, #tpu.memory_space<vmem>>, vector<128x784xf32>
    tpu.vector_store %arg15[%c0_37, %c0_38], %56 {strides = array<i32>} : memref<128x784xf32, #tpu.memory_space<vmem>>, vector<128x784xf32>,
    %c0_39 = arith.constant 0 : index
    %c0_40 = arith.constant 0 : index
    %58 = vector.load %arg16[%c0_39, %c0_40] : memref<128x256xf32, #tpu.memory_space<vmem>>, vector<128x256xf32>
    tpu.vector_store %arg16[%c0_39, %c0_40], %23 {strides = array<i32>} : memref<128x256xf32, #tpu.memory_space<vmem>>, vector<128x256xf32>,
    return
  }
  func.func @transform_0(%arg0: i32) -> (i32, i32) {
    %c0_i32 = arith.constant 0 : i32
    %c0_i32_0 = arith.constant 0 : i32
    return %arg0, %c0_i32 : i32, i32
  }
  func.func @transform_1(%arg0: i32) -> (i32, i32) {
    %c0_i32 = arith.constant 0 : i32
    %c0_i32_0 = arith.constant 0 : i32
    return %arg0, %c0_i32 : i32, i32
  }
  func.func @transform_2(%arg0: i32) -> (i32, i32) {
    %c0_i32 = arith.constant 0 : i32
    %c0_i32_0 = arith.constant 0 : i32
    %c0_i32_1 = arith.constant 0 : i32
    return %c0_i32, %c0_i32_0 : i32, i32
  }
  func.func @transform_3(%arg0: i32) -> (i32, i32) {
    %c0_i32 = arith.constant 0 : i32
    %c0_i32_0 = arith.constant 0 : i32
    %c0_i32_1 = arith.constant 0 : i32
    return %c0_i32, %c0_i32_0 : i32, i32
  }
  func.func @transform_4(%arg0: i32) -> (i32, i32) {
    %c0_i32 = arith.constant 0 : i32
    %c0_i32_0 = arith.constant 0 : i32
    %c0_i32_1 = arith.constant 0 : i32
    return %c0_i32, %c0_i32_0 : i32, i32
  }
  func.func @transform_5(%arg0: i32) -> (i32, i32) {
    %c0_i32 = arith.constant 0 : i32
    %c0_i32_0 = arith.constant 0 : i32
    %c0_i32_1 = arith.constant 0 : i32
    return %c0_i32, %c0_i32_0 : i32, i32
  }
  func.func @transform_6(%arg0: i32) -> (i32, i32) {
    %c0_i32 = arith.constant 0 : i32
    %c0_i32_0 = arith.constant 0 : i32
    %c0_i32_1 = arith.constant 0 : i32
    return %c0_i32, %c0_i32_0 : i32, i32
  }
  func.func @transform_7(%arg0: i32) -> (i32, i32) {
    %c0_i32 = arith.constant 0 : i32
    %c0_i32_0 = arith.constant 0 : i32
    %c0_i32_1 = arith.constant 0 : i32
    return %c0_i32, %c0_i32_0 : i32, i32
  }
  func.func @transform_8(%arg0: i32) -> (i32, i32) {
    %c0_i32 = arith.constant 0 : i32
    %c0_i32_0 = arith.constant 0 : i32
    %c0_i32_1 = arith.constant 0 : i32
    return %c0_i32, %c0_i32_0 : i32, i32
  }
  func.func @transform_9(%arg0: i32) -> (i32, i32) {
    %c0_i32 = arith.constant 0 : i32
    %c0_i32_0 = arith.constant 0 : i32
    %c0_i32_1 = arith.constant 0 : i32
    return %c0_i32, %c0_i32_0 : i32, i32
  }
  func.func @transform_10(%arg0: i32) -> (i32, i32) {
    %c0_i32 = arith.constant 0 : i32
    %c0_i32_0 = arith.constant 0 : i32
    %c0_i32_1 = arith.constant 0 : i32
    return %c0_i32, %c0_i32_0 : i32, i32
  }
  func.func @transform_11(%arg0: i32) -> (i32, i32) {
    %c0_i32 = arith.constant 0 : i32
    %c0_i32_0 = arith.constant 0 : i32
    %c0_i32_1 = arith.constant 0 : i32
    return %c0_i32, %c0_i32_0 : i32, i32
  }
  func.func @transform_12(%arg0: i32) -> (i32, i32) {
    %c0_i32 = arith.constant 0 : i32
    %c0_i32_0 = arith.constant 0 : i32
    %c0_i32_1 = arith.constant 0 : i32
    return %c0_i32, %c0_i32_0 : i32, i32
  }
  func.func @transform_13(%arg0: i32) -> (i32, i32) {
    %c0_i32 = arith.constant 0 : i32
    %c0_i32_0 = arith.constant 0 : i32
    %c0_i32_1 = arith.constant 0 : i32
    return %c0_i32, %c0_i32_0 : i32, i32
  }
  func.func @transform_14(%arg0: i32) -> (i32, i32) {
    %c0_i32 = arith.constant 0 : i32
    %c0_i32_0 = arith.constant 0 : i32
    return %arg0, %c0_i32 : i32, i32
  }
  func.func @transform_15(%arg0: i32) -> (i32, i32) {
    %c0_i32 = arith.constant 0 : i32
    %c0_i32_0 = arith.constant 0 : i32
    return %arg0, %c0_i32 : i32, i32
  }
}

</mosaic_0001>

<bundles_post_ra>
// kernel: vae_forward.1
= control target key start
LH: loop header
LB: loop body
LE: loop exit
PB: predicated region body
PF: predicated region fallthrough
CT: control target
= control target key end

     0   :  { %s12776_s18 = smov 0   ;;  %s18511_s0 = inlined_call_operand.vmem [shape: bf16[256,784], index: 0, kind: input, shape index: {}]   ;;  %s18512_s1 = inlined_call_operand.vmem [shape: bf16[256,128], index: 1, kind: input, shape index: {}]   ;;  %s18513_s2 = inlined_call_operand.vmem [shape: bf16[784,512], index: 2, kind: input, shape index: {}]   ;;  %s18514_s3 = inlined_call_operand.vmem [shape: f32[1,512], index: 3, kind: input, shape index: {}]   ;;  %s18515_s4 = inlined_call_operand.vmem [shape: bf16[512,256], index: 4, kind: input, shape index: {}]   ;;  %s18516_s5 = inlined_call_operand.vmem [shape: f32[1,256], index: 5, kind: input, shape index: {}]   ;;  %s18517_s6 = inlined_call_operand.vmem [shape: bf16[256,256], index: 6, kind: input, shape index: {}]   ;;  %s18518_s7 = inlined_call_operand.vmem [shape: f32[1,256], index: 7, kind: input, shape index: {}]   ;;  %s18519_s8 = inlined_call_operand.vmem [shape: bf16[128,256], index: 8, kind: input, shape index: {}]   ;;  %s18520_s9 = inlined_call_operand.vmem [shape: f32[1,256], index: 9, kind: input, shape index: {}]   ;;  %s18521_s10 = inlined_call_operand.vmem [shape: bf16[256,512], index: 10, kind: input, shape index: {}]   ;;  %s18522_s11 = inlined_call_operand.vmem [shape: f32[1,512], index: 11, kind: input, shape index: {}]   ;;  %s18523_s12 = inlined_call_operand.vmem [shape: bf16[512,784], index: 12, kind: input, shape index: {}]   ;;  %s18524_s13 = inlined_call_operand.vmem [shape: f32[1,784], index: 13, kind: input, shape index: {}]   ;;  %s18525_s14 = inlined_call_operand.vmem [shape: f32[256,784], index: 14, kind: output, shape index: {0}]   ;;  %s18526_s15 = inlined_call_operand.vmem [shape: f32[256,256], index: 15, kind: output, shape index: {1}]  }
   0x1 LB: > { %s9277_s19 = sadd.s32 4294967295, %s12694_s18   ;;  %p9281_p0 = scmp.ge.s32.totalorder %s12694_s18, 1  ;;  %s12694_s18 = sphi %s12776_s18, %s26_s18  }
   0x2   : > { %p453_p1 = scmp.lt.s32.totalorder %s12694_s18, 3 }
   0x4   : > { %p454_p2 = pnand %p9281_p0, %p453_p1 }
   0x6   : > { %457 = sbr.rel (%p454_p2) target bundleno = 2903 (0xb57), region = 76 }
   0xb   : > { %v9629_v0 = vld [vmem:[%s18513_s2 + $0xe0] sm:$0xf]  ;;  %v12020_v1 = vld [vmem:[%s18513_s2 + $0xec] sm:$0xf0]  ;;  %s9282_s26 = sshll.u32 %s9277_s19, 4  ;;  %vm2072_vm0 = vcmask 130048  }
   0xc   : > { %v9757_v2 = vld [vmem:[%s18513_s2 + $0x1e0] sm:$0xf]  ;;  %v9630_v3 = vor.u32 %v12020_v1, %v9629_v0  ;;  %v12052_v4 = vld [vmem:[%s18513_s2 + $0x1ec] sm:$0xf0]  ;;  %p515_p3 = scmp.lt.s32.totalorder %s9282_s26, 31 }
   0xd   : > { %v9613_v5 = vld [vmem:[%s18513_s2 + $0xc0] sm:$0xf]  ;;  %v12016_v6 = vld [vmem:[%s18513_s2 + $0xcc] sm:$0xf0]  ;;  %v9758_v7 = vor.u32 %v12052_v4, %v9757_v2 }
   0xe   : > { %v9741_v8 = vld [vmem:[%s18513_s2 + $0x1c0] sm:$0xf]  ;;  %v12048_v9 = vld [vmem:[%s18513_s2 + $0x1cc] sm:$0xf0]  ;;  %2097 = vmatpush.bf16.msra.mxu0 %v9630_v3  ;;  %12625 = vmatpush.bf16.msra.mxu2 %v9630_v3  ;;  %v9614_v10 = vor.u32 %v12016_v6, %v9613_v5  ;;  %s18761_s26 = smov (!%p515_p3, %s9282_s26), 31 }
   0xf   : > { %2146 = vmatpush.bf16.msra.mxu1 %v9758_v7  ;;  %12633 = vmatpush.bf16.msra.mxu3 %v9758_v7  ;;  %v9742_v11 = vor.u32 %v12048_v9, %v9741_v8  ;;  %v9597_v12 = vld [vmem:[%s18513_s2 + $0xa0] sm:$0xf]  ;;  %v12012_v13 = vld [vmem:[%s18513_s2 + $0xac] sm:$0xf0]  ;;  %s12641_s30 = smul.u32 28, %s18761_s26  ;;  %s11933_s27 = sshll.u32 %s18761_s26, 4 }
  0x10   : > { %v9725_v14 = vld [vmem:[%s18513_s2 + $0x1a0] sm:$0xf]  ;;  %v12044_v15 = vld [vmem:[%s18513_s2 + $0x1ac] sm:$0xf0]  ;;  %v9598_v16 = vor.u32 %v12012_v13, %v9597_v12  ;;  %s9285_s25 = sshll.u32 %s18761_s26, 2  ;;  %s12642_s22 = smul.u32 56, %s18761_s26 }
  0x11   : > { %v9726_v17 = vor.u32 %v12044_v15, %v9725_v14  ;;  %v9581_v18 = vld [vmem:[%s18513_s2 + $0x80] sm:$0xf]  ;;  %v12008_v19 = vld [vmem:[%s18513_s2 + $0x8c] sm:$0xf0]  ;;  %s12879_s16 = scalar_lea.vmem %s18511_s0, %s12641_s30  ;;  %s15822_s29 = scalar_lea.vmem %s18512_s1, %s9285_s25 }
  0x12   : > { %2098 = vmatpush.bf16.msra.mxu0 %v9614_v10  ;;  %12626 = vmatpush.bf16.msra.mxu2 %v9614_v10  ;;  %v9709_v20 = vld [vmem:[%s18513_s2 + $0x180] sm:$0xf]  ;;  %v12040_v21 = vld [vmem:[%s18513_s2 + $0x18c] sm:$0xf0]  ;;  %v9582_v22 = vor.u32 %v12008_v19, %v9581_v18  ;;  %v11937_v50 = vld [vmem:[%s12879_s16 + $0x18] sm:$0xf0] }
  0x13   : > { %2147 = vmatpush.bf16.msra.mxu1 %v9742_v11  ;;  %12634 = vmatpush.bf16.msra.mxu3 %v9742_v11  ;;  %v9710_v23 = vor.u32 %v12040_v21, %v9709_v20  ;;  %v9565_v24 = vld [vmem:[%s18513_s2 + $0x60] sm:$0xf]  ;;  %v12004_v25 = vld [vmem:[%s18513_s2 + $0x6c] sm:$0xf0]  ;;  %v11965_v54 = vld [vmem:[%s12879_s16 + $0xf8] sm:$0xf0] }
  0x14   : > { %v9693_v26 = vld [vmem:[%s18513_s2 + $0x160] sm:$0xf]  ;;  %v12036_v27 = vld [vmem:[%s18513_s2 + $0x16c] sm:$0xf0]  ;;  %v9566_v28 = vor.u32 %v12004_v25, %v9565_v24  ;;  %v11934_v55 = vld [vmem:[%s12879_s16 + $0x4] sm:$0xf] }
  0x15   : > { %v9694_v29 = vor.u32 %v12036_v27, %v9693_v26  ;;  %v9549_v30 = vld [vmem:[%s18513_s2 + $0x40] sm:$0xf]  ;;  %v12000_v31 = vld [vmem:[%s18513_s2 + $0x4c] sm:$0xf0]  ;;  %v11962_v58 = vld [vmem:[%s12879_s16 + $0xe4] sm:$0xf] }
  0x16   : > { %2099 = vmatpush.bf16.msra.mxu0 %v9598_v16  ;;  %12627 = vmatpush.bf16.msra.mxu2 %v9598_v16  ;;  %v9677_v32 = vld [vmem:[%s18513_s2 + $0x140] sm:$0xf]  ;;  %v12032_v33 = vld [vmem:[%s18513_s2 + $0x14c] sm:$0xf0]  ;;  %v9550_v34 = vor.u32 %v12000_v31, %v9549_v30 }
  0x17   : > { %2148 = vmatpush.bf16.msra.mxu1 %v9726_v17  ;;  %12635 = vmatpush.bf16.msra.mxu3 %v9726_v17  ;;  %v9678_v35 = vor.u32 %v12032_v33, %v9677_v32  ;;  %v9533_v36 = vld [vmem:[%s18513_s2 + $0x20] sm:$0xf]  ;;  %v11996_v37 = vld [vmem:[%s18513_s2 + $0x2c] sm:$0xf0] }
  0x18   : > { %v9661_v38 = vld [vmem:[%s18513_s2 + $0x120] sm:$0xf]  ;;  %v12028_v39 = vld [vmem:[%s18513_s2 + $0x12c] sm:$0xf0]  ;;  %v9534_v40 = vor.u32 %v11996_v37, %v9533_v36  ;;  %v9433_v36 = vld [vmem:[%s12879_s16 + $0x118] sm:$0xf] }
  0x19   : > { %v9517_v41 = vld [vmem:[%s18513_s2] sm:$0xf]  ;;  %v9662_v42 = vor.u32 %v12028_v39, %v9661_v38  ;;  %v11992_v43 = vld [vmem:[%s18513_s2 + $0xc] sm:$0xf0]  ;;  %v11972_v37 = vld [vmem:[%s12879_s16 + $0x130] sm:$0xf0] }
  0x1a   : > { %2100 = vmatpush.bf16.msra.mxu0 %v9582_v22  ;;  %12628 = vmatpush.bf16.msra.mxu2 %v9582_v22  ;;  %v9645_v44 = vld [vmem:[%s18513_s2 + $0x100] sm:$0xf]  ;;  %v12024_v45 = vld [vmem:[%s18513_s2 + $0x10c] sm:$0xf0]  ;;  %v9518_v52 = vor.u32 %v11992_v43, %v9517_v41 }
  0x1b   : > { %2149 = vmatpush.bf16.msra.mxu1 %v9710_v23  ;;  %12636 = vmatpush.bf16.msra.mxu3 %v9710_v23  ;;  %v9885_v46 = vld [vmem:[%s18513_s2 + $0x2e0] sm:$0xf]  ;;  %v12084_v47 = vld [vmem:[%s18513_s2 + $0x2ec] sm:$0xf0]  ;;  %v9646_v56 = vor.u32 %v12024_v45, %v9645_v44 }
  0x1c   : > { %v10013_v48 = vld [vmem:[%s18513_s2 + $0x3e0] sm:$0xf]  ;;  %v12116_v51 = vld [vmem:[%s18513_s2 + $0x3ec] sm:$0xf0]  ;;  %v9886_v60 = vor.u32 %v12084_v47, %v9885_v46  ;;  %v11941_v46 = vld [vmem:[%s12879_s16 + $0x3c] sm:$0xf] }
  0x1d   : > { %v9293_v49 = vld [vmem:[%s12879_s16] sm:$0xf]  ;;  %v10014_v61 = vor.u32 %v12116_v51, %v10013_v48  ;;  %v12080_v1 = vld [vmem:[%s18513_s2 + $0x2cc] sm:$0xf0]  ;;  %v9323_v47 = vld [vmem:[%s12879_s16 + $0x54] sm:$0xf0] }
  0x1e   : > { %2101 = vmatpush.bf16.msra.mxu0 %v9566_v28  ;;  %12629 = vmatpush.bf16.msra.mxu2 %v9566_v28  ;;  %v9405_v53 = vld [vmem:[%s12879_s16 + $0xe0] sm:$0xf]  ;;  %v12913_v63 = vor.u32 %v11937_v50, %v9293_v49  ;;  %v12112_v3 = vld [vmem:[%s18513_s2 + $0x3cc] sm:$0xf0]  ;;  %v11969_v48 = vld [vmem:[%s12879_s16 + $0x11c] sm:$0xf] }
  0x1f   : > { %2150 = vmatpush.bf16.msra.mxu1 %v9694_v29  ;;  %12637 = vmatpush.bf16.msra.mxu3 %v9694_v29  ;;  %v9295_v57 = vld [vmem:[%s12879_s16 + $0x1c] sm:$0xf0]  ;;  %v12915_v0 = vor.u32 %v11965_v54, %v9405_v53  ;;  %v12076_v9 = vld [vmem:[%s18513_s2 + $0x2ac] sm:$0xf0]  ;;  %v9435_v49 = vld [vmem:[%s12879_s16 + $0x134] sm:$0xf0] }
  0x20   : > { %v9407_v59 = vld [vmem:[%s12879_s16 + $0xfc] sm:$0xf0]  ;;  %18620 = vst [vmem:[#allocation2_spill] sm:$0xff] %v12913_v63  ;;  %v12926_v4 = vor.u32 %v11934_v55, %v9295_v57  ;;  %v12108_v11 = vld [vmem:[%s18513_s2 + $0x3ac] sm:$0xf0] }
  0x21   : > { %v9869_v62 = vld [vmem:[%s18513_s2 + $0x2c0] sm:$0xf]  ;;  %v12928_v5 = vor.u32 %v11962_v58, %v9407_v59  ;;  %v12148_v13 = vld [vmem:[%s18513_s2 + $0x4ec] sm:$0xf0]  ;;  %v13031_v58 = vor.u32 %v11972_v37, %v9433_v36  ;;  %v11951_v37 = vld [vmem:[%s12879_s16 + $0x88] sm:$0xf0] }
  0x22   : > { %2102 = vmatpush.bf16.msra.mxu0 %v9550_v34  ;;  %12630 = vmatpush.bf16.msra.mxu2 %v9550_v34  ;;  %v9997_v2 = vld [vmem:[%s18513_s2 + $0x3c0] sm:$0xf]  ;;  %18621 = vst [vmem:[#allocation3_spill] sm:$0xff] %v12926_v4  ;;  %v9870_v7 = vor.u32 %v12080_v1, %v9869_v62  ;;  %v12180_v16 = vld [vmem:[%s18513_s2 + $0x5ec] sm:$0xf0]  ;;  %v13042_v62 = vor.u32 %v11941_v46, %v9323_v47 }
  0x23   : > { %2151 = vmatpush.bf16.msra.mxu1 %v9678_v35  ;;  %12638 = vmatpush.bf16.msra.mxu3 %v9678_v35  ;;  %v9853_v6 = vld [vmem:[%s18513_s2 + $0x2a0] sm:$0xf]  ;;  %v9998_v8 = vor.u32 %v12112_v3, %v9997_v2  ;;  %v12072_v18 = vld [vmem:[%s18513_s2 + $0x28c] sm:$0xf0]  ;;  %v9321_v34 = vld [vmem:[%s12879_s16 + $0x38] sm:$0xf]  ;;  %v13044_v1 = vor.u32 %v11969_v48, %v9435_v49 }
  0x24   : > { %v9981_v10 = vld [vmem:[%s18513_s2 + $0x3a0] sm:$0xf]  ;;  %v9854_v21 = vor.u32 %v12076_v9, %v9853_v6  ;;  %v12144_v23 = vld [vmem:[%s18513_s2 + $0x4cc] sm:$0xf0]  ;;  %v11944_v35 = vld [vmem:[%s12879_s16 + $0x50] sm:$0xf0] }
  0x25   : > { %v10141_v12 = vld [vmem:[%s18513_s2 + $0x4e0] sm:$0xf]  ;;  %v9982_v22 = vor.u32 %v12108_v11, %v9981_v10  ;;  %v12176_v25 = vld [vmem:[%s18513_s2 + $0x5cc] sm:$0xf0]  ;;  %v13029_v57 = vor.u32 %v11944_v35, %v9321_v34  ;;  %18622 = vst [vmem:[#allocation4_spill] sm:$0xff] %v13042_v62 }
  0x26   : > { %2103 = vmatpush.bf16.msra.mxu0 %v9534_v40  ;;  %12631 = vmatpush.bf16.msra.mxu2 %v9534_v40  ;;  %v10269_v14 = vld [vmem:[%s18513_s2 + $0x5e0] sm:$0xf]  ;;  %v10142_v15 = vor.u32 %v12148_v13, %v10141_v12  ;;  %v12104_v27 = vld [vmem:[%s18513_s2 + $0x38c] sm:$0xf0] }
  0x27   : > { %2152 = vmatpush.bf16.msra.mxu1 %v9662_v42  ;;  %12639 = vmatpush.bf16.msra.mxu3 %v9662_v42  ;;  %v9837_v17 = vld [vmem:[%s18513_s2 + $0x280] sm:$0xf]  ;;  %v10270_v19 = vor.u32 %v12180_v16, %v10269_v14  ;;  %v12140_v31 = vld [vmem:[%s18513_s2 + $0x4ac] sm:$0xf0] }
  0x28   : > { %v10125_v20 = vld [vmem:[%s18513_s2 + $0x4c0] sm:$0xf]  ;;  %v12172_v33 = vld [vmem:[%s18513_s2 + $0x5ac] sm:$0xf0]  ;;  %v9838_v38 = vor.u32 %v12072_v18, %v9837_v17 }
  0x29   : > { %v10253_v24 = vld [vmem:[%s18513_s2 + $0x5c0] sm:$0xf]  ;;  %v10126_v28 = vor.u32 %v12144_v23, %v10125_v20  ;;  %v12068_v41 = vld [vmem:[%s18513_s2 + $0x26c] sm:$0xf0] }
  0x2a   : > { %2104 = vmatpush.bf16.msra.mxu0 %v9518_v52  ;;  %12632 = vmatpush.bf16.msra.mxu2 %v9518_v52  ;;  %v9965_v26 = vld [vmem:[%s18513_s2 + $0x380] sm:$0xf]  ;;  %v10254_v29 = vor.u32 %v12176_v25, %v10253_v24  ;;  %v12100_v43 = vld [vmem:[%s18513_s2 + $0x36c] sm:$0xf0] }
  0x2b   : > { %2153 = vmatpush.bf16.msra.mxu1 %v9646_v56  ;;  %12640 = vmatpush.bf16.msra.mxu3 %v9646_v56  ;;  %v10109_v30 = vld [vmem:[%s18513_s2 + $0x4a0] sm:$0xf]  ;;  %v9966_v39 = vor.u32 %v12104_v27, %v9965_v26  ;;  %v12136_v54 = vld [vmem:[%s18513_s2 + $0x48c] sm:$0xf0] }
  0x2c   : > { %v10237_v32 = vld [vmem:[%s18513_s2 + $0x5a0] sm:$0xf]  ;;  %v10110_v44 = vor.u32 %v12140_v31, %v10109_v30  ;;  %v12168_v56 = vld [vmem:[%s18513_s2 + $0x58c] sm:$0xf0] }
  0x2d   : > { %2105 = vmatmul.bf16.vlgmr.msra.gmra.mxu0 %v12913_v63  ;;  %2125 = vmatmul.bf16.vlgmr.msra.gmra.mxu2 %v12915_v0  ;;  %v9821_v40 = vld [vmem:[%s18513_s2 + $0x260] sm:$0xf]  ;;  %v10238_v45 = vor.u32 %v12172_v33, %v10237_v32  ;;  %v12064_v59 = vld [vmem:[%s18513_s2 + $0x24c] sm:$0xf0] }
  0x2e   : > { %2195 = vmatpush.bf16.msrb.mxu2 %v9886_v60  ;;  %2154 = vmatmul.bf16.vlgmr.msra.gmra.mxu1 %v12926_v4  ;;  %v9949_v42 = vld [vmem:[%s18513_s2 + $0x360] sm:$0xf]  ;;  %v9822_v52 = vor.u32 %v12068_v41, %v9821_v40  ;;  %v12132_v9 = vld [vmem:[%s18513_s2 + $0x46c] sm:$0xf0]  ;;  %v11948_v40 = vld [vmem:[%s12879_s16 + $0x74] sm:$0xf] }
  0x2f   : > { %2244 = vmatpush.bf16.msrb.mxu3 %v10014_v61  ;;  %2293 = vmatpush.bf16.msrb.mxu0 %v10142_v15  ;;  %v9805_v50 = vld [vmem:[%s18513_s2 + $0x240] sm:$0xf]  ;;  %v9950_v53 = vor.u32 %v12100_v43, %v9949_v42  ;;  %v12096_v61 = vld [vmem:[%s18513_s2 + $0x34c] sm:$0xf0]  ;;  %v11976_v42 = vld [vmem:[%s12879_s16 + $0x154] sm:$0xf] }
  0x30   : > { %2174 = vmatmul.bf16.vlgmr.msra.gmra.mxu3 %v12928_v5  ;;  %2342 = vmatpush.bf16.msrb.mxu1 %v10270_v19  ;;  %v10093_v51 = vld [vmem:[%s18513_s2 + $0x480] sm:$0xf]  ;;  %v9806_v6 = vor.u32 %v12064_v59, %v9805_v50  ;;  %v12060_v12 = vld [vmem:[%s18513_s2 + $0x22c] sm:$0xf0] }
  0x31   : > { %v10221_v55 = vld [vmem:[%s18513_s2 + $0x580] sm:$0xf]  ;;  %v10094_v2 = vor.u32 %v12136_v54, %v10093_v51  ;;  %v12164_v13 = vld [vmem:[%s18513_s2 + $0x56c] sm:$0xf0] }
  0x32   : > { %2196 = vmatpush.bf16.msrb.mxu2 %v9870_v7  ;;  %v9933_v60 = vld [vmem:[%s18513_s2 + $0x340] sm:$0xf]  ;;  %v10222_v3 = vor.u32 %v12168_v56, %v10221_v55  ;;  %v12092_v17 = vld [vmem:[%s18513_s2 + $0x32c] sm:$0xf0] }
  0x33   : > { %2245 = vmatpush.bf16.msrb.mxu3 %v9998_v8  ;;  %2294 = vmatpush.bf16.msrb.mxu0 %v10126_v28  ;;  %v9934_v7 = vor.u32 %v12096_v61, %v9933_v60  ;;  %v10077_v8 = vld [vmem:[%s18513_s2 + $0x460] sm:$0xf]  ;;  %v12160_v23 = vld [vmem:[%s18513_s2 + $0x54c] sm:$0xf0]  ;;  %v12018_v60 = vld [vmem:[%s18513_s2 + $0xe4] sm:$0xf] }
  0x34   : > { %2343 = vmatpush.bf16.msrb.mxu1 %v10254_v29  ;;  %v10205_v10 = vld [vmem:[%s18513_s2 + $0x560] sm:$0xf]  ;;  %v10078_v14 = vor.u32 %v12132_v9, %v10077_v8  ;;  %v12056_v25 = vld [vmem:[%s18513_s2 + $0x20c] sm:$0xf0]  ;;  %v9489_v8 = vld [vmem:[%s12879_s16 + $0x188] sm:$0xf] }
  0x35   : > { %v9789_v11 = vld [vmem:[%s18513_s2 + $0x220] sm:$0xf]  ;;  %v10206_v15 = vor.u32 %v12164_v13, %v10205_v10  ;;  %v12088_v30 = vld [vmem:[%s18513_s2 + $0x30c] sm:$0xf0]  ;;  %v11986_v9 = vld [vmem:[%s12879_s16 + $0x1a0] sm:$0xf0] }
  0x36   : > { %2197 = vmatpush.bf16.msrb.mxu2 %v9854_v21  ;;  %v9917_v16 = vld [vmem:[%s18513_s2 + $0x320] sm:$0xf]  ;;  %v9790_v19 = vor.u32 %v12060_v12, %v9789_v11  ;;  %v12128_v21 = vld [vmem:[%s18513_s2 + $0x44c] sm:$0xf0]  ;;  %v11955_v10 = vld [vmem:[%s12879_s16 + $0xac] sm:$0xf] }
  0x37   : > { %2246 = vmatpush.bf16.msrb.mxu3 %v9982_v22  ;;  %2295 = vmatpush.bf16.msrb.mxu0 %v10110_v44  ;;  %v10061_v18 = vld [vmem:[%s18513_s2 + $0x440] sm:$0xf]  ;;  %v9918_v20 = vor.u32 %v12092_v17, %v9917_v16  ;;  %v12124_v32 = vld [vmem:[%s18513_s2 + $0x42c] sm:$0xf0]  ;;  %v9379_v11 = vld [vmem:[%s12879_s16 + $0xc4] sm:$0xf0] }
  0x38   : > { %2344 = vmatpush.bf16.msrb.mxu1 %v10238_v45  ;;  %v10189_v22 = vld [vmem:[%s18513_s2 + $0x540] sm:$0xf]  ;;  %v10062_v26 = vor.u32 %v12128_v21, %v10061_v18  ;;  %v12156_v34 = vld [vmem:[%s18513_s2 + $0x52c] sm:$0xf0]  ;;  %v11983_v12 = vld [vmem:[%s12879_s16 + $0x18c] sm:$0xf]  ;;  %v13166_v16 = vor.u32 %v11955_v10, %v9379_v11 }
  0x39   : > { %v9773_v24 = vld [vmem:[%s18513_s2 + $0x200] sm:$0xf]  ;;  %v10190_v27 = vor.u32 %v12160_v23, %v10189_v22  ;;  %v9349_v36 = vld [vmem:[%s12879_s16 + $0x70] sm:$0xf]  ;;  %v9491_v13 = vld [vmem:[%s12879_s16 + $0x1a4] sm:$0xf0] }
  0x3a   : > { %2198 = vmatpush.bf16.msrb.mxu2 %v9838_v38  ;;  %v10045_v28 = vld [vmem:[%s18513_s2 + $0x420] sm:$0xf]  ;;  %v9774_v31 = vor.u32 %v12056_v25, %v9773_v24  ;;  %v9461_v38 = vld [vmem:[%s12879_s16 + $0x150] sm:$0xf]  ;;  %v13130_v50 = vor.u32 %v11951_v37, %v9349_v36  ;;  %18626 = vst [vmem:[#allocation8_spill] sm:$0xff] %v13166_v16  ;;  %v13168_v17 = vor.u32 %v11983_v12, %v9491_v13 }
  0x3b   : > { %2247 = vmatpush.bf16.msrb.mxu3 %v9966_v39  ;;  %2296 = vmatpush.bf16.msrb.mxu0 %v10094_v2  ;;  %v9901_v29 = vld [vmem:[%s18513_s2 + $0x300] sm:$0xf]  ;;  %v11979_v39 = vld [vmem:[%s12879_s16 + $0x168] sm:$0xf0]  ;;  %v9351_v41 = vld [vmem:[%s12879_s16 + $0x8c] sm:$0xf0]  ;;  %v10046_v44 = vor.u32 %v12124_v32, %v10045_v28 }
  0x3c   : > { %2345 = vmatpush.bf16.msrb.mxu1 %v10222_v3  ;;  %v10173_v33 = vld [vmem:[%s18513_s2 + $0x520] sm:$0xf]  ;;  %v9902_v35 = vor.u32 %v12088_v30, %v9901_v29  ;;  %v9463_v43 = vld [vmem:[%s12879_s16 + $0x16c] sm:$0xf0]  ;;  %v13132_v51 = vor.u32 %v11979_v39, %v9461_v38  ;;  %v9631_v2 = vld [vmem:[%s18513_s2 + $0xf0] sm:$0xf0] }
  0x3d   : > { %2110 = vmatmul.bf16.gmra.mxu0 %v13029_v57  ;;  %2130 = vmatmul.bf16.gmra.mxu2 %v13031_v58  ;;  %v10174_v45 = vor.u32 %v12156_v34, %v10173_v33  ;;  %v10029_v46 = vld [vmem:[%s18513_s2 + $0x400] sm:$0xf]  ;;  %v12120_v47 = vld [vmem:[%s18513_s2 + $0x40c] sm:$0xf0]  ;;  %v9634_v3 = vor.u32 %v12018_v60, %v9631_v2  ;;  %18627 = vst [vmem:[#allocation9_spill] sm:$0xff] %v13168_v17 }
  0x3e   : > { %2199 = vmatpush.bf16.msrb.mxu2 %v9822_v52  ;;  %2159 = vmatmul.bf16.gmra.mxu1 %v13042_v62  ;;  %v10157_v48 = vld [vmem:[%s18513_s2 + $0x500] sm:$0xf]  ;;  %v12152_v49 = vld [vmem:[%s18513_s2 + $0x50c] sm:$0xf0]  ;;  %18623 = vst [vmem:[#allocation5_spill] sm:$0xff] %v13132_v51  ;;  %v13134_v52 = vor.u32 %v11948_v40, %v9351_v41  ;;  %v10030_v54 = vor.u32 %v12120_v47, %v10029_v46 }
  0x3f   : > { %2248 = vmatpush.bf16.msrb.mxu3 %v9950_v53  ;;  %2297 = vmatpush.bf16.msrb.mxu0 %v10078_v14  ;;  %v13136_v53 = vor.u32 %v11976_v42, %v9463_v43  ;;  %v10158_v55 = vor.u32 %v12152_v49, %v10157_v48  ;;  %v10285_v56 = vld [vmem:[%s18513_s2 + $0x600] sm:$0xf]  ;;  %v12184_v59 = vld [vmem:[%s18513_s2 + $0x60c] sm:$0xf0]  ;;  %v12014_v18 = vld [vmem:[%s18513_s2 + $0xc4] sm:$0xf] }
  0x40   : > { %2179 = vmatmul.bf16.gmra.mxu3 %v13044_v1  ;;  %2346 = vmatpush.bf16.msrb.mxu1 %v10206_v15  ;;  %18624 = vst [vmem:[#allocation6_spill] sm:$0xff] %v13134_v52  ;;  %v10286_v61 = vor.u32 %v12184_v59, %v10285_v56  ;;  %v13164_v15 = vor.u32 %v11986_v9, %v9489_v8  ;;  %v9301_v21 = vld [vmem:[%s12879_s16 + $0x8] sm:$0xf]  ;;  %v11938_v22 = vld [vmem:[%s12879_s16 + $0x20] sm:$0xf0] }
  0x41   : > { %18625 = vst [vmem:[#allocation7_spill] sm:$0xff] %v13136_v53  ;;  %v11935_v23 = vld [vmem:[%s12879_s16 + $0xc] sm:$0xf]  ;;  %v9309_v24 = vld [vmem:[%s12879_s16 + $0x10] sm:$0xf]  ;;  %v13188_v29 = vor.u32 %v11938_v22, %v9301_v21 }
  0x42   : > { %2200 = vmatpush.bf16.msrb.mxu2 %v9806_v6  ;;  %v9377_v6 = vld [vmem:[%s12879_s16 + $0xa8] sm:$0xf]  ;;  %v11939_v25 = vld [vmem:[%s12879_s16 + $0x28] sm:$0xf0]  ;;  %v9311_v28 = vld [vmem:[%s12879_s16 + $0x2c] sm:$0xf0] }
  0x43   : > { %2249 = vmatpush.bf16.msrb.mxu3 %v9934_v7  ;;  %2298 = vmatpush.bf16.msrb.mxu0 %v10062_v26  ;;  %v11958_v7 = vld [vmem:[%s12879_s16 + $0xc0] sm:$0xf0]  ;;  %v9303_v26 = vld [vmem:[%s12879_s16 + $0x24] sm:$0xf0]  ;;  %18628 = vst [vmem:[#allocation10_spill] sm:$0xff] %v13188_v29  ;;  %v13190_v30 = vor.u32 %v11939_v25, %v9309_v24 }
  0x44   : > { %2347 = vmatpush.bf16.msrb.mxu1 %v10190_v27  ;;  %v13162_v14 = vor.u32 %v11958_v7, %v9377_v6  ;;  %v11936_v27 = vld [vmem:[%s12879_s16 + $0x14] sm:$0xf]  ;;  %v12010_v33 = vld [vmem:[%s18513_s2 + $0xa4] sm:$0xf]  ;;  %v9329_v36 = vld [vmem:[%s12879_s16 + $0x40] sm:$0xf] }
  0x45   : > { %v13194_v32 = vor.u32 %v11936_v27, %v9311_v28  ;;  %v9599_v34 = vld [vmem:[%s18513_s2 + $0xb0] sm:$0xf0]  ;;  %v11945_v37 = vld [vmem:[%s12879_s16 + $0x58] sm:$0xf0]  ;;  %v11942_v38 = vld [vmem:[%s12879_s16 + $0x44] sm:$0xf] }
  0x46   : > { %2201 = vmatpush.bf16.msrb.mxu2 %v9790_v19  ;;  %v9615_v19 = vld [vmem:[%s18513_s2 + $0xd0] sm:$0xf0]  ;;  %v9337_v39 = vld [vmem:[%s12879_s16 + $0x48] sm:$0xf]  ;;  %v11946_v40 = vld [vmem:[%s12879_s16 + $0x60] sm:$0xf0] }
  0x47   : > { %2250 = vmatpush.bf16.msrb.mxu3 %v9918_v20  ;;  %2299 = vmatpush.bf16.msrb.mxu0 %v10046_v44  ;;  %v9618_v20 = vor.u32 %v12014_v18, %v9615_v19  ;;  %v9331_v41 = vld [vmem:[%s12879_s16 + $0x5c] sm:$0xf0]  ;;  %v11943_v42 = vld [vmem:[%s12879_s16 + $0x4c] sm:$0xf]  ;;  %v9339_v43 = vld [vmem:[%s12879_s16 + $0x64] sm:$0xf0]  ;;  %v13214_v44 = vor.u32 %v11945_v37, %v9329_v36 }
  0x48   : > { %2348 = vmatpush.bf16.msrb.mxu1 %v10174_v45  ;;  %v13216_v45 = vor.u32 %v11946_v40, %v9337_v39  ;;  %v13218_v46 = vor.u32 %v11942_v38, %v9331_v41  ;;  %v13220_v47 = vor.u32 %v11943_v42, %v9339_v43  ;;  %v12006_v48 = vld [vmem:[%s18513_s2 + $0x84] sm:$0xf]  ;;  %v9583_v49 = vld [vmem:[%s18513_s2 + $0x90] sm:$0xf0]  ;;  %v11949_v59 = vld [vmem:[%s12879_s16 + $0x7c] sm:$0xf] }
  0x49   : > { %18630 = vst [vmem:[#allocation12_spill] sm:$0xff] %v13214_v44  ;;  %v11952_v56 = vld [vmem:[%s12879_s16 + $0x90] sm:$0xf0]  ;;  %v9365_v60 = vld [vmem:[%s12879_s16 + $0x80] sm:$0xf] }
  0x4a   : > { %2202 = vmatpush.bf16.msrb.mxu2 %v9774_v31  ;;  %v13192_v31 = vor.u32 %v11935_v23, %v9303_v26  ;;  %18631 = vst [vmem:[#allocation13_spill] sm:$0xff] %v13216_v45  ;;  %v9359_v2 = vld [vmem:[%s12879_s16 + $0x94] sm:$0xf0]  ;;  %v9367_v6 = vld [vmem:[%s12879_s16 + $0x9c] sm:$0xf0] }
  0x4b   : > { %2251 = vmatpush.bf16.msrb.mxu3 %v9902_v35  ;;  %2300 = vmatpush.bf16.msrb.mxu0 %v10030_v54  ;;  %v9602_v35 = vor.u32 %v12010_v33, %v9599_v34  ;;  %18632 = vst [vmem:[#allocation14_spill] sm:$0xff] %v13218_v46  ;;  %v9586_v54 = vor.u32 %v12006_v48, %v9583_v49  ;;  %v12002_v11 = vld [vmem:[%s18513_s2 + $0x64] sm:$0xf]  ;;  %v9567_v12 = vld [vmem:[%s18513_s2 + $0x70] sm:$0xf0] }
  0x4c   : > { %2349 = vmatpush.bf16.msrb.mxu1 %v10158_v55  ;;  %18629 = vst [vmem:[#allocation11_spill] sm:$0xff] %v13192_v31  ;;  %v9357_v55 = vld [vmem:[%s12879_s16 + $0x78] sm:$0xf]  ;;  %v13244_v9 = vor.u32 %v11949_v59, %v9359_v2  ;;  %v9570_v13 = vor.u32 %v12002_v11, %v9567_v12  ;;  %v9385_v18 = vld [vmem:[%s12879_s16 + $0xb0] sm:$0xf] }
  0x4d   : > { %2115 = vmatmul.bf16.gmra.mxu0 %v13130_v50  ;;  %2135 = vmatmul.bf16.gmra.mxu2 %v13132_v51  ;;  %18633 = vst [vmem:[#allocation15_spill] sm:$0xff] %v13220_v47  ;;  %v13240_v7 = vor.u32 %v11952_v56, %v9357_v55  ;;  %v11959_v19 = vld [vmem:[%s12879_s16 + $0xc8] sm:$0xf0]  ;;  %v9393_v21 = vld [vmem:[%s12879_s16 + $0xb8] sm:$0xf] }
  0x4e   : > { %2164 = vmatmul.bf16.gmra.mxu1 %v13134_v52  ;;  %2398 = vmatpush.bf16.msra.mxu2 %v10286_v61  ;;  %v11953_v61 = vld [vmem:[%s12879_s16 + $0x98] sm:$0xf0]  ;;  %18635 = vst [vmem:[#allocation17_spill] sm:$0xff] %v13244_v9  ;;  %v11960_v22 = vld [vmem:[%s12879_s16 + $0xd0] sm:$0xf0]  ;;  %v13266_v26 = vor.u32 %v11959_v19, %v9385_v18 }
  0x4f   : > { %2440 = vmatpush.bf16.msra.mxu3 %v9634_v3  ;;  %v11950_v3 = vld [vmem:[%s12879_s16 + $0x84] sm:$0xf]  ;;  %v13242_v8 = vor.u32 %v11953_v61, %v9365_v60  ;;  %v9387_v23 = vld [vmem:[%s12879_s16 + $0xcc] sm:$0xf0]  ;;  %v11957_v24 = vld [vmem:[%s12879_s16 + $0xbc] sm:$0xf]  ;;  %v13268_v27 = vor.u32 %v11960_v22, %v9393_v21 }
  0x50   : > { %2184 = vmatmul.bf16.gmra.mxu3 %v13136_v53  ;;  %v13246_v10 = vor.u32 %v11950_v3, %v9367_v6  ;;  %v9395_v25 = vld [vmem:[%s12879_s16 + $0xd4] sm:$0xf0]  ;;  %v11998_v34 = vld [vmem:[%s18513_s2 + $0x44] sm:$0xf]  ;;  %v13287_v37 = vld [vmem:[%s18514_s3] sm:$0xf] }
  0x51   : > { %18634 = vst [vmem:[#allocation16_spill] sm:$0xff] %v13242_v8  ;;  %v13272_v33 = vor.u32 %v11957_v24, %v9395_v25  ;;  %v9413_v38 = vld [vmem:[%s12879_s16 + $0xe8] sm:$0xf]  ;;  %v11966_v39 = vld [vmem:[%s12879_s16 + $0x100] sm:$0xf0] }
  0x52   : > { %18636 = vst [vmem:[#allocation18_spill] sm:$0xff] %v13246_v10  ;;  %v11963_v40 = vld [vmem:[%s12879_s16 + $0xec] sm:$0xf]  ;;  %v9421_v41 = vld [vmem:[%s12879_s16 + $0xf0] sm:$0xf]  ;;  %v13300_v55 = vor.u32 %v11966_v39, %v9413_v38 }
  0x53   : > { %2441 = vmatpush.bf16.msra.mxu3 %v9618_v20  ;;  %v11956_v20 = vld [vmem:[%s12879_s16 + $0xb4] sm:$0xf]  ;;  %18637 = vst [vmem:[#allocation19_spill] sm:$0xff] %v13268_v27  ;;  %v11967_v42 = vld [vmem:[%s12879_s16 + $0x108] sm:$0xf0] }
  0x54   : > { %v13270_v28 = vor.u32 %v11956_v20, %v9387_v23  ;;  %18639 = vst [vmem:[#allocation21_spill] sm:$0xff] %v13272_v33  ;;  %v9415_v43 = vld [vmem:[%s12879_s16 + $0x104] sm:$0xf0]  ;;  %v11964_v48 = vld [vmem:[%s12879_s16 + $0xf4] sm:$0xf]  ;;  %v13302_v56 = vor.u32 %v11967_v42, %v9421_v41 }
  0x55   : > { %v9423_v49 = vld [vmem:[%s12879_s16 + $0x10c] sm:$0xf0]  ;;  %v13304_v60 = vor.u32 %v11963_v40, %v9415_v43  ;;  %v12050_v11 = vld [vmem:[%s18513_s2 + $0x1e4] sm:$0xf]  ;;  %v9759_v12 = vld [vmem:[%s18513_s2 + $0x1f0] sm:$0xf0] }
  0x56   : > { %18638 = vst [vmem:[#allocation20_spill] sm:$0xff] %v13270_v28  ;;  %v13306_v61 = vor.u32 %v11964_v48, %v9423_v49  ;;  %v9887_v18 = vld [vmem:[%s18513_s2 + $0x2f0] sm:$0xf0]  ;;  %v9762_v19 = vor.u32 %v12050_v11, %v9759_v12  ;;  %v11994_v21 = vld [vmem:[%s18513_s2 + $0x24] sm:$0xf] }
  0x57   : > { %2442 = vmatpush.bf16.msra.mxu3 %v9602_v35  ;;  %v9551_v35 = vld [vmem:[%s18513_s2 + $0x50] sm:$0xf0]  ;;  %18640 = vst [vmem:[#allocation22_spill] sm:$0xff] %v13302_v56  ;;  %v12046_v25 = vld [vmem:[%s18513_s2 + $0x1c4] sm:$0xf] }
  0x58   : > { %v9554_v36 = vor.u32 %v11998_v34, %v9551_v35  ;;  %18641 = vst [vmem:[#allocation23_spill] sm:$0xff] %v13304_v60  ;;  %v9535_v22 = vld [vmem:[%s18513_s2 + $0x30] sm:$0xf0]  ;;  %v12078_v35 = vld [vmem:[%s18513_s2 + $0x2c4] sm:$0xf]  ;;  %2489 = vmatpush.bf16.msra.mxu0 %v9762_v19 }
  0x59   : > { %18642 = vst [vmem:[#allocation24_spill] sm:$0xff] %v13306_v61  ;;  %v9538_v24 = vor.u32 %v11994_v21, %v9535_v22  ;;  %v9743_v34 = vld [vmem:[%s18513_s2 + $0x1d0] sm:$0xf0]  ;;  %v9441_v12 = vld [vmem:[%s12879_s16 + $0x120] sm:$0xf] }
  0x5a   : > { %v9746_v39 = vor.u32 %v12046_v25, %v9743_v34  ;;  %v9871_v40 = vld [vmem:[%s18513_s2 + $0x2d0] sm:$0xf0]  ;;  %v9449_v21 = vld [vmem:[%s12879_s16 + $0x128] sm:$0xf]  ;;  %v11974_v22 = vld [vmem:[%s12879_s16 + $0x140] sm:$0xf0] }
  0x5b   : > { %2443 = vmatpush.bf16.msra.mxu3 %v9586_v54  ;;  %v13298_v54 = vperm.slane %v13287_v37, 0  ;;  %v9874_v42 = vor.u32 %v12078_v35, %v9871_v40  ;;  %v9855_v19 = vld [vmem:[%s18513_s2 + $0x2b0] sm:$0xf0]  ;;  %v11971_v25 = vld [vmem:[%s12879_s16 + $0x12c] sm:$0xf] }
  0x5c   : > { %2490 = vmatpush.bf16.msra.mxu0 %v9746_v39  ;;  %v9451_v34 = vld [vmem:[%s12879_s16 + $0x144] sm:$0xf0]  ;;  %v12070_v39 = vld [vmem:[%s18513_s2 + $0x284] sm:$0xf] }
  0x5d   : > { %2120 = vmatmul.bf16.gmra.mxu0 %v13162_v14  ;;  %2140 = vmatmul.bf16.gmra.mxu2 %v13164_v15 }
  0x5e   : > { %2169 = vmatmul.bf16.gmra.mxu1 %v13166_v16 }
  0x5f   : > { %2444 = vmatpush.bf16.msra.mxu3 %v9570_v13  ;;  %v12082_v13 = vld [vmem:[%s18513_s2 + $0x2e4] sm:$0xf] }
  0x60   : > { %2189 = vmatmul.bf16.gmra.mxu3 %v13168_v17  ;;  %v9890_v20 = vor.u32 %v12082_v13, %v9887_v18  ;;  %v11973_v13 = vld [vmem:[%s12879_s16 + $0x138] sm:$0xf0] }
  0x62   : > { %2538 = vmatpush.bf16.msra.mxu1 %v9890_v20  ;;  %v11970_v20 = vld [vmem:[%s12879_s16 + $0x124] sm:$0xf] }
  0x63   : > { %2445 = vmatpush.bf16.msra.mxu3 %v9554_v36 }
  0x66   : > { %2539 = vmatpush.bf16.msra.mxu1 %v9874_v42  ;;  %v13381_v42 = vor.u32 %v11973_v13, %v9441_v12 }
  0x67   : > { %2446 = vmatpush.bf16.msra.mxu3 %v9538_v24  ;;  %v9443_v24 = vld [vmem:[%s12879_s16 + $0x13c] sm:$0xf0] }
  0x6d   : > { %2203 = vmatmul.bf16.vlgmr.msrb.gmra.mxu2 %v13188_v29  ;;  %2301 = vmatmul.bf16.vlgmr.msrb.gmra.mxu0 %v13190_v30 }
  0x6e   : > { %2350 = vmatmul.bf16.vlgmr.msrb.gmra.mxu1 %v13194_v32 }
  0x70   : > { %2252 = vmatmul.bf16.vlgmr.msrb.gmra.mxu3 %v13192_v31 }
  0x7d   : > { %2208 = vmatmul.bf16.gmra.mxu2 %v13214_v44  ;;  %2306 = vmatmul.bf16.gmra.mxu0 %v13216_v45 }
  0x7e   : > { %2355 = vmatmul.bf16.gmra.mxu1 %v13220_v47 }
  0x80   : > { %2257 = vmatmul.bf16.gmra.mxu3 %v13218_v46 }
  0x8d   : > { %2213 = vmatmul.bf16.gmra.mxu2 %v13240_v7  ;;  %2311 = vmatmul.bf16.gmra.mxu0 %v13242_v8 }
  0x8e   : > { %2360 = vmatmul.bf16.gmra.mxu1 %v13246_v10 }
  0x90   : > { %2262 = vmatmul.bf16.gmra.mxu3 %v13244_v9 }
  0x9d   : > { %2218 = vmatmul.bf16.gmra.mxu2 %v13266_v26  ;;  %2316 = vmatmul.bf16.gmra.mxu0 %v13268_v27 }
  0x9e   : > { %2365 = vmatmul.bf16.gmra.mxu1 %v13272_v33 }
  0xa0   : > { %2267 = vmatmul.bf16.gmra.mxu3 %v13270_v28 }
  0xaa   : > { %v2106_v59 = vpop.f32.mrf.mxu0 }
  0xab   : > { %v2107_v2 = vadd.f32 %v2106_v59, %v13298_v54  ;;  %v2155_v3 = vpop.f32.mrf.mxu1  ;;  %v12042_v59 = vld [vmem:[%s18513_s2 + $0x1a4] sm:$0xf] }
  0xad   : > { %v13309_v6 = vadd.f32 %v2155_v3, %v2107_v2  ;;  %2223 = vmatmul.bf16.gmra.mxu2 %v13300_v55  ;;  %2321 = vmatmul.bf16.gmra.mxu0 %v13302_v56  ;;  %v9727_v2 = vld [vmem:[%s18513_s2 + $0x1b0] sm:$0xf0]  ;;  %v12074_v3 = vld [vmem:[%s18513_s2 + $0x2a4] sm:$0xf] }
  0xae   : > { %2370 = vmatmul.bf16.gmra.mxu1 %v13306_v61  ;;  %v9730_v18 = vor.u32 %v12042_v59, %v9727_v2  ;;  %v13388_v2 = vor.u32 %v11970_v20, %v9443_v24  ;;  %v9695_v20 = vld [vmem:[%s18513_s2 + $0x170] sm:$0xf0]  ;;  %v12054_v61 = vld [vmem:[%s18513_s2 + $0x204] sm:$0xf] }
  0xb0   : > { %2272 = vmatmul.bf16.gmra.mxu3 %v13304_v60  ;;  %v2126_v23 = vpop.f32.mrf.mxu2  ;;  %2491 = vmatpush.bf16.msra.mxu0 %v9730_v18  ;;  %18644 = vst [vmem:[#allocation26_spill] sm:$0xff] %v13388_v2  ;;  %v12034_v18 = vld [vmem:[%s18513_s2 + $0x164] sm:$0xf] }
  0xb1   : > { %v2127_v36 = vadd.f32 %v2126_v23, %v13298_v54  ;;  %v9858_v23 = vor.u32 %v12074_v3, %v9855_v19  ;;  %v13390_v3 = vor.u32 %v11971_v25, %v9451_v34  ;;  %v11990_v25 = vld [vmem:[%s18513_s2 + $0x4] sm:$0xf]  ;;  %v9519_v34 = vld [vmem:[%s18513_s2 + $0x10] sm:$0xf0] }
  0xb2   : > { %v2108_v41 = vpop.f32.mrf.mxu0 }
  0xb3   : > { %v2175_v38 = vpop.f32.mrf.mxu3  ;;  %v2109_v48 = vadd.f32 %v2108_v41, %v13298_v54  ;;  %v2157_v49 = vpop.f32.mrf.mxu1  ;;  %2540 = vmatpush.bf16.msra.mxu1 %v9858_v23  ;;  %18645 = vst [vmem:[#allocation27_spill] sm:$0xff] %v13390_v3  ;;  %v9698_v23 = vor.u32 %v12034_v18, %v9695_v20 }
  0xb4   : > { %v13346_v43 = vadd.f32 %v2175_v38, %v2127_v36  ;;  %v12038_v36 = vld [vmem:[%s18513_s2 + $0x184] sm:$0xf]  ;;  %v9711_v38 = vld [vmem:[%s18513_s2 + $0x190] sm:$0xf0] }
  0xb5   : > { %v13358_v11 = vadd.f32 %v2157_v49, %v2109_v48  ;;  %v13383_v48 = vor.u32 %v11974_v22, %v9449_v21  ;;  %v9839_v49 = vld [vmem:[%s18513_s2 + $0x290] sm:$0xf0]  ;;  %v9714_v12 = vor.u32 %v12038_v36, %v9711_v38  ;;  %v9522_v38 = vor.u32 %v11990_v25, %v9519_v34  ;;  %v12026_v25 = vld [vmem:[%s18513_s2 + $0x124] sm:$0xf] }
  0xb6   : > { %v9842_v13 = vor.u32 %v12070_v39, %v9839_v49  ;;  %v9823_v22 = vld [vmem:[%s18513_s2 + $0x270] sm:$0xf0]  ;;  %v12030_v39 = vld [vmem:[%s18513_s2 + $0x144] sm:$0xf] }
  0xb7   : > { %18643 = vst [vmem:[#allocation25_spill] sm:$0xff] %v13383_v48  ;;  %2492 = vmatpush.bf16.msra.mxu0 %v9714_v12  ;;  %2447 = vmatpush.bf16.msra.mxu3 %v9522_v38  ;;  %v9663_v34 = vld [vmem:[%s18513_s2 + $0x130] sm:$0xf0] }
  0xb8   : > { %v2128_v35 = vpop.f32.mrf.mxu2  ;;  %2541 = vmatpush.bf16.msra.mxu1 %v9842_v13 }
  0xb9   : > { %v2129_v40 = vadd.f32 %v2128_v35, %v13298_v54 }
  0xba   : > { %v2111_v59 = vpop.f32.mrf.mxu0 }
  0xbb   : > { %v2177_v41 = vpop.f32.mrf.mxu3  ;;  %v2112_v35 = vadd.f32 %v2111_v59, %v13298_v54  ;;  %v2160_v56 = vpop.f32.mrf.mxu1  ;;  %2493 = vmatpush.bf16.msra.mxu0 %v9698_v23  ;;  %v9791_v23 = vld [vmem:[%s18513_s2 + $0x230] sm:$0xf0] }
  0xbc   : > { %v13392_v19 = vadd.f32 %v2177_v41, %v2129_v40  ;;  %v9679_v40 = vld [vmem:[%s18513_s2 + $0x150] sm:$0xf0]  ;;  %v12062_v41 = vld [vmem:[%s18513_s2 + $0x244] sm:$0xf] }
  0xbd   : > { %v13395_v21 = vadd.f32 %v2160_v56, %v2112_v35  ;;  %2228 = vmatmul.bf16.gmra.mxu2 %v13381_v42  ;;  %2326 = vmatmul.bf16.gmra.mxu0 %v13383_v48  ;;  %v12066_v56 = vld [vmem:[%s18513_s2 + $0x264] sm:$0xf]  ;;  %v9807_v35 = vld [vmem:[%s18513_s2 + $0x250] sm:$0xf0]  ;;  %v9682_v13 = vor.u32 %v12030_v39, %v9679_v40  ;;  %v9469_v39 = vld [vmem:[%s12879_s16 + $0x158] sm:$0xf]  ;;  %v9666_v48 = vor.u32 %v12026_v25, %v9663_v34 }
  0xbe   : > { %2375 = vmatmul.bf16.gmra.mxu1 %v13390_v3  ;;  %v9826_v24 = vor.u32 %v12066_v56, %v9823_v22  ;;  %v9810_v22 = vor.u32 %v12062_v41, %v9807_v35  ;;  %v11980_v40 = vld [vmem:[%s12879_s16 + $0x170] sm:$0xf0]  ;;  %v9477_v41 = vld [vmem:[%s12879_s16 + $0x160] sm:$0xf]  ;;  %v11978_v35 = vld [vmem:[%s12879_s16 + $0x164] sm:$0xf] }
  0xbf   : > { %2494 = vmatpush.bf16.msra.mxu0 %v9682_v13  ;;  %v13467_v13 = vor.u32 %v11980_v40, %v9469_v39  ;;  %v9775_v25 = vld [vmem:[%s18513_s2 + $0x210] sm:$0xf0] }
  0xc0   : > { %2277 = vmatmul.bf16.gmra.mxu3 %v13388_v2  ;;  %v2131_v36 = vpop.f32.mrf.mxu2  ;;  %2542 = vmatpush.bf16.msra.mxu1 %v9826_v24  ;;  %v11977_v24 = vld [vmem:[%s12879_s16 + $0x15c] sm:$0xf]  ;;  %v9778_v39 = vor.u32 %v12054_v61, %v9775_v25  ;;  %v11987_v25 = vld [vmem:[%s12879_s16 + $0x1a8] sm:$0xf0] }
  0xc1   : > { %v2132_v49 = vadd.f32 %v2131_v36, %v13298_v54  ;;  %v12058_v36 = vld [vmem:[%s18513_s2 + $0x224] sm:$0xf]  ;;  %18646 = vst [vmem:[#allocation28_spill] sm:$0xff] %v13467_v13 }
  0xc2   : > { %v2113_v12 = vpop.f32.mrf.mxu0  ;;  %v9794_v3 = vor.u32 %v12058_v36, %v9791_v23 }
  0xc3   : > { %v2180_v59 = vpop.f32.mrf.mxu3  ;;  %v2114_v20 = vadd.f32 %v2113_v12, %v13298_v54  ;;  %v2162_v56 = vpop.f32.mrf.mxu1  ;;  %v9479_v12 = vld [vmem:[%s12879_s16 + $0x17c] sm:$0xf0]  ;;  %2495 = vmatpush.bf16.msra.mxu0 %v9666_v48  ;;  %v10143_v48 = vld [vmem:[%s18513_s2 + $0x4f0] sm:$0xf0] }
  0xc4   : > { %v13432_v18 = vadd.f32 %v2180_v59, %v2132_v49  ;;  %v11981_v49 = vld [vmem:[%s12879_s16 + $0x178] sm:$0xf0]  ;;  %v9471_v59 = vld [vmem:[%s12879_s16 + $0x174] sm:$0xf0]  ;;  %2543 = vmatpush.bf16.msra.mxu1 %v9810_v22  ;;  %v13476_v23 = vor.u32 %v11978_v35, %v9479_v12 }
  0xc5   : > { %v13444_v38 = vadd.f32 %v2162_v56, %v2114_v20  ;;  %v12022_v20 = vld [vmem:[%s18513_s2 + $0x104] sm:$0xf]  ;;  %v9647_v56 = vld [vmem:[%s18513_s2 + $0x110] sm:$0xf0]  ;;  %v13469_v22 = vor.u32 %v11981_v49, %v9477_v41  ;;  %v13474_v36 = vor.u32 %v11977_v24, %v9471_v59 }
  0xc6   : > { %18649 = vst [vmem:[#allocation31_spill] sm:$0xff] %v13476_v23  ;;  %v9650_v33 = vor.u32 %v12022_v20, %v9647_v56  ;;  %v9497_v56 = vld [vmem:[%s12879_s16 + $0x190] sm:$0xf] }
  0xc7   : > { %18647 = vst [vmem:[#allocation29_spill] sm:$0xff] %v13469_v22 }
  0xc8   : > { %v2133_v2 = vpop.f32.mrf.mxu2  ;;  %18648 = vst [vmem:[#allocation30_spill] sm:$0xff] %v13474_v36  ;;  %2544 = vmatpush.bf16.msra.mxu1 %v9794_v3  ;;  %2496 = vmatpush.bf16.msra.mxu0 %v9650_v33 }
  0xc9   : > { %v2134_v60 = vadd.f32 %v2133_v2, %v13298_v54 }
  0xca   : > { %v2116_v34 = vpop.f32.mrf.mxu0 }
  0xcb   : > { %v2182_v27 = vpop.f32.mrf.mxu3  ;;  %v2117_v8 = vadd.f32 %v2116_v34, %v13298_v54  ;;  %v2165_v2 = vpop.f32.mrf.mxu1  ;;  %v11984_v34 = vld [vmem:[%s12879_s16 + $0x194] sm:$0xf] }
  0xcc   : > { %v13478_v28 = vadd.f32 %v2182_v27, %v2134_v60  ;;  %v12114_v27 = vld [vmem:[%s18513_s2 + $0x3e4] sm:$0xf]  ;;  %v10015_v60 = vld [vmem:[%s18513_s2 + $0x3f0] sm:$0xf0]  ;;  %2545 = vmatpush.bf16.msra.mxu1 %v9778_v39 }
  0xcd   : > { %v13481_v40 = vadd.f32 %v2165_v2, %v2117_v8  ;;  %2233 = vmatmul.bf16.gmra.mxu2 %v13467_v13  ;;  %2331 = vmatmul.bf16.gmra.mxu0 %v13469_v22  ;;  %v12146_v8 = vld [vmem:[%s18513_s2 + $0x4e4] sm:$0xf]  ;;  %v10018_v61 = vor.u32 %v12114_v27, %v10015_v60  ;;  %v9505_v2 = vld [vmem:[%s12879_s16 + $0x198] sm:$0xf]  ;;  %v11988_v39 = vld [vmem:[%s12879_s16 + $0x1b0] sm:$0xf0] }
  0xce   : > { %2380 = vmatmul.bf16.gmra.mxu1 %v13476_v23  ;;  %v10146_v24 = vor.u32 %v12146_v8, %v10143_v48  ;;  %v9499_v27 = vld [vmem:[%s12879_s16 + $0x1ac] sm:$0xf0]  ;;  %v11985_v60 = vld [vmem:[%s12879_s16 + $0x19c] sm:$0xf]  ;;  %v9507_v8 = vld [vmem:[%s12879_s16 + $0x1b4] sm:$0xf0] }
  0xcf   : > { %2587 = vmatpush.bf16.msrb.mxu2 %v10018_v61 }
  0xd0   : > { %2282 = vmatmul.bf16.gmra.mxu3 %v13474_v36  ;;  %v2136_v3 = vpop.f32.mrf.mxu2 }
  0xd1   : > { %v2137_v41 = vadd.f32 %v2136_v3, %v13298_v54  ;;  %2636 = vmatpush.bf16.msrb.mxu3 %v10146_v24  ;;  %v13514_v24 = vor.u32 %v11987_v25, %v9497_v56  ;;  %v12110_v56 = vld [vmem:[%s18513_s2 + $0x3c4] sm:$0xf]  ;;  %v9999_v25 = vld [vmem:[%s18513_s2 + $0x3d0] sm:$0xf0] }
  0xd2   : > { %v2118_v33 = vpop.f32.mrf.mxu0 }
  0xd3   : > { %v2185_v49 = vpop.f32.mrf.mxu3  ;;  %v2119_v35 = vadd.f32 %v2118_v33, %v13298_v54  ;;  %v2167_v12 = vpop.f32.mrf.mxu1  ;;  %18650 = vst [vmem:[#allocation32_spill] sm:$0xff] %v13514_v24  ;;  %v13518_v33 = vor.u32 %v11984_v34, %v9499_v27  ;;  %v10127_v34 = vld [vmem:[%s18513_s2 + $0x4d0] sm:$0xf0] }
  0xd4   : > { %v13500_v59 = vadd.f32 %v2185_v49, %v2137_v41  ;;  %v13516_v41 = vor.u32 %v11988_v39, %v9505_v2 }
  0xd5   : > { %v13503_v20 = vadd.f32 %v2167_v12, %v2119_v35  ;;  %18652 = vst [vmem:[#allocation34_spill] sm:$0xff] %v13518_v33  ;;  %v13520_v35 = vor.u32 %v11985_v60, %v9507_v8 }
  0xd6   : > { %18651 = vst [vmem:[#allocation33_spill] sm:$0xff] %v13516_v41 }
  0xd7   : > { %18653 = vst [vmem:[#allocation35_spill] sm:$0xff] %v13520_v35 }
  0xd8   : > { %v2138_v48 = vpop.f32.mrf.mxu2 }
  0xd9   : > { %v2139_v61 = vadd.f32 %v2138_v48, %v13298_v54 }
  0xda   : > { %v2121_v49 = vpop.f32.mrf.mxu0 }
  0xdb   : > { %v2187_v3 = vpop.f32.mrf.mxu3  ;;  %v2122_v22 = vadd.f32 %v2121_v49, %v13298_v54  ;;  %v2170_v23 = vpop.f32.mrf.mxu1 }
  0xdc   : > { %v13522_v12 = vadd.f32 %v2187_v3, %v2139_v61 }
  0xdd   : > { %v13525_v36 = vadd.f32 %v2170_v23, %v2122_v22  ;;  %2238 = vmatmul.bf16.gmra.mxu2 %v13514_v24  ;;  %2336 = vmatmul.bf16.gmra.mxu0 %v13516_v41  ;;  %v12142_v22 = vld [vmem:[%s18513_s2 + $0x4c4] sm:$0xf]  ;;  %v10002_v23 = vor.u32 %v12110_v56, %v9999_v25  ;;  %v9317_v56 = vld [vmem:[%s12879_s16 + $0x18] sm:$0xf]  ;;  %v11940_v25 = vld [vmem:[%s12879_s16 + $0x30] sm:$0xf0] }
  0xde   : > { %2385 = vmatmul.bf16.gmra.mxu1 %v13520_v35  ;;  %v10130_v39 = vor.u32 %v12142_v22, %v10127_v34  ;;  %v13552_v22 = vor.u32 %v11940_v25, %v9317_v56 }
  0xdf   : > { %2588 = vmatpush.bf16.msrb.mxu2 %v10002_v23 }
  0xe0   : > { %2287 = vmatmul.bf16.gmra.mxu3 %v13518_v33  ;;  %v2141_v2 = vpop.f32.mrf.mxu2 }
  0xe1   : > { %v2142_v27 = vadd.f32 %v2141_v2, %v13298_v54  ;;  %2637 = vmatpush.bf16.msrb.mxu3 %v10130_v39  ;;  %v10111_v39 = vld [vmem:[%s18513_s2 + $0x4b0] sm:$0xf0] }
  0xe2   : > { %v2123_v8 = vpop.f32.mrf.mxu0 }
  0xe3   : > { %v2190_v60 = vpop.f32.mrf.mxu3  ;;  %v2124_v61 = vadd.f32 %v2123_v8, %v13298_v54  ;;  %v2172_v3 = vpop.f32.mrf.mxu1 }
  0xe4   : > { %v13544_v48 = vadd.f32 %v2190_v60, %v2142_v27 }
  0xe5   : > { %v13547_v49 = vadd.f32 %v2172_v3, %v2124_v61 }
  0xe8   : > { %v2143_v41 = vpop.f32.mrf.mxu2 }
  0xe9   : > { %v2144_v35 = vadd.f32 %v2143_v41, %v13298_v54  ;;  %v12106_v54 = vld [vmem:[%s18513_s2 + $0x3a4] sm:$0xf]  ;;  %v9983_v41 = vld [vmem:[%s18513_s2 + $0x3b0] sm:$0xf0] }
  0xea   : > { %v2302_v34 = vpop.f32.mrf.mxu0 }
  0xeb   : > { %v2192_v33 = vpop.f32.mrf.mxu3  ;;  %v2351_v2 = vpop.f32.mrf.mxu1 }
  0xec   : > { %v13554_v23 = vadd.f32 %v2192_v33, %v2144_v35  ;;  %v12138_v33 = vld [vmem:[%s18513_s2 + $0x4a4] sm:$0xf]  ;;  %v9986_v35 = vor.u32 %v12106_v54, %v9983_v41 }
  0xed   : > { %10299 = vmatmul.msk.bf16.vlgmr.msra.gmra.mxu2 %vm2072_vm0, %v13552_v22  ;;  %2497 = vmatmul.bf16.vlgmr.msra.gmra.mxu0 %v12926_v4  ;;  %v10114_v60 = vor.u32 %v12138_v33, %v10111_v39 }
  0xee   : > { %2546 = vmatmul.bf16.vlgmr.msra.gmra.mxu1 %v13188_v29  ;;  %2589 = vmatpush.bf16.msrb.mxu2 %v9986_v35  ;;  %v9345_v29 = vld [vmem:[%s12879_s16 + $0x50] sm:$0xf] }
  0xef   : > { %2638 = vmatpush.bf16.msrb.mxu3 %v10114_v60 }
  0xf0   : > { %2448 = vmatmul.bf16.vlgmr.msra.gmra.mxu3 %v12913_v63  ;;  %v2204_v27 = vpop.f32.mrf.mxu2  ;;  %v11947_v63 = vld [vmem:[%s12879_s16 + $0x68] sm:$0xf0] }
  0xf1   : > { %v2205_v8 = vadd.f32 %v2204_v27, %v13309_v6  ;;  %v13579_v45 = vor.u32 %v11947_v63, %v9345_v29  ;;  %v9967_v63 = vld [vmem:[%s18513_s2 + $0x390] sm:$0xf0]  ;;  %v12134_v29 = vld [vmem:[%s18513_s2 + $0x484] sm:$0xf] }
  0xf2   : > { %v2304_v3 = vpop.f32.mrf.mxu0 }
  0xf3   : > { %v2253_v61 = vpop.f32.mrf.mxu3  ;;  %v2353_v25 = vpop.f32.mrf.mxu1  ;;  %18654 = vst [vmem:[#allocation36_spill] sm:$0xff] %v13579_v45 }
  0xf4   : > { %v2254_v56 = vadd.f32 %v2253_v61, %v2205_v8 }
  0xf6   : > { %v2303_v4 = vadd.f32 %v2302_v34, %v2254_v56 }
  0xf8   : > { %v13576_v10 = vadd.f32 %v2351_v2, %v2303_v4  ;;  %v2206_v54 = vpop.f32.mrf.mxu2  ;;  %v12102_v4 = vld [vmem:[%s18513_s2 + $0x384] sm:$0xf] }
  0xf9   : > { %v2207_v41 = vadd.f32 %v2206_v54, %v13358_v11  ;;  %v10095_v11 = vld [vmem:[%s18513_s2 + $0x490] sm:$0xf0] }
  0xfa   : > { %v2307_v33 = vpop.f32.mrf.mxu0  ;;  %v10098_v35 = vor.u32 %v12134_v29, %v10095_v11 }
  0xfb   : > { %v2255_v9 = vpop.f32.mrf.mxu3  ;;  %v2356_v6 = vpop.f32.mrf.mxu1 }
  0xfc   : > { %v2256_v39 = vadd.f32 %v2255_v9, %v2207_v41  ;;  %v9970_v9 = vor.u32 %v12102_v4, %v9967_v63  ;;  %2639 = vmatpush.bf16.msrb.mxu3 %v10098_v35  ;;  %v9373_v41 = vld [vmem:[%s12879_s16 + $0x88] sm:$0xf] }
  0xfd   : > { %10300 = vmatmul.msk.bf16.gmra.mxu2 %vm2072_vm0, %v13579_v45  ;;  %2502 = vmatmul.bf16.gmra.mxu0 %v13042_v62 }
  0xfe   : > { %v2305_v27 = vadd.f32 %v2304_v3, %v2256_v39  ;;  %2551 = vmatmul.bf16.gmra.mxu1 %v13214_v44  ;;  %2590 = vmatpush.bf16.msrb.mxu2 %v9970_v9  ;;  %v11954_v39 = vld [vmem:[%s12879_s16 + $0xa0] sm:$0xf0]  ;;  %v10079_v9 = vld [vmem:[%s18513_s2 + $0x470] sm:$0xf0] }
 0x100   : > { %2453 = vmatmul.bf16.gmra.mxu3 %v13029_v57  ;;  %v13598_v34 = vadd.f32 %v2353_v25, %v2305_v27  ;;  %v2209_v2 = vpop.f32.mrf.mxu2  ;;  %v13606_v27 = vor.u32 %v11954_v39, %v9373_v41 }
 0x101   : > { %v2210_v60 = vadd.f32 %v2209_v2, %v13395_v21 }
 0x102   : > { %v2309_v61 = vpop.f32.mrf.mxu0  ;;  %18655 = vst [vmem:[#allocation37_spill] sm:$0xff] %v13606_v27 }
 0x103   : > { %v2258_v8 = vpop.f32.mrf.mxu3  ;;  %v2358_v56 = vpop.f32.mrf.mxu1 }
 0x104   : > { %v2259_v3 = vadd.f32 %v2258_v8, %v2210_v60 }
 0x106   : > { %v2308_v54 = vadd.f32 %v2307_v33, %v2259_v3  ;;  %v12130_v33 = vld [vmem:[%s18513_s2 + $0x464] sm:$0xf] }
 0x107   : > { %v10082_v8 = vor.u32 %v12130_v33, %v10079_v9 }
 0x108   : > { %v13603_v4 = vadd.f32 %v2356_v6, %v2308_v54  ;;  %v2211_v63 = vpop.f32.mrf.mxu2 }
 0x109   : > { %v2212_v62 = vadd.f32 %v2211_v63, %v13444_v38  ;;  %v12098_v38 = vld [vmem:[%s18513_s2 + $0x364] sm:$0xf]  ;;  %2640 = vmatpush.bf16.msrb.mxu3 %v10082_v8 }
 0x10a   : > { %v2312_v29 = vpop.f32.mrf.mxu0 }
 0x10b   : > { %v2260_v25 = vpop.f32.mrf.mxu3  ;;  %v2361_v21 = vpop.f32.mrf.mxu1 }
 0x10c   : > { %v2261_v11 = vadd.f32 %v2260_v25, %v2212_v62  ;;  %v9951_v62 = vld [vmem:[%s18513_s2 + $0x370] sm:$0xf0]  ;;  %v9401_v25 = vld [vmem:[%s12879_s16 + $0xc0] sm:$0xf] }
 0x10d   : > { %10301 = vmatmul.msk.bf16.gmra.mxu2 %vm2072_vm0, %v13606_v27  ;;  %2507 = vmatmul.bf16.gmra.mxu0 %v13134_v52  ;;  %v9954_v6 = vor.u32 %v12098_v38, %v9951_v62 }
 0x10e   : > { %v2310_v2 = vadd.f32 %v2309_v61, %v2261_v11  ;;  %2556 = vmatmul.bf16.gmra.mxu1 %v13240_v7  ;;  %v11961_v11 = vld [vmem:[%s12879_s16 + $0xd8] sm:$0xf0] }
 0x10f   : > { %2591 = vmatpush.bf16.msrb.mxu2 %v9954_v6  ;;  %v10063_v6 = vld [vmem:[%s18513_s2 + $0x450] sm:$0xf0] }
 0x110   : > { %2458 = vmatmul.bf16.gmra.mxu3 %v13130_v50  ;;  %v13625_v35 = vadd.f32 %v2358_v56, %v2310_v2  ;;  %v2214_v60 = vpop.f32.mrf.mxu2  ;;  %v13633_v2 = vor.u32 %v11961_v11, %v9401_v25 }
 0x111   : > { %v2215_v61 = vadd.f32 %v2214_v60, %v13481_v40 }
 0x112   : > { %v2314_v54 = vpop.f32.mrf.mxu0  ;;  %18656 = vst [vmem:[#allocation38_spill] sm:$0xff] %v13633_v2 }
 0x113   : > { %v2263_v3 = vpop.f32.mrf.mxu3  ;;  %v2363_v39 = vpop.f32.mrf.mxu1 }
 0x114   : > { %v2264_v41 = vadd.f32 %v2263_v3, %v2215_v61 }
 0x116   : > { %v2313_v63 = vadd.f32 %v2312_v29, %v2264_v41  ;;  %v12126_v29 = vld [vmem:[%s18513_s2 + $0x444] sm:$0xf] }
 0x117   : > { %v10066_v3 = vor.u32 %v12126_v29, %v10063_v6 }
 0x118   : > { %v13630_v38 = vadd.f32 %v2361_v21, %v2313_v63  ;;  %v2216_v62 = vpop.f32.mrf.mxu2 }
 0x119   : > { %v2217_v52 = vadd.f32 %v2216_v62, %v13503_v20  ;;  %v12094_v20 = vld [vmem:[%s18513_s2 + $0x344] sm:$0xf]  ;;  %2641 = vmatpush.bf16.msrb.mxu3 %v10066_v3 }
 0x11a   : > { %v2317_v33 = vpop.f32.mrf.mxu0  ;;  %v12122_v3 = vld [vmem:[%s18513_s2 + $0x424] sm:$0xf] }
 0x11b   : > { %v2265_v56 = vpop.f32.mrf.mxu3  ;;  %v2366_v40 = vpop.f32.mrf.mxu1 }
 0x11c   : > { %v2266_v9 = vadd.f32 %v2265_v56, %v2217_v52  ;;  %v9935_v52 = vld [vmem:[%s18513_s2 + $0x350] sm:$0xf0]  ;;  %v9429_v56 = vld [vmem:[%s12879_s16 + $0xf8] sm:$0xf] }
 0x11d   : > { %10302 = vmatmul.msk.bf16.gmra.mxu2 %vm2072_vm0, %v13633_v2  ;;  %2512 = vmatmul.bf16.gmra.mxu0 %v13166_v16  ;;  %v9938_v21 = vor.u32 %v12094_v20, %v9935_v52 }
 0x11e   : > { %v2315_v60 = vadd.f32 %v2314_v54, %v2266_v9  ;;  %2561 = vmatmul.bf16.gmra.mxu1 %v13266_v26  ;;  %v11968_v9 = vld [vmem:[%s12879_s16 + $0x110] sm:$0xf0] }
 0x11f   : > { %2592 = vmatpush.bf16.msrb.mxu2 %v9938_v21  ;;  %v12178_v21 = vld [vmem:[%s18513_s2 + $0x5e4] sm:$0xf] }
 0x120   : > { %2463 = vmatmul.bf16.gmra.mxu3 %v13162_v14  ;;  %v13652_v8 = vadd.f32 %v2363_v39, %v2315_v60  ;;  %v2219_v61 = vpop.f32.mrf.mxu2  ;;  %v13660_v60 = vor.u32 %v11968_v9, %v9429_v56  ;;  %v12174_v56 = vld [vmem:[%s18513_s2 + $0x5c4] sm:$0xf]  ;;  %v10255_v9 = vld [vmem:[%s18513_s2 + $0x5d0] sm:$0xf0] }
 0x121   : > { %v2220_v54 = vadd.f32 %v2219_v61, %v13525_v36 }
 0x122   : > { %v2319_v63 = vpop.f32.mrf.mxu0  ;;  %18657 = vst [vmem:[#allocation39_spill] sm:$0xff] %v13660_v60 }
 0x123   : > { %v2268_v41 = vpop.f32.mrf.mxu3  ;;  %v2368_v11 = vpop.f32.mrf.mxu1 }
 0x124   : > { %v2269_v25 = vadd.f32 %v2268_v41, %v2220_v54  ;;  %v10047_v41 = vld [vmem:[%s18513_s2 + $0x430] sm:$0xf0] }
 0x126   : > { %v2318_v62 = vadd.f32 %v2317_v33, %v2269_v25  ;;  %v10271_v33 = vld [vmem:[%s18513_s2 + $0x5f0] sm:$0xf0] }
 0x128   : > { %v13657_v20 = vadd.f32 %v2366_v40, %v2318_v62  ;;  %v2221_v52 = vpop.f32.mrf.mxu2  ;;  %v9919_v40 = vld [vmem:[%s18513_s2 + $0x330] sm:$0xf0]  ;;  %v10050_v62 = vor.u32 %v12122_v3, %v10047_v41  ;;  %v9457_v3 = vld [vmem:[%s12879_s16 + $0x130] sm:$0xf] }
 0x129   : > { %v2222_v16 = vadd.f32 %v2221_v52, %v13547_v49  ;;  %v10274_v49 = vor.u32 %v12178_v21, %v10271_v33 }
 0x12a   : > { %v2322_v29 = vpop.f32.mrf.mxu0  ;;  %2642 = vmatpush.bf16.msrb.mxu3 %v10050_v62  ;;  %v10223_v62 = vld [vmem:[%s18513_s2 + $0x590] sm:$0xf0] }
 0x12b   : > { %v2270_v39 = vpop.f32.mrf.mxu3  ;;  %v2371_v36 = vpop.f32.mrf.mxu1  ;;  %2685 = vmatpush.bf16.msrb.mxu0 %v10274_v49  ;;  %v10239_v49 = vld [vmem:[%s18513_s2 + $0x5b0] sm:$0xf0] }
 0x12c   : > { %v2271_v6 = vadd.f32 %v2270_v39, %v2222_v16  ;;  %v12090_v16 = vld [vmem:[%s18513_s2 + $0x324] sm:$0xf] }
 0x12d   : > { %10303 = vmatmul.msk.bf16.gmra.mxu2 %vm2072_vm0, %v13660_v60  ;;  %2517 = vmatmul.bf16.gmra.mxu0 %v12928_v5  ;;  %v9922_v54 = vor.u32 %v12090_v16, %v9919_v40 }
 0x12e   : > { %v2320_v61 = vadd.f32 %v2319_v63, %v2271_v6  ;;  %2566 = vmatmul.bf16.gmra.mxu1 %v13300_v55  ;;  %v10258_v6 = vor.u32 %v12174_v56, %v10255_v9 }
 0x12f   : > { %2593 = vmatpush.bf16.msrb.mxu2 %v9922_v54 }
 0x130   : > { %2468 = vmatmul.bf16.gmra.mxu3 %v12915_v0  ;;  %v13685_v63 = vadd.f32 %v2368_v11, %v2320_v61  ;;  %v2224_v25 = vpop.f32.mrf.mxu2  ;;  %2686 = vmatpush.bf16.msrb.mxu0 %v10258_v6  ;;  %v12170_v61 = vld [vmem:[%s18513_s2 + $0x5a4] sm:$0xf] }
 0x131   : > { %v2225_v52 = vadd.f32 %v2224_v25, %v13346_v43  ;;  %v10242_v40 = vor.u32 %v12170_v61, %v10239_v49  ;;  %v11975_v43 = vld [vmem:[%s12879_s16 + $0x148] sm:$0xf0]  ;;  %v12166_v25 = vld [vmem:[%s18513_s2 + $0x584] sm:$0xf]  ;;  %v10207_v61 = vld [vmem:[%s18513_s2 + $0x570] sm:$0xf0] }
 0x132   : > { %v2324_v21 = vpop.f32.mrf.mxu0 }
 0x133   : > { %v2273_v39 = vpop.f32.mrf.mxu3  ;;  %v2373_v33 = vpop.f32.mrf.mxu1 }
 0x134   : > { %v2274_v11 = vadd.f32 %v2273_v39, %v2225_v52  ;;  %2687 = vmatpush.bf16.msrb.mxu0 %v10242_v40  ;;  %v13711_v52 = vor.u32 %v11975_v43, %v9457_v3  ;;  %v9903_v40 = vld [vmem:[%s18513_s2 + $0x310] sm:$0xf0] }
 0x135   : > { %v10031_v43 = vld [vmem:[%s18513_s2 + $0x410] sm:$0xf0] }
 0x136   : > { %v2323_v16 = vadd.f32 %v2322_v29, %v2274_v11  ;;  %18658 = vst [vmem:[#allocation40_spill] sm:$0xff] %v13711_v52  ;;  %v10226_v29 = vor.u32 %v12166_v25, %v10223_v62 }
 0x138   : > { %v13702_v54 = vadd.f32 %v2371_v36, %v2323_v16  ;;  %v2226_v41 = vpop.f32.mrf.mxu2  ;;  %2688 = vmatpush.bf16.msrb.mxu0 %v10226_v29  ;;  %v12162_v36 = vld [vmem:[%s18513_s2 + $0x564] sm:$0xf] }
 0x139   : > { %v2227_v56 = vadd.f32 %v2226_v41, %v13392_v19  ;;  %v10210_v19 = vor.u32 %v12162_v36, %v10207_v61  ;;  %v12086_v16 = vld [vmem:[%s18513_s2 + $0x304] sm:$0xf] }
 0x13a   : > { %v2327_v39 = vpop.f32.mrf.mxu0  ;;  %v9906_v3 = vor.u32 %v12086_v16, %v9903_v40  ;;  %v10175_v16 = vld [vmem:[%s18513_s2 + $0x530] sm:$0xf0] }
 0x13b   : > { %v2275_v9 = vpop.f32.mrf.mxu3  ;;  %v2376_v11 = vpop.f32.mrf.mxu1 }
 0x13c   : > { %v2276_v6 = vadd.f32 %v2275_v9, %v2227_v56  ;;  %2689 = vmatpush.bf16.msrb.mxu0 %v10210_v19  ;;  %v12158_v56 = vld [vmem:[%s18513_s2 + $0x544] sm:$0xf]  ;;  %v10191_v9 = vld [vmem:[%s18513_s2 + $0x550] sm:$0xf0]  ;;  %2594 = vmatpush.bf16.msrb.mxu2 %v9906_v3 }
 0x13d   : > { %10304 = vmatmul.msk.bf16.gmra.mxu2 %vm2072_vm0, %v13711_v52  ;;  %2522 = vmatmul.bf16.gmra.mxu0 %v13044_v1  ;;  %v10194_v36 = vor.u32 %v12158_v56, %v10191_v9  ;;  %v12154_v19 = vld [vmem:[%s18513_s2 + $0x524] sm:$0xf]  ;;  %v10159_v56 = vld [vmem:[%s18513_s2 + $0x510] sm:$0xf0] }
 0x13e   : > { %v2325_v49 = vadd.f32 %v2324_v21, %v2276_v6  ;;  %2571 = vmatmul.bf16.gmra.mxu1 %v13381_v42  ;;  %v12118_v21 = vld [vmem:[%s18513_s2 + $0x404] sm:$0xf] }
 0x13f   : > { %v10034_v62 = vor.u32 %v12118_v21, %v10031_v43  ;;  %v10178_v21 = vor.u32 %v12154_v19, %v10175_v16  ;;  %v9485_v43 = vld [vmem:[%s12879_s16 + $0x168] sm:$0xf]  ;;  %v12182_v9 = vld [vmem:[%s18513_s2 + $0x604] sm:$0xf] }
 0x140   : > { %2473 = vmatmul.bf16.gmra.mxu3 %v13031_v58  ;;  %v13736_v41 = vadd.f32 %v2373_v33, %v2325_v49  ;;  %v2229_v25 = vpop.f32.mrf.mxu2  ;;  %2690 = vmatpush.bf16.msrb.mxu0 %v10194_v36  ;;  %v10287_v36 = vld [vmem:[%s18513_s2 + $0x610] sm:$0xf0] }
 0x141   : > { %v2230_v29 = vadd.f32 %v2229_v25, %v13432_v18  ;;  %2643 = vmatpush.bf16.msrb.mxu3 %v10034_v62  ;;  %v11982_v18 = vld [vmem:[%s12879_s16 + $0x180] sm:$0xf0]  ;;  %v10290_v19 = vor.u32 %v12182_v9, %v10287_v36 }
 0x142   : > { %v2329_v61 = vpop.f32.mrf.mxu0  ;;  %v12150_v62 = vld [vmem:[%s18513_s2 + $0x504] sm:$0xf] }
 0x143   : > { %v2278_v6 = vpop.f32.mrf.mxu3  ;;  %v2378_v49 = vpop.f32.mrf.mxu1  ;;  %2741 = vmatpush.bf16.msrb.mxu1 %v10290_v19 }
 0x144   : > { %v2279_v33 = vadd.f32 %v2278_v6, %v2230_v29  ;;  %2691 = vmatpush.bf16.msrb.mxu0 %v10178_v21  ;;  %v13765_v6 = vor.u32 %v11982_v18, %v9485_v43  ;;  %v12021_v43 = vld [vmem:[%s18513_s2 + $0xf4] sm:$0xf0] }
 0x146   : > { %v2328_v40 = vadd.f32 %v2327_v39, %v2279_v33  ;;  %18659 = vst [vmem:[#allocation41_spill] sm:$0xff] %v13765_v6 }
 0x148   : > { %v13753_v3 = vadd.f32 %v2376_v11, %v2328_v40  ;;  %v2231_v25 = vpop.f32.mrf.mxu2  ;;  %v10162_v11 = vor.u32 %v12150_v62, %v10159_v56 }
 0x149   : > { %v2232_v39 = vadd.f32 %v2231_v25, %v13478_v28  ;;  %v9637_v28 = vld [vmem:[%s18513_s2 + $0xe8] sm:$0xf]  ;;  %v12053_v25 = vld [vmem:[%s18513_s2 + $0x1f4] sm:$0xf0] }
 0x14a   : > { %v2332_v33 = vpop.f32.mrf.mxu0  ;;  %2692 = vmatpush.bf16.msrb.mxu0 %v10162_v11  ;;  %v9638_v18 = vor.u32 %v12021_v43, %v9637_v28 }
 0x14b   : > { %v2280_v29 = vpop.f32.mrf.mxu3  ;;  %v2381_v40 = vpop.f32.mrf.mxu1 }
 0x14c   : > { %v2281_v16 = vadd.f32 %v2280_v29, %v2232_v39  ;;  %2783 = vmatpush.bf16.msra.mxu2 %v9638_v18  ;;  %v12049_v18 = vld [vmem:[%s18513_s2 + $0x1d4] sm:$0xf0] }
 0x14d   : > { %10305 = vmatmul.msk.bf16.gmra.mxu2 %vm2072_vm0, %v13765_v6  ;;  %2527 = vmatmul.bf16.gmra.mxu0 %v13136_v53  ;;  %v9513_v53 = vld [vmem:[%s12879_s16 + $0x1a0] sm:$0xf] }
 0x14e   : > { %v2330_v21 = vadd.f32 %v2329_v61, %v2281_v16  ;;  %2576 = vmatmul.bf16.gmra.mxu1 %v13467_v13  ;;  %v9765_v61 = vld [vmem:[%s18513_s2 + $0x1e8] sm:$0xf]  ;;  %v11989_v13 = vld [vmem:[%s12879_s16 + $0x1b8] sm:$0xf0]  ;;  %s15803_s16 = scalar_lea.vmem %s18526_s15, %s11933_s27 }
 0x14f   : > { %v9766_v9 = vor.u32 %v12053_v25, %v9765_v61 }
 0x150   : > { %2478 = vmatmul.bf16.gmra.mxu3 %v13132_v51  ;;  %v13787_v62 = vadd.f32 %v2378_v49, %v2330_v21  ;;  %v2234_v56 = vpop.f32.mrf.mxu2  ;;  %v13795_v21 = vor.u32 %v11989_v13, %v9513_v53  ;;  %v12017_v53 = vld [vmem:[%s18513_s2 + $0xd4] sm:$0xf0] }
 0x151   : > { %v2235_v39 = vadd.f32 %v2234_v56, %v13500_v59  ;;  %2832 = vmatpush.bf16.msra.mxu3 %v9766_v9 }
 0x152   : > { %v2334_v11 = vpop.f32.mrf.mxu0  ;;  %18660 = vst [vmem:[#allocation42_spill] sm:$0xff] %v13795_v21 }
 0x153   : > { %v2283_v29 = vpop.f32.mrf.mxu3  ;;  %v2383_v19 = vpop.f32.mrf.mxu1 }
 0x154   : > { %v2284_v36 = vadd.f32 %v2283_v29, %v2235_v39 }
 0x156   : > { %v2333_v16 = vadd.f32 %v2332_v33, %v2284_v36 }
 0x158   : > { %v13792_v28 = vadd.f32 %v2381_v40, %v2333_v16  ;;  %v2236_v43 = vpop.f32.mrf.mxu2 }
 0x159   : > { %v2237_v51 = vadd.f32 %v2236_v43, %v13522_v12  ;;  %v9621_v12 = vld [vmem:[%s18513_s2 + $0xc8] sm:$0xf] }
 0x15a   : > { %v2337_v61 = vpop.f32.mrf.mxu0  ;;  %v9622_v40 = vor.u32 %v12017_v53, %v9621_v12 }
 0x15b   : > { %v2285_v49 = vpop.f32.mrf.mxu3  ;;  %v2386_v59 = vpop.f32.mrf.mxu1 }
 0x15c   : > { %v2286_v25 = vadd.f32 %v2285_v49, %v2237_v51  ;;  %v9749_v51 = vld [vmem:[%s18513_s2 + $0x1c8] sm:$0xf]  ;;  %2784 = vmatpush.bf16.msra.mxu2 %v9622_v40 }
 0x15d   : > { %10306 = vmatmul.msk.bf16.gmra.mxu2 %vm2072_vm0, %v13795_v21  ;;  %2532 = vmatmul.bf16.gmra.mxu0 %v13168_v17  ;;  %v9750_v29 = vor.u32 %v12049_v18, %v9749_v51 }
 0x15e   : > { %v2335_v56 = vadd.f32 %v2334_v11, %v2286_v25  ;;  %2581 = vmatmul.bf16.gmra.mxu1 %v13514_v24 }
 0x15f   : > { %2833 = vmatpush.bf16.msra.mxu3 %v9750_v29 }
 0x160   : > { %2483 = vmatmul.bf16.gmra.mxu3 %v13164_v15  ;;  %v13811_v13 = vadd.f32 %v2383_v19, %v2335_v56  ;;  %v2239_v33 = vpop.f32.mrf.mxu2 }
 0x161   : > { %v2240_v9 = vadd.f32 %v2239_v33, %v13544_v48  ;;  %v13823_v48 = vperm.slane %v13287_v37, 1  ;;  %v12045_v37 = vld [vmem:[%s18513_s2 + $0x1b4] sm:$0xf0] }
 0x162   : > { %v2339_v11 = vpop.f32.mrf.mxu0 }
 0x163   : > { %v2288_v39 = vpop.f32.mrf.mxu3  ;;  %v2388_v16 = vpop.f32.mrf.mxu1 }
 0x164   : > { %v2289_v36 = vadd.f32 %v2288_v39, %v2240_v9 }
 0x166   : > { %v2338_v43 = vadd.f32 %v2337_v61, %v2289_v36  ;;  %v12013_v61 = vld [vmem:[%s18513_s2 + $0xb4] sm:$0xf0] }
 0x168   : > { %v13817_v49 = vadd.f32 %v2386_v59, %v2338_v43  ;;  %v2241_v19 = vpop.f32.mrf.mxu2  ;;  %v9733_v59 = vld [vmem:[%s18513_s2 + $0x1a8] sm:$0xf] }
 0x169   : > { %v2242_v25 = vadd.f32 %v2241_v19, %v13554_v23  ;;  %v9605_v23 = vld [vmem:[%s18513_s2 + $0xa8] sm:$0xf]  ;;  %v9734_v18 = vor.u32 %v12045_v37, %v9733_v59 }
 0x16a   : > { %v2498_v12 = vpop.f32.mrf.mxu0  ;;  %v9606_v51 = vor.u32 %v12013_v61, %v9605_v23 }
 0x16b   : > { %v2290_v56 = vpop.f32.mrf.mxu3  ;;  %v2547_v17 = vpop.f32.mrf.mxu1  ;;  %2834 = vmatpush.bf16.msra.mxu3 %v9734_v18 }
 0x16c   : > { %v2291_v53 = vadd.f32 %v2290_v56, %v2242_v25  ;;  %2785 = vmatpush.bf16.msra.mxu2 %v9606_v51 }
 0x16d   : > { %2595 = vmatmul.bf16.vlgmr.msrb.gmra.mxu2 %v13192_v31  ;;  %2693 = vmatmul.bf16.vlgmr.msrb.gmra.mxu0 %v13194_v32 }
 0x16e   : > { %v2340_v24 = vadd.f32 %v2339_v11, %v2291_v53  ;;  %10307 = vmatmul.msk.bf16.vlgmr.msrb.gmra.mxu1 %vm2072_vm0, %v13552_v22 }
 0x170   : > { %2644 = vmatmul.bf16.vlgmr.msrb.gmra.mxu3 %v13190_v30  ;;  %v13840_v33 = vadd.f32 %v2388_v16, %v2340_v24  ;;  %v2400_v40 = vpop.f32.mrf.mxu2 }
 0x171   : > { %v2401_v9 = vadd.f32 %v2400_v40, %v13576_v10  ;;  %v9717_v40 = vld [vmem:[%s18513_s2 + $0x188] sm:$0xf] }
 0x172   : > { %v2500_v11 = vpop.f32.mrf.mxu0 }
 0x173   : > { %v2449_v39 = vpop.f32.mrf.mxu3  ;;  %v2549_v36 = vpop.f32.mrf.mxu1  ;;  %v3469_v56 = vmul.f32 0.2, %v2401_v9 }
 0x174   : > { %v2450_v29 = vadd.f32 %v2449_v39, %v13823_v48 }
 0x175   : > { %v3533_v51 = vmax.f32 %v2401_v9, %v3469_v56 }
 0x176   : > { %v2499_v43 = vadd.f32 %v2498_v12, %v2450_v29  ;;  %v18661_v12 = vld [vmem:[#allocation13_spill] sm:$0xff] }
 0x177   : > { %v12041_v29 = vld [vmem:[%s18513_s2 + $0x194] sm:$0xf0] }
 0x178   : > { %v13844_v19 = vadd.f32 %v2547_v17, %v2499_v43  ;;  %v2402_v25 = vpop.f32.mrf.mxu2  ;;  %v9589_v17 = vld [vmem:[%s18513_s2 + $0x88] sm:$0xf]  ;;  %v9718_v43 = vor.u32 %v12041_v29, %v9717_v40 }
 0x179   : > { %v2403_v53 = vadd.f32 %v2402_v25, %v13598_v34  ;;  %v12009_v34 = vld [vmem:[%s18513_s2 + $0x94] sm:$0xf0] }
 0x17a   : > { %v2503_v23 = vpop.f32.mrf.mxu0  ;;  %v9590_v39 = vor.u32 %v12009_v34, %v9589_v17  ;;  %2835 = vmatpush.bf16.msra.mxu3 %v9718_v43  ;;  %v18664_v43 = vld [vmem:[#allocation18_spill] sm:$0xff] }
 0x17b   : > { %v2451_v24 = vpop.f32.mrf.mxu3  ;;  %v3473_v61 = vmul.f32 0.2, %v2403_v53  ;;  %v2552_v10 = vpop.f32.mrf.mxu1 }
 0x17c   : > { %v2452_v16 = vadd.f32 %v2451_v24, %v13823_v48  ;;  %2786 = vmatpush.bf16.msra.mxu2 %v9590_v39 }
 0x17d   : > { %v3537_v37 = vmax.f32 %v2403_v53, %v3473_v61  ;;  %2600 = vmatmul.bf16.gmra.mxu2 %v13218_v46  ;;  %2698 = vmatmul.bf16.gmra.mxu0 %v13220_v47  ;;  %v18679_v47 = vld [vmem:[#allocation30_spill] sm:$0xff] }
 0x17e   : > { %v2501_v59 = vadd.f32 %v2500_v11, %v2452_v16  ;;  %10308 = vmatmul.msk.bf16.gmra.mxu1 %vm2072_vm0, %v13579_v45 }
 0x17f   : > { %v13864_v9 = vpack.c.bf16 %v3537_v37, %v3533_v51 }
 0x180   : > { %2649 = vmatmul.bf16.gmra.mxu3 %v18661_v12  ;;  %v13862_v18 = vadd.f32 %v2549_v36, %v2501_v59  ;;  %v2405_v11 = vpop.f32.mrf.mxu2 }
 0x181   : > { %18662 = vst [vmem:[#allocation13_spill] sm:$0xff] %v13864_v9  ;;  %v2406_v25 = vadd.f32 %v2405_v11, %v13603_v4 }
 0x182   : > { %v2505_v24 = vpop.f32.mrf.mxu0 }
 0x183   : > { %v2454_v56 = vpop.f32.mrf.mxu3  ;;  %v2554_v16 = vpop.f32.mrf.mxu1  ;;  %v3477_v51 = vmul.f32 0.2, %v2406_v25 }
 0x184   : > { %v2455_v53 = vadd.f32 %v2454_v56, %v13823_v48  ;;  %v18663_v56 = vld [vmem:[#allocation17_spill] sm:$0xff] }
 0x185   : > { %v3541_v39 = vmax.f32 %v2406_v25, %v3477_v51  ;;  %v9701_v25 = vld [vmem:[%s18513_s2 + $0x168] sm:$0xf] }
 0x186   : > { %v2504_v36 = vadd.f32 %v2503_v23, %v2455_v53  ;;  %v18665_v23 = vld [vmem:[#allocation16_spill] sm:$0xff] }
 0x188   : > { %v13871_v61 = vadd.f32 %v2552_v10, %v2504_v36  ;;  %v2407_v59 = vpop.f32.mrf.mxu2  ;;  %v12005_v10 = vld [vmem:[%s18513_s2 + $0x74] sm:$0xf0] }
 0x189   : > { %v2408_v37 = vadd.f32 %v2407_v59, %v13625_v35  ;;  %v9573_v35 = vld [vmem:[%s18513_s2 + $0x68] sm:$0xf]  ;;  %v12037_v36 = vld [vmem:[%s18513_s2 + $0x174] sm:$0xf0] }
 0x18a   : > { %v2508_v40 = vpop.f32.mrf.mxu0 }
 0x18b   : > { %v2456_v17 = vpop.f32.mrf.mxu3  ;;  %v3481_v29 = vmul.f32 0.2, %v2408_v37  ;;  %v2557_v4 = vpop.f32.mrf.mxu1 }
 0x18c   : > { %v2457_v34 = vadd.f32 %v2456_v17, %v13823_v48 }
 0x18d   : > { %v3545_v9 = vmax.f32 %v2408_v37, %v3481_v29  ;;  %2605 = vmatmul.bf16.gmra.mxu2 %v18663_v56  ;;  %2703 = vmatmul.bf16.gmra.mxu0 %v18664_v43  ;;  %v9702_v37 = vor.u32 %v12037_v36, %v9701_v25 }
 0x18e   : > { %v2506_v11 = vadd.f32 %v2505_v24, %v2457_v34  ;;  %10309 = vmatmul.msk.bf16.gmra.mxu1 %vm2072_vm0, %v13606_v27  ;;  %v9574_v24 = vor.u32 %v12005_v10, %v9573_v35 }
 0x18f   : > { %v13894_v59 = vpack.c.bf16 %v3545_v9, %v3541_v39  ;;  %2836 = vmatpush.bf16.msra.mxu3 %v9702_v37  ;;  %v18668_v37 = vld [vmem:[#allocation21_spill] sm:$0xff] }
 0x190   : > { %2654 = vmatmul.bf16.gmra.mxu3 %v18665_v23  ;;  %v13889_v53 = vadd.f32 %v2554_v16, %v2506_v11  ;;  %v2410_v51 = vpop.f32.mrf.mxu2  ;;  %2787 = vmatpush.bf16.msra.mxu2 %v9574_v24 }
 0x191   : > { %18666 = vst [vmem:[#allocation17_spill] sm:$0xff] %v13894_v59  ;;  %v2411_v17 = vadd.f32 %v2410_v51, %v13630_v38 }
 0x192   : > { %v2510_v43 = vpop.f32.mrf.mxu0 }
 0x193   : > { %v2459_v34 = vpop.f32.mrf.mxu3  ;;  %v2559_v27 = vpop.f32.mrf.mxu1  ;;  %v3485_v10 = vmul.f32 0.2, %v2411_v17 }
 0x194   : > { %v2460_v29 = vadd.f32 %v2459_v34, %v13823_v48  ;;  %v18667_v34 = vld [vmem:[#allocation20_spill] sm:$0xff] }
 0x195   : > { %v3549_v24 = vmax.f32 %v2411_v17, %v3485_v10 }
 0x196   : > { %v2509_v16 = vadd.f32 %v2508_v40, %v2460_v29  ;;  %v18669_v40 = vld [vmem:[#allocation19_spill] sm:$0xff]  ;;  %v12033_v29 = vld [vmem:[%s18513_s2 + $0x154] sm:$0xf0] }
 0x198   : > { %v13898_v11 = vadd.f32 %v2557_v4, %v2509_v16  ;;  %v2412_v35 = vpop.f32.mrf.mxu2  ;;  %v12001_v4 = vld [vmem:[%s18513_s2 + $0x54] sm:$0xf0] }
 0x199   : > { %v2413_v23 = vadd.f32 %v2412_v35, %v13652_v8  ;;  %v9557_v8 = vld [vmem:[%s18513_s2 + $0x48] sm:$0xf] }
 0x19a   : > { %v2513_v25 = vpop.f32.mrf.mxu0  ;;  %v9558_v17 = vor.u32 %v12001_v4, %v9557_v8 }
 0x19b   : > { %v2461_v9 = vpop.f32.mrf.mxu3  ;;  %v3489_v36 = vmul.f32 0.2, %v2413_v23  ;;  %v2562_v38 = vpop.f32.mrf.mxu1 }
 0x19c   : > { %v2462_v39 = vadd.f32 %v2461_v9, %v13823_v48  ;;  %2788 = vmatpush.bf16.msra.mxu2 %v9558_v17  ;;  %v9893_v17 = vld [vmem:[%s18513_s2 + $0x2e8] sm:$0xf] }
 0x19d   : > { %v3553_v59 = vmax.f32 %v2413_v23, %v3489_v36  ;;  %2610 = vmatmul.bf16.gmra.mxu2 %v18667_v34  ;;  %2708 = vmatmul.bf16.gmra.mxu0 %v18668_v37 }
 0x19e   : > { %v2511_v51 = vadd.f32 %v2510_v43, %v2462_v39  ;;  %10310 = vmatmul.msk.bf16.gmra.mxu1 %vm2072_vm0, %v13633_v2  ;;  %v9685_v43 = vld [vmem:[%s18513_s2 + $0x148] sm:$0xf] }
 0x19f   : > { %v13921_v16 = vpack.c.bf16 %v3553_v59, %v3549_v24  ;;  %v9686_v10 = vor.u32 %v12033_v29, %v9685_v43 }
 0x1a0   : > { %2659 = vmatmul.bf16.gmra.mxu3 %v18669_v40  ;;  %v13916_v23 = vadd.f32 %v2559_v27, %v2511_v51  ;;  %v2415_v35 = vpop.f32.mrf.mxu2 }
 0x1a1   : > { %18670 = vst [vmem:[#allocation20_spill] sm:$0xff] %v13921_v16  ;;  %v2416_v9 = vadd.f32 %v2415_v35, %v13657_v20  ;;  %2837 = vmatpush.bf16.msra.mxu3 %v9686_v10 }
 0x1a2   : > { %v2515_v37 = vpop.f32.mrf.mxu0 }
 0x1a3   : > { %v2464_v39 = vpop.f32.mrf.mxu3  ;;  %v2564_v2 = vpop.f32.mrf.mxu1  ;;  %v3493_v4 = vmul.f32 0.2, %v2416_v9 }
 0x1a4   : > { %v2465_v36 = vadd.f32 %v2464_v39, %v13823_v48  ;;  %v18671_v39 = vld [vmem:[#allocation23_spill] sm:$0xff] }
 0x1a6   : > { %v2514_v27 = vadd.f32 %v2513_v25, %v2465_v36  ;;  %v12085_v25 = vld [vmem:[%s18513_s2 + $0x2f4] sm:$0xf0]  ;;  %v18672_v36 = vld [vmem:[#allocation24_spill] sm:$0xff] }
 0x1a8   : > { %v13925_v51 = vadd.f32 %v2562_v38, %v2514_v27  ;;  %v2417_v8 = vpop.f32.mrf.mxu2  ;;  %v10021_v38 = vld [vmem:[%s18513_s2 + $0x3e8] sm:$0xf]  ;;  %v9894_v27 = vor.u32 %v12085_v25, %v9893_v17  ;;  %v12029_v17 = vld [vmem:[%s18513_s2 + $0x134] sm:$0xf0] }
 0x1a9   : > { %v2418_v40 = vadd.f32 %v2417_v8, %v13685_v63  ;;  %v3557_v63 = vmax.f32 %v2416_v9, %v3493_v4  ;;  %v18673_v8 = vld [vmem:[#allocation22_spill] sm:$0xff]  ;;  %v9669_v4 = vld [vmem:[%s18513_s2 + $0x128] sm:$0xf] }
 0x1aa   : > { %v2518_v43 = vpop.f32.mrf.mxu0  ;;  %2881 = vmatpush.bf16.msra.mxu0 %v9894_v27 }
 0x1ab   : > { %v2466_v59 = vpop.f32.mrf.mxu3  ;;  %v3497_v29 = vmul.f32 0.2, %v2418_v40  ;;  %v2567_v20 = vpop.f32.mrf.mxu1 }
 0x1ac   : > { %v2467_v24 = vadd.f32 %v2466_v59, %v13823_v48  ;;  %v9541_v59 = vld [vmem:[%s18513_s2 + $0x28] sm:$0xf] }
 0x1ad   : > { %v3561_v10 = vmax.f32 %v2418_v40, %v3497_v29  ;;  %2615 = vmatmul.bf16.gmra.mxu2 %v18671_v39  ;;  %2713 = vmatmul.bf16.gmra.mxu0 %v18672_v36  ;;  %v11997_v40 = vld [vmem:[%s18513_s2 + $0x34] sm:$0xf0]  ;;  %v9670_v36 = vor.u32 %v12029_v17, %v9669_v4 }
 0x1ae   : > { %v2516_v35 = vadd.f32 %v2515_v37, %v2467_v24  ;;  %v12117_v37 = vld [vmem:[%s18513_s2 + $0x3f4] sm:$0xf0]  ;;  %10311 = vmatmul.msk.bf16.gmra.mxu1 %vm2072_vm0, %v13660_v60  ;;  %v9542_v29 = vor.u32 %v11997_v40, %v9541_v59  ;;  %v9829_v60 = vld [vmem:[%s18513_s2 + $0x268] sm:$0xf] }
 0x1af   : > { %v10022_v9 = vor.u32 %v12117_v37, %v10021_v38  ;;  %v13960_v25 = vpack.c.bf16 %v3561_v10, %v3557_v63  ;;  %v9877_v38 = vld [vmem:[%s18513_s2 + $0x2c8] sm:$0xf]  ;;  %v12113_v10 = vld [vmem:[%s18513_s2 + $0x3d4] sm:$0xf0]  ;;  %2838 = vmatpush.bf16.msra.mxu3 %v9670_v36 }
 0x1b0   : > { %2664 = vmatmul.bf16.gmra.mxu3 %v18673_v8  ;;  %v13955_v24 = vadd.f32 %v2564_v2, %v2516_v35  ;;  %v2420_v16 = vpop.f32.mrf.mxu2  ;;  %v12081_v2 = vld [vmem:[%s18513_s2 + $0x2d4] sm:$0xf0]  ;;  %v10005_v35 = vld [vmem:[%s18513_s2 + $0x3c8] sm:$0xf]  ;;  %2789 = vmatpush.bf16.msra.mxu2 %v9542_v29 }
 0x1b1   : > { %18674 = vst [vmem:[#allocation23_spill] sm:$0xff] %v13960_v25  ;;  %2930 = vmatpush.bf16.msra.mxu1 %v10022_v9  ;;  %v2421_v27 = vadd.f32 %v2420_v16, %v13702_v54  ;;  %v9878_v63 = vor.u32 %v12081_v2, %v9877_v38  ;;  %v10006_v9 = vor.u32 %v12113_v10, %v10005_v35  ;;  %v9861_v54 = vld [vmem:[%s18513_s2 + $0x2a8] sm:$0xf]  ;;  %v12077_v16 = vld [vmem:[%s18513_s2 + $0x2b4] sm:$0xf0] }
 0x1b2   : > { %v2520_v40 = vpop.f32.mrf.mxu0  ;;  %v9989_v29 = vld [vmem:[%s18513_s2 + $0x3a8] sm:$0xf]  ;;  %v9862_v38 = vor.u32 %v12077_v16, %v9861_v54  ;;  %v12109_v36 = vld [vmem:[%s18513_s2 + $0x3b4] sm:$0xf0] }
 0x1b3   : > { %v2469_v37 = vpop.f32.mrf.mxu3  ;;  %v2569_v4 = vpop.f32.mrf.mxu1  ;;  %2882 = vmatpush.bf16.msra.mxu0 %v9878_v63  ;;  %v9990_v2 = vor.u32 %v12109_v36, %v9989_v29  ;;  %v12073_v63 = vld [vmem:[%s18513_s2 + $0x294] sm:$0xf0]  ;;  %v9973_v10 = vld [vmem:[%s18513_s2 + $0x388] sm:$0xf] }
 0x1b4   : > { %v2470_v59 = vadd.f32 %v2469_v37, %v13823_v48  ;;  %v9845_v37 = vld [vmem:[%s18513_s2 + $0x288] sm:$0xf]  ;;  %v12105_v54 = vld [vmem:[%s18513_s2 + $0x394] sm:$0xf0] }
 0x1b5   : > { %2931 = vmatpush.bf16.msra.mxu1 %v10006_v9 }
 0x1b6   : > { %v2519_v17 = vadd.f32 %v2518_v43, %v2470_v59  ;;  %v3501_v59 = vmul.f32 0.2, %v2421_v27 }
 0x1b7   : > { %2883 = vmatpush.bf16.msra.mxu0 %v9862_v38  ;;  %v9974_v38 = vor.u32 %v12105_v54, %v9973_v10  ;;  %v18675_v10 = vld [vmem:[#allocation26_spill] sm:$0xff]  ;;  %v18677_v54 = vld [vmem:[#allocation25_spill] sm:$0xff] }
 0x1b8   : > { %v13988_v43 = vadd.f32 %v2567_v20, %v2519_v17  ;;  %v2422_v35 = vpop.f32.mrf.mxu2  ;;  %v9846_v17 = vor.u32 %v12073_v63, %v9845_v37  ;;  %v3565_v37 = vmax.f32 %v2421_v27, %v3501_v59  ;;  %v11993_v27 = vld [vmem:[%s18513_s2 + $0x14] sm:$0xf0] }
 0x1b9   : > { %2932 = vmatpush.bf16.msra.mxu1 %v9990_v2  ;;  %v2423_v9 = vadd.f32 %v2422_v35, %v13736_v41  ;;  %v12069_v41 = vld [vmem:[%s18513_s2 + $0x274] sm:$0xf0]  ;;  %v9957_v35 = vld [vmem:[%s18513_s2 + $0x368] sm:$0xf] }
 0x1ba   : > { %v2523_v29 = vpop.f32.mrf.mxu0 }
 0x1bb   : > { %v2471_v20 = vpop.f32.mrf.mxu3  ;;  %v3505_v36 = vmul.f32 0.2, %v2423_v9  ;;  %v2572_v2 = vpop.f32.mrf.mxu1  ;;  %2884 = vmatpush.bf16.msra.mxu0 %v9846_v17  ;;  %v12101_v17 = vld [vmem:[%s18513_s2 + $0x374] sm:$0xf0] }
 0x1bc   : > { %v2472_v16 = vadd.f32 %v2471_v20, %v13823_v48  ;;  %v18676_v20 = vld [vmem:[#allocation27_spill] sm:$0xff]  ;;  %v9958_v59 = vor.u32 %v12101_v17, %v9957_v35 }
 0x1bd   : > { %2933 = vmatpush.bf16.msra.mxu1 %v9974_v38  ;;  %v3569_v63 = vmax.f32 %v2423_v9, %v3505_v36  ;;  %2620 = vmatmul.bf16.gmra.mxu2 %v18675_v10  ;;  %v12025_v36 = vld [vmem:[%s18513_s2 + $0x114] sm:$0xf0]  ;;  %v9813_v35 = vld [vmem:[%s18513_s2 + $0x248] sm:$0xf] }
 0x1be   : > { %v2521_v25 = vadd.f32 %v2520_v40, %v2472_v16  ;;  %2718 = vmatmul.bf16.gmra.mxu0 %v18676_v20  ;;  %v9830_v40 = vor.u32 %v12069_v41, %v9829_v60  ;;  %10312 = vmatmul.msk.bf16.gmra.mxu1 %vm2072_vm0, %v13711_v52  ;;  %v9525_v16 = vld [vmem:[%s18513_s2 + $0x8] sm:$0xf] }
 0x1bf   : > { %v9653_v60 = vld [vmem:[%s18513_s2 + $0x108] sm:$0xf]  ;;  %v9526_v38 = vor.u32 %v11993_v27, %v9525_v16  ;;  %v14035_v41 = vpack.c.bf16 %v3569_v63, %v3565_v37  ;;  %v12097_v63 = vld [vmem:[%s18513_s2 + $0x354] sm:$0xf0] }
 0x1c0   : > { %2669 = vmatmul.bf16.gmra.mxu3 %v18677_v54  ;;  %v14030_v9 = vadd.f32 %v2569_v4, %v2521_v25  ;;  %2885 = vmatpush.bf16.msra.mxu0 %v9830_v40  ;;  %v2425_v20 = vpop.f32.mrf.mxu2  ;;  %v9654_v52 = vor.u32 %v12025_v36, %v9653_v60  ;;  %v12065_v25 = vld [vmem:[%s18513_s2 + $0x254] sm:$0xf0]  ;;  %v9941_v4 = vld [vmem:[%s18513_s2 + $0x348] sm:$0xf] }
 0x1c1   : > { %18678 = vst [vmem:[#allocation26_spill] sm:$0xff] %v14035_v41  ;;  %2934 = vmatpush.bf16.msra.mxu1 %v9958_v59  ;;  %v2426_v40 = vadd.f32 %v2425_v20, %v13753_v3  ;;  %2790 = vmatpush.bf16.msra.mxu2 %v9526_v38  ;;  %v9814_v37 = vor.u32 %v12065_v25, %v9813_v35  ;;  %v9797_v3 = vld [vmem:[%s18513_s2 + $0x228] sm:$0xf]  ;;  %v12061_v20 = vld [vmem:[%s18513_s2 + $0x234] sm:$0xf0] }
 0x1c2   : > { %v2525_v27 = vpop.f32.mrf.mxu0  ;;  %2839 = vmatpush.bf16.msra.mxu3 %v9654_v52  ;;  %v9942_v59 = vor.u32 %v12097_v63, %v9941_v4  ;;  %v9925_v38 = vld [vmem:[%s18513_s2 + $0x328] sm:$0xf]  ;;  %v9798_v35 = vor.u32 %v12061_v20, %v9797_v3  ;;  %v12093_v52 = vld [vmem:[%s18513_s2 + $0x334] sm:$0xf0] }
 0x1c3   : > { %v2474_v17 = vpop.f32.mrf.mxu3  ;;  %v2574_v60 = vpop.f32.mrf.mxu1  ;;  %v9926_v25 = vor.u32 %v12093_v52, %v9925_v38  ;;  %v9909_v63 = vld [vmem:[%s18513_s2 + $0x308] sm:$0xf]  ;;  %v12089_v3 = vld [vmem:[%s18513_s2 + $0x314] sm:$0xf0] }
 0x1c4   : > { %v2475_v16 = vadd.f32 %v2474_v17, %v13823_v48  ;;  %2886 = vmatpush.bf16.msra.mxu0 %v9814_v37  ;;  %v9781_v17 = vld [vmem:[%s18513_s2 + $0x208] sm:$0xf]  ;;  %v12057_v37 = vld [vmem:[%s18513_s2 + $0x214] sm:$0xf0] }
 0x1c5   : > { %2935 = vmatpush.bf16.msra.mxu1 %v9942_v59 }
 0x1c6   : > { %v2524_v36 = vadd.f32 %v2523_v29, %v2475_v16  ;;  %v3509_v16 = vmul.f32 0.2, %v2426_v40 }
 0x1c8   : > { %v14063_v29 = vadd.f32 %v2572_v2, %v2524_v36  ;;  %2887 = vmatpush.bf16.msra.mxu0 %v9798_v35  ;;  %v2427_v4 = vpop.f32.mrf.mxu2  ;;  %v9782_v36 = vor.u32 %v12057_v37, %v9781_v17  ;;  %v9910_v35 = vor.u32 %v12089_v3, %v9909_v63  ;;  %v3573_v54 = vmax.f32 %v2426_v40, %v3509_v16  ;;  %v10149_v17 = vld [vmem:[%s18513_s2 + $0x4e8] sm:$0xf]  ;;  %v12181_v16 = vld [vmem:[%s18513_s2 + $0x5f4] sm:$0xf0] }
 0x1c9   : > { %2936 = vmatpush.bf16.msra.mxu1 %v9926_v25  ;;  %v2428_v59 = vadd.f32 %v2427_v4, %v13787_v62  ;;  %v18680_v62 = vld [vmem:[#allocation31_spill] sm:$0xff]  ;;  %v18681_v4 = vld [vmem:[#allocation29_spill] sm:$0xff] }
 0x1ca   : > { %v2528_v38 = vpop.f32.mrf.mxu0  ;;  %v10277_v40 = vld [vmem:[%s18513_s2 + $0x5e8] sm:$0xf] }
 0x1cb   : > { %v2476_v2 = vpop.f32.mrf.mxu3  ;;  %v3513_v52 = vmul.f32 0.2, %v2428_v59  ;;  %v2577_v25 = vpop.f32.mrf.mxu1 }
 0x1cc   : > { %v2477_v20 = vadd.f32 %v2476_v2, %v13823_v48  ;;  %2888 = vmatpush.bf16.msra.mxu0 %v9782_v36  ;;  %v10278_v36 = vor.u32 %v12181_v16, %v10277_v40 }
 0x1cd   : > { %2937 = vmatpush.bf16.msra.mxu1 %v9910_v35  ;;  %v3577_v8 = vmax.f32 %v2428_v59, %v3513_v52  ;;  %2625 = vmatmul.bf16.gmra.mxu2 %v18679_v47 }
 0x1ce   : > { %v2526_v41 = vadd.f32 %v2525_v27, %v2477_v20  ;;  %2723 = vmatmul.bf16.gmra.mxu0 %v18680_v62  ;;  %10313 = vmatmul.msk.bf16.gmra.mxu1 %vm2072_vm0, %v13765_v6  ;;  %v12149_v27 = vld [vmem:[%s18513_s2 + $0x4f4] sm:$0xf0] }
 0x1cf   : > { %v10150_v63 = vor.u32 %v12149_v27, %v10149_v17  ;;  %v14098_v59 = vpack.c.bf16 %v3577_v8, %v3573_v54  ;;  %3028 = vmatpush.bf16.msrb.mxu3 %v10278_v36  ;;  %v18684_v36 = vld [vmem:[#allocation35_spill] sm:$0xff] }
 0x1d0   : > { %2674 = vmatmul.bf16.gmra.mxu3 %v18681_v4  ;;  %v14093_v37 = vadd.f32 %v2574_v60, %v2526_v41  ;;  %v2430_v2 = vpop.f32.mrf.mxu2  ;;  %v18687_v4 = vld [vmem:[#allocation2_spill] sm:$0xff] }
 0x1d1   : > { %18682 = vst [vmem:[#allocation30_spill] sm:$0xff] %v14098_v59  ;;  %v2431_v3 = vadd.f32 %v2430_v2, %v13792_v28  ;;  %2979 = vmatpush.bf16.msrb.mxu2 %v10150_v63 }
 0x1d2   : > { %v2530_v52 = vpop.f32.mrf.mxu0 }
 0x1d3   : > { %v2479_v20 = vpop.f32.mrf.mxu3  ;;  %v2579_v62 = vpop.f32.mrf.mxu1  ;;  %v3517_v27 = vmul.f32 0.2, %v2431_v3 }
 0x1d4   : > { %v2480_v35 = vadd.f32 %v2479_v20, %v13823_v48  ;;  %v18683_v20 = vld [vmem:[#allocation34_spill] sm:$0xff] }
 0x1d5   : > { %v3581_v63 = vmax.f32 %v2431_v3, %v3517_v27 }
 0x1d6   : > { %v2529_v41 = vadd.f32 %v2528_v38, %v2480_v35  ;;  %v18685_v38 = vld [vmem:[#allocation33_spill] sm:$0xff] }
 0x1d8   : > { %v14102_v60 = vadd.f32 %v2577_v25, %v2529_v41  ;;  %v2432_v17 = vpop.f32.mrf.mxu2 }
 0x1d9   : > { %v2433_v6 = vadd.f32 %v2432_v17, %v13811_v13 }
 0x1da   : > { %v2533_v40 = vpop.f32.mrf.mxu0 }
 0x1db   : > { %v2481_v8 = vpop.f32.mrf.mxu3  ;;  %v3521_v16 = vmul.f32 0.2, %v2433_v6  ;;  %v2582_v28 = vpop.f32.mrf.mxu1 }
 0x1dc   : > { %v2482_v54 = vadd.f32 %v2481_v8, %v13823_v48  ;;  %v10133_v8 = vld [vmem:[%s18513_s2 + $0x4c8] sm:$0xf] }
 0x1dd   : > { %v3585_v59 = vmax.f32 %v2433_v6, %v3521_v16  ;;  %2630 = vmatmul.bf16.gmra.mxu2 %v18683_v20 }
 0x1de   : > { %v2531_v2 = vadd.f32 %v2530_v52, %v2482_v54  ;;  %2728 = vmatmul.bf16.gmra.mxu0 %v18684_v36  ;;  %10314 = vmatmul.msk.bf16.gmra.mxu1 %vm2072_vm0, %v13795_v21 }
 0x1df   : > { %v14113_v13 = vpack.c.bf16 %v3585_v59, %v3581_v63  ;;  %v10261_v59 = vld [vmem:[%s18513_s2 + $0x5c8] sm:$0xf] }
 0x1e0   : > { %2679 = vmatmul.bf16.gmra.mxu3 %v18685_v38  ;;  %v14111_v25 = vadd.f32 %v2579_v62, %v2531_v2  ;;  %v2435_v35 = vpop.f32.mrf.mxu2  ;;  %v12145_v62 = vld [vmem:[%s18513_s2 + $0x4d4] sm:$0xf0] }
 0x1e1   : > { %18686 = vst [vmem:[#allocation34_spill] sm:$0xff] %v14113_v13  ;;  %v2436_v41 = vadd.f32 %v2435_v35, %v13817_v49  ;;  %v10134_v54 = vor.u32 %v12145_v62, %v10133_v8  ;;  %v12177_v49 = vld [vmem:[%s18513_s2 + $0x5d4] sm:$0xf0] }
 0x1e2   : > { %v2535_v6 = vpop.f32.mrf.mxu0 }
 0x1e3   : > { %v2484_v17 = vpop.f32.mrf.mxu3  ;;  %v2584_v52 = vpop.f32.mrf.mxu1  ;;  %2980 = vmatpush.bf16.msrb.mxu2 %v10134_v54  ;;  %v3525_v63 = vmul.f32 0.2, %v2436_v41 }
 0x1e4   : > { %v2485_v3 = vadd.f32 %v2484_v17, %v13823_v48 }
 0x1e5   : > { %v3589_v62 = vmax.f32 %v2436_v41, %v3525_v63  ;;  %v12141_v41 = vld [vmem:[%s18513_s2 + $0x4b4] sm:$0xf0] }
 0x1e6   : > { %v2534_v27 = vadd.f32 %v2533_v40, %v2485_v3  ;;  %v10262_v40 = vor.u32 %v12177_v49, %v10261_v59 }
 0x1e8   : > { %v14129_v16 = vadd.f32 %v2582_v28, %v2534_v27  ;;  %v2437_v2 = vpop.f32.mrf.mxu2  ;;  %3029 = vmatpush.bf16.msrb.mxu3 %v10262_v40  ;;  %v18688_v28 = vld [vmem:[#allocation10_spill] sm:$0xff]  ;;  %v18689_v27 = vld [vmem:[#allocation3_spill] sm:$0xff] }
 0x1e9   : > { %v2438_v35 = vadd.f32 %v2437_v2, %v13840_v33 }
 0x1ea   : > { %v2694_v13 = vpop.f32.mrf.mxu0 }
 0x1eb   : > { %v2486_v17 = vpop.f32.mrf.mxu3  ;;  %v3529_v36 = vmul.f32 0.2, %v2438_v35  ;;  %v2743_v21 = vpop.f32.mrf.mxu1 }
 0x1ec   : > { %v2487_v3 = vadd.f32 %v2486_v17, %v13823_v48 }
 0x1ed   : > { %v3593_v38 = vmax.f32 %v2438_v35, %v3529_v36  ;;  %2791 = vmatmul.bf16.vlgmr.msra.gmra.mxu2 %v18687_v4  ;;  %v10117_v36 = vld [vmem:[%s18513_s2 + $0x4a8] sm:$0xf] }
 0x1ee   : > { %v2536_v8 = vadd.f32 %v2535_v6, %v2487_v3  ;;  %2889 = vmatmul.bf16.vlgmr.msra.gmra.mxu0 %v18688_v28  ;;  %2938 = vmatmul.bf16.vlgmr.msra.gmra.mxu1 %v13192_v31  ;;  %v10245_v6 = vld [vmem:[%s18513_s2 + $0x5a8] sm:$0xf]  ;;  %v10118_v40 = vor.u32 %v12141_v41, %v10117_v36  ;;  %v18691_v36 = vld [vmem:[#allocation4_spill] sm:$0xff] }
 0x1ef   : > { %v14139_v33 = vpack.c.bf16 %v3593_v38, %v3589_v62  ;;  %v12173_v38 = vld [vmem:[%s18513_s2 + $0x5b4] sm:$0xf0] }
 0x1f0   : > { %2840 = vmatmul.bf16.vlgmr.msra.gmra.mxu3 %v18689_v27  ;;  %v14137_v59 = vadd.f32 %v2584_v52, %v2536_v8  ;;  %v2596_v54 = vpop.f32.mrf.mxu2  ;;  %v10246_v63 = vor.u32 %v12173_v38, %v10245_v6  ;;  %2981 = vmatpush.bf16.msrb.mxu2 %v10118_v40  ;;  %v10101_v6 = vld [vmem:[%s18513_s2 + $0x488] sm:$0xf] }
 0x1f1   : > { %18690 = vst [vmem:[#allocation2_spill] sm:$0xff] %v14139_v33  ;;  %v2597_v48 = vadd.f32 %v2596_v54, %v13844_v19  ;;  %v10229_v38 = vld [vmem:[%s18513_s2 + $0x588] sm:$0xf] }
 0x1f2   : > { %v2696_v52 = vpop.f32.mrf.mxu0  ;;  %3030 = vmatpush.bf16.msrb.mxu3 %v10246_v63 }
 0x1f3   : > { %v2645_v49 = vpop.f32.mrf.mxu3  ;;  %v2745_v2 = vpop.f32.mrf.mxu1 }
 0x1f4   : > { %v2646_v19 = vadd.f32 %v2645_v49, %v2597_v48 }
 0x1f6   : > { %v2695_v35 = vadd.f32 %v2694_v13, %v2646_v19 }
 0x1f8   : > { %v2744_v17 = vadd.f32 %v2743_v21, %v2695_v35  ;;  %v2598_v3 = vpop.f32.mrf.mxu2 }
 0x1f9   : > { %v2599_v8 = vadd.f32 %v2598_v3, %v13862_v18 }
 0x1fa   : > { %v2699_v54 = vpop.f32.mrf.mxu0  ;;  %v3470_v48 = vmul.f32 0.2, %v2744_v17 }
 0x1fb   : > { %v2647_v62 = vpop.f32.mrf.mxu3  ;;  %v2748_v28 = vpop.f32.mrf.mxu1 }
 0x1fc   : > { %v2648_v33 = vadd.f32 %v2647_v62, %v2599_v8 }
 0x1fd   : > { %2796 = vmatmul.bf16.gmra.mxu2 %v13029_v57 }
 0x1fe   : > { %v2697_v31 = vadd.f32 %v2696_v52, %v2648_v33  ;;  %2894 = vmatmul.bf16.gmra.mxu0 %v13214_v44  ;;  %2943 = vmatmul.bf16.gmra.mxu1 %v13218_v46  ;;  %v12137_v33 = vld [vmem:[%s18513_s2 + $0x494] sm:$0xf0] }
 0x1ff   : > { %v10102_v40 = vor.u32 %v12137_v33, %v10101_v6 }
 0x200   : > { %2845 = vmatmul.bf16.gmra.mxu3 %v18691_v36  ;;  %v2746_v13 = vadd.f32 %v2745_v2, %v2697_v31  ;;  %v2601_v49 = vpop.f32.mrf.mxu2  ;;  %v12169_v31 = vld [vmem:[%s18513_s2 + $0x594] sm:$0xf0] }
 0x201   : > { %v2602_v41 = vadd.f32 %v2601_v49, %v13871_v61  ;;  %v3534_v61 = vmax.f32 %v2744_v17, %v3470_v48  ;;  %v10230_v35 = vor.u32 %v12169_v31, %v10229_v38  ;;  %2982 = vmatpush.bf16.msrb.mxu2 %v10102_v40  ;;  %v18692_v17 = vld [vmem:[#allocation6_spill] sm:$0xff]  ;;  %v10213_v40 = vld [vmem:[%s18513_s2 + $0x568] sm:$0xf] }
 0x202   : > { %v3474_v21 = vmul.f32 0.2, %v2746_v13  ;;  %v2701_v52 = vpop.f32.mrf.mxu0 }
 0x203   : > { %v2650_v18 = vpop.f32.mrf.mxu3  ;;  %v2750_v63 = vpop.f32.mrf.mxu1  ;;  %3031 = vmatpush.bf16.msrb.mxu3 %v10230_v35 }
 0x204   : > { %v3538_v19 = vmax.f32 %v2746_v13, %v3474_v21  ;;  %v2651_v2 = vadd.f32 %v2650_v18, %v2602_v41  ;;  %v10085_v41 = vld [vmem:[%s18513_s2 + $0x468] sm:$0xf] }
 0x206   : > { %v14172_v3 = vpack.c.bf16 %v3538_v19, %v3534_v61  ;;  %v2700_v8 = vadd.f32 %v2699_v54, %v2651_v2 }
 0x208   : > { %v2749_v62 = vadd.f32 %v2748_v28, %v2700_v8  ;;  %v2603_v49 = vpop.f32.mrf.mxu2 }
 0x209   : > { %v2604_v6 = vadd.f32 %v2603_v49, %v13889_v53 }
 0x20a   : > { %v2704_v44 = vpop.f32.mrf.mxu0  ;;  %v3478_v48 = vmul.f32 0.2, %v2749_v62 }
 0x20b   : > { %v2652_v33 = vpop.f32.mrf.mxu3  ;;  %v2753_v36 = vpop.f32.mrf.mxu1 }
 0x20c   : > { %v2653_v46 = vadd.f32 %v2652_v33, %v2604_v6  ;;  %v3542_v61 = vmax.f32 %v2749_v62, %v3478_v48  ;;  %v18694_v62 = vld [vmem:[#allocation8_spill] sm:$0xff] }
 0x20d   : > { %2801 = vmatmul.bf16.gmra.mxu2 %v13130_v50 }
 0x20e   : > { %v2702_v27 = vadd.f32 %v2701_v52, %v2653_v46  ;;  %2899 = vmatmul.bf16.gmra.mxu0 %v13240_v7  ;;  %2948 = vmatmul.bf16.gmra.mxu1 %v18663_v56  ;;  %v12133_v46 = vld [vmem:[%s18513_s2 + $0x474] sm:$0xf0] }
 0x20f   : > { %v10086_v52 = vor.u32 %v12133_v46, %v10085_v41 }
 0x210   : > { %2850 = vmatmul.bf16.gmra.mxu3 %v18692_v17  ;;  %v2751_v54 = vadd.f32 %v2750_v63, %v2702_v27  ;;  %v2606_v13 = vpop.f32.mrf.mxu2  ;;  %v12165_v27 = vld [vmem:[%s18513_s2 + $0x574] sm:$0xf0] }
 0x211   : > { %v2607_v21 = vadd.f32 %v2606_v13, %v13898_v11  ;;  %v10214_v31 = vor.u32 %v12165_v27, %v10213_v40  ;;  %2983 = vmatpush.bf16.msrb.mxu2 %v10086_v52  ;;  %v10197_v40 = vld [vmem:[%s18513_s2 + $0x548] sm:$0xf]  ;;  %v12161_v27 = vld [vmem:[%s18513_s2 + $0x554] sm:$0xf0] }
 0x212   : > { %v3482_v28 = vmul.f32 0.2, %v2751_v54  ;;  %v2706_v18 = vpop.f32.mrf.mxu0 }
 0x213   : > { %v2655_v53 = vpop.f32.mrf.mxu3  ;;  %v2755_v38 = vpop.f32.mrf.mxu1  ;;  %3032 = vmatpush.bf16.msrb.mxu3 %v10214_v31 }
 0x214   : > { %v2656_v11 = vadd.f32 %v2655_v53, %v2607_v21  ;;  %v3546_v19 = vmax.f32 %v2751_v54, %v3482_v28  ;;  %v10069_v21 = vld [vmem:[%s18513_s2 + $0x448] sm:$0xf]  ;;  %v12129_v53 = vld [vmem:[%s18513_s2 + $0x454] sm:$0xf0] }
 0x215   : > { %v10070_v52 = vor.u32 %v12129_v53, %v10069_v21 }
 0x216   : > { %v2705_v2 = vadd.f32 %v2704_v44, %v2656_v11  ;;  %v14192_v63 = vpack.c.bf16 %v3546_v19, %v3542_v61 }
 0x217   : > { %2984 = vmatpush.bf16.msrb.mxu2 %v10070_v52 }
 0x218   : > { %18693 = vst [vmem:[#allocation6_spill] sm:$0xff] %v14192_v63  ;;  %v2754_v35 = vadd.f32 %v2753_v36, %v2705_v2  ;;  %v2608_v8 = vpop.f32.mrf.mxu2 }
 0x219   : > { %v2609_v49 = vadd.f32 %v2608_v8, %v13916_v23 }
 0x21a   : > { %v2709_v33 = vpop.f32.mrf.mxu0  ;;  %v3486_v44 = vmul.f32 0.2, %v2754_v35 }
 0x21b   : > { %v2657_v6 = vpop.f32.mrf.mxu3  ;;  %v2758_v41 = vpop.f32.mrf.mxu1 }
 0x21c   : > { %v2658_v13 = vadd.f32 %v2657_v6, %v2609_v49  ;;  %v3550_v31 = vmax.f32 %v2754_v35, %v3486_v44  ;;  %v9639_v35 = vld [vmem:[%s18513_s2 + $0xf8] sm:$0xf0] }
 0x21d   : > { %2806 = vmatmul.bf16.gmra.mxu2 %v13162_v14 }
 0x21e   : > { %v2707_v46 = vadd.f32 %v2706_v18, %v2658_v13  ;;  %2904 = vmatmul.bf16.gmra.mxu0 %v13266_v26  ;;  %2953 = vmatmul.bf16.gmra.mxu1 %v18667_v34 }
 0x220   : > { %2855 = vmatmul.bf16.gmra.mxu3 %v18694_v62  ;;  %v2756_v48 = vadd.f32 %v2755_v38, %v2707_v46  ;;  %v2611_v54 = vpop.f32.mrf.mxu2  ;;  %v10198_v38 = vor.u32 %v12161_v27, %v10197_v40  ;;  %v10053_v40 = vld [vmem:[%s18513_s2 + $0x428] sm:$0xf]  ;;  %v12125_v27 = vld [vmem:[%s18513_s2 + $0x434] sm:$0xf0] }
 0x221   : > { %v2612_v28 = vadd.f32 %v2611_v54, %v13925_v51 }
 0x222   : > { %v3490_v36 = vmul.f32 0.2, %v2756_v48  ;;  %v2711_v18 = vpop.f32.mrf.mxu0  ;;  %3033 = vmatpush.bf16.msrb.mxu3 %v10198_v38  ;;  %v10054_v38 = vor.u32 %v12125_v27, %v10053_v40  ;;  %v9575_v40 = vld [vmem:[%s18513_s2 + $0x78] sm:$0xf0] }
 0x223   : > { %v2660_v23 = vpop.f32.mrf.mxu3  ;;  %v2760_v11 = vpop.f32.mrf.mxu1 }
 0x224   : > { %v2661_v51 = vadd.f32 %v2660_v23, %v2612_v28  ;;  %v3554_v61 = vmax.f32 %v2756_v48, %v3490_v36  ;;  %v12019_v28 = vld [vmem:[%s18513_s2 + $0xec] sm:$0xf]  ;;  %v9623_v23 = vld [vmem:[%s18513_s2 + $0xd8] sm:$0xf0]  ;;  %2985 = vmatpush.bf16.msrb.mxu2 %v10054_v38 }
 0x225   : > { %v12015_v36 = vld [vmem:[%s18513_s2 + $0xcc] sm:$0xf] }
 0x226   : > { %v2710_v19 = vadd.f32 %v2709_v33, %v2661_v51  ;;  %v14212_v2 = vpack.c.bf16 %v3554_v61, %v3550_v31  ;;  %v9626_v51 = vor.u32 %v12015_v36, %v9623_v23  ;;  %v10181_v31 = vld [vmem:[%s18513_s2 + $0x528] sm:$0xf] }
 0x228   : > { %18695 = vst [vmem:[#allocation8_spill] sm:$0xff] %v14212_v2  ;;  %v2759_v8 = vadd.f32 %v2758_v41, %v2710_v19  ;;  %v2613_v49 = vpop.f32.mrf.mxu2  ;;  %v9642_v41 = vor.u32 %v12019_v28, %v9639_v35  ;;  %v9607_v28 = vld [vmem:[%s18513_s2 + $0xb8] sm:$0xf0]  ;;  %v18721_v2 = vld [vmem:[#allocation31_spill] sm:$0xff] }
 0x229   : > { %v2614_v6 = vadd.f32 %v2613_v49, %v13955_v24 }
 0x22a   : > { %v2714_v46 = vpop.f32.mrf.mxu0  ;;  %v3494_v24 = vmul.f32 0.2, %v2759_v8  ;;  %3126 = vmatpush.bf16.msrb.mxu1 %v9642_v41 }
 0x22b   : > { %v2662_v13 = vpop.f32.mrf.mxu3  ;;  %v2763_v21 = vpop.f32.mrf.mxu1 }
 0x22c   : > { %v2663_v54 = vadd.f32 %v2662_v13, %v2614_v6  ;;  %v3558_v6 = vmax.f32 %v2759_v8, %v3494_v24  ;;  %v12007_v8 = vld [vmem:[%s18513_s2 + $0x8c] sm:$0xf]  ;;  %v9591_v24 = vld [vmem:[%s18513_s2 + $0x98] sm:$0xf0] }
 0x22d   : > { %2811 = vmatmul.bf16.gmra.mxu2 %v12915_v0 }
 0x22e   : > { %v2712_v33 = vadd.f32 %v2711_v18, %v2663_v54  ;;  %2909 = vmatmul.bf16.gmra.mxu0 %v13300_v55  ;;  %2958 = vmatmul.bf16.gmra.mxu1 %v18671_v39  ;;  %v12011_v54 = vld [vmem:[%s18513_s2 + $0xac] sm:$0xf] }
 0x22f   : > { %3127 = vmatpush.bf16.msrb.mxu1 %v9626_v51 }
 0x230   : > { %2860 = vmatmul.bf16.gmra.mxu3 %v12928_v5  ;;  %v2761_v44 = vadd.f32 %v2760_v11, %v2712_v33  ;;  %v2616_v48 = vpop.f32.mrf.mxu2  ;;  %v9610_v33 = vor.u32 %v12011_v54, %v9607_v28 }
 0x231   : > { %v2617_v18 = vadd.f32 %v2616_v48, %v13988_v43  ;;  %v12157_v43 = vld [vmem:[%s18513_s2 + $0x534] sm:$0xf0] }
 0x232   : > { %v3498_v53 = vmul.f32 0.2, %v2761_v44  ;;  %v2716_v11 = vpop.f32.mrf.mxu0  ;;  %v10182_v49 = vor.u32 %v12157_v43, %v10181_v31  ;;  %v11999_v43 = vld [vmem:[%s18513_s2 + $0x4c] sm:$0xf] }
 0x233   : > { %v2665_v52 = vpop.f32.mrf.mxu3  ;;  %v2765_v19 = vpop.f32.mrf.mxu1  ;;  %3128 = vmatpush.bf16.msrb.mxu1 %v9610_v33  ;;  %v10165_v33 = vld [vmem:[%s18513_s2 + $0x508] sm:$0xf] }
 0x234   : > { %v2666_v61 = vadd.f32 %v2665_v52, %v2617_v18  ;;  %v3562_v13 = vmax.f32 %v2761_v44, %v3498_v53  ;;  %3034 = vmatpush.bf16.msrb.mxu3 %v10182_v49  ;;  %v9594_v53 = vor.u32 %v12007_v8, %v9591_v24 }
 0x236   : > { %v2715_v35 = vadd.f32 %v2714_v46, %v2666_v61  ;;  %v14250_v41 = vpack.c.bf16 %v3562_v13, %v3558_v6  ;;  %v10037_v13 = vld [vmem:[%s18513_s2 + $0x408] sm:$0xf] }
 0x237   : > { %3129 = vmatpush.bf16.msrb.mxu1 %v9594_v53  ;;  %v11995_v53 = vld [vmem:[%s18513_s2 + $0x2c] sm:$0xf] }
 0x238   : > { %18696 = vst [vmem:[#allocation43_spill] sm:$0xff] %v14250_v41  ;;  %v2764_v48 = vadd.f32 %v2763_v21, %v2715_v35  ;;  %v2618_v36 = vpop.f32.mrf.mxu2  ;;  %v12003_v21 = vld [vmem:[%s18513_s2 + $0x6c] sm:$0xf] }
 0x239   : > { %v2619_v44 = vadd.f32 %v2618_v36, %v14030_v9  ;;  %v9578_v9 = vor.u32 %v12003_v21, %v9575_v40 }
 0x23a   : > { %v3502_v51 = vmul.f32 0.2, %v2764_v48 }
 0x23b   : > { %v2667_v23 = vpop.f32.mrf.mxu3  ;;  %v2719_v46 = vpop.f32.mrf.mxu0  ;;  %3130 = vmatpush.bf16.msrb.mxu1 %v9578_v9 }
 0x23c   : > { %v2668_v18 = vadd.f32 %v2667_v23, %v2619_v44  ;;  %v2768_v52 = vpop.f32.mrf.mxu1  ;;  %v3566_v44 = vmax.f32 %v2764_v48, %v3502_v51  ;;  %v10293_v48 = vld [vmem:[%s18513_s2 + $0x608] sm:$0xf]  ;;  %v12185_v51 = vld [vmem:[%s18513_s2 + $0x614] sm:$0xf0] }
 0x23d   : > { %2816 = vmatmul.bf16.gmra.mxu2 %v13031_v58 }
 0x23e   : > { %v2717_v27 = vadd.f32 %v2716_v11, %v2668_v18  ;;  %2914 = vmatmul.bf16.gmra.mxu0 %v13381_v42  ;;  %2963 = vmatmul.bf16.gmra.mxu1 %v18675_v10  ;;  %v9559_v11 = vld [vmem:[%s18513_s2 + $0x58] sm:$0xf0] }
 0x23f   : > { %v9562_v54 = vor.u32 %v11999_v43, %v9559_v11  ;;  %v9543_v18 = vld [vmem:[%s18513_s2 + $0x38] sm:$0xf0]  ;;  %v10294_v11 = vor.u32 %v12185_v51, %v10293_v48 }
 0x240   : > { %2865 = vmatmul.bf16.gmra.mxu3 %v13044_v1  ;;  %v2766_v38 = vadd.f32 %v2765_v19, %v2717_v27  ;;  %v2621_v31 = vpop.f32.mrf.mxu2  ;;  %v12121_v19 = vld [vmem:[%s18513_s2 + $0x414] sm:$0xf0]  ;;  %v9546_v40 = vor.u32 %v11995_v53, %v9543_v18  ;;  %v12051_v53 = vld [vmem:[%s18513_s2 + $0x1ec] sm:$0xf] }
 0x241   : > { %v2622_v49 = vadd.f32 %v2621_v31, %v14063_v29  ;;  %v10038_v35 = vor.u32 %v12121_v19, %v10037_v13  ;;  %v12153_v29 = vld [vmem:[%s18513_s2 + $0x514] sm:$0xf0]  ;;  %3131 = vmatpush.bf16.msrb.mxu1 %v9562_v54  ;;  %3084 = vmatpush.bf16.msrb.mxu0 %v10294_v11 }
 0x242   : > { %v3506_v61 = vmul.f32 0.2, %v2766_v38  ;;  %v10166_v24 = vor.u32 %v12153_v29, %v10165_v33  ;;  %v18698_v54 = vld [vmem:[#allocation5_spill] sm:$0xff]  ;;  %v18700_v33 = vld [vmem:[#allocation7_spill] sm:$0xff] }
 0x243   : > { %v2670_v6 = vpop.f32.mrf.mxu3  ;;  %v2721_v28 = vpop.f32.mrf.mxu0  ;;  %2986 = vmatpush.bf16.msrb.mxu2 %v10038_v35  ;;  %v18699_v35 = vld [vmem:[#allocation28_spill] sm:$0xff] }
 0x244   : > { %v2671_v36 = vadd.f32 %v2670_v6, %v2622_v49  ;;  %v2770_v8 = vpop.f32.mrf.mxu1  ;;  %v3570_v23 = vmax.f32 %v2766_v38, %v3506_v61  ;;  %3035 = vmatpush.bf16.msrb.mxu3 %v10166_v24  ;;  %v11991_v38 = vld [vmem:[%s18513_s2 + $0xc] sm:$0xf] }
 0x245   : > { %3132 = vmatpush.bf16.msrb.mxu1 %v9546_v40  ;;  %v12083_v40 = vld [vmem:[%s18513_s2 + $0x2ec] sm:$0xf] }
 0x246   : > { %v2720_v21 = vadd.f32 %v2719_v46, %v2671_v36  ;;  %v14294_v27 = vpack.c.bf16 %v3570_v23, %v3566_v44 }
 0x248   : > { %18697 = vst [vmem:[#allocation44_spill] sm:$0xff] %v14294_v27  ;;  %v2769_v9 = vadd.f32 %v2768_v52, %v2720_v21  ;;  %v2623_v31 = vpop.f32.mrf.mxu2  ;;  %v9527_v52 = vld [vmem:[%s18513_s2 + $0x18] sm:$0xf0] }
 0x249   : > { %v2624_v46 = vadd.f32 %v2623_v31, %v14093_v37  ;;  %v9530_v49 = vor.u32 %v11991_v38, %v9527_v52 }
 0x24a   : > { %v3510_v37 = vmul.f32 0.2, %v2769_v9 }
 0x24b   : > { %v2672_v43 = vpop.f32.mrf.mxu3  ;;  %v2724_v61 = vpop.f32.mrf.mxu0  ;;  %3133 = vmatpush.bf16.msrb.mxu1 %v9530_v49 }
 0x24c   : > { %v2673_v6 = vadd.f32 %v2672_v43, %v2624_v46  ;;  %v2773_v13 = vpop.f32.mrf.mxu1  ;;  %v3574_v51 = vmax.f32 %v2769_v9, %v3510_v37  ;;  %v18703_v9 = vld [vmem:[#allocation9_spill] sm:$0xff] }
 0x24d   : > { %2821 = vmatmul.bf16.gmra.mxu2 %v18698_v54 }
 0x24e   : > { %v2722_v19 = vadd.f32 %v2721_v28, %v2673_v6  ;;  %2919 = vmatmul.bf16.gmra.mxu0 %v18699_v35  ;;  %2968 = vmatmul.bf16.gmra.mxu1 %v18679_v47  ;;  %v9767_v28 = vld [vmem:[%s18513_s2 + $0x1f8] sm:$0xf0] }
 0x24f   : > { %v9770_v21 = vor.u32 %v12051_v53, %v9767_v28 }
 0x250   : > { %2870 = vmatmul.bf16.gmra.mxu3 %v18700_v33  ;;  %v2771_v29 = vadd.f32 %v2770_v8, %v2722_v19  ;;  %v2626_v36 = vpop.f32.mrf.mxu2  ;;  %v9895_v8 = vld [vmem:[%s18513_s2 + $0x2f8] sm:$0xf0] }
 0x251   : > { %v2627_v44 = vadd.f32 %v2626_v36, %v14102_v60  ;;  %v9898_v48 = vor.u32 %v12083_v40, %v9895_v8  ;;  %3175 = vmatpush.bf16.msra.mxu2 %v9770_v21 }
 0x252   : > { %v3514_v24 = vmul.f32 0.2, %v2771_v29 }
 0x253   : > { %v2675_v23 = vpop.f32.mrf.mxu3  ;;  %v2726_v18 = vpop.f32.mrf.mxu0  ;;  %3224 = vmatpush.bf16.msra.mxu3 %v9898_v48 }
 0x254   : > { %v2676_v60 = vadd.f32 %v2675_v23, %v2627_v44  ;;  %v2775_v31 = vpop.f32.mrf.mxu1  ;;  %v3578_v38 = vmax.f32 %v2771_v29, %v3514_v24  ;;  %v18702_v44 = vld [vmem:[#allocation32_spill] sm:$0xff]  ;;  %v9879_v23 = vld [vmem:[%s18513_s2 + $0x2d8] sm:$0xf0] }
 0x256   : > { %v2725_v46 = vadd.f32 %v2724_v61, %v2676_v60  ;;  %v14326_v43 = vpack.c.bf16 %v3578_v38, %v3574_v51  ;;  %v12047_v61 = vld [vmem:[%s18513_s2 + $0x1cc] sm:$0xf] }
 0x258   : > { %18701 = vst [vmem:[#allocation5_spill] sm:$0xff] %v14326_v43  ;;  %v2774_v11 = vadd.f32 %v2773_v13, %v2725_v46  ;;  %v2628_v52 = vpop.f32.mrf.mxu2  ;;  %v12079_v13 = vld [vmem:[%s18513_s2 + $0x2cc] sm:$0xf] }
 0x259   : > { %v2629_v49 = vadd.f32 %v2628_v52, %v14111_v25  ;;  %v9751_v25 = vld [vmem:[%s18513_s2 + $0x1d8] sm:$0xf0]  ;;  %v9882_v21 = vor.u32 %v12079_v13, %v9879_v23 }
 0x25a   : > { %v3518_v37 = vmul.f32 0.2, %v2774_v11  ;;  %v9754_v24 = vor.u32 %v12047_v61, %v9751_v25 }
 0x25b   : > { %v2677_v6 = vpop.f32.mrf.mxu3  ;;  %v2729_v19 = vpop.f32.mrf.mxu0  ;;  %3225 = vmatpush.bf16.msra.mxu3 %v9882_v21  ;;  %v9863_v21 = vld [vmem:[%s18513_s2 + $0x2b8] sm:$0xf0] }
 0x25c   : > { %v2678_v36 = vadd.f32 %v2677_v6, %v2629_v49  ;;  %v2778_v53 = vpop.f32.mrf.mxu1  ;;  %3176 = vmatpush.bf16.msra.mxu2 %v9754_v24  ;;  %v3582_v46 = vmax.f32 %v2774_v11, %v3518_v37  ;;  %v12683_v11 = vld [vmem:[%s18514_s3] sm:$0xf]  ;;  %v12075_v37 = vld [vmem:[%s18513_s2 + $0x2ac] sm:$0xf] }
 0x25d   : > { %2826 = vmatmul.bf16.gmra.mxu2 %v13164_v15 }
 0x25e   : > { %v2727_v28 = vadd.f32 %v2726_v18, %v2678_v36  ;;  %2924 = vmatmul.bf16.gmra.mxu0 %v18702_v44  ;;  %2973 = vmatmul.bf16.gmra.mxu1 %v18683_v20 }
 0x260   : > { %2875 = vmatmul.bf16.gmra.mxu3 %v18703_v9  ;;  %v2776_v29 = vadd.f32 %v2775_v31, %v2727_v28  ;;  %v2631_v18 = vpop.f32.mrf.mxu2 }
 0x261   : > { %v2632_v8 = vadd.f32 %v2631_v18, %v14129_v16 }
 0x262   : > { %v3522_v40 = vmul.f32 0.2, %v2776_v29 }
 0x263   : > { %v2680_v60 = vpop.f32.mrf.mxu3  ;;  %v2731_v48 = vpop.f32.mrf.mxu0 }
 0x264   : > { %v2681_v51 = vadd.f32 %v2680_v60, %v2632_v8  ;;  %v2780_v38 = vpop.f32.mrf.mxu1  ;;  %v3586_v52 = vmax.f32 %v2776_v29, %v3522_v40  ;;  %v9866_v40 = vor.u32 %v12075_v37, %v9863_v21 }
 0x266   : > { %v2730_v49 = vadd.f32 %v2729_v19, %v2681_v51  ;;  %v14346_v31 = vpack.c.bf16 %v3586_v52, %v3582_v46  ;;  %v14355_v19 = vperm.slane %v12683_v11, 2  ;;  %3226 = vmatpush.bf16.msra.mxu3 %v9866_v40 }
 0x268   : > { %18704 = vst [vmem:[#allocation28_spill] sm:$0xff] %v14346_v31  ;;  %v2779_v6 = vadd.f32 %v2778_v53, %v2730_v49  ;;  %v2633_v36 = vpop.f32.mrf.mxu2  ;;  %v9735_v53 = vld [vmem:[%s18513_s2 + $0x1b8] sm:$0xf0] }
 0x269   : > { %v2634_v28 = vadd.f32 %v2633_v36, %v14137_v59  ;;  %v12043_v59 = vld [vmem:[%s18513_s2 + $0x1ac] sm:$0xf] }
 0x26a   : > { %v3526_v29 = vmul.f32 0.2, %v2779_v6  ;;  %v9738_v18 = vor.u32 %v12043_v59, %v9735_v53 }
 0x26b   : > { %v2682_v61 = vpop.f32.mrf.mxu3  ;;  %v2890_v25 = vpop.f32.mrf.mxu0 }
 0x26c   : > { %v2683_v13 = vadd.f32 %v2682_v61, %v2634_v28  ;;  %v2939_v23 = vpop.f32.mrf.mxu1  ;;  %3177 = vmatpush.bf16.msra.mxu2 %v9738_v18  ;;  %v3590_v49 = vmax.f32 %v2779_v6, %v3526_v29  ;;  %v18706_v6 = vld [vmem:[#allocation15_spill] sm:$0xff]  ;;  %v9847_v18 = vld [vmem:[%s18513_s2 + $0x298] sm:$0xf0] }
 0x26d   : > { %2987 = vmatmul.bf16.vlgmr.msrb.gmra.mxu2 %v13190_v30  ;;  %v12071_v29 = vld [vmem:[%s18513_s2 + $0x28c] sm:$0xf] }
 0x26e   : > { %v2732_v16 = vadd.f32 %v2731_v48, %v2683_v13  ;;  %10315 = vmatmul.msk.bf16.vlgmr.msrb.gmra.mxu0 %vm2072_vm0, %v13552_v22  ;;  %3134 = vmatmul.bf16.vlgmr.msrb.gmra.mxu1 %v18687_v4  ;;  %v9850_v40 = vor.u32 %v12071_v29, %v9847_v18  ;;  %v18709_v29 = vld [vmem:[#allocation18_spill] sm:$0xff] }
 0x270   : > { %3036 = vmatmul.bf16.vlgmr.msrb.gmra.mxu3 %v13194_v32  ;;  %v2781_v24 = vadd.f32 %v2780_v38, %v2732_v16  ;;  %v2792_v4 = vpop.f32.mrf.mxu2 }
 0x271   : > { %v2793_v60 = vadd.f32 %v2792_v4, %v14355_v19  ;;  %3227 = vmatpush.bf16.msra.mxu3 %v9850_v40 }
 0x272   : > { %v3530_v8 = vmul.f32 0.2, %v2781_v24 }
 0x273   : > { %v2841_v48 = vpop.f32.mrf.mxu3  ;;  %v2892_v51 = vpop.f32.mrf.mxu0 }
 0x274   : > { %v2842_v46 = vadd.f32 %v2841_v48, %v2793_v60  ;;  %v2941_v52 = vpop.f32.mrf.mxu1  ;;  %v3594_v36 = vmax.f32 %v2781_v24, %v3530_v8 }
 0x276   : > { %v2891_v28 = vadd.f32 %v2890_v25, %v2842_v46  ;;  %v14372_v38 = vpack.c.bf16 %v3594_v36, %v3590_v49  ;;  %v12039_v25 = vld [vmem:[%s18513_s2 + $0x18c] sm:$0xf] }
 0x278   : > { %18705 = vst [vmem:[#allocation7_spill] sm:$0xff] %v14372_v38  ;;  %v14374_v61 = vadd.f32 %v2939_v23, %v2891_v28  ;;  %v2794_v13 = vpop.f32.mrf.mxu2  ;;  %v9719_v23 = vld [vmem:[%s18513_s2 + $0x198] sm:$0xf0] }
 0x279   : > { %v2795_v16 = vadd.f32 %v2794_v13, %v14355_v19  ;;  %v9722_v24 = vor.u32 %v12039_v25, %v9719_v23  ;;  %v18707_v25 = vld [vmem:[#allocation16_spill] sm:$0xff]  ;;  %v18708_v23 = vld [vmem:[#allocation37_spill] sm:$0xff] }
 0x27b   : > { %v2843_v11 = vpop.f32.mrf.mxu3  ;;  %v2895_v59 = vpop.f32.mrf.mxu0  ;;  %3178 = vmatpush.bf16.msra.mxu2 %v9722_v24  ;;  %v12067_v24 = vld [vmem:[%s18513_s2 + $0x26c] sm:$0xf] }
 0x27c   : > { %v2844_v53 = vadd.f32 %v2843_v11, %v2795_v16  ;;  %v2944_v37 = vpop.f32.mrf.mxu1 }
 0x27d   : > { %2992 = vmatmul.bf16.gmra.mxu2 %v18661_v12 }
 0x27e   : > { %v2893_v21 = vadd.f32 %v2892_v51, %v2844_v53  ;;  %10316 = vmatmul.msk.bf16.gmra.mxu0 %vm2072_vm0, %v13579_v45  ;;  %3139 = vmatmul.bf16.gmra.mxu1 %v13029_v57 }
 0x280   : > { %3041 = vmatmul.bf16.gmra.mxu3 %v18706_v6  ;;  %v14394_v4 = vadd.f32 %v2941_v52, %v2893_v21  ;;  %v2797_v57 = vpop.f32.mrf.mxu2  ;;  %v18727_v6 = vld [vmem:[#allocation10_spill] sm:$0xff] }
 0x281   : > { %v2798_v8 = vadd.f32 %v2797_v57, %v14355_v19  ;;  %v9831_v57 = vld [vmem:[%s18513_s2 + $0x278] sm:$0xf0] }
 0x283   : > { %v2846_v60 = vpop.f32.mrf.mxu3  ;;  %v2897_v48 = vpop.f32.mrf.mxu0 }
 0x284   : > { %v2847_v51 = vadd.f32 %v2846_v60, %v2798_v8  ;;  %v2946_v46 = vpop.f32.mrf.mxu1  ;;  %v9834_v8 = vor.u32 %v12067_v24, %v9831_v57  ;;  %v18710_v24 = vld [vmem:[#allocation19_spill] sm:$0xff]  ;;  %v18711_v57 = vld [vmem:[#allocation38_spill] sm:$0xff] }
 0x286   : > { %v2896_v49 = vadd.f32 %v2895_v59, %v2847_v51  ;;  %v12035_v59 = vld [vmem:[%s18513_s2 + $0x16c] sm:$0xf]  ;;  %3228 = vmatpush.bf16.msra.mxu3 %v9834_v8 }
 0x288   : > { %v14397_v36 = vadd.f32 %v2944_v37, %v2896_v49  ;;  %v2799_v28 = vpop.f32.mrf.mxu2  ;;  %v9703_v37 = vld [vmem:[%s18513_s2 + $0x178] sm:$0xf0] }
 0x289   : > { %v2800_v13 = vadd.f32 %v2799_v28, %v14355_v19  ;;  %v9706_v18 = vor.u32 %v12035_v59, %v9703_v37 }
 0x28b   : > { %v2848_v16 = vpop.f32.mrf.mxu3  ;;  %v2900_v11 = vpop.f32.mrf.mxu0  ;;  %3179 = vmatpush.bf16.msra.mxu2 %v9706_v18  ;;  %v18712_v18 = vld [vmem:[#allocation21_spill] sm:$0xff] }
 0x28c   : > { %v2849_v52 = vadd.f32 %v2848_v16, %v2800_v13  ;;  %v2949_v53 = vpop.f32.mrf.mxu1 }
 0x28d   : > { %2997 = vmatmul.bf16.gmra.mxu2 %v18707_v25 }
 0x28e   : > { %v2898_v21 = vadd.f32 %v2897_v48, %v2849_v52  ;;  %10317 = vmatmul.msk.bf16.gmra.mxu0 %vm2072_vm0, %v18708_v23  ;;  %3144 = vmatmul.bf16.gmra.mxu1 %v13130_v50 }
 0x290   : > { %3046 = vmatmul.bf16.gmra.mxu3 %v18709_v29  ;;  %v14417_v40 = vadd.f32 %v2946_v46, %v2898_v21  ;;  %v2802_v50 = vpop.f32.mrf.mxu2 }
 0x291   : > { %v2803_v60 = vadd.f32 %v2802_v50, %v14355_v19  ;;  %v12063_v50 = vld [vmem:[%s18513_s2 + $0x24c] sm:$0xf] }
 0x293   : > { %v2851_v48 = vpop.f32.mrf.mxu3  ;;  %v2902_v51 = vpop.f32.mrf.mxu0 }
 0x294   : > { %v2852_v49 = vadd.f32 %v2851_v48, %v2803_v60  ;;  %v2951_v28 = vpop.f32.mrf.mxu1  ;;  %v9815_v60 = vld [vmem:[%s18513_s2 + $0x258] sm:$0xf0] }
 0x296   : > { %v2901_v13 = vadd.f32 %v2900_v11, %v2852_v49  ;;  %v12031_v11 = vld [vmem:[%s18513_s2 + $0x14c] sm:$0xf] }
 0x298   : > { %v14420_v16 = vadd.f32 %v2949_v53, %v2901_v13  ;;  %v2804_v52 = vpop.f32.mrf.mxu2  ;;  %v9687_v53 = vld [vmem:[%s18513_s2 + $0x158] sm:$0xf0] }
 0x299   : > { %v2805_v59 = vadd.f32 %v2804_v52, %v14355_v19  ;;  %v9690_v8 = vor.u32 %v12031_v11, %v9687_v53 }
 0x29b   : > { %v2853_v37 = vpop.f32.mrf.mxu3  ;;  %v2905_v38 = vpop.f32.mrf.mxu0  ;;  %3180 = vmatpush.bf16.msra.mxu2 %v9690_v8  ;;  %v10023_v8 = vld [vmem:[%s18513_s2 + $0x3f8] sm:$0xf0] }
 0x29c   : > { %v2854_v46 = vadd.f32 %v2853_v37, %v2805_v59  ;;  %v2954_v21 = vpop.f32.mrf.mxu1 }
 0x29d   : > { %3002 = vmatmul.bf16.gmra.mxu2 %v18710_v24 }
 0x29e   : > { %v2903_v31 = vadd.f32 %v2902_v51, %v2854_v46  ;;  %10318 = vmatmul.msk.bf16.gmra.mxu0 %vm2072_vm0, %v18711_v57  ;;  %3149 = vmatmul.bf16.gmra.mxu1 %v13162_v14  ;;  %v9818_v51 = vor.u32 %v12063_v50, %v9815_v60  ;;  %v12115_v50 = vld [vmem:[%s18513_s2 + $0x3ec] sm:$0xf]  ;;  %v18713_v60 = vld [vmem:[#allocation22_spill] sm:$0xff] }
 0x29f   : > { %v12091_v57 = vld [vmem:[%s18513_s2 + $0x32c] sm:$0xf] }
 0x2a0   : > { %3051 = vmatmul.bf16.gmra.mxu3 %v18712_v18  ;;  %v14440_v48 = vadd.f32 %v2951_v28, %v2903_v31  ;;  %v2807_v14 = vpop.f32.mrf.mxu2  ;;  %v18720_v18 = vld [vmem:[#allocation41_spill] sm:$0xff] }
 0x2a1   : > { %v2808_v49 = vadd.f32 %v2807_v14, %v14355_v19  ;;  %3229 = vmatpush.bf16.msra.mxu3 %v9818_v51  ;;  %v18714_v14 = vld [vmem:[#allocation39_spill] sm:$0xff]  ;;  %v10151_v51 = vld [vmem:[%s18513_s2 + $0x4f8] sm:$0xf0] }
 0x2a3   : > { %v2856_v13 = vpop.f32.mrf.mxu3  ;;  %v2907_v52 = vpop.f32.mrf.mxu0 }
 0x2a4   : > { %v2857_v59 = vadd.f32 %v2856_v13, %v2808_v49  ;;  %v2956_v37 = vpop.f32.mrf.mxu1  ;;  %v18715_v49 = vld [vmem:[#allocation24_spill] sm:$0xff]  ;;  %v12027_v13 = vld [vmem:[%s18513_s2 + $0x12c] sm:$0xf] }
 0x2a6   : > { %v2906_v46 = vadd.f32 %v2905_v38, %v2857_v59  ;;  %v12147_v38 = vld [vmem:[%s18513_s2 + $0x4ec] sm:$0xf] }
 0x2a7   : > { %v10154_v59 = vor.u32 %v12147_v38, %v10151_v51  ;;  %v10007_v38 = vld [vmem:[%s18513_s2 + $0x3d8] sm:$0xf0] }
 0x2a8   : > { %v14443_v43 = vadd.f32 %v2954_v21, %v2906_v46  ;;  %v2809_v11 = vpop.f32.mrf.mxu2  ;;  %v12059_v46 = vld [vmem:[%s18513_s2 + $0x22c] sm:$0xf] }
 0x2a9   : > { %v2810_v53 = vadd.f32 %v2809_v11, %v14355_v19  ;;  %3322 = vmatpush.bf16.msra.mxu1 %v10154_v59 }
 0x2ab   : > { %v2858_v27 = vpop.f32.mrf.mxu3  ;;  %v2910_v41 = vpop.f32.mrf.mxu0 }
 0x2ac   : > { %v2859_v31 = vadd.f32 %v2858_v27, %v2810_v53  ;;  %v2959_v28 = vpop.f32.mrf.mxu1  ;;  %v10026_v27 = vor.u32 %v12115_v50, %v10023_v8  ;;  %v9799_v53 = vld [vmem:[%s18513_s2 + $0x238] sm:$0xf0]  ;;  %v12111_v8 = vld [vmem:[%s18513_s2 + $0x3cc] sm:$0xf] }
 0x2ad   : > { %3007 = vmatmul.bf16.gmra.mxu2 %v18713_v60  ;;  %v9802_v50 = vor.u32 %v12059_v46, %v9799_v53 }
 0x2ae   : > { %v2908_v21 = vadd.f32 %v2907_v52, %v2859_v31  ;;  %10319 = vmatmul.msk.bf16.gmra.mxu0 %vm2072_vm0, %v18714_v14  ;;  %3154 = vmatmul.bf16.gmra.mxu1 %v12915_v0  ;;  %v9671_v52 = vld [vmem:[%s18513_s2 + $0x138] sm:$0xf0]  ;;  %v12107_v14 = vld [vmem:[%s18513_s2 + $0x3ac] sm:$0xf] }
 0x2af   : > { %v9674_v11 = vor.u32 %v12027_v13, %v9671_v52  ;;  %3273 = vmatpush.bf16.msra.mxu0 %v10026_v27  ;;  %v12143_v27 = vld [vmem:[%s18513_s2 + $0x4cc] sm:$0xf]  ;;  %3230 = vmatpush.bf16.msra.mxu3 %v9802_v50  ;;  %v10119_v50 = vld [vmem:[%s18513_s2 + $0x4b8] sm:$0xf0] }
 0x2b0   : > { %3056 = vmatmul.bf16.gmra.mxu3 %v18715_v49  ;;  %v14475_v0 = vadd.f32 %v2956_v37, %v2908_v21  ;;  %v2812_v31 = vpop.f32.mrf.mxu2  ;;  %v10010_v37 = vor.u32 %v12111_v8, %v10007_v38  ;;  %v10135_v21 = vld [vmem:[%s18513_s2 + $0x4d8] sm:$0xf0]  ;;  %v12095_v49 = vld [vmem:[%s18513_s2 + $0x34c] sm:$0xf] }
 0x2b1   : > { %v2813_v51 = vadd.f32 %v2812_v31, %v14355_v19  ;;  %3181 = vmatpush.bf16.msra.mxu2 %v9674_v11  ;;  %v10138_v59 = vor.u32 %v12143_v27, %v10135_v21  ;;  %v9991_v11 = vld [vmem:[%s18513_s2 + $0x3b8] sm:$0xf0]  ;;  %v12139_v31 = vld [vmem:[%s18513_s2 + $0x4ac] sm:$0xf] }
 0x2b2   : > { %v9994_v38 = vor.u32 %v12107_v14, %v9991_v11  ;;  %v10122_v27 = vor.u32 %v12139_v31, %v10119_v50  ;;  %v9975_v21 = vld [vmem:[%s18513_s2 + $0x398] sm:$0xf0]  ;;  %v12099_v50 = vld [vmem:[%s18513_s2 + $0x36c] sm:$0xf] }
 0x2b3   : > { %v2861_v13 = vpop.f32.mrf.mxu3  ;;  %v2912_v52 = vpop.f32.mrf.mxu0  ;;  %3274 = vmatpush.bf16.msra.mxu0 %v10010_v37  ;;  %3323 = vmatpush.bf16.msra.mxu1 %v10138_v59  ;;  %v12103_v37 = vld [vmem:[%s18513_s2 + $0x38c] sm:$0xf] }
 0x2b4   : > { %v2862_v46 = vadd.f32 %v2861_v13, %v2813_v51  ;;  %v2961_v53 = vpop.f32.mrf.mxu1 }
 0x2b6   : > { %v2911_v8 = vadd.f32 %v2910_v41, %v2862_v46  ;;  %v12135_v41 = vld [vmem:[%s18513_s2 + $0x48c] sm:$0xf]  ;;  %v9978_v46 = vor.u32 %v12103_v37, %v9975_v21  ;;  %v18716_v21 = vld [vmem:[#allocation25_spill] sm:$0xff] }
 0x2b7   : > { %3275 = vmatpush.bf16.msra.mxu0 %v9994_v38  ;;  %3324 = vmatpush.bf16.msra.mxu1 %v10122_v27  ;;  %v9959_v27 = vld [vmem:[%s18513_s2 + $0x378] sm:$0xf0] }
 0x2b8   : > { %v14502_v51 = vadd.f32 %v2959_v28, %v2911_v8  ;;  %v2814_v13 = vpop.f32.mrf.mxu2  ;;  %v10103_v28 = vld [vmem:[%s18513_s2 + $0x498] sm:$0xf0] }
 0x2b9   : > { %v2815_v14 = vadd.f32 %v2814_v13, %v14355_v19  ;;  %v10106_v31 = vor.u32 %v12135_v41, %v10103_v28  ;;  %v12131_v13 = vld [vmem:[%s18513_s2 + $0x46c] sm:$0xf]  ;;  %v18717_v41 = vld [vmem:[#allocation40_spill] sm:$0xff] }
 0x2ba   : > { %v12023_v28 = vld [vmem:[%s18513_s2 + $0x10c] sm:$0xf] }
 0x2bb   : > { %v2863_v59 = vpop.f32.mrf.mxu3  ;;  %v2915_v11 = vpop.f32.mrf.mxu0  ;;  %3276 = vmatpush.bf16.msra.mxu0 %v9978_v46  ;;  %3325 = vmatpush.bf16.msra.mxu1 %v10106_v31  ;;  %v18718_v46 = vld [vmem:[#allocation27_spill] sm:$0xff] }
 0x2bc   : > { %v2864_v8 = vadd.f32 %v2863_v59, %v2815_v14  ;;  %v2964_v38 = vpop.f32.mrf.mxu1  ;;  %v9962_v14 = vor.u32 %v12099_v50, %v9959_v27  ;;  %v10087_v59 = vld [vmem:[%s18513_s2 + $0x478] sm:$0xf0] }
 0x2bd   : > { %3012 = vmatmul.bf16.gmra.mxu2 %v18716_v21  ;;  %v10090_v31 = vor.u32 %v12131_v13, %v10087_v59  ;;  %v9783_v27 = vld [vmem:[%s18513_s2 + $0x218] sm:$0xf0] }
 0x2be   : > { %v2913_v37 = vadd.f32 %v2912_v52, %v2864_v8  ;;  %10320 = vmatmul.msk.bf16.gmra.mxu0 %vm2072_vm0, %v18717_v41  ;;  %3159 = vmatmul.bf16.gmra.mxu1 %v13031_v58  ;;  %v9655_v52 = vld [vmem:[%s18513_s2 + $0x118] sm:$0xf0]  ;;  %v12055_v8 = vld [vmem:[%s18513_s2 + $0x20c] sm:$0xf] }
 0x2bf   : > { %v9658_v50 = vor.u32 %v12023_v28, %v9655_v52  ;;  %3277 = vmatpush.bf16.msra.mxu0 %v9962_v14  ;;  %3326 = vmatpush.bf16.msra.mxu1 %v10090_v31  ;;  %v9943_v13 = vld [vmem:[%s18513_s2 + $0x358] sm:$0xf0]  ;;  %v12127_v14 = vld [vmem:[%s18513_s2 + $0x44c] sm:$0xf] }
 0x2c0   : > { %3061 = vmatmul.bf16.gmra.mxu3 %v18718_v46  ;;  %v14546_v58 = vadd.f32 %v2961_v53, %v2913_v37  ;;  %v2817_v41 = vpop.f32.mrf.mxu2  ;;  %v9786_v46 = vor.u32 %v12055_v8, %v9783_v27  ;;  %v9946_v53 = vor.u32 %v12095_v49, %v9943_v13  ;;  %v10071_v37 = vld [vmem:[%s18513_s2 + $0x458] sm:$0xf0]  ;;  %v12123_v49 = vld [vmem:[%s18513_s2 + $0x42c] sm:$0xf] }
 0x2c1   : > { %v2818_v59 = vadd.f32 %v2817_v41, %v14355_v19  ;;  %3182 = vmatpush.bf16.msra.mxu2 %v9658_v50  ;;  %v10074_v31 = vor.u32 %v12127_v14, %v10071_v37  ;;  %v9927_v41 = vld [vmem:[%s18513_s2 + $0x338] sm:$0xf0] }
 0x2c2   : > { %3231 = vmatpush.bf16.msra.mxu3 %v9786_v46  ;;  %v9930_v13 = vor.u32 %v12091_v57, %v9927_v41  ;;  %v10055_v46 = vld [vmem:[%s18513_s2 + $0x438] sm:$0xf0]  ;;  %v12119_v57 = vld [vmem:[%s18513_s2 + $0x40c] sm:$0xf] }
 0x2c3   : > { %v2866_v28 = vpop.f32.mrf.mxu3  ;;  %v2917_v52 = vpop.f32.mrf.mxu0  ;;  %3278 = vmatpush.bf16.msra.mxu0 %v9946_v53  ;;  %3327 = vmatpush.bf16.msra.mxu1 %v10074_v31  ;;  %v10058_v14 = vor.u32 %v12123_v49, %v10055_v46  ;;  %v12087_v53 = vld [vmem:[%s18513_s2 + $0x30c] sm:$0xf]  ;;  %v9911_v37 = vld [vmem:[%s18513_s2 + $0x318] sm:$0xf0] }
 0x2c4   : > { %v2867_v8 = vadd.f32 %v2866_v28, %v2818_v59  ;;  %v2966_v27 = vpop.f32.mrf.mxu1 }
 0x2c6   : > { %v2916_v50 = vadd.f32 %v2915_v11, %v2867_v8  ;;  %v9914_v8 = vor.u32 %v12087_v53, %v9911_v37  ;;  %v10279_v53 = vld [vmem:[%s18513_s2 + $0x5f8] sm:$0xf0] }
 0x2c7   : > { %3279 = vmatpush.bf16.msra.mxu0 %v9930_v13  ;;  %3328 = vmatpush.bf16.msra.mxu1 %v10058_v14  ;;  %v18719_v14 = vld [vmem:[#allocation29_spill] sm:$0xff] }
 0x2c8   : > { %v14573_v59 = vadd.f32 %v2964_v38, %v2916_v50  ;;  %v2819_v28 = vpop.f32.mrf.mxu2  ;;  %v10039_v38 = vld [vmem:[%s18513_s2 + $0x418] sm:$0xf0] }
 0x2c9   : > { %v2820_v11 = vadd.f32 %v2819_v28, %v14355_v19  ;;  %v10042_v49 = vor.u32 %v12119_v57, %v10039_v38  ;;  %v12179_v28 = vld [vmem:[%s18513_s2 + $0x5ec] sm:$0xf]  ;;  %v10295_v57 = vld [vmem:[%s18513_s2 + $0x618] sm:$0xf0] }
 0x2ca   : > { %v10282_v37 = vor.u32 %v12179_v28, %v10279_v53 }
 0x2cb   : > { %v2868_v31 = vpop.f32.mrf.mxu3  ;;  %v2920_v41 = vpop.f32.mrf.mxu0  ;;  %3280 = vmatpush.bf16.msra.mxu0 %v9914_v8  ;;  %3329 = vmatpush.bf16.msra.mxu1 %v10042_v49 }
 0x2cc   : > { %v2869_v50 = vadd.f32 %v2868_v31, %v2820_v11  ;;  %v2969_v13 = vpop.f32.mrf.mxu1  ;;  %3371 = vmatpush.bf16.msrb.mxu2 %v10282_v37  ;;  %v18724_v37 = vld [vmem:[#allocation35_spill] sm:$0xff] }
 0x2cd   : > { %3017 = vmatmul.bf16.gmra.mxu2 %v18719_v14 }
 0x2ce   : > { %v2918_v46 = vadd.f32 %v2917_v52, %v2869_v50  ;;  %10321 = vmatmul.msk.bf16.gmra.mxu0 %vm2072_vm0, %v18720_v18  ;;  %3164 = vmatmul.bf16.gmra.mxu1 %v18698_v54  ;;  %v12183_v52 = vld [vmem:[%s18513_s2 + $0x60c] sm:$0xf] }
 0x2cf   : > { %v10298_v31 = vor.u32 %v12183_v52, %v10295_v57  ;;  %v18722_v52 = vld [vmem:[#allocation33_spill] sm:$0xff]  ;;  %v18723_v57 = vld [vmem:[#allocation42_spill] sm:$0xff] }
 0x2d0   : > { %3066 = vmatmul.bf16.gmra.mxu3 %v18721_v2  ;;  %v14605_v11 = vadd.f32 %v2966_v27, %v2918_v46  ;;  %v2822_v54 = vpop.f32.mrf.mxu2 }
 0x2d1   : > { %v2823_v8 = vadd.f32 %v2822_v54, %v14355_v19  ;;  %3427 = vmatpush.bf16.msrb.mxu3 %v10298_v31 }
 0x2d3   : > { %v2871_v38 = vpop.f32.mrf.mxu3  ;;  %v2922_v49 = vpop.f32.mrf.mxu0 }
 0x2d4   : > { %v2872_v50 = vadd.f32 %v2871_v38, %v2823_v8  ;;  %v2971_v18 = vpop.f32.mrf.mxu1  ;;  %v12175_v38 = vld [vmem:[%s18513_s2 + $0x5cc] sm:$0xf] }
 0x2d6   : > { %v2921_v2 = vadd.f32 %v2920_v41, %v2872_v50 }
 0x2d8   : > { %v14608_v23 = vadd.f32 %v2969_v13, %v2921_v2  ;;  %v2824_v28 = vpop.f32.mrf.mxu2 }
 0x2d9   : > { %v2825_v53 = vadd.f32 %v2824_v28, %v14355_v19 }
 0x2db   : > { %v2873_v29 = vpop.f32.mrf.mxu3  ;;  %v2925_v63 = vpop.f32.mrf.mxu0 }
 0x2dc   : > { %v2874_v27 = vadd.f32 %v2873_v29, %v2825_v53  ;;  %v2974_v46 = vpop.f32.mrf.mxu1 }
 0x2dd   : > { %3022 = vmatmul.bf16.gmra.mxu2 %v18722_v52 }
 0x2de   : > { %v2923_v45 = vadd.f32 %v2922_v49, %v2874_v27  ;;  %10322 = vmatmul.msk.bf16.gmra.mxu0 %vm2072_vm0, %v18723_v57  ;;  %3169 = vmatmul.bf16.gmra.mxu1 %v13164_v15  ;;  %v10263_v49 = vld [vmem:[%s18513_s2 + $0x5d8] sm:$0xf0]  ;;  %v18725_v57 = vld [vmem:[#allocation3_spill] sm:$0xff] }
 0x2df   : > { %v10266_v50 = vor.u32 %v12175_v38, %v10263_v49  ;;  %v12171_v38 = vld [vmem:[%s18513_s2 + $0x5ac] sm:$0xf] }
 0x2e0   : > { %3071 = vmatmul.bf16.gmra.mxu3 %v18724_v37  ;;  %v14616_v41 = vadd.f32 %v2971_v18, %v2923_v45  ;;  %v2827_v2 = vpop.f32.mrf.mxu2  ;;  %v18726_v37 = vld [vmem:[#allocation11_spill] sm:$0xff] }
 0x2e1   : > { %v2828_v13 = vadd.f32 %v2827_v2, %v14355_v19  ;;  %3372 = vmatpush.bf16.msrb.mxu2 %v10266_v50 }
 0x2e3   : > { %v2876_v54 = vpop.f32.mrf.mxu3  ;;  %v2927_v31 = vpop.f32.mrf.mxu0 }
 0x2e4   : > { %v2877_v8 = vadd.f32 %v2876_v54, %v2828_v13  ;;  %v2976_v29 = vpop.f32.mrf.mxu1 }
 0x2e6   : > { %v2926_v28 = vadd.f32 %v2925_v63, %v2877_v8 }
 0x2e8   : > { %v14625_v15 = vadd.f32 %v2974_v46, %v2926_v28  ;;  %v2829_v45 = vpop.f32.mrf.mxu2 }
 0x2e9   : > { %v2830_v18 = vadd.f32 %v2829_v45, %v14355_v19 }
 0x2eb   : > { %v2878_v53 = vpop.f32.mrf.mxu3  ;;  %v3086_v27 = vpop.f32.mrf.mxu0 }
 0x2ec   : > { %v2879_v2 = vadd.f32 %v2878_v53, %v2830_v18  ;;  %v14628_v13 = vpop.f32.mrf.mxu1 }
 0x2ed   : > { %3183 = vmatmul.bf16.vlgmr.msra.gmra.mxu2 %v18725_v57  ;;  %v10247_v57 = vld [vmem:[%s18513_s2 + $0x5b8] sm:$0xf0] }
 0x2ee   : > { %v2928_v54 = vadd.f32 %v2927_v31, %v2879_v2  ;;  %3281 = vmatmul.bf16.vlgmr.msra.gmra.mxu0 %v18726_v37  ;;  %3330 = vmatmul.bf16.vlgmr.msra.gmra.mxu1 %v13190_v30  ;;  %v10250_v37 = vor.u32 %v12171_v38, %v10247_v57  ;;  %v18730_v38 = vld [vmem:[#allocation12_spill] sm:$0xff] }
 0x2f0   : > { %3232 = vmatmul.bf16.vlgmr.msra.gmra.mxu3 %v18727_v6  ;;  %v14634_v63 = vadd.f32 %v2976_v29, %v2928_v54  ;;  %v2988_v46 = vpop.f32.mrf.mxu2  ;;  %3373 = vmatpush.bf16.msrb.mxu2 %v10250_v37  ;;  %v18728_v54 = vld [vmem:[#allocation4_spill] sm:$0xff] }
 0x2f1   : > { %v2989_v8 = vadd.f32 %v2988_v46, %v14374_v61  ;;  %v18729_v46 = vld [vmem:[#allocation14_spill] sm:$0xff] }
 0x2f3   : > { %v3037_v19 = vpop.f32.mrf.mxu3  ;;  %v3088_v31 = vpop.f32.mrf.mxu0 }
 0x2f4   : > { %v3038_v49 = vadd.f32 %v3037_v19, %v2989_v8  ;;  %v14643_v6 = vpop.f32.mrf.mxu1 }
 0x2f6   : > { %v3087_v30 = vadd.f32 %v3086_v27, %v3038_v49  ;;  %v12167_v49 = vld [vmem:[%s18513_s2 + $0x58c] sm:$0xf] }
 0x2f8   : > { %v2990_v29 = vpop.f32.mrf.mxu2  ;;  %v3471_v53 = vmul.f32 0.2, %v3087_v30 }
 0x2f9   : > { %v2991_v50 = vadd.f32 %v2990_v29, %v14394_v4 }
 0x2fa   : > { %v3535_v19 = vmax.f32 %v3087_v30, %v3471_v53 }
 0x2fb   : > { %v3039_v61 = vpop.f32.mrf.mxu3  ;;  %v3091_v28 = vpop.f32.mrf.mxu0 }
 0x2fc   : > { %v3040_v45 = vadd.f32 %v3039_v61, %v2991_v50  ;;  %v14646_v18 = vpop.f32.mrf.mxu1 }
 0x2fd   : > { %3188 = vmatmul.bf16.gmra.mxu2 %v18728_v54 }
 0x2fe   : > { %v3089_v2 = vadd.f32 %v3088_v31, %v3040_v45  ;;  %3286 = vmatmul.bf16.gmra.mxu0 %v18729_v46  ;;  %3335 = vmatmul.bf16.gmra.mxu1 %v18661_v12  ;;  %v10231_v31 = vld [vmem:[%s18513_s2 + $0x598] sm:$0xf0] }
 0x2ff   : > { %v10234_v50 = vor.u32 %v12167_v49, %v10231_v31  ;;  %v12163_v49 = vld [vmem:[%s18513_s2 + $0x56c] sm:$0xf] }
 0x300   : > { %3237 = vmatmul.bf16.gmra.mxu3 %v18730_v38  ;;  %v3475_v8 = vmul.f32 0.2, %v3089_v2  ;;  %v2993_v27 = vpop.f32.mrf.mxu2 }
 0x301   : > { %v2994_v4 = vadd.f32 %v2993_v27, %v14397_v36  ;;  %3374 = vmatpush.bf16.msrb.mxu2 %v10234_v50 }
 0x302   : > { %v3539_v57 = vmax.f32 %v3089_v2, %v3475_v8 }
 0x303   : > { %v3042_v37 = vpop.f32.mrf.mxu3  ;;  %v3093_v29 = vpop.f32.mrf.mxu0 }
 0x304   : > { %v14659_v61 = vpack.c.bf16 %v3539_v57, %v3535_v19  ;;  %v3043_v12 = vadd.f32 %v3042_v37, %v2994_v4  ;;  %v14661_v45 = vpop.f32.mrf.mxu1 }
 0x306   : > { %v3092_v30 = vadd.f32 %v3091_v28, %v3043_v12 }
 0x308   : > { %v2995_v53 = vpop.f32.mrf.mxu2  ;;  %v3479_v8 = vmul.f32 0.2, %v3092_v30 }
 0x309   : > { %v2996_v36 = vadd.f32 %v2995_v53, %v14417_v40 }
 0x30a   : > { %v3543_v57 = vmax.f32 %v3092_v30, %v3479_v8 }
 0x30b   : > { %v3044_v2 = vpop.f32.mrf.mxu3  ;;  %v3096_v54 = vpop.f32.mrf.mxu0 }
 0x30c   : > { %v3045_v46 = vadd.f32 %v3044_v2, %v2996_v36  ;;  %v14664_v38 = vpop.f32.mrf.mxu1 }
 0x30d   : > { %3193 = vmatmul.bf16.gmra.mxu2 %v18692_v17  ;;  %v10215_v17 = vld [vmem:[%s18513_s2 + $0x578] sm:$0xf0] }
 0x30e   : > { %v3094_v27 = vadd.f32 %v3093_v29, %v3045_v46  ;;  %3291 = vmatmul.bf16.gmra.mxu0 %v18663_v56  ;;  %3340 = vmatmul.bf16.gmra.mxu1 %v18707_v25  ;;  %v10218_v31 = vor.u32 %v12163_v49, %v10215_v17 }
 0x310   : > { %3242 = vmatmul.bf16.gmra.mxu3 %v13240_v7  ;;  %v3483_v19 = vmul.f32 0.2, %v3094_v27  ;;  %v2998_v28 = vpop.f32.mrf.mxu2  ;;  %3375 = vmatpush.bf16.msrb.mxu2 %v10218_v31 }
 0x311   : > { %v2999_v40 = vadd.f32 %v2998_v28, %v14420_v16 }
 0x312   : > { %v3547_v4 = vmax.f32 %v3094_v27, %v3483_v19 }
 0x313   : > { %v3047_v37 = vpop.f32.mrf.mxu3  ;;  %v3098_v56 = vpop.f32.mrf.mxu0 }
 0x314   : > { %v3048_v7 = vadd.f32 %v3047_v37, %v2999_v40  ;;  %v14677_v29 = vpop.f32.mrf.mxu1  ;;  %v14679_v25 = vpack.c.bf16 %v3547_v4, %v3543_v57  ;;  %v12159_v4 = vld [vmem:[%s18513_s2 + $0x54c] sm:$0xf] }
 0x316   : > { %v3097_v50 = vadd.f32 %v3096_v54, %v3048_v7 }
 0x318   : > { %v3000_v12 = vpop.f32.mrf.mxu2  ;;  %v3487_v46 = vmul.f32 0.2, %v3097_v50 }
 0x319   : > { %v3001_v16 = vadd.f32 %v3000_v12, %v14440_v48  ;;  %v10389_v12 = vld [vmem:[%s18515_s4 + $0x70] sm:$0xf] }
 0x31a   : > { %v3551_v19 = vmax.f32 %v3097_v50, %v3487_v46  ;;  %v12217_v46 = vld [vmem:[%s18515_s4 + $0xf4] sm:$0xf0] }
 0x31b   : > { %v3049_v30 = vpop.f32.mrf.mxu3  ;;  %v3101_v53 = vpop.f32.mrf.mxu0 }
 0x31c   : > { %v3050_v36 = vadd.f32 %v3049_v30, %v3001_v16  ;;  %v14682_v2 = vpop.f32.mrf.mxu1  ;;  %v12201_v16 = vld [vmem:[%s18515_s4 + $0x74] sm:$0xf0]  ;;  %v10453_v30 = vld [vmem:[%s18515_s4 + $0xf0] sm:$0xf] }
 0x31d   : > { %3198 = vmatmul.bf16.gmra.mxu2 %v18694_v62  ;;  %v10199_v62 = vld [vmem:[%s18513_s2 + $0x558] sm:$0xf0] }
 0x31e   : > { %v3099_v8 = vadd.f32 %v3098_v56, %v3050_v36  ;;  %3296 = vmatmul.bf16.gmra.mxu0 %v18667_v34  ;;  %3345 = vmatmul.bf16.gmra.mxu1 %v18710_v24  ;;  %v10202_v40 = vor.u32 %v12159_v4, %v10199_v62  ;;  %v10183_v4 = vld [vmem:[%s18513_s2 + $0x538] sm:$0xf0] }
 0x320   : > { %3247 = vmatmul.bf16.gmra.mxu3 %v13266_v26  ;;  %v3491_v27 = vmul.f32 0.2, %v3099_v8  ;;  %v3003_v54 = vpop.f32.mrf.mxu2  ;;  %3376 = vmatpush.bf16.msrb.mxu2 %v10202_v40 }
 0x321   : > { %v3004_v48 = vadd.f32 %v3003_v54, %v14443_v43 }
 0x322   : > { %v3555_v28 = vmax.f32 %v3099_v8, %v3491_v27  ;;  %v10454_v8 = vor.u32 %v12217_v46, %v10453_v30  ;;  %v10365_v46 = vld [vmem:[%s18515_s4 + $0x40] sm:$0xf] }
 0x323   : > { %v3052_v57 = vpop.f32.mrf.mxu3  ;;  %v3103_v34 = vpop.f32.mrf.mxu0 }
 0x324   : > { %v3053_v26 = vadd.f32 %v3052_v57, %v3004_v48  ;;  %v14695_v37 = vpop.f32.mrf.mxu1  ;;  %v14697_v24 = vpack.c.bf16 %v3555_v28, %v3551_v19  ;;  %4068 = vmatpush.bf16.msrb.mxu1 %v10454_v8  ;;  %v10445_v19 = vld [vmem:[%s18515_s4 + $0xe0] sm:$0xf]  ;;  %v12155_v57 = vld [vmem:[%s18513_s2 + $0x52c] sm:$0xf]  ;;  %v12195_v8 = vld [vmem:[%s18515_s4 + $0x44] sm:$0xf0] }
 0x326   : > { %v3102_v49 = vadd.f32 %v3101_v53, %v3053_v26  ;;  %v10186_v26 = vor.u32 %v12155_v57, %v10183_v4  ;;  %v10421_v57 = vld [vmem:[%s18515_s4 + $0xb0] sm:$0xf] }
 0x328   : > { %v3005_v17 = vpop.f32.mrf.mxu2  ;;  %v3495_v53 = vmul.f32 0.2, %v3102_v49  ;;  %3377 = vmatpush.bf16.msrb.mxu2 %v10186_v26  ;;  %v12209_v26 = vld [vmem:[%s18515_s4 + $0xb4] sm:$0xf0] }
 0x329   : > { %v3006_v43 = vadd.f32 %v3005_v17, %v14475_v0  ;;  %v10390_v0 = vor.u32 %v12201_v16, %v10389_v12  ;;  %v10437_v12 = vld [vmem:[%s18515_s4 + $0xd0] sm:$0xf] }
 0x32b   : > { %v3054_v56 = vpop.f32.mrf.mxu3  ;;  %v3106_v31 = vpop.f32.mrf.mxu0  ;;  %4019 = vmatpush.bf16.msrb.mxu0 %v10390_v0 }
 0x32c   : > { %v3055_v7 = vadd.f32 %v3054_v56, %v3006_v43  ;;  %v14700_v50 = vpop.f32.mrf.mxu1  ;;  %v10373_v56 = vld [vmem:[%s18515_s4 + $0x50] sm:$0xf] }
 0x32d   : > { %3203 = vmatmul.bf16.gmra.mxu2 %v12928_v5  ;;  %v10381_v5 = vld [vmem:[%s18515_s4 + $0x60] sm:$0xf] }
 0x32e   : > { %v3104_v36 = vadd.f32 %v3103_v34, %v3055_v7  ;;  %3301 = vmatmul.bf16.gmra.mxu0 %v18671_v39  ;;  %3350 = vmatmul.bf16.gmra.mxu1 %v18713_v60  ;;  %v12199_v39 = vld [vmem:[%s18515_s4 + $0x64] sm:$0xf0]  ;;  %v12197_v7 = vld [vmem:[%s18515_s4 + $0x54] sm:$0xf0] }
 0x32f   : > { %v10382_v62 = vor.u32 %v12199_v39, %v10381_v5  ;;  %v12215_v34 = vld [vmem:[%s18515_s4 + $0xe4] sm:$0xf0]  ;;  %v10374_v30 = vor.u32 %v12197_v7, %v10373_v56  ;;  %v10366_v5 = vor.u32 %v12195_v8, %v10365_v46 }
 0x330   : > { %3252 = vmatmul.bf16.gmra.mxu3 %v13300_v55  ;;  %v3499_v27 = vmul.f32 0.2, %v3104_v36  ;;  %v3008_v54 = vpop.f32.mrf.mxu2  ;;  %v3559_v55 = vmax.f32 %v3102_v49, %v3495_v53  ;;  %v10446_v49 = vor.u32 %v12215_v34, %v10445_v19  ;;  %v12213_v53 = vld [vmem:[%s18515_s4 + $0xd4] sm:$0xf0]  ;;  %v12211_v39 = vld [vmem:[%s18515_s4 + $0xc4] sm:$0xf0] }
 0x331   : > { %v3009_v60 = vadd.f32 %v3008_v54, %v14502_v51  ;;  %4020 = vmatpush.bf16.msrb.mxu0 %v10382_v62 }
 0x332   : > { %v3563_v28 = vmax.f32 %v3104_v36, %v3499_v27  ;;  %4069 = vmatpush.bf16.msrb.mxu1 %v10446_v49  ;;  %v10438_v36 = vor.u32 %v12213_v53, %v10437_v12  ;;  %v10422_v49 = vor.u32 %v12209_v26, %v10421_v57  ;;  %v10167_v53 = vld [vmem:[%s18513_s2 + $0x518] sm:$0xf0] }
 0x333   : > { %v3057_v48 = vpop.f32.mrf.mxu3  ;;  %v3108_v40 = vpop.f32.mrf.mxu0 }
 0x334   : > { %v3058_v17 = vadd.f32 %v3057_v48, %v3009_v60  ;;  %v14737_v43 = vpop.f32.mrf.mxu1  ;;  %v14739_v51 = vpack.c.bf16 %v3563_v28, %v3559_v55  ;;  %v10357_v48 = vld [vmem:[%s18515_s4 + $0x30] sm:$0xf] }
 0x335   : > { %4021 = vmatpush.bf16.msrb.mxu0 %v10374_v30  ;;  %v12151_v30 = vld [vmem:[%s18513_s2 + $0x50c] sm:$0xf] }
 0x336   : > { %v3107_v16 = vadd.f32 %v3106_v31, %v3058_v17  ;;  %4070 = vmatpush.bf16.msrb.mxu1 %v10438_v36  ;;  %v10429_v31 = vld [vmem:[%s18515_s4 + $0xc0] sm:$0xf]  ;;  %v10170_v8 = vor.u32 %v12151_v30, %v10167_v53 }
 0x337   : > { %v10430_v55 = vor.u32 %v12211_v39, %v10429_v31  ;;  %v10405_v39 = vld [vmem:[%s18515_s4 + $0x90] sm:$0xf] }
 0x338   : > { %v3010_v0 = vpop.f32.mrf.mxu2  ;;  %v3503_v4 = vmul.f32 0.2, %v3107_v16  ;;  %3378 = vmatpush.bf16.msrb.mxu2 %v10170_v8 }
 0x339   : > { %v3011_v27 = vadd.f32 %v3010_v0, %v14546_v58  ;;  %4022 = vmatpush.bf16.msrb.mxu0 %v10366_v5  ;;  %v12193_v58 = vld [vmem:[%s18515_s4 + $0x34] sm:$0xf0]  ;;  %v12207_v0 = vld [vmem:[%s18515_s4 + $0xa4] sm:$0xf0] }
 0x33a   : > { %4071 = vmatpush.bf16.msrb.mxu1 %v10430_v55  ;;  %v10358_v34 = vor.u32 %v12193_v58, %v10357_v48  ;;  %v12189_v5 = vld [vmem:[%s18515_s4 + $0x14] sm:$0xf0] }
 0x33b   : > { %v3059_v54 = vpop.f32.mrf.mxu3  ;;  %v3111_v19 = vpop.f32.mrf.mxu0  ;;  %v12205_v48 = vld [vmem:[%s18515_s4 + $0x94] sm:$0xf0] }
 0x33c   : > { %v3060_v28 = vadd.f32 %v3059_v54, %v3011_v27  ;;  %v14766_v60 = vpop.f32.mrf.mxu1  ;;  %v10341_v54 = vld [vmem:[%s18515_s4 + $0x10] sm:$0xf]  ;;  %v10406_v58 = vor.u32 %v12205_v48, %v10405_v39 }
 0x33d   : > { %3208 = vmatmul.bf16.gmra.mxu2 %v13044_v1  ;;  %4023 = vmatpush.bf16.msrb.mxu0 %v10358_v34  ;;  %v10349_v1 = vld [vmem:[%s18515_s4 + $0x20] sm:$0xf] }
 0x33e   : > { %v3109_v62 = vadd.f32 %v3108_v40, %v3060_v28  ;;  %3306 = vmatmul.bf16.gmra.mxu0 %v18675_v10  ;;  %3355 = vmatmul.bf16.gmra.mxu1 %v18716_v21  ;;  %v12191_v10 = vld [vmem:[%s18515_s4 + $0x24] sm:$0xf0]  ;;  %v10413_v40 = vld [vmem:[%s18515_s4 + $0xa0] sm:$0xf]  ;;  %v10342_v28 = vor.u32 %v12189_v5, %v10341_v54 }
 0x33f   : > { %4072 = vmatpush.bf16.msrb.mxu1 %v10422_v49  ;;  %v10350_v36 = vor.u32 %v12191_v10, %v10349_v1 }
 0x340   : > { %3257 = vmatmul.bf16.gmra.mxu3 %v13381_v42  ;;  %v3507_v17 = vmul.f32 0.2, %v3109_v62  ;;  %v3013_v56 = vpop.f32.mrf.mxu2  ;;  %v3567_v42 = vmax.f32 %v3107_v16, %v3503_v4  ;;  %v10414_v16 = vor.u32 %v12207_v0, %v10413_v40  ;;  %v10333_v4 = vld [vmem:[%s18515_s4] sm:$0xf] }
 0x341   : > { %v3014_v21 = vadd.f32 %v3013_v56, %v14573_v59  ;;  %4024 = vmatpush.bf16.msrb.mxu0 %v10350_v36 }
 0x342   : > { %v3571_v7 = vmax.f32 %v3109_v62, %v3507_v17  ;;  %v12187_v62 = vld [vmem:[%s18515_s4 + $0x4] sm:$0xf0] }
 0x343   : > { %v3062_v12 = vpop.f32.mrf.mxu3  ;;  %v3113_v46 = vpop.f32.mrf.mxu0  ;;  %4073 = vmatpush.bf16.msrb.mxu1 %v10414_v16  ;;  %v10334_v49 = vor.u32 %v12187_v62, %v10333_v4  ;;  %v12203_v17 = vld [vmem:[%s18515_s4 + $0x84] sm:$0xf0] }
 0x344   : > { %v3063_v31 = vadd.f32 %v3062_v12, %v3014_v21  ;;  %v14803_v27 = vpop.f32.mrf.mxu1  ;;  %v14805_v59 = vpack.c.bf16 %v3571_v7, %v3567_v42 }
 0x345   : > { %4025 = vmatpush.bf16.msrb.mxu0 %v10342_v28 }
 0x346   : > { %v3112_v55 = vadd.f32 %v3111_v19, %v3063_v31  ;;  %v10397_v19 = vld [vmem:[%s18515_s4 + $0x80] sm:$0xf] }
 0x347   : > { %4074 = vmatpush.bf16.msrb.mxu1 %v10406_v58  ;;  %v10398_v1 = vor.u32 %v12203_v17, %v10397_v19 }
 0x348   : > { %v3015_v57 = vpop.f32.mrf.mxu2  ;;  %v3511_v42 = vmul.f32 0.2, %v3112_v55 }
 0x349   : > { %v3016_v34 = vadd.f32 %v3015_v57, %v14605_v11  ;;  %4026 = vmatpush.bf16.msrb.mxu0 %v10334_v49 }
 0x34a   : > { %v3575_v12 = vmax.f32 %v3112_v55, %v3511_v42 }
 0x34b   : > { %v3064_v26 = vpop.f32.mrf.mxu3  ;;  %v3116_v56 = vpop.f32.mrf.mxu0  ;;  %4075 = vmatpush.bf16.msrb.mxu1 %v10398_v1 }
 0x34c   : > { %v3065_v10 = vadd.f32 %v3064_v26, %v3016_v34  ;;  %v14832_v40 = vpop.f32.mrf.mxu1  ;;  %v12249_v26 = vld [vmem:[%s18515_s4 + $0x1f4] sm:$0xf0] }
 0x34d   : > { %3213 = vmatmul.bf16.gmra.mxu2 %v18700_v33 }
 0x34e   : > { %v3114_v7 = vadd.f32 %v3113_v46, %v3065_v10  ;;  %3311 = vmatmul.bf16.gmra.mxu0 %v18679_v47  ;;  %3360 = vmatmul.bf16.gmra.mxu1 %v18719_v14 }
 0x350   : > { %3262 = vmatmul.bf16.gmra.mxu3 %v18699_v35  ;;  %v3515_v11 = vmul.f32 0.2, %v3114_v7  ;;  %v3018_v21 = vpop.f32.mrf.mxu2 }
 0x351   : > { %v3019_v53 = vadd.f32 %v3018_v21, %v14608_v23 }
 0x352   : > { %v3579_v30 = vmax.f32 %v3114_v7, %v3515_v11 }
 0x353   : > { %v3067_v36 = vpop.f32.mrf.mxu3  ;;  %v3118_v0 = vpop.f32.mrf.mxu0 }
 0x354   : > { %v3068_v8 = vadd.f32 %v3067_v36, %v3019_v53  ;;  %v14839_v16 = vpop.f32.mrf.mxu1  ;;  %v14841_v46 = vpack.c.bf16 %v3579_v30, %v3575_v12  ;;  %v18731_v36 = vld [vmem:[#allocation13_spill] sm:$0xff] }
 0x356   : > { %v3117_v33 = vadd.f32 %v3116_v56, %v3068_v8  ;;  %v12684_v56 = vld [vmem:[%s18514_s3] sm:$0xf] }
 0x357   : > { %v14870_v1 = vperm.slane %v12684_v56, 3 }
 0x358   : > { %v3020_v31 = vpop.f32.mrf.mxu2  ;;  %v3519_v39 = vmul.f32 0.2, %v3117_v33 }
 0x359   : > { %v3021_v47 = vadd.f32 %v3020_v31, %v14616_v41  ;;  %v3136_v12 = vadd.f32 %v14628_v13, %v14870_v1 }
 0x35a   : > { %v3583_v48 = vmax.f32 %v3117_v33, %v3519_v39 }
 0x35b   : > { %v3069_v35 = vpop.f32.mrf.mxu3  ;;  %v3121_v54 = vpop.f32.mrf.mxu0 }
 0x35c   : > { %v3070_v14 = vadd.f32 %v3069_v35, %v3021_v47  ;;  %v14844_v5 = vpop.f32.mrf.mxu1 }
 0x35d   : > { %3218 = vmatmul.bf16.gmra.mxu2 %v18703_v9 }
 0x35e   : > { %v3119_v55 = vadd.f32 %v3118_v0, %v3070_v14  ;;  %3316 = vmatmul.bf16.gmra.mxu0 %v18683_v20  ;;  %3365 = vmatmul.bf16.gmra.mxu1 %v18722_v52  ;;  %v10517_v20 = vld [vmem:[%s18515_s4 + $0x170] sm:$0xf] }
 0x35f   : > { %v10581_v52 = vld [vmem:[%s18515_s4 + $0x1f0] sm:$0xf] }
 0x360   : > { %3267 = vmatmul.bf16.gmra.mxu3 %v18702_v44  ;;  %v3523_v23 = vmul.f32 0.2, %v3119_v55  ;;  %v3023_v28 = vpop.f32.mrf.mxu2  ;;  %v12233_v44 = vld [vmem:[%s18515_s4 + $0x174] sm:$0xf0]  ;;  %v10582_v49 = vor.u32 %v12249_v26, %v10581_v52  ;;  %v3141_v52 = vadd.f32 %v14646_v18, %v14870_v1  ;;  %v18732_v26 = vld [vmem:[#allocation15_spill] sm:$0xff] }
 0x361   : > { %v3024_v41 = vadd.f32 %v3023_v28, %v14625_v15  ;;  %v10518_v15 = vor.u32 %v12233_v44, %v10517_v20  ;;  %v12247_v28 = vld [vmem:[%s18515_s4 + $0x1e4] sm:$0xf0]  ;;  %v10501_v18 = vld [vmem:[%s18515_s4 + $0x150] sm:$0xf] }
 0x362   : > { %v3587_v58 = vmax.f32 %v3119_v55, %v3523_v23  ;;  %4166 = vmatpush.bf16.msra.mxu3 %v10582_v49  ;;  %v10573_v55 = vld [vmem:[%s18515_s4 + $0x1e0] sm:$0xf]  ;;  %v18733_v49 = vld [vmem:[#allocation17_spill] sm:$0xff] }
 0x363   : > { %v3072_v57 = vpop.f32.mrf.mxu3  ;;  %v3123_v4 = vpop.f32.mrf.mxu0  ;;  %4117 = vmatpush.bf16.msra.mxu2 %v10518_v15 }
 0x364   : > { %v3073_v62 = vadd.f32 %v3072_v57, %v3024_v41  ;;  %v14851_v19 = vpop.f32.mrf.mxu1  ;;  %v14853_v34 = vpack.c.bf16 %v3587_v58, %v3583_v48  ;;  %v3138_v48 = vadd.f32 %v14643_v6, %v14870_v1  ;;  %v10574_v58 = vor.u32 %v12247_v28, %v10573_v55  ;;  %v18734_v6 = vld [vmem:[#allocation36_spill] sm:$0xff]  ;;  %v18736_v28 = vld [vmem:[#allocation18_spill] sm:$0xff] }
 0x365   : > { %v3146_v55 = vadd.f32 %v14664_v38, %v14870_v1  ;;  %v10493_v38 = vld [vmem:[%s18515_s4 + $0x140] sm:$0xf] }
 0x366   : > { %v3122_v9 = vadd.f32 %v3121_v54, %v3073_v62  ;;  %4167 = vmatpush.bf16.msra.mxu3 %v10574_v58  ;;  %v18739_v58 = vld [vmem:[#allocation8_spill] sm:$0xff] }
 0x368   : > { %v3025_v17 = vpop.f32.mrf.mxu2  ;;  %v3527_v30 = vmul.f32 0.2, %v3122_v9 }
 0x369   : > { %v3026_v10 = vadd.f32 %v3025_v17, %v14634_v63  ;;  %v18735_v17 = vld [vmem:[#allocation6_spill] sm:$0xff] }
 0x36a   : > { %v3591_v8 = vmax.f32 %v3122_v9, %v3527_v30 }
 0x36b   : > { %v3074_v42 = vpop.f32.mrf.mxu3  ;;  %v3282_v7 = vpop.f32.mrf.mxu0 }
 0x36c   : > { %v3075_v11 = vadd.f32 %v3074_v42, %v3026_v10  ;;  %v3331_v21 = vpop.f32.mrf.mxu1 }
 0x36d   : > { %3379 = vmatmul.bf16.vlgmr.msrb.gmra.mxu2 %v13194_v32  ;;  %v10509_v32 = vld [vmem:[%s18515_s4 + $0x160] sm:$0xf] }
 0x36e   : > { %v3124_v53 = vadd.f32 %v3123_v4, %v3075_v11  ;;  %4027 = vmatmul.bf16.vlgmr.msrb.gmra.mxu0 %v18731_v36  ;;  %4076 = vmatmul.bf16.vlgmr.msrb.gmra.mxu1 %v14172_v3 }
 0x370   : > { %10323 = vmatmul.msk.bf16.vlgmr.msrb.gmra.mxu3 %vm2072_vm0, %v13552_v22  ;;  %v3531_v63 = vmul.f32 0.2, %v3124_v53  ;;  %v3184_v0 = vpop.f32.mrf.mxu2  ;;  %v12231_v22 = vld [vmem:[%s18515_s4 + $0x164] sm:$0xf0] }
 0x371   : > { %v3185_v31 = vadd.f32 %v3184_v0, %v3136_v12  ;;  %v10510_v23 = vor.u32 %v12231_v22, %v10509_v32 }
 0x372   : > { %v3595_v33 = vmax.f32 %v3124_v53, %v3531_v63  ;;  %v12229_v53 = vld [vmem:[%s18515_s4 + $0x154] sm:$0xf0]  ;;  %v10565_v63 = vld [vmem:[%s18515_s4 + $0x1d0] sm:$0xf] }
 0x373   : > { %v3233_v47 = vpop.f32.mrf.mxu3  ;;  %v3284_v35 = vpop.f32.mrf.mxu0  ;;  %4118 = vmatpush.bf16.msra.mxu2 %v10510_v23  ;;  %v10502_v0 = vor.u32 %v12229_v53, %v10501_v18 }
 0x374   : > { %v3234_v54 = vadd.f32 %v3233_v47, %v3185_v31  ;;  %v3333_v13 = vpop.f32.mrf.mxu1  ;;  %v14880_v14 = vpack.c.bf16 %v3595_v33, %v3591_v8  ;;  %v12245_v8 = vld [vmem:[%s18515_s4 + $0x1d4] sm:$0xf0]  ;;  %v3143_v33 = vadd.f32 %v14661_v45, %v14870_v1 }
 0x375   : > { %v10566_v31 = vor.u32 %v12245_v8, %v10565_v63  ;;  %v18738_v45 = vld [vmem:[#allocation37_spill] sm:$0xff]  ;;  %v3151_v8 = vadd.f32 %v14682_v2, %v14870_v1  ;;  %v10485_v2 = vld [vmem:[%s18515_s4 + $0x130] sm:$0xf] }
 0x376   : > { %v3283_v39 = vadd.f32 %v3282_v7, %v3234_v54 }
 0x377   : > { %4119 = vmatpush.bf16.msra.mxu2 %v10502_v0  ;;  %4168 = vmatpush.bf16.msra.mxu3 %v10566_v31  ;;  %v18740_v31 = vld [vmem:[#allocation21_spill] sm:$0xff] }
 0x378   : > { %v14896_v41 = vadd.f32 %v3331_v21, %v3283_v39  ;;  %v3186_v57 = vpop.f32.mrf.mxu2 }
 0x379   : > { %v3187_v4 = vadd.f32 %v3186_v57, %v3138_v48  ;;  %v18737_v48 = vld [vmem:[#allocation20_spill] sm:$0xff] }
 0x37b   : > { %v3235_v62 = vpop.f32.mrf.mxu3  ;;  %v3287_v9 = vpop.f32.mrf.mxu0 }
 0x37c   : > { %v3236_v20 = vadd.f32 %v3235_v62, %v3187_v4  ;;  %v3336_v44 = vpop.f32.mrf.mxu1 }
 0x37d   : > { %3384 = vmatmul.bf16.gmra.mxu2 %v18732_v26  ;;  %v12227_v26 = vld [vmem:[%s18515_s4 + $0x144] sm:$0xf0] }
 0x37e   : > { %v3285_v15 = vadd.f32 %v3284_v35, %v3236_v20  ;;  %4032 = vmatmul.bf16.gmra.mxu0 %v18733_v49  ;;  %4081 = vmatmul.bf16.gmra.mxu1 %v18735_v17 }
 0x380   : > { %10324 = vmatmul.msk.bf16.gmra.mxu3 %vm2072_vm0, %v18734_v6  ;;  %v14905_v56 = vadd.f32 %v3333_v13, %v3285_v15  ;;  %v3189_v10 = vpop.f32.mrf.mxu2  ;;  %v10557_v6 = vld [vmem:[%s18515_s4 + $0x1c0] sm:$0xf] }
 0x381   : > { %v3190_v42 = vadd.f32 %v3189_v10, %v3141_v52  ;;  %v10494_v10 = vor.u32 %v12227_v26, %v10493_v38 }
 0x383   : > { %v3238_v7 = vpop.f32.mrf.mxu3  ;;  %v3289_v11 = vpop.f32.mrf.mxu0  ;;  %4120 = vmatpush.bf16.msra.mxu2 %v10494_v10 }
 0x384   : > { %v3239_v21 = vadd.f32 %v3238_v7, %v3190_v42  ;;  %v3338_v12 = vpop.f32.mrf.mxu1  ;;  %v12243_v42 = vld [vmem:[%s18515_s4 + $0x1c4] sm:$0xf0]  ;;  %v3148_v7 = vadd.f32 %v14677_v29, %v14870_v1  ;;  %v18742_v29 = vld [vmem:[#allocation38_spill] sm:$0xff] }
 0x386   : > { %v3288_v30 = vadd.f32 %v3287_v9, %v3239_v21 }
 0x388   : > { %v14921_v47 = vadd.f32 %v3336_v44, %v3288_v30  ;;  %v3191_v35 = vpop.f32.mrf.mxu2 }
 0x389   : > { %v3192_v54 = vadd.f32 %v3191_v35, %v3143_v33  ;;  %v18741_v35 = vld [vmem:[#allocation23_spill] sm:$0xff] }
 0x38b   : > { %v3240_v13 = vpop.f32.mrf.mxu3  ;;  %v3292_v39 = vpop.f32.mrf.mxu0 }
 0x38c   : > { %v3241_v32 = vadd.f32 %v3240_v13, %v3192_v54  ;;  %v3341_v22 = vpop.f32.mrf.mxu1  ;;  %v18743_v54 = vld [vmem:[#allocation43_spill] sm:$0xff] }
 0x38d   : > { %3389 = vmatmul.bf16.gmra.mxu2 %v18736_v28 }
 0x38e   : > { %v3290_v23 = vadd.f32 %v3289_v11, %v3241_v32  ;;  %4037 = vmatmul.bf16.gmra.mxu0 %v18737_v48  ;;  %4086 = vmatmul.bf16.gmra.mxu1 %v18739_v58  ;;  %v10558_v11 = vor.u32 %v12243_v42, %v10557_v6 }
 0x390   : > { %10325 = vmatmul.msk.bf16.gmra.mxu3 %vm2072_vm0, %v18738_v45  ;;  %v14930_v57 = vadd.f32 %v3338_v12, %v3290_v23  ;;  %v3194_v4 = vpop.f32.mrf.mxu2 }
 0x391   : > { %v3195_v62 = vadd.f32 %v3194_v4, %v3146_v55  ;;  %4169 = vmatpush.bf16.msra.mxu3 %v10558_v11  ;;  %v12225_v4 = vld [vmem:[%s18515_s4 + $0x134] sm:$0xf0]  ;;  %v12200_v11 = vld [vmem:[%s18515_s4 + $0x74] sm:$0xf] }
 0x393   : > { %v3243_v9 = vpop.f32.mrf.mxu3  ;;  %v3294_v20 = vpop.f32.mrf.mxu0 }
 0x394   : > { %v3244_v44 = vadd.f32 %v3243_v9, %v3195_v62  ;;  %v3343_v52 = vpop.f32.mrf.mxu1  ;;  %v10549_v62 = vld [vmem:[%s18515_s4 + $0x1b0] sm:$0xf]  ;;  %v10486_v9 = vor.u32 %v12225_v4, %v10485_v2 }
 0x396   : > { %v3293_v15 = vadd.f32 %v3292_v39, %v3244_v44  ;;  %v3153_v44 = vadd.f32 %v14695_v37, %v14870_v1  ;;  %4121 = vmatpush.bf16.msra.mxu2 %v10486_v9  ;;  %v12216_v37 = vld [vmem:[%s18515_s4 + $0xf4] sm:$0xf] }
 0x398   : > { %v14946_v21 = vadd.f32 %v3341_v22, %v3293_v15  ;;  %v3196_v12 = vpop.f32.mrf.mxu2 }
 0x399   : > { %v3197_v30 = vadd.f32 %v3196_v12, %v3148_v7  ;;  %v10391_v12 = vld [vmem:[%s18515_s4 + $0x78] sm:$0xf0] }
 0x39b   : > { %v3245_v18 = vpop.f32.mrf.mxu3  ;;  %v3297_v53 = vpop.f32.mrf.mxu0 }
 0x39c   : > { %v3246_v63 = vadd.f32 %v3245_v18, %v3197_v30  ;;  %v3346_v0 = vpop.f32.mrf.mxu1  ;;  %v3156_v30 = vadd.f32 %v14700_v50, %v14870_v1 }
 0x39d   : > { %3394 = vmatmul.bf16.gmra.mxu2 %v18740_v31  ;;  %v18747_v31 = vld [vmem:[#allocation44_spill] sm:$0xff] }
 0x39e   : > { %v3295_v33 = vadd.f32 %v3294_v20, %v3246_v63  ;;  %4042 = vmatmul.bf16.gmra.mxu0 %v18741_v35  ;;  %4091 = vmatmul.bf16.gmra.mxu1 %v18743_v54  ;;  %v12241_v20 = vld [vmem:[%s18515_s4 + $0x1b4] sm:$0xf0]  ;;  %v18745_v63 = vld [vmem:[#allocation26_spill] sm:$0xff] }
 0x3a0   : > { %10326 = vmatmul.msk.bf16.gmra.mxu3 %vm2072_vm0, %v18742_v29  ;;  %v14955_v13 = vadd.f32 %v3343_v52, %v3295_v33  ;;  %v3199_v39 = vpop.f32.mrf.mxu2  ;;  %v10550_v52 = vor.u32 %v12241_v20, %v10549_v62  ;;  %v18746_v33 = vld [vmem:[#allocation39_spill] sm:$0xff] }
 0x3a1   : > { %v3200_v32 = vadd.f32 %v3199_v39, %v3151_v8  ;;  %v10455_v8 = vld [vmem:[%s18515_s4 + $0xf8] sm:$0xf0] }
 0x3a2   : > { %4170 = vmatpush.bf16.msra.mxu3 %v10550_v52  ;;  %v10458_v29 = vor.u32 %v12216_v37, %v10455_v8  ;;  %v10375_v52 = vld [vmem:[%s18515_s4 + $0x58] sm:$0xf0] }
 0x3a3   : > { %v3248_v22 = vpop.f32.mrf.mxu3  ;;  %v3299_v55 = vpop.f32.mrf.mxu0 }
 0x3a4   : > { %v3249_v23 = vadd.f32 %v3248_v22, %v3200_v32  ;;  %v3348_v28 = vpop.f32.mrf.mxu1  ;;  %4264 = vmatpush.bf16.msra.mxu1 %v10458_v29  ;;  %v12198_v32 = vld [vmem:[%s18515_s4 + $0x64] sm:$0xf]  ;;  %v10383_v22 = vld [vmem:[%s18515_s4 + $0x68] sm:$0xf0] }
 0x3a5   : > { %v10386_v2 = vor.u32 %v12198_v32, %v10383_v22  ;;  %v12194_v29 = vld [vmem:[%s18515_s4 + $0x44] sm:$0xf] }
 0x3a6   : > { %v3298_v45 = vadd.f32 %v3297_v53, %v3249_v23  ;;  %v18744_v53 = vld [vmem:[#allocation24_spill] sm:$0xff]  ;;  %v12210_v32 = vld [vmem:[%s18515_s4 + $0xc4] sm:$0xf] }
 0x3a8   : > { %v14971_v15 = vadd.f32 %v3346_v0, %v3298_v45  ;;  %v3201_v38 = vpop.f32.mrf.mxu2  ;;  %v10394_v0 = vor.u32 %v12200_v11, %v10391_v12  ;;  %v10541_v11 = vld [vmem:[%s18515_s4 + $0x1a0] sm:$0xf] }
 0x3a9   : > { %v3202_v26 = vadd.f32 %v3201_v38, %v3153_v44  ;;  %v12196_v44 = vld [vmem:[%s18515_s4 + $0x54] sm:$0xf] }
 0x3aa   : > { %4215 = vmatpush.bf16.msra.mxu0 %v10394_v0  ;;  %v12212_v38 = vld [vmem:[%s18515_s4 + $0xd4] sm:$0xf]  ;;  %v10378_v12 = vor.u32 %v12196_v44, %v10375_v52  ;;  %v3161_v52 = vadd.f32 %v14766_v60, %v14870_v1 }
 0x3ab   : > { %v3250_v6 = vpop.f32.mrf.mxu3  ;;  %v3302_v10 = vpop.f32.mrf.mxu0  ;;  %v12208_v44 = vld [vmem:[%s18515_s4 + $0xb4] sm:$0xf] }
 0x3ac   : > { %v3251_v42 = vadd.f32 %v3250_v6, %v3202_v26  ;;  %v3351_v7 = vpop.f32.mrf.mxu1  ;;  %v10477_v6 = vld [vmem:[%s18515_s4 + $0x120] sm:$0xf] }
 0x3ad   : > { %3399 = vmatmul.bf16.gmra.mxu2 %v18744_v53 }
 0x3ae   : > { %v3300_v18 = vadd.f32 %v3299_v55, %v3251_v42  ;;  %4047 = vmatmul.bf16.gmra.mxu0 %v18745_v63  ;;  %4096 = vmatmul.bf16.gmra.mxu1 %v18747_v31  ;;  %v12214_v55 = vld [vmem:[%s18515_s4 + $0xe4] sm:$0xf]  ;;  %v12223_v42 = vld [vmem:[%s18515_s4 + $0x124] sm:$0xf0] }
 0x3af   : > { %4216 = vmatpush.bf16.msra.mxu0 %v10386_v2  ;;  %v10478_v37 = vor.u32 %v12223_v42, %v10477_v6  ;;  %v18749_v6 = vld [vmem:[#allocation30_spill] sm:$0xff] }
 0x3b0   : > { %10327 = vmatmul.msk.bf16.gmra.mxu3 %vm2072_vm0, %v18746_v33  ;;  %v14992_v39 = vadd.f32 %v3348_v28, %v3300_v18  ;;  %v3204_v50 = vpop.f32.mrf.mxu2  ;;  %v10447_v28 = vld [vmem:[%s18515_s4 + $0xe8] sm:$0xf0]  ;;  %v3158_v18 = vadd.f32 %v14737_v43, %v14870_v1 }
 0x3b1   : > { %v3205_v23 = vadd.f32 %v3204_v50, %v3156_v30  ;;  %v10450_v62 = vor.u32 %v12214_v55, %v10447_v28  ;;  %v12239_v30 = vld [vmem:[%s18515_s4 + $0x1a4] sm:$0xf0]  ;;  %4122 = vmatpush.bf16.msra.mxu2 %v10478_v37  ;;  %v10367_v50 = vld [vmem:[%s18515_s4 + $0x48] sm:$0xf0]  ;;  %v18751_v37 = vld [vmem:[#allocation5_spill] sm:$0xff] }
 0x3b2   : > { %v10542_v53 = vor.u32 %v12239_v30, %v10541_v11  ;;  %v10431_v55 = vld [vmem:[%s18515_s4 + $0xc8] sm:$0xf0]  ;;  %v10423_v11 = vld [vmem:[%s18515_s4 + $0xb8] sm:$0xf0] }
 0x3b3   : > { %v3253_v45 = vpop.f32.mrf.mxu3  ;;  %v3304_v4 = vpop.f32.mrf.mxu0  ;;  %4265 = vmatpush.bf16.msra.mxu1 %v10450_v62  ;;  %4217 = vmatpush.bf16.msra.mxu0 %v10378_v12  ;;  %v10434_v28 = vor.u32 %v12210_v32, %v10431_v55  ;;  %v12192_v62 = vld [vmem:[%s18515_s4 + $0x34] sm:$0xf]  ;;  %v10426_v30 = vor.u32 %v12208_v44, %v10423_v11  ;;  %v12221_v55 = vld [vmem:[%s18515_s4 + $0x114] sm:$0xf0]  ;;  %v3163_v11 = vadd.f32 %v14803_v27, %v14870_v1  ;;  %v12186_v27 = vld [vmem:[%s18515_s4 + $0x4] sm:$0xf] }
 0x3b4   : > { %v3254_v9 = vadd.f32 %v3253_v45, %v3205_v23  ;;  %v3353_v20 = vpop.f32.mrf.mxu1  ;;  %4171 = vmatpush.bf16.msra.mxu3 %v10542_v53  ;;  %v18750_v12 = vld [vmem:[#allocation40_spill] sm:$0xff]  ;;  %v12206_v53 = vld [vmem:[%s18515_s4 + $0xa4] sm:$0xf]  ;;  %v12237_v44 = vld [vmem:[%s18515_s4 + $0x194] sm:$0xf0] }
 0x3b6   : > { %v3303_v26 = vadd.f32 %v3302_v10, %v3254_v9  ;;  %v10439_v10 = vld [vmem:[%s18515_s4 + $0xd8] sm:$0xf0] }
 0x3b7   : > { %v10442_v0 = vor.u32 %v12212_v38, %v10439_v10  ;;  %v10359_v9 = vld [vmem:[%s18515_s4 + $0x38] sm:$0xf0] }
 0x3b8   : > { %v15032_v8 = vadd.f32 %v3351_v7, %v3303_v26  ;;  %v3206_v33 = vpop.f32.mrf.mxu2  ;;  %v10370_v7 = vor.u32 %v12194_v29, %v10367_v50  ;;  %v18748_v26 = vld [vmem:[#allocation27_spill] sm:$0xff]  ;;  %v10362_v42 = vor.u32 %v12192_v62, %v10359_v9  ;;  %v10533_v9 = vld [vmem:[%s18515_s4 + $0x190] sm:$0xf] }
 0x3b9   : > { %v3207_v43 = vadd.f32 %v3206_v33, %v3158_v18  ;;  %4266 = vmatpush.bf16.msra.mxu1 %v10442_v0  ;;  %v10351_v18 = vld [vmem:[%s18515_s4 + $0x28] sm:$0xf0] }
 0x3ba   : > { %4218 = vmatpush.bf16.msra.mxu0 %v10370_v7  ;;  %v10469_v7 = vld [vmem:[%s18515_s4 + $0x110] sm:$0xf] }
 0x3bb   : > { %v3255_v22 = vpop.f32.mrf.mxu3  ;;  %v3307_v23 = vpop.f32.mrf.mxu0  ;;  %v10470_v62 = vor.u32 %v12221_v55, %v10469_v7 }
 0x3bc   : > { %v3256_v45 = vadd.f32 %v3255_v22, %v3207_v43  ;;  %v3356_v2 = vpop.f32.mrf.mxu1 }
 0x3bd   : > { %3404 = vmatmul.bf16.gmra.mxu2 %v18748_v26  ;;  %4267 = vmatpush.bf16.msra.mxu1 %v10434_v28 }
 0x3be   : > { %v3305_v38 = vadd.f32 %v3304_v4, %v3256_v45  ;;  %4052 = vmatmul.bf16.gmra.mxu0 %v18749_v6  ;;  %4101 = vmatmul.bf16.gmra.mxu1 %v18751_v37  ;;  %v12190_v4 = vld [vmem:[%s18515_s4 + $0x24] sm:$0xf]  ;;  %v12188_v45 = vld [vmem:[%s18515_s4 + $0x14] sm:$0xf] }
 0x3bf   : > { %4219 = vmatpush.bf16.msra.mxu0 %v10362_v42  ;;  %v10354_v29 = vor.u32 %v12190_v4, %v10351_v18  ;;  %v12204_v42 = vld [vmem:[%s18515_s4 + $0x94] sm:$0xf]  ;;  %4123 = vmatpush.bf16.msra.mxu2 %v10470_v62  ;;  %v10461_v4 = vld [vmem:[%s18515_s4 + $0x100] sm:$0xf]  ;;  %v12219_v18 = vld [vmem:[%s18515_s4 + $0x104] sm:$0xf0] }
 0x3c0   : > { %10328 = vmatmul.msk.bf16.gmra.mxu3 %vm2072_vm0, %v18750_v12  ;;  %v15065_v10 = vadd.f32 %v3353_v20, %v3305_v38  ;;  %v3209_v60 = vpop.f32.mrf.mxu2  ;;  %v10415_v20 = vld [vmem:[%s18515_s4 + $0xa8] sm:$0xf0]  ;;  %v10534_v38 = vor.u32 %v12237_v44, %v10533_v9  ;;  %v18753_v44 = vld [vmem:[#allocation34_spill] sm:$0xff] }
 0x3c1   : > { %v3210_v0 = vadd.f32 %v3209_v60, %v3161_v52  ;;  %4268 = vmatpush.bf16.msra.mxu1 %v10426_v30  ;;  %v10418_v22 = vor.u32 %v12206_v53, %v10415_v20  ;;  %v10343_v52 = vld [vmem:[%s18515_s4 + $0x18] sm:$0xf0]  ;;  %v18752_v9 = vld [vmem:[#allocation31_spill] sm:$0xff] }
 0x3c2   : > { %v10346_v26 = vor.u32 %v12188_v45, %v10343_v52  ;;  %4172 = vmatpush.bf16.msra.mxu3 %v10534_v38  ;;  %v18754_v52 = vld [vmem:[#allocation41_spill] sm:$0xff]  ;;  %v18755_v38 = vld [vmem:[#allocation28_spill] sm:$0xff] }
 0x3c3   : > { %v3258_v33 = vpop.f32.mrf.mxu3  ;;  %v3309_v50 = vpop.f32.mrf.mxu0  ;;  %4220 = vmatpush.bf16.msra.mxu0 %v10354_v29  ;;  %v12202_v29 = vld [vmem:[%s18515_s4 + $0x84] sm:$0xf] }
 0x3c4   : > { %v3259_v32 = vadd.f32 %v3258_v33, %v3210_v0  ;;  %v3358_v43 = vpop.f32.mrf.mxu1  ;;  %v10462_v33 = vor.u32 %v12219_v18, %v10461_v4  ;;  %v10525_v18 = vld [vmem:[%s18515_s4 + $0x180] sm:$0xf] }
 0x3c5   : > { %4269 = vmatpush.bf16.msra.mxu1 %v10418_v22  ;;  %v10399_v22 = vld [vmem:[%s18515_s4 + $0x88] sm:$0xf0] }
 0x3c6   : > { %v3308_v28 = vadd.f32 %v3307_v23, %v3259_v32  ;;  %v10407_v23 = vld [vmem:[%s18515_s4 + $0x98] sm:$0xf0]  ;;  %4124 = vmatpush.bf16.msra.mxu2 %v10462_v33  ;;  %v10402_v45 = vor.u32 %v12202_v29, %v10399_v22 }
 0x3c7   : > { %v10410_v12 = vor.u32 %v12204_v42, %v10407_v23  ;;  %4221 = vmatpush.bf16.msra.mxu0 %v10346_v26 }
 0x3c8   : > { %v15105_v30 = vadd.f32 %v3356_v2, %v3308_v28  ;;  %v3211_v60 = vpop.f32.mrf.mxu2  ;;  %v10335_v2 = vld [vmem:[%s18515_s4 + $0x8] sm:$0xf0]  ;;  %v3166_v28 = vadd.f32 %v14832_v40, %v14870_v1 }
 0x3c9   : > { %v3212_v53 = vadd.f32 %v3211_v60, %v3163_v11  ;;  %v10338_v32 = vor.u32 %v12186_v27, %v10335_v2  ;;  %4270 = vmatpush.bf16.msra.mxu1 %v10410_v12  ;;  %v12235_v27 = vld [vmem:[%s18515_s4 + $0x184] sm:$0xf0] }
 0x3cb   : > { %v3260_v0 = vpop.f32.mrf.mxu3  ;;  %v3312_v20 = vpop.f32.mrf.mxu0  ;;  %4222 = vmatpush.bf16.msra.mxu0 %v10338_v32 }
 0x3cc   : > { %v3261_v7 = vadd.f32 %v3260_v0, %v3212_v53  ;;  %v3361_v55 = vpop.f32.mrf.mxu1  ;;  %v10526_v0 = vor.u32 %v12235_v27, %v10525_v18  ;;  %v10519_v18 = vld [vmem:[%s18515_s4 + $0x178] sm:$0xf0]  ;;  %v12248_v27 = vld [vmem:[%s18515_s4 + $0x1f4] sm:$0xf] }
 0x3cd   : > { %3409 = vmatmul.bf16.gmra.mxu2 %v18752_v9  ;;  %4271 = vmatpush.bf16.msra.mxu1 %v10402_v45  ;;  %v18757_v45 = vld [vmem:[#allocation2_spill] sm:$0xff] }
 0x3ce   : > { %v3310_v62 = vadd.f32 %v3309_v50, %v3261_v7  ;;  %4057 = vmatmul.bf16.gmra.mxu0 %v18753_v44  ;;  %4106 = vmatmul.bf16.gmra.mxu1 %v18755_v38  ;;  %v3168_v50 = vadd.f32 %v14839_v16, %v14870_v1  ;;  %v3171_v16 = vadd.f32 %v14844_v5, %v14870_v1  ;;  %v18756_v7 = vld [vmem:[#allocation35_spill] sm:$0xff]  ;;  %v3693_v5 = vld [vmem:[%s18516_s5] sm:$0x3] }
 0x3cf   : > { %4173 = vmatpush.bf16.msra.mxu3 %v10526_v0 }
 0x3d0   : > { %10329 = vmatmul.msk.bf16.gmra.mxu3 %vm2072_vm0, %v18754_v52  ;;  %v15132_v26 = vadd.f32 %v3358_v43, %v3310_v62  ;;  %v3214_v42 = vpop.f32.mrf.mxu2 }
 0x3d1   : > { %v3215_v23 = vadd.f32 %v3214_v42, %v3166_v28  ;;  %v18758_v28 = vld [vmem:[#allocation42_spill] sm:$0xff] }
 0x3d3   : > { %v3263_v11 = vpop.f32.mrf.mxu3  ;;  %v3314_v12 = vpop.f32.mrf.mxu0 }
 0x3d4   : > { %v3264_v60 = vadd.f32 %v3263_v11, %v3215_v23  ;;  %v3363_v4 = vpop.f32.mrf.mxu1 }
 0x3d6   : > { %v3313_v40 = vadd.f32 %v3312_v20, %v3264_v60 }
 0x3d8   : > { %v15142_v43 = vadd.f32 %v3361_v55, %v3313_v40  ;;  %v3216_v53 = vpop.f32.mrf.mxu2  ;;  %v18759_v55 = vld [vmem:[#allocation7_spill] sm:$0xff]  ;;  %v15156_v40 = vperm.slane %v3693_v5, 0 }
 0x3d9   : > { %v3217_v33 = vadd.f32 %v3216_v53, %v3168_v50  ;;  %v3173_v50 = vadd.f32 %v14851_v19, %v14870_v1  ;;  %v10583_v19 = vld [vmem:[%s18515_s4 + $0x1f8] sm:$0xf0] }
 0x3db   : > { %v3265_v2 = vpop.f32.mrf.mxu3  ;;  %v3317_v29 = vpop.f32.mrf.mxu0 }
 0x3dc   : > { %v3266_v20 = vadd.f32 %v3265_v2, %v3217_v33  ;;  %v3366_v32 = vpop.f32.mrf.mxu1 }
 0x3dd   : > { %3414 = vmatmul.bf16.gmra.mxu2 %v18756_v7 }
 0x3de   : > { %v3315_v22 = vadd.f32 %v3314_v12, %v3266_v20  ;;  %4062 = vmatmul.bf16.gmra.mxu0 %v18757_v45  ;;  %4111 = vmatmul.bf16.gmra.mxu1 %v18759_v55 }
 0x3e0   : > { %10330 = vmatmul.msk.bf16.gmra.mxu3 %vm2072_vm0, %v18758_v28  ;;  %v15151_v62 = vadd.f32 %v3363_v4, %v3315_v22  ;;  %v3219_v9 = vpop.f32.mrf.mxu2  ;;  %v12232_v4 = vld [vmem:[%s18515_s4 + $0x174] sm:$0xf] }
 0x3e1   : > { %v3220_v52 = vadd.f32 %v3219_v9, %v3171_v16  ;;  %v10522_v33 = vor.u32 %v12232_v4, %v10519_v18  ;;  %v12230_v18 = vld [vmem:[%s18515_s4 + $0x164] sm:$0xf] }
 0x3e3   : > { %v3268_v42 = vpop.f32.mrf.mxu3  ;;  %v3319_v23 = vpop.f32.mrf.mxu0  ;;  %4313 = vmatpush.bf16.msrb.mxu2 %v10522_v33 }
 0x3e4   : > { %v3269_v11 = vadd.f32 %v3268_v42, %v3220_v52  ;;  %v3368_v60 = vpop.f32.mrf.mxu1 }
 0x3e6   : > { %v3318_v12 = vadd.f32 %v3317_v29, %v3269_v11  ;;  %v10586_v29 = vor.u32 %v12248_v27, %v10583_v19  ;;  %v10575_v27 = vld [vmem:[%s18515_s4 + $0x1e8] sm:$0xf0] }
 0x3e8   : > { %v15169_v53 = vadd.f32 %v3366_v32, %v3318_v12  ;;  %v3221_v0 = vpop.f32.mrf.mxu2  ;;  %4362 = vmatpush.bf16.msrb.mxu3 %v10586_v29 }
 0x3e9   : > { %v3222_v1 = vadd.f32 %v3221_v0, %v3173_v50 }
 0x3eb   : > { %v3270_v2 = vpop.f32.mrf.mxu3  ;;  %v4028_v20 = vpop.f32.mrf.mxu0 }
 0x3ec   : > { %v3271_v16 = vadd.f32 %v3270_v2, %v3222_v1  ;;  %v4029_v22 = vadd.f32 %v4028_v20, %v15156_v40  ;;  %v4077_v7 = vpop.f32.mrf.mxu1 }
 0x3ed   : > { %4125 = vmatmul.bf16.vlgmr.msra.gmra.mxu2 %v14659_v61 }
 0x3ee   : > { %v3320_v28 = vadd.f32 %v3319_v23, %v3271_v16  ;;  %v15175_v9 = vadd.f32 %v4077_v7, %v4029_v22  ;;  %4223 = vmatmul.bf16.vlgmr.msra.gmra.mxu0 %v18731_v36  ;;  %4272 = vmatmul.bf16.vlgmr.msra.gmra.mxu1 %v14172_v3  ;;  %v10511_v3 = vld [vmem:[%s18515_s4 + $0x168] sm:$0xf0]  ;;  %v12246_v36 = vld [vmem:[%s18515_s4 + $0x1e4] sm:$0xf] }
 0x3ef   : > { %v10578_v19 = vor.u32 %v12246_v36, %v10575_v27 }
 0x3f0   : > { %v15180_v32 = vadd.f32 %v3368_v60, %v3320_v28  ;;  %v3380_v52 = vpop.f32.mrf.mxu2 }
 0x3f1   : > { %v3381_v5 = vadd.f32 %v3380_v52, %v14896_v41  ;;  %v10514_v41 = vor.u32 %v12230_v18, %v10511_v3  ;;  %4363 = vmatpush.bf16.msrb.mxu3 %v10578_v19 }
 0x3f3   : > { %v3429_v42 = vpop.f32.mrf.mxu3  ;;  %v4030_v11 = vpop.f32.mrf.mxu0  ;;  %4314 = vmatpush.bf16.msrb.mxu2 %v10514_v41  ;;  %v10567_v41 = vld [vmem:[%s18515_s4 + $0x1d8] sm:$0xf0] }
 0x3f4   : > { %v4031_v12 = vadd.f32 %v4030_v11, %v15156_v40  ;;  %v4079_v50 = vpop.f32.mrf.mxu1  ;;  %v3430_v23 = vadd.f32 %v3429_v42, %v3381_v5 }
 0x3f6   : > { %v15184_v4 = vadd.f32 %v4079_v50, %v4031_v12  ;;  %v3472_v2 = vmul.f32 0.2, %v3430_v23 }
 0x3f8   : > { %v3382_v60 = vpop.f32.mrf.mxu2 }
 0x3f9   : > { %v3383_v0 = vadd.f32 %v3382_v60, %v14905_v56  ;;  %v3536_v56 = vmax.f32 %v3430_v23, %v3472_v2 }
 0x3fb   : > { %v3431_v33 = vpop.f32.mrf.mxu3  ;;  %v4033_v1 = vpop.f32.mrf.mxu0 }
 0x3fc   : > { %v3432_v29 = vadd.f32 %v3431_v33, %v3383_v0  ;;  %v4034_v20 = vadd.f32 %v4033_v1, %v15156_v40  ;;  %v4082_v16 = vpop.f32.mrf.mxu1 }
 0x3fd   : > { %4130 = vmatmul.bf16.gmra.mxu2 %v14679_v25 }
 0x3fe   : > { %v3476_v22 = vmul.f32 0.2, %v3432_v29  ;;  %v15200_v7 = vadd.f32 %v4082_v16, %v4034_v20  ;;  %4228 = vmatmul.bf16.gmra.mxu0 %v18733_v49  ;;  %4277 = vmatmul.bf16.gmra.mxu1 %v18735_v17  ;;  %v12228_v49 = vld [vmem:[%s18515_s4 + $0x154] sm:$0xf]  ;;  %v10503_v17 = vld [vmem:[%s18515_s4 + $0x158] sm:$0xf0] }
 0x3ff   : > { %v10506_v60 = vor.u32 %v12228_v49, %v10503_v17 }
 0x400   : > { %v3540_v28 = vmax.f32 %v3432_v29, %v3476_v22  ;;  %v3385_v52 = vpop.f32.mrf.mxu2 }
 0x401   : > { %v3386_v12 = vadd.f32 %v3385_v52, %v14921_v47  ;;  %v12244_v47 = vld [vmem:[%s18515_s4 + $0x1d4] sm:$0xf]  ;;  %4315 = vmatpush.bf16.msrb.mxu2 %v10506_v60 }
 0x402   : > { %v15205_v42 = vpack.c.bf16 %v3540_v28, %v3536_v56  ;;  %v10570_v33 = vor.u32 %v12244_v47, %v10567_v41 }
 0x403   : > { %v3434_v11 = vpop.f32.mrf.mxu3  ;;  %v4035_v5 = vpop.f32.mrf.mxu0 }
 0x404   : > { %v4036_v50 = vadd.f32 %v4035_v5, %v15156_v40  ;;  %v4084_v18 = vpop.f32.mrf.mxu1  ;;  %4174 = vmatmul.bf16.vlgmr.msra.gmra.mxu3 %v15205_v42  ;;  %v3435_v36 = vadd.f32 %v3434_v11, %v3386_v12 }
 0x405   : > { %4364 = vmatpush.bf16.msrb.mxu3 %v10570_v33 }
 0x406   : > { %v15210_v3 = vadd.f32 %v4084_v18, %v4036_v50  ;;  %v3480_v1 = vmul.f32 0.2, %v3435_v36 }
 0x408   : > { %v3387_v23 = vpop.f32.mrf.mxu2 }
 0x409   : > { %v3388_v27 = vadd.f32 %v3387_v23, %v14930_v57  ;;  %v3544_v57 = vmax.f32 %v3435_v36, %v3480_v1  ;;  %v10559_v23 = vld [vmem:[%s18515_s4 + $0x1c8] sm:$0xf0] }
 0x40b   : > { %v3436_v0 = vpop.f32.mrf.mxu3  ;;  %v4038_v19 = vpop.f32.mrf.mxu0 }
 0x40c   : > { %v3437_v2 = vadd.f32 %v3436_v0, %v3388_v27  ;;  %v4039_v29 = vadd.f32 %v4038_v19, %v15156_v40  ;;  %v4087_v20 = vpop.f32.mrf.mxu1 }
 0x40d   : > { %4135 = vmatmul.bf16.gmra.mxu2 %v14697_v24 }
 0x40e   : > { %v3484_v16 = vmul.f32 0.2, %v3437_v2  ;;  %v15226_v22 = vadd.f32 %v4087_v20, %v4039_v29  ;;  %4233 = vmatmul.bf16.gmra.mxu0 %v18737_v48  ;;  %4282 = vmatmul.bf16.gmra.mxu1 %v18739_v58  ;;  %v12226_v48 = vld [vmem:[%s18515_s4 + $0x144] sm:$0xf]  ;;  %v10495_v58 = vld [vmem:[%s18515_s4 + $0x148] sm:$0xf0] }
 0x40f   : > { %v10498_v47 = vor.u32 %v12226_v48, %v10495_v58 }
 0x410   : > { %v3548_v56 = vmax.f32 %v3437_v2, %v3484_v16  ;;  %v3390_v28 = vpop.f32.mrf.mxu2 }
 0x411   : > { %v3391_v12 = vadd.f32 %v3390_v28, %v14946_v21  ;;  %v12242_v21 = vld [vmem:[%s18515_s4 + $0x1c4] sm:$0xf]  ;;  %4316 = vmatpush.bf16.msrb.mxu2 %v10498_v47 }
 0x412   : > { %v15231_v11 = vpack.c.bf16 %v3548_v56, %v3544_v57  ;;  %v10562_v27 = vor.u32 %v12242_v21, %v10559_v23  ;;  %v10551_v21 = vld [vmem:[%s18515_s4 + $0x1b8] sm:$0xf0] }
 0x413   : > { %v3439_v52 = vpop.f32.mrf.mxu3  ;;  %v4040_v5 = vpop.f32.mrf.mxu0 }
 0x414   : > { %v4041_v50 = vadd.f32 %v4040_v5, %v15156_v40  ;;  %v4089_v18 = vpop.f32.mrf.mxu1  ;;  %4179 = vmatmul.bf16.gmra.mxu3 %v15231_v11  ;;  %v3440_v17 = vadd.f32 %v3439_v52, %v3391_v12 }
 0x415   : > { %4365 = vmatpush.bf16.msrb.mxu3 %v10562_v27 }
 0x416   : > { %v15236_v49 = vadd.f32 %v4089_v18, %v4041_v50  ;;  %v3488_v33 = vmul.f32 0.2, %v3440_v17 }
 0x418   : > { %v3392_v36 = vpop.f32.mrf.mxu2 }
 0x419   : > { %v3393_v60 = vadd.f32 %v3392_v36, %v14955_v13  ;;  %v3552_v13 = vmax.f32 %v3440_v17, %v3488_v33 }
 0x41b   : > { %v3441_v41 = vpop.f32.mrf.mxu3  ;;  %v4043_v0 = vpop.f32.mrf.mxu0 }
 0x41c   : > { %v3442_v19 = vadd.f32 %v3441_v41, %v3393_v60  ;;  %v4044_v1 = vadd.f32 %v4043_v0, %v15156_v40  ;;  %v4092_v2 = vpop.f32.mrf.mxu1 }
 0x41d   : > { %4140 = vmatmul.bf16.gmra.mxu2 %v14739_v51 }
 0x41e   : > { %v3492_v29 = vmul.f32 0.2, %v3442_v19  ;;  %v15252_v20 = vadd.f32 %v4092_v2, %v4044_v1  ;;  %4238 = vmatmul.bf16.gmra.mxu0 %v18741_v35  ;;  %4287 = vmatmul.bf16.gmra.mxu1 %v18743_v54  ;;  %v12224_v35 = vld [vmem:[%s18515_s4 + $0x134] sm:$0xf]  ;;  %v10487_v54 = vld [vmem:[%s18515_s4 + $0x138] sm:$0xf0] }
 0x41f   : > { %v10490_v58 = vor.u32 %v12224_v35, %v10487_v54 }
 0x420   : > { %v3556_v16 = vmax.f32 %v3442_v19, %v3492_v29  ;;  %v3395_v57 = vpop.f32.mrf.mxu2 }
 0x421   : > { %v3396_v5 = vadd.f32 %v3395_v57, %v14971_v15  ;;  %v12240_v15 = vld [vmem:[%s18515_s4 + $0x1b4] sm:$0xf]  ;;  %4317 = vmatpush.bf16.msrb.mxu2 %v10490_v58 }
 0x422   : > { %v15257_v28 = vpack.c.bf16 %v3556_v16, %v3552_v13  ;;  %v10554_v23 = vor.u32 %v12240_v15, %v10551_v21  ;;  %v12222_v13 = vld [vmem:[%s18515_s4 + $0x124] sm:$0xf]  ;;  %v12220_v21 = vld [vmem:[%s18515_s4 + $0x114] sm:$0xf] }
 0x423   : > { %v3444_v56 = vpop.f32.mrf.mxu3  ;;  %v4045_v52 = vpop.f32.mrf.mxu0 }
 0x424   : > { %v4046_v12 = vadd.f32 %v4045_v52, %v15156_v40  ;;  %4184 = vmatmul.bf16.gmra.mxu3 %v15257_v28  ;;  %v4094_v50 = vpop.f32.mrf.mxu1  ;;  %v3445_v48 = vadd.f32 %v3444_v56, %v3396_v5 }
 0x425   : > { %4366 = vmatpush.bf16.msrb.mxu3 %v10554_v23 }
 0x426   : > { %v15262_v18 = vadd.f32 %v4094_v50, %v4046_v12  ;;  %v3496_v60 = vmul.f32 0.2, %v3445_v48 }
 0x428   : > { %v3397_v17 = vpop.f32.mrf.mxu2  ;;  %v3560_v0 = vmax.f32 %v3445_v48, %v3496_v60 }
 0x429   : > { %v3398_v36 = vadd.f32 %v3397_v17, %v14992_v39 }
 0x42b   : > { %v3446_v47 = vpop.f32.mrf.mxu3 }
 0x42c   : > { %v3447_v41 = vadd.f32 %v3446_v47, %v3398_v36  ;;  %v12236_v47 = vld [vmem:[%s18515_s4 + $0x194] sm:$0xf] }
 0x42d   : > { %4145 = vmatmul.bf16.gmra.mxu2 %v14805_v59 }
 0x42e   : > { %v3500_v27 = vmul.f32 0.2, %v3447_v41  ;;  %4243 = vmatmul.bf16.gmra.mxu0 %v18745_v63  ;;  %4292 = vmatmul.bf16.gmra.mxu1 %v18747_v31  ;;  %v10479_v63 = vld [vmem:[%s18515_s4 + $0x128] sm:$0xf0]  ;;  %v12238_v31 = vld [vmem:[%s18515_s4 + $0x1a4] sm:$0xf] }
 0x42f   : > { %v10482_v57 = vor.u32 %v12222_v13, %v10479_v63 }
 0x430   : > { %v3564_v33 = vmax.f32 %v3447_v41, %v3500_v27  ;;  %v3400_v19 = vpop.f32.mrf.mxu2  ;;  %v12218_v41 = vld [vmem:[%s18515_s4 + $0x104] sm:$0xf]  ;;  %v10463_v27 = vld [vmem:[%s18515_s4 + $0x108] sm:$0xf0] }
 0x431   : > { %v3401_v39 = vadd.f32 %v3400_v19, %v15032_v8  ;;  %v10543_v8 = vld [vmem:[%s18515_s4 + $0x1a8] sm:$0xf0]  ;;  %4318 = vmatpush.bf16.msrb.mxu2 %v10482_v57  ;;  %v10466_v19 = vor.u32 %v12218_v41, %v10463_v27 }
 0x432   : > { %v15280_v2 = vpack.c.bf16 %v3564_v33, %v3560_v0  ;;  %v10546_v5 = vor.u32 %v12238_v31, %v10543_v8  ;;  %v12234_v8 = vld [vmem:[%s18515_s4 + $0x184] sm:$0xf] }
 0x433   : > { %v3449_v1 = vpop.f32.mrf.mxu3 }
 0x434   : > { %4189 = vmatmul.bf16.gmra.mxu3 %v15280_v2  ;;  %v3450_v29 = vadd.f32 %v3449_v1, %v3401_v39 }
 0x435   : > { %4367 = vmatpush.bf16.msrb.mxu3 %v10546_v5 }
 0x436   : > { %v3504_v12 = vmul.f32 0.2, %v3450_v29 }
 0x438   : > { %v3402_v16 = vpop.f32.mrf.mxu2  ;;  %v3568_v35 = vmax.f32 %v3450_v29, %v3504_v12 }
 0x439   : > { %v3403_v56 = vadd.f32 %v3402_v16, %v15065_v10 }
 0x43b   : > { %v3451_v52 = vpop.f32.mrf.mxu3 }
 0x43c   : > { %v3452_v50 = vadd.f32 %v3451_v52, %v3403_v56  ;;  %v12265_v52 = vld [vmem:[%s18517_s6 + $0x74] sm:$0xf0] }
 0x43d   : > { %4150 = vmatmul.bf16.gmra.mxu2 %v14841_v46 }
 0x43e   : > { %v3508_v48 = vmul.f32 0.2, %v3452_v50  ;;  %4248 = vmatmul.bf16.gmra.mxu0 %v18749_v6  ;;  %4297 = vmatmul.bf16.gmra.mxu1 %v18751_v37  ;;  %v10471_v6 = vld [vmem:[%s18515_s4 + $0x118] sm:$0xf0] }
 0x43f   : > { %v10474_v36 = vor.u32 %v12220_v21, %v10471_v6  ;;  %v12261_v6 = vld [vmem:[%s18517_s6 + $0x54] sm:$0xf0] }
 0x440   : > { %v3572_v54 = vmax.f32 %v3452_v50, %v3508_v48  ;;  %v3405_v15 = vpop.f32.mrf.mxu2 }
 0x441   : > { %v3406_v10 = vadd.f32 %v3405_v15, %v15105_v30  ;;  %4319 = vmatpush.bf16.msrb.mxu2 %v10474_v36  ;;  %v10535_v30 = vld [vmem:[%s18515_s4 + $0x198] sm:$0xf0] }
 0x442   : > { %v15300_v58 = vpack.c.bf16 %v3572_v54, %v3568_v35  ;;  %v10538_v60 = vor.u32 %v12236_v47, %v10535_v30  ;;  %v10637_v35 = vld [vmem:[%s18517_s6 + $0x60] sm:$0xf]  ;;  %v12263_v54 = vld [vmem:[%s18517_s6 + $0x64] sm:$0xf0] }
 0x443   : > { %v3454_v17 = vpop.f32.mrf.mxu3 }
 0x444   : > { %4194 = vmatmul.bf16.gmra.mxu3 %v15300_v58  ;;  %v3455_v37 = vadd.f32 %v3454_v17, %v3406_v10  ;;  %v10638_v10 = vor.u32 %v12263_v54, %v10637_v35  ;;  %v12264_v35 = vld [vmem:[%s18517_s6 + $0x74] sm:$0xf]  ;;  %v10647_v54 = vld [vmem:[%s18517_s6 + $0x78] sm:$0xf0] }
 0x445   : > { %4368 = vmatpush.bf16.msrb.mxu3 %v10538_v60  ;;  %4320 = vmatpush.bf16.msrb.mxu2 %v10466_v19 }
 0x446   : > { %v3512_v1 = vmul.f32 0.2, %v3455_v37 }
 0x448   : > { %v3407_v23 = vpop.f32.mrf.mxu2  ;;  %v3576_v13 = vmax.f32 %v3455_v37, %v3512_v1 }
 0x449   : > { %v3408_v0 = vadd.f32 %v3407_v23, %v15132_v26 }
 0x44b   : > { %v3456_v33 = vpop.f32.mrf.mxu3 }
 0x44c   : > { %v3457_v39 = vadd.f32 %v3456_v33, %v3408_v0  ;;  %v10613_v0 = vld [vmem:[%s18517_s6 + $0x30] sm:$0xf]  ;;  %v12257_v33 = vld [vmem:[%s18517_s6 + $0x34] sm:$0xf0] }
 0x44d   : > { %4155 = vmatmul.bf16.gmra.mxu2 %v14853_v34  ;;  %v10614_v1 = vor.u32 %v12257_v33, %v10613_v0 }
 0x44e   : > { %v3516_v29 = vmul.f32 0.2, %v3457_v39  ;;  %4253 = vmatmul.bf16.gmra.mxu0 %v18753_v44  ;;  %4302 = vmatmul.bf16.gmra.mxu1 %v18755_v38  ;;  %v10527_v44 = vld [vmem:[%s18515_s4 + $0x188] sm:$0xf0]  ;;  %v10645_v38 = vld [vmem:[%s18517_s6 + $0x70] sm:$0xf] }
 0x44f   : > { %v10530_v56 = vor.u32 %v12234_v8, %v10527_v44  ;;  %v10646_v5 = vor.u32 %v12265_v52, %v10645_v38  ;;  %v12253_v44 = vld [vmem:[%s18517_s6 + $0x14] sm:$0xf0] }
 0x450   : > { %v3580_v63 = vmax.f32 %v3457_v39, %v3516_v29  ;;  %v3410_v31 = vpop.f32.mrf.mxu2 }
 0x451   : > { %v3411_v26 = vadd.f32 %v3410_v31, %v15142_v43  ;;  %4369 = vmatpush.bf16.msrb.mxu3 %v10530_v56  ;;  %4689 = vmatpush.bf16.msrb.mxu0 %v10646_v5  ;;  %v15388_v5 = vpop.f32.mrf.mxu0 }
 0x452   : > { %v15326_v57 = vpack.c.bf16 %v3580_v63, %v3576_v13  ;;  %v12255_v63 = vld [vmem:[%s18517_s6 + $0x24] sm:$0xf0] }
 0x453   : > { %v3459_v16 = vpop.f32.mrf.mxu3 }
 0x454   : > { %4199 = vmatmul.bf16.gmra.mxu3 %v15326_v57  ;;  %v3460_v43 = vadd.f32 %v3459_v16, %v3411_v26 }
 0x455   : > { %4690 = vmatpush.bf16.msrb.mxu0 %v10638_v10 }
 0x456   : > { %v3520_v15 = vmul.f32 0.2, %v3460_v43 }
 0x458   : > { %v3412_v12 = vpop.f32.mrf.mxu2  ;;  %v3584_v36 = vmax.f32 %v3460_v43, %v3520_v15  ;;  %v10650_v15 = vor.u32 %v12264_v35, %v10647_v54  ;;  %v10701_v54 = vld [vmem:[%s18517_s6 + $0xe0] sm:$0xf] }
 0x459   : > { %v3413_v50 = vadd.f32 %v3412_v12, %v15151_v62  ;;  %v10629_v62 = vld [vmem:[%s18517_s6 + $0x50] sm:$0xf]  ;;  %v15405_v10 = vpop.f32.mrf.mxu0 }
 0x45a   : > { %v10630_v47 = vor.u32 %v12261_v6, %v10629_v62  ;;  %4787 = vmatpush.bf16.msra.mxu2 %v10650_v15  ;;  %v10711_v62 = vld [vmem:[%s18517_s6 + $0xf8] sm:$0xf0] }
 0x45b   : > { %v3461_v48 = vpop.f32.mrf.mxu3 }
 0x45c   : > { %v3462_v17 = vadd.f32 %v3461_v48, %v3413_v50  ;;  %4691 = vmatpush.bf16.msrb.mxu0 %v10630_v47  ;;  %v12251_v50 = vld [vmem:[%s18517_s6 + $0x4] sm:$0xf0]  ;;  %v12262_v47 = vld [vmem:[%s18517_s6 + $0x64] sm:$0xf] }
 0x45d   : > { %4160 = vmatmul.bf16.gmra.mxu2 %v14880_v14 }
 0x45e   : > { %v3524_v21 = vmul.f32 0.2, %v3462_v17  ;;  %4258 = vmatmul.bf16.gmra.mxu0 %v18757_v45  ;;  %4307 = vmatmul.bf16.gmra.mxu1 %v18759_v55  ;;  %v10621_v45 = vld [vmem:[%s18517_s6 + $0x40] sm:$0xf]  ;;  %v12259_v55 = vld [vmem:[%s18517_s6 + $0x44] sm:$0xf0] }
 0x45f   : > { %v10622_v27 = vor.u32 %v12259_v55, %v10621_v45 }
 0x460   : > { %v3588_v37 = vmax.f32 %v3462_v17, %v3524_v21  ;;  %v3415_v30 = vpop.f32.mrf.mxu2  ;;  %v12280_v21 = vld [vmem:[%s18517_s6 + $0xf4] sm:$0xf] }
 0x461   : > { %v3416_v41 = vadd.f32 %v3415_v30, %v15169_v53  ;;  %4692 = vmatpush.bf16.msrb.mxu0 %v10622_v27  ;;  %v10605_v53 = vld [vmem:[%s18517_s6 + $0x20] sm:$0xf]  ;;  %v10714_v6 = vor.u32 %v12280_v21, %v10711_v62  ;;  %v10639_v30 = vld [vmem:[%s18517_s6 + $0x68] sm:$0xf0] }
 0x462   : > { %v15358_v60 = vpack.c.bf16 %v3588_v37, %v3584_v36  ;;  %v10606_v26 = vor.u32 %v12255_v63, %v10605_v53  ;;  %v15415_v37 = vpop.f32.mrf.mxu0  ;;  %v10642_v45 = vor.u32 %v12262_v47, %v10639_v30  ;;  %v10703_v27 = vld [vmem:[%s18517_s6 + $0xe8] sm:$0xf0] }
 0x463   : > { %v3464_v23 = vpop.f32.mrf.mxu3  ;;  %4836 = vmatpush.bf16.msra.mxu3 %v10714_v6 }
 0x464   : > { %4204 = vmatmul.bf16.gmra.mxu3 %v15358_v60  ;;  %v3465_v19 = vadd.f32 %v3464_v23, %v3416_v41  ;;  %4788 = vmatpush.bf16.msra.mxu2 %v10642_v45  ;;  %v12258_v45 = vld [vmem:[%s18517_s6 + $0x44] sm:$0xf] }
 0x465   : > { %4693 = vmatpush.bf16.msrb.mxu0 %v10614_v1 }
 0x466   : > { %v3528_v31 = vmul.f32 0.2, %v3465_v19 }
 0x468   : > { %v3417_v39 = vpop.f32.mrf.mxu2  ;;  %v3592_v56 = vmax.f32 %v3465_v19, %v3528_v31  ;;  %v10709_v19 = vld [vmem:[%s18517_s6 + $0xf0] sm:$0xf] }
 0x469   : > { %v3418_v29 = vadd.f32 %v3417_v39, %v15180_v32  ;;  %4694 = vmatpush.bf16.msrb.mxu0 %v10606_v26  ;;  %v10597_v32 = vld [vmem:[%s18517_s6 + $0x10] sm:$0xf] }
 0x46a   : > { %v10598_v52 = vor.u32 %v12253_v44, %v10597_v32  ;;  %v10631_v32 = vld [vmem:[%s18517_s6 + $0x58] sm:$0xf0] }
 0x46b   : > { %v3466_v13 = vpop.f32.mrf.mxu3 }
 0x46c   : > { %v3467_v16 = vadd.f32 %v3466_v13, %v3418_v29  ;;  %v15438_v29 = vpop.f32.mrf.mxu0 }
 0x46d   : > { %4321 = vmatmul.bf16.vlgmr.msrb.gmra.mxu2 %v14659_v61  ;;  %4695 = vmatpush.bf16.msrb.mxu0 %v10598_v52  ;;  %v10589_v61 = vld [vmem:[%s18517_s6] sm:$0xf] }
 0x46e   : > { %v3532_v8 = vmul.f32 0.2, %v3467_v16  ;;  %v10590_v48 = vor.u32 %v12251_v50, %v10589_v61  ;;  %v12276_v61 = vld [vmem:[%s18517_s6 + $0xd4] sm:$0xf]  ;;  %v10695_v50 = vld [vmem:[%s18517_s6 + $0xd8] sm:$0xf0] }
 0x470   : > { %v3596_v38 = vmax.f32 %v3467_v16, %v3532_v8  ;;  %v4126_v43 = vpop.f32.mrf.mxu2  ;;  %v15441_v16 = vpop.f32.mrf.mxu1  ;;  %v12260_v8 = vld [vmem:[%s18517_s6 + $0x54] sm:$0xf] }
 0x471   : > { %4696 = vmatpush.bf16.msrb.mxu0 %v10590_v48  ;;  %v10698_v48 = vor.u32 %v12276_v61, %v10695_v50 }
 0x472   : > { %v15390_v12 = vpack.c.bf16 %v3596_v38, %v3592_v56  ;;  %v10634_v56 = vor.u32 %v12260_v8, %v10631_v32 }
 0x474   : > { %4209 = vmatmul.bf16.gmra.mxu3 %v15390_v12  ;;  %4789 = vmatpush.bf16.msra.mxu2 %v10634_v56  ;;  %v15452_v52 = vpop.f32.mrf.mxu0  ;;  %v12256_v56 = vld [vmem:[%s18517_s6 + $0x34] sm:$0xf] }
 0x478   : > { %v4128_v17 = vpop.f32.mrf.mxu2  ;;  %v15469_v15 = vpop.f32.mrf.mxu1 }
 0x479   : > { %v4129_v33 = vadd.f32 %v4128_v17, %v15184_v4 }
 0x47c   : > { %v15471_v47 = vpop.f32.mrf.mxu0 }
 0x47d   : > { %4326 = vmatmul.bf16.gmra.mxu2 %v14679_v25  ;;  %v4127_v25 = vadd.f32 %v4126_v43, %v15175_v9  ;;  %v12281_v9 = vld [vmem:[%s18517_s6 + $0xf4] sm:$0xf0] }
 0x47e   : > { %v10710_v39 = vor.u32 %v12281_v9, %v10709_v19  ;;  %v10687_v19 = vld [vmem:[%s18517_s6 + $0xc8] sm:$0xf0] }
 0x480   : > { %v4131_v36 = vpop.f32.mrf.mxu2  ;;  %4738 = vmatpush.bf16.msrb.mxu1 %v10710_v39 }
 0x484   : > { %4370 = vmatmul.bf16.vlgmr.msrb.gmra.mxu3 %v15205_v42  ;;  %v12278_v42 = vld [vmem:[%s18517_s6 + $0xe4] sm:$0xf] }
 0x485   : > { %v10706_v0 = vor.u32 %v12278_v42, %v10703_v27  ;;  %v15483_v42 = vpop.f32.mrf.mxu1 }
 0x487   : > { %v4175_v23 = vpop.f32.mrf.mxu3  ;;  %4837 = vmatpush.bf16.msra.mxu3 %v10706_v0 }
 0x488   : > { %v4133_v55 = vpop.f32.mrf.mxu2  ;;  %v4176_v41 = vadd.f32 %v4175_v23, %v4127_v25 }
 0x489   : > { %v4134_v35 = vadd.f32 %v4133_v55, %v15210_v3  ;;  %v10623_v55 = vld [vmem:[%s18517_s6 + $0x48] sm:$0xf0] }
 0x48a   : > { %v4411_v13 = vmul.f32 0.2, %v4176_v41 }
 0x48b   : > { %4838 = vmatpush.bf16.msra.mxu3 %v10698_v48 }
 0x48c   : > { %v4443_v31 = vmax.f32 %v4176_v41, %v4411_v13  ;;  %v10626_v41 = vor.u32 %v12258_v45, %v10623_v55  ;;  %v12277_v13 = vld [vmem:[%s18517_s6 + $0xd4] sm:$0xf0] }
 0x48d   : > { %4331 = vmatmul.bf16.gmra.mxu2 %v14697_v24  ;;  %v15502_v32 = vpop.f32.mrf.mxu1 }
 0x48e   : > { %4790 = vmatpush.bf16.msra.mxu2 %v10626_v41  ;;  %v4049_v41 = vadd.f32 %v15388_v5, %v15156_v40 }
 0x48f   : > { %v4177_v1 = vpop.f32.mrf.mxu3 }
 0x490   : > { %v4178_v53 = vadd.f32 %v4177_v1, %v4129_v33  ;;  %v4136_v63 = vpop.f32.mrf.mxu2  ;;  %v12274_v33 = vld [vmem:[%s18517_s6 + $0xc4] sm:$0xf]  ;;  %v15492_v1 = vpop.f32.mrf.mxu0  ;;  %v4098_v5 = vadd.f32 %v15441_v16, %v4049_v41 }
 0x491   : > { %v10690_v9 = vor.u32 %v12274_v33, %v10687_v19  ;;  %v10599_v33 = vld [vmem:[%s18517_s6 + $0x18] sm:$0xf0] }
 0x492   : > { %v4413_v4 = vmul.f32 0.2, %v4178_v53 }
 0x493   : > { %4839 = vmatpush.bf16.msra.mxu3 %v10690_v9 }
 0x494   : > { %v4445_v24 = vmax.f32 %v4178_v53, %v4413_v4  ;;  %4375 = vmatmul.bf16.gmra.mxu3 %v15231_v11  ;;  %v4132_v11 = vadd.f32 %v4131_v36, %v15200_v7  ;;  %v12279_v7 = vld [vmem:[%s18517_s6 + $0xe4] sm:$0xf0] }
 0x495   : > { %v10702_v21 = vor.u32 %v12279_v7, %v10701_v54  ;;  %v10679_v54 = vld [vmem:[%s18517_s6 + $0xb8] sm:$0xf0]  ;;  %v15523_v7 = vpop.f32.mrf.mxu1 }
 0x496   : > { %v15443_v26 = vpack.c.bf16 %v4445_v24, %v4443_v31 }
 0x497   : > { %v4180_v44 = vpop.f32.mrf.mxu3  ;;  %4739 = vmatpush.bf16.msrb.mxu1 %v10702_v21 }
 0x498   : > { %4697 = vmatmul.bf16.vlgmr.msrb.gmra.mxu0 %v15443_v26  ;;  %v4138_v38 = vpop.f32.mrf.mxu2  ;;  %v4181_v43 = vadd.f32 %v4180_v44, %v4132_v11  ;;  %v15513_v61 = vpop.f32.mrf.mxu0 }
 0x499   : > { %v4139_v39 = vadd.f32 %v4138_v38, %v15236_v49  ;;  %v10615_v38 = vld [vmem:[%s18517_s6 + $0x38] sm:$0xf0] }
 0x49a   : > { %v4415_v62 = vmul.f32 0.2, %v4181_v43 }
 0x49d   : > { %4336 = vmatmul.bf16.gmra.mxu2 %v14739_v51  ;;  %v4447_v51 = vmax.f32 %v4181_v43, %v4415_v62  ;;  %v10618_v43 = vor.u32 %v12256_v56, %v10615_v38  ;;  %v12275_v62 = vld [vmem:[%s18517_s6 + $0xc4] sm:$0xf0]  ;;  %v10677_v56 = vld [vmem:[%s18517_s6 + $0xb0] sm:$0xf] }
 0x49f   : > { %v4182_v17 = vpop.f32.mrf.mxu3  ;;  %4791 = vmatpush.bf16.msra.mxu2 %v10618_v43 }
 0x4a0   : > { %v4183_v6 = vadd.f32 %v4182_v17, %v4134_v35  ;;  %v4141_v36 = vpop.f32.mrf.mxu2  ;;  %v12272_v35 = vld [vmem:[%s18517_s6 + $0xb4] sm:$0xf]  ;;  %v15539_v45 = vpop.f32.mrf.mxu0 }
 0x4a1   : > { %v10682_v17 = vor.u32 %v12272_v35, %v10679_v54 }
 0x4a2   : > { %v4417_v3 = vmul.f32 0.2, %v4183_v6 }
 0x4a3   : > { %4840 = vmatpush.bf16.msra.mxu3 %v10682_v17 }
 0x4a4   : > { %v4449_v30 = vmax.f32 %v4183_v6, %v4417_v3  ;;  %4380 = vmatmul.bf16.gmra.mxu3 %v15257_v28  ;;  %v4137_v28 = vadd.f32 %v4136_v63, %v15226_v22  ;;  %v10693_v22 = vld [vmem:[%s18517_s6 + $0xd0] sm:$0xf] }
 0x4a5   : > { %v10694_v63 = vor.u32 %v12277_v13, %v10693_v22 }
 0x4a6   : > { %v15474_v23 = vpack.c.bf16 %v4449_v30, %v4447_v51 }
 0x4a7   : > { %v4185_v25 = vpop.f32.mrf.mxu3  ;;  %4740 = vmatpush.bf16.msrb.mxu1 %v10694_v63  ;;  %v10591_v63 = vld [vmem:[%s18517_s6 + $0x8] sm:$0xf0] }
 0x4a8   : > { %4702 = vmatmul.bf16.gmra.mxu0 %v15474_v23  ;;  %v4143_v27 = vpop.f32.mrf.mxu2  ;;  %v4186_v0 = vadd.f32 %v4185_v25, %v4137_v28  ;;  %v15565_v16 = vpop.f32.mrf.mxu0 }
 0x4a9   : > { %v4144_v21 = vadd.f32 %v4143_v27, %v15262_v18  ;;  %v12254_v18 = vld [vmem:[%s18517_s6 + $0x24] sm:$0xf] }
 0x4aa   : > { %v4419_v4 = vmul.f32 0.2, %v4186_v0 }
 0x4ac   : > { %v4451_v49 = vmax.f32 %v4186_v0, %v4419_v4  ;;  %v12252_v0 = vld [vmem:[%s18517_s6 + $0x14] sm:$0xf] }
 0x4ad   : > { %4341 = vmatmul.bf16.gmra.mxu2 %v14805_v59  ;;  %v10602_v9 = vor.u32 %v12252_v0, %v10599_v33 }
 0x4af   : > { %v4187_v53 = vpop.f32.mrf.mxu3 }
 0x4b0   : > { %v4188_v31 = vadd.f32 %v4187_v53, %v4139_v39  ;;  %v4146_v24 = vpop.f32.mrf.mxu2  ;;  %v15552_v39 = vpop.f32.mrf.mxu1  ;;  %v12250_v53 = vld [vmem:[%s18517_s6 + $0x4] sm:$0xf] }
 0x4b1   : > { %v4147_v4 = vadd.f32 %v4146_v24, %v4098_v5  ;;  %v4059_v5 = vadd.f32 %v15452_v52, %v15156_v40 }
 0x4b2   : > { %v4421_v8 = vmul.f32 0.2, %v4188_v31 }
 0x4b4   : > { %v4453_v59 = vmax.f32 %v4188_v31, %v4421_v8  ;;  %4385 = vmatmul.bf16.gmra.mxu3 %v15280_v2  ;;  %v4142_v2 = vadd.f32 %v4141_v36, %v15252_v20  ;;  %v10685_v20 = vld [vmem:[%s18517_s6 + $0xc0] sm:$0xf]  ;;  %v10594_v31 = vor.u32 %v12250_v53, %v10591_v63 }
 0x4b5   : > { %v10686_v36 = vor.u32 %v12275_v62, %v10685_v20 }
 0x4b6   : > { %v15505_v44 = vpack.c.bf16 %v4453_v59, %v4451_v49  ;;  %v10671_v59 = vld [vmem:[%s18517_s6 + $0xa8] sm:$0xf0] }
 0x4b7   : > { %v4190_v11 = vpop.f32.mrf.mxu3  ;;  %4741 = vmatpush.bf16.msrb.mxu1 %v10686_v36 }
 0x4b8   : > { %4707 = vmatmul.bf16.gmra.mxu0 %v15505_v44  ;;  %v4148_v50 = vpop.f32.mrf.mxu2  ;;  %v4191_v48 = vadd.f32 %v4190_v11, %v4142_v2  ;;  %v15580_v35 = vpop.f32.mrf.mxu1 }
 0x4ba   : > { %v4423_v3 = vmul.f32 0.2, %v4191_v48 }
 0x4bc   : > { %v4455_v27 = vmax.f32 %v4191_v48, %v4423_v3  ;;  %v4056_v3 = vadd.f32 %v15438_v29, %v15156_v40  ;;  %v10669_v29 = vld [vmem:[%s18517_s6 + $0xa0] sm:$0xf] }
 0x4bd   : > { %4346 = vmatmul.bf16.gmra.mxu2 %v14841_v46  ;;  %v10607_v46 = vld [vmem:[%s18517_s6 + $0x28] sm:$0xf0] }
 0x4be   : > { %v10610_v25 = vor.u32 %v12254_v18, %v10607_v46 }
 0x4bf   : > { %v4192_v6 = vpop.f32.mrf.mxu3 }
 0x4c0   : > { %v4193_v51 = vadd.f32 %v4192_v6, %v4144_v21  ;;  %v4151_v30 = vpop.f32.mrf.mxu2  ;;  %4792 = vmatpush.bf16.msra.mxu2 %v10610_v25  ;;  %v4054_v21 = vadd.f32 %v15415_v37, %v15156_v40  ;;  %v15593_v46 = vpop.f32.mrf.mxu1  ;;  %v4105_v37 = vadd.f32 %v15502_v32, %v4056_v3 }
 0x4c2   : > { %v4425_v55 = vmul.f32 0.2, %v4193_v51  ;;  %v4103_v36 = vadd.f32 %v15483_v42, %v4054_v21  ;;  %v10663_v42 = vld [vmem:[%s18517_s6 + $0x98] sm:$0xf0]  ;;  %v12267_v21 = vld [vmem:[%s18517_s6 + $0x84] sm:$0xf0] }
 0x4c4   : > { %v4457_v28 = vmax.f32 %v4193_v51, %v4425_v55  ;;  %4390 = vmatmul.bf16.gmra.mxu3 %v15300_v58  ;;  %v4051_v58 = vadd.f32 %v15405_v10, %v15156_v40  ;;  %4793 = vmatpush.bf16.msra.mxu2 %v10602_v9  ;;  %v12270_v10 = vld [vmem:[%s18517_s6 + $0xa4] sm:$0xf]  ;;  %v4152_v18 = vadd.f32 %v4151_v30, %v4103_v36  ;;  %v12271_v30 = vld [vmem:[%s18517_s6 + $0xa4] sm:$0xf0] }
 0x4c5   : > { %v10674_v24 = vor.u32 %v12270_v10, %v10671_v59  ;;  %v10670_v32 = vor.u32 %v12271_v30, %v10669_v29 }
 0x4c6   : > { %v15550_v19 = vpack.c.bf16 %v4457_v28, %v4455_v27  ;;  %v4100_v8 = vadd.f32 %v15469_v15, %v4051_v58  ;;  %v12273_v15 = vld [vmem:[%s18517_s6 + $0xb4] sm:$0xf0] }
 0x4c7   : > { %v4195_v22 = vpop.f32.mrf.mxu3  ;;  %v10678_v11 = vor.u32 %v12273_v15, %v10677_v56  ;;  %4841 = vmatpush.bf16.msra.mxu3 %v10674_v24  ;;  %v12269_v24 = vld [vmem:[%s18517_s6 + $0x94] sm:$0xf0] }
 0x4c8   : > { %4712 = vmatmul.bf16.gmra.mxu0 %v15550_v19  ;;  %v4153_v13 = vpop.f32.mrf.mxu2  ;;  %v4196_v49 = vadd.f32 %v4195_v22, %v4147_v4  ;;  %4794 = vmatpush.bf16.msra.mxu2 %v10594_v31  ;;  %v4149_v38 = vadd.f32 %v4148_v50, %v4100_v8  ;;  %v15585_v50 = vpop.f32.mrf.mxu0  ;;  %v4108_v4 = vadd.f32 %v15523_v7, %v4059_v5  ;;  %v10655_v7 = vld [vmem:[%s18517_s6 + $0x88] sm:$0xf0] }
 0x4c9   : > { %4742 = vmatpush.bf16.msrb.mxu1 %v10678_v11  ;;  %v4154_v41 = vadd.f32 %v4153_v13, %v4105_v37  ;;  %v4273_v13 = vpop.f32.mrf.mxu1  ;;  %v4061_v31 = vadd.f32 %v15471_v47, %v15156_v40  ;;  %v10661_v47 = vld [vmem:[%s18517_s6 + $0x90] sm:$0xf]  ;;  %v4066_v37 = vadd.f32 %v15513_v61, %v15156_v40 }
 0x4ca   : > { %v4427_v2 = vmul.f32 0.2, %v4196_v49 }
 0x4cb   : > { %v4110_v52 = vadd.f32 %v15552_v39, %v4061_v31  ;;  %v10662_v39 = vor.u32 %v12269_v24, %v10661_v47 }
 0x4cc   : > { %v4459_v20 = vmax.f32 %v4196_v49, %v4427_v2 }
 0x4cd   : > { %4351 = vmatmul.bf16.gmra.mxu2 %v14853_v34  ;;  %4743 = vmatpush.bf16.msrb.mxu1 %v10670_v32 }
 0x4cf   : > { %v4197_v43 = vpop.f32.mrf.mxu3 }
 0x4d0   : > { %v4198_v48 = vadd.f32 %v4197_v43, %v4149_v38  ;;  %v4156_v54 = vpop.f32.mrf.mxu2  ;;  %v15609_v28 = vpop.f32.mrf.mxu0 }
 0x4d1   : > { %v4157_v10 = vadd.f32 %v4156_v54, %v4108_v4  ;;  %v4275_v38 = vpop.f32.mrf.mxu1  ;;  %4744 = vmatpush.bf16.msrb.mxu1 %v10662_v39 }
 0x4d2   : > { %v4429_v17 = vmul.f32 0.2, %v4198_v48 }
 0x4d4   : > { %v4461_v62 = vmax.f32 %v4198_v48, %v4429_v17  ;;  %4395 = vmatmul.bf16.gmra.mxu3 %v15326_v57  ;;  %v12268_v57 = vld [vmem:[%s18517_s6 + $0x94] sm:$0xf]  ;;  %v10653_v17 = vld [vmem:[%s18517_s6 + $0x80] sm:$0xf] }
 0x4d5   : > { %v10666_v25 = vor.u32 %v12268_v57, %v10663_v42  ;;  %v10654_v36 = vor.u32 %v12267_v21, %v10653_v17  ;;  %v4115_v42 = vadd.f32 %v15593_v46, %v4066_v37  ;;  %v12296_v17 = vld [vmem:[%s18519_s8 + $0x74] sm:$0xf] }
 0x4d6   : > { %v15587_v34 = vpack.c.bf16 %v4461_v62, %v4459_v20 }
 0x4d7   : > { %v4200_v6 = vpop.f32.mrf.mxu3  ;;  %4842 = vmatpush.bf16.msra.mxu3 %v10666_v25  ;;  %4745 = vmatpush.bf16.msrb.mxu1 %v10654_v36 }
 0x4d8   : > { %4717 = vmatmul.bf16.gmra.mxu0 %v15587_v34  ;;  %v4158_v51 = vpop.f32.mrf.mxu2  ;;  %v4201_v55 = vadd.f32 %v4200_v6, %v4152_v18  ;;  %v15620_v49 = vpop.f32.mrf.mxu0 }
 0x4d9   : > { %v4159_v15 = vadd.f32 %v4158_v51, %v4110_v52 }
 0x4da   : > { %v4431_v0 = vmul.f32 0.2, %v4201_v55 }
 0x4dc   : > { %v4463_v58 = vmax.f32 %v4201_v55, %v4431_v0  ;;  %v4278_v55 = vpop.f32.mrf.mxu1 }
 0x4dd   : > { %4356 = vmatmul.bf16.gmra.mxu2 %v14880_v14 }
 0x4df   : > { %v4202_v27 = vpop.f32.mrf.mxu3 }
 0x4e0   : > { %v4203_v33 = vadd.f32 %v4202_v27, %v4154_v41  ;;  %v4161_v9 = vpop.f32.mrf.mxu2  ;;  %v15644_v20 = vpop.f32.mrf.mxu0 }
 0x4e2   : > { %v4433_v22 = vmul.f32 0.2, %v4203_v33 }
 0x4e4   : > { %v4465_v53 = vmax.f32 %v4203_v33, %v4433_v22  ;;  %4400 = vmatmul.bf16.gmra.mxu3 %v15358_v60  ;;  %v12266_v60 = vld [vmem:[%s18517_s6 + $0x84] sm:$0xf]  ;;  %v4280_v0 = vpop.f32.mrf.mxu1 }
 0x4e5   : > { %v10658_v56 = vor.u32 %v12266_v60, %v10655_v7 }
 0x4e6   : > { %v15614_v63 = vpack.c.bf16 %v4465_v53, %v4463_v58 }
 0x4e7   : > { %v4205_v14 = vpop.f32.mrf.mxu3  ;;  %4843 = vmatpush.bf16.msra.mxu3 %v10658_v56 }
 0x4e8   : > { %4722 = vmatmul.bf16.gmra.mxu0 %v15614_v63  ;;  %v4163_v8 = vpop.f32.mrf.mxu2  ;;  %v4206_v59 = vadd.f32 %v4205_v14, %v4157_v10  ;;  %v15654_v25 = vpop.f32.mrf.mxu0 }
 0x4ea   : > { %v4435_v43 = vmul.f32 0.2, %v4206_v59 }
 0x4ec   : > { %v4467_v62 = vmax.f32 %v4206_v59, %v4435_v43  ;;  %v4283_v10 = vpop.f32.mrf.mxu1 }
 0x4ed   : > { %4795 = vmatmul.bf16.vlgmr.msra.gmra.mxu2 %v15443_v26  ;;  %v4064_v26 = vadd.f32 %v15492_v1, %v15156_v40 }
 0x4ef   : > { %v4207_v11 = vpop.f32.mrf.mxu3  ;;  %v4113_v18 = vadd.f32 %v15580_v35, %v4064_v26  ;;  %v12685_v35 = vld [vmem:[%s18516_s5] sm:$0x3] }
 0x4f0   : > { %v4208_v2 = vadd.f32 %v4207_v11, %v4159_v15  ;;  %v4322_v48 = vpop.f32.mrf.mxu2  ;;  %v15660_v41 = vperm.slane %v12685_v35, 1  ;;  %v15668_v53 = vpop.f32.mrf.mxu0 }
 0x4f1   : > { %v4162_v57 = vadd.f32 %v4161_v9, %v4113_v18 }
 0x4f2   : > { %v4437_v54 = vmul.f32 0.2, %v4208_v2  ;;  %v4225_v46 = vadd.f32 %v15539_v45, %v15660_v41  ;;  %v4227_v58 = vadd.f32 %v15565_v16, %v15660_v41  ;;  %v4230_v16 = vadd.f32 %v15585_v50, %v15660_v41  ;;  %v12297_v50 = vld [vmem:[%s18519_s8 + $0x74] sm:$0xf0] }
 0x4f4   : > { %v4469_v6 = vmax.f32 %v4208_v2, %v4437_v54  ;;  %4405 = vmatmul.bf16.gmra.mxu3 %v15390_v12  ;;  %v4164_v12 = vadd.f32 %v4163_v8, %v4115_v42  ;;  %v4274_v5 = vadd.f32 %v4273_v13, %v4225_v46  ;;  %v4276_v31 = vadd.f32 %v4275_v38, %v4227_v58  ;;  %v4285_v15 = vpop.f32.mrf.mxu1  ;;  %v10773_v54 = vld [vmem:[%s18519_s8 + $0x70] sm:$0xf]  ;;  %v12295_v46 = vld [vmem:[%s18519_s8 + $0x64] sm:$0xf0] }
 0x4f5   : > { %v4279_v11 = vadd.f32 %v4278_v55, %v4230_v16  ;;  %v4232_v38 = vadd.f32 %v15609_v28, %v15660_v41  ;;  %v10774_v21 = vor.u32 %v12297_v50, %v10773_v54  ;;  %v10775_v28 = vld [vmem:[%s18519_s8 + $0x78] sm:$0xf0] }
 0x4f6   : > { %v15647_v3 = vpack.c.bf16 %v4469_v6, %v4467_v62  ;;  %v4323_v4 = vadd.f32 %v4322_v48, %v4274_v5  ;;  %v10778_v62 = vor.u32 %v12296_v17, %v10775_v28 }
 0x4f7   : > { %v4210_v51 = vpop.f32.mrf.mxu3  ;;  %v4281_v2 = vadd.f32 %v4280_v0, %v4232_v38  ;;  %5107 = vmatpush.bf16.msra.mxu0 %v10774_v21  ;;  %v12292_v38 = vld [vmem:[%s18519_s8 + $0x54] sm:$0xf] }
 0x4f8   : > { %4727 = vmatmul.bf16.gmra.mxu0 %v15647_v3  ;;  %v4324_v1 = vpop.f32.mrf.mxu2  ;;  %v4211_v29 = vadd.f32 %v4210_v51, %v4162_v57  ;;  %5156 = vmatpush.bf16.msra.mxu1 %v10778_v62 }
 0x4f9   : > { %v4325_v52 = vadd.f32 %v4324_v1, %v4276_v31  ;;  %v4235_v1 = vadd.f32 %v15620_v49, %v15660_v41  ;;  %v10765_v49 = vld [vmem:[%s18519_s8 + $0x60] sm:$0xf] }
 0x4fa   : > { %v4439_v40 = vmul.f32 0.2, %v4211_v29 }
 0x4fb   : > { %v4284_v35 = vadd.f32 %v4283_v10, %v4235_v1 }
 0x4fc   : > { %v4471_v33 = vmax.f32 %v4211_v29, %v4439_v40  ;;  %v4288_v18 = vpop.f32.mrf.mxu1  ;;  %v4244_v29 = vpop.f32.mrf.mxu0 }
 0x4fd   : > { %4800 = vmatmul.bf16.gmra.mxu2 %v15474_v23  ;;  %v4245_v62 = vadd.f32 %v4244_v29, %v15660_v41  ;;  %v12291_v29 = vld [vmem:[%s18519_s8 + $0x44] sm:$0xf0] }
 0x4ff   : > { %v4212_v30 = vpop.f32.mrf.mxu3 }
 0x500   : > { %v4213_v61 = vadd.f32 %v4212_v30, %v4164_v12  ;;  %v4327_v32 = vpop.f32.mrf.mxu2 }
 0x501   : > { %v4328_v43 = vadd.f32 %v4327_v32, %v4279_v11  ;;  %v12293_v11 = vld [vmem:[%s18519_s8 + $0x54] sm:$0xf0] }
 0x502   : > { %v4441_v27 = vmul.f32 0.2, %v4213_v61 }
 0x504   : > { %v4473_v9 = vmax.f32 %v4213_v61, %v4441_v27  ;;  %v4290_v32 = vpop.f32.mrf.mxu1  ;;  %v4246_v58 = vpop.f32.mrf.mxu0 }
 0x506   : > { %v15664_v22 = vpack.c.bf16 %v4473_v9, %v4471_v33  ;;  %v12294_v33 = vld [vmem:[%s18519_s8 + $0x64] sm:$0xf]  ;;  %v10767_v9 = vld [vmem:[%s18519_s8 + $0x68] sm:$0xf0] }
 0x507   : > { %v4371_v23 = vpop.f32.mrf.mxu3  ;;  %v10770_v5 = vor.u32 %v12294_v33, %v10767_v9 }
 0x508   : > { %4732 = vmatmul.bf16.gmra.mxu0 %v15664_v22  ;;  %v4329_v14 = vpop.f32.mrf.mxu2  ;;  %v4372_v8 = vadd.f32 %v4371_v23, %v4323_v4 }
 0x509   : > { %v4330_v26 = vadd.f32 %v4329_v14, %v4281_v2  ;;  %5157 = vmatpush.bf16.msra.mxu1 %v10770_v5 }
 0x50a   : > { %v4412_v59 = vmul.f32 0.2, %v4372_v8 }
 0x50c   : > { %v4444_v47 = vmax.f32 %v4372_v8, %v4412_v59 }
 0x50d   : > { %4805 = vmatmul.bf16.gmra.mxu2 %v15505_v44 }
 0x50f   : > { %v4373_v45 = vpop.f32.mrf.mxu3 }
 0x510   : > { %v4374_v60 = vadd.f32 %v4373_v45, %v4325_v52  ;;  %v4332_v7 = vpop.f32.mrf.mxu2  ;;  %v4240_v52 = vadd.f32 %v15654_v25, %v15660_v41  ;;  %v10757_v25 = vld [vmem:[%s18519_s8 + $0x50] sm:$0xf] }
 0x511   : > { %v4333_v61 = vadd.f32 %v4332_v7, %v4284_v35  ;;  %v12290_v35 = vld [vmem:[%s18519_s8 + $0x44] sm:$0xf] }
 0x512   : > { %v4414_v13 = vmul.f32 0.2, %v4374_v60  ;;  %v4289_v16 = vadd.f32 %v4288_v18, %v4240_v52 }
 0x514   : > { %v4446_v56 = vmax.f32 %v4374_v60, %v4414_v13  ;;  %v4293_v60 = vpop.f32.mrf.mxu1 }
 0x516   : > { %v4476_v24 = vpack.c.bf16 %v4446_v56, %v4444_v47  ;;  %v4249_v47 = vpop.f32.mrf.mxu0 }
 0x517   : > { %v4376_v39 = vpop.f32.mrf.mxu3 }
 0x518   : > { %4746 = vmatmul.bf16.vlgmr.msrb.gmra.mxu1 %v4476_v24  ;;  %4844 = vmatmul.bf16.vlgmr.msra.gmra.mxu3 %v4476_v24  ;;  %v4334_v44 = vpop.f32.mrf.mxu2  ;;  %v4377_v48 = vadd.f32 %v4376_v39, %v4328_v43 }
 0x51a   : > { %v4416_v36 = vmul.f32 0.2, %v4377_v48 }
 0x51c   : > { %v4448_v57 = vmax.f32 %v4377_v48, %v4416_v36  ;;  %v4295_v48 = vpop.f32.mrf.mxu1 }
 0x51d   : > { %4810 = vmatmul.bf16.gmra.mxu2 %v15550_v19  ;;  %v4237_v19 = vadd.f32 %v15644_v20, %v15660_v41  ;;  %v10766_v20 = vor.u32 %v12295_v46, %v10765_v49 }
 0x51f   : > { %v4378_v6 = vpop.f32.mrf.mxu3  ;;  %v4286_v27 = vadd.f32 %v4285_v15, %v4237_v19  ;;  %5108 = vmatpush.bf16.msra.mxu0 %v10766_v20 }
 0x520   : > { %v4379_v51 = vadd.f32 %v4378_v6, %v4330_v26  ;;  %v4337_v37 = vpop.f32.mrf.mxu2  ;;  %v4251_v26 = vpop.f32.mrf.mxu0 }
 0x521   : > { %v4335_v23 = vadd.f32 %v4334_v44, %v4286_v27  ;;  %v4338_v24 = vadd.f32 %v4337_v37, %v4289_v16  ;;  %v10759_v44 = vld [vmem:[%s18519_s8 + $0x58] sm:$0xf0]  ;;  %v4294_v37 = vadd.f32 %v4293_v60, %v4245_v62  ;;  %v10741_v60 = vld [vmem:[%s18519_s8 + $0x30] sm:$0xf] }
 0x522   : > { %v4418_v55 = vmul.f32 0.2, %v4379_v51  ;;  %v10762_v2 = vor.u32 %v12292_v38, %v10759_v44 }
 0x524   : > { %v4450_v42 = vmax.f32 %v4379_v51, %v4418_v55  ;;  %5158 = vmatpush.bf16.msra.mxu1 %v10762_v2  ;;  %v4247_v55 = vadd.f32 %v4246_v58, %v15660_v41 }
 0x526   : > { %v4478_v12 = vpack.c.bf16 %v4450_v42, %v4448_v57  ;;  %v4296_v42 = vadd.f32 %v4295_v48, %v4247_v55 }
 0x527   : > { %v4381_v30 = vpop.f32.mrf.mxu3 }
 0x528   : > { %4751 = vmatmul.bf16.gmra.mxu1 %v4478_v12  ;;  %4849 = vmatmul.bf16.gmra.mxu3 %v4478_v12  ;;  %v4339_v40 = vpop.f32.mrf.mxu2  ;;  %v4382_v0 = vadd.f32 %v4381_v30, %v4333_v61  ;;  %v10749_v30 = vld [vmem:[%s18519_s8 + $0x40] sm:$0xf]  ;;  %v4254_v19 = vpop.f32.mrf.mxu0  ;;  %v10751_v61 = vld [vmem:[%s18519_s8 + $0x48] sm:$0xf0] }
 0x529   : > { %v10754_v27 = vor.u32 %v12290_v35, %v10751_v61 }
 0x52a   : > { %v4420_v4 = vmul.f32 0.2, %v4382_v0 }
 0x52b   : > { %5159 = vmatpush.bf16.msra.mxu1 %v10754_v27 }
 0x52c   : > { %v4452_v45 = vmax.f32 %v4382_v0, %v4420_v4 }
 0x52d   : > { %4815 = vmatmul.bf16.gmra.mxu2 %v15587_v34  ;;  %v4242_v34 = vadd.f32 %v15668_v53, %v15660_v41  ;;  %v10758_v53 = vor.u32 %v12293_v11, %v10757_v25 }
 0x52f   : > { %v4383_v14 = vpop.f32.mrf.mxu3  ;;  %v4291_v15 = vadd.f32 %v4290_v32, %v4242_v34  ;;  %5109 = vmatpush.bf16.msra.mxu0 %v10758_v53  ;;  %v4255_v53 = vadd.f32 %v4254_v19, %v15660_v41 }
 0x530   : > { %v4384_v31 = vadd.f32 %v4383_v14, %v4335_v23  ;;  %v4342_v8 = vpop.f32.mrf.mxu2  ;;  %v4250_v23 = vadd.f32 %v4249_v47, %v15660_v41  ;;  %v4256_v4 = vpop.f32.mrf.mxu0  ;;  %v10743_v47 = vld [vmem:[%s18519_s8 + $0x38] sm:$0xf0] }
 0x531   : > { %v4340_v43 = vadd.f32 %v4339_v40, %v4291_v15  ;;  %v4343_v57 = vadd.f32 %v4342_v8, %v4294_v37  ;;  %v10750_v40 = vor.u32 %v12291_v29, %v10749_v30 }
 0x532   : > { %v4422_v10 = vmul.f32 0.2, %v4384_v31 }
 0x533   : > { %5110 = vmatpush.bf16.msra.mxu0 %v10750_v40 }
 0x534   : > { %v4454_v59 = vmax.f32 %v4384_v31, %v4422_v10  ;;  %v4252_v10 = vadd.f32 %v4251_v26, %v15660_v41  ;;  %v4257_v26 = vadd.f32 %v4256_v4, %v15660_v41 }
 0x536   : > { %v4480_v7 = vpack.c.bf16 %v4454_v59, %v4452_v45 }
 0x537   : > { %v4386_v13 = vpop.f32.mrf.mxu3 }
 0x538   : > { %4756 = vmatmul.bf16.gmra.mxu1 %v4480_v7  ;;  %4854 = vmatmul.bf16.gmra.mxu3 %v4480_v7  ;;  %v4344_v56 = vpop.f32.mrf.mxu2  ;;  %v4387_v39 = vadd.f32 %v4386_v13, %v4338_v24  ;;  %v12289_v7 = vld [vmem:[%s18519_s8 + $0x34] sm:$0xf0]  ;;  %v12288_v13 = vld [vmem:[%s18519_s8 + $0x34] sm:$0xf]  ;;  %v4259_v11 = vpop.f32.mrf.mxu0 }
 0x539   : > { %v4345_v32 = vadd.f32 %v4344_v56, %v4296_v42  ;;  %v10742_v34 = vor.u32 %v12289_v7, %v10741_v60  ;;  %v10746_v24 = vor.u32 %v12288_v13, %v10743_v47  ;;  %v4260_v19 = vadd.f32 %v4259_v11, %v15660_v41  ;;  %v4523_v47 = vld [vmem:[%s18518_s7] sm:$0x3]  ;;  %v12282_v11 = vld [vmem:[%s18519_s8 + $0x4] sm:$0xf] }
 0x53a   : > { %v4424_v50 = vmul.f32 0.2, %v4387_v39 }
 0x53b   : > { %5111 = vmatpush.bf16.msra.mxu0 %v10742_v34  ;;  %5160 = vmatpush.bf16.msra.mxu1 %v10746_v24  ;;  %v15784_v24 = vperm.slane %v4523_v47, 0 }
 0x53c   : > { %v4456_v6 = vmax.f32 %v4387_v39, %v4424_v50 }
 0x53d   : > { %4820 = vmatmul.bf16.gmra.mxu2 %v15614_v63  ;;  %v4298_v63 = vpop.f32.mrf.mxu1 }
 0x53e   : > { %v4299_v8 = vadd.f32 %v4298_v63, %v4250_v23 }
 0x53f   : > { %v4388_v54 = vpop.f32.mrf.mxu3 }
 0x540   : > { %v4389_v17 = vadd.f32 %v4388_v54, %v4340_v43  ;;  %v4347_v21 = vpop.f32.mrf.mxu2  ;;  %v10733_v54 = vld [vmem:[%s18519_s8 + $0x20] sm:$0xf] }
 0x542   : > { %v4426_v28 = vmul.f32 0.2, %v4389_v17 }
 0x544   : > { %v4458_v36 = vmax.f32 %v4389_v17, %v4426_v28 }
 0x545   : > { %v4300_v9 = vpop.f32.mrf.mxu1 }
 0x546   : > { %v4482_v51 = vpack.c.bf16 %v4458_v36, %v4456_v6  ;;  %v4301_v45 = vadd.f32 %v4300_v9, %v4252_v10  ;;  %v12286_v6 = vld [vmem:[%s18519_s8 + $0x24] sm:$0xf]  ;;  %v10735_v36 = vld [vmem:[%s18519_s8 + $0x28] sm:$0xf0] }
 0x547   : > { %v4391_v18 = vpop.f32.mrf.mxu3 }
 0x548   : > { %4761 = vmatmul.bf16.gmra.mxu1 %v4482_v51  ;;  %4859 = vmatmul.bf16.gmra.mxu3 %v4482_v51  ;;  %v4349_v1 = vpop.f32.mrf.mxu2  ;;  %v4392_v12 = vadd.f32 %v4391_v18, %v4343_v57  ;;  %v4261_v51 = vpop.f32.mrf.mxu0  ;;  %v10738_v18 = vor.u32 %v12286_v6, %v10735_v36 }
 0x549   : > { %v4350_v56 = vadd.f32 %v4349_v1, %v4301_v45 }
 0x54a   : > { %v4428_v49 = vmul.f32 0.2, %v4392_v12  ;;  %5161 = vmatpush.bf16.msra.mxu1 %v10738_v18 }
 0x54c   : > { %v4460_v5 = vmax.f32 %v4392_v12, %v4428_v49  ;;  %v4262_v49 = vadd.f32 %v4261_v51, %v15660_v41  ;;  %v10727_v41 = vld [vmem:[%s18519_s8 + $0x18] sm:$0xf0] }
 0x54d   : > { %4825 = vmatmul.bf16.gmra.mxu2 %v15647_v3  ;;  %v4348_v3 = vadd.f32 %v4347_v21, %v4299_v8  ;;  %v4303_v16 = vpop.f32.mrf.mxu1 }
 0x54e   : > { %v4304_v28 = vadd.f32 %v4303_v16, %v4255_v53  ;;  %v10719_v53 = vld [vmem:[%s18519_s8 + $0x8] sm:$0xf0] }
 0x54f   : > { %v4393_v0 = vpop.f32.mrf.mxu3 }
 0x550   : > { %v4394_v46 = vadd.f32 %v4393_v0, %v4345_v32  ;;  %v4352_v33 = vpop.f32.mrf.mxu2  ;;  %v4698_v35 = vpop.f32.mrf.mxu0 }
 0x551   : > { %v4353_v62 = vadd.f32 %v4352_v33, %v4304_v28  ;;  %v12285_v33 = vld [vmem:[%s18519_s8 + $0x14] sm:$0xf0] }
 0x552   : > { %v4430_v20 = vmul.f32 0.2, %v4394_v46 }
 0x554   : > { %v4462_v58 = vmax.f32 %v4394_v46, %v4430_v20  ;;  %v10725_v46 = vld [vmem:[%s18519_s8 + $0x10] sm:$0xf] }
 0x555   : > { %v4305_v50 = vpop.f32.mrf.mxu1  ;;  %v10726_v9 = vor.u32 %v12285_v33, %v10725_v46  ;;  %v12360_v33 = vld [vmem:[%s18521_s10 + $0x1ec] sm:$0xf0] }
 0x556   : > { %v4484_v14 = vpack.c.bf16 %v4462_v58, %v4460_v5  ;;  %v4306_v37 = vadd.f32 %v4305_v50, %v4257_v26  ;;  %v12284_v5 = vld [vmem:[%s18519_s8 + $0x14] sm:$0xf] }
 0x557   : > { %v4396_v31 = vpop.f32.mrf.mxu3 }
 0x558   : > { %4766 = vmatmul.bf16.gmra.mxu1 %v4484_v14  ;;  %4864 = vmatmul.bf16.gmra.mxu3 %v4484_v14  ;;  %v4354_v52 = vpop.f32.mrf.mxu2  ;;  %v4397_v59 = vadd.f32 %v4396_v31, %v4348_v3  ;;  %v10730_v14 = vor.u32 %v12284_v5, %v10727_v41  ;;  %v4700_v8 = vpop.f32.mrf.mxu0 }
 0x559   : > { %v4355_v63 = vadd.f32 %v4354_v52, %v4306_v37  ;;  %v4701_v28 = vadd.f32 %v4700_v8, %v15784_v24 }
 0x55a   : > { %v4432_v39 = vmul.f32 0.2, %v4397_v59  ;;  %5162 = vmatpush.bf16.msra.mxu1 %v10730_v14 }
 0x55c   : > { %v4464_v44 = vmax.f32 %v4397_v59, %v4432_v39  ;;  %v10717_v39 = vld [vmem:[%s18519_s8] sm:$0xf] }
 0x55d   : > { %4830 = vmatmul.bf16.gmra.mxu2 %v15664_v22  ;;  %v12287_v22 = vld [vmem:[%s18519_s8 + $0x24] sm:$0xf0]  ;;  %v4308_v30 = vpop.f32.mrf.mxu1 }
 0x55e   : > { %v10734_v21 = vor.u32 %v12287_v22, %v10733_v54  ;;  %v4309_v0 = vadd.f32 %v4308_v30, %v4260_v19 }
 0x55f   : > { %v4398_v15 = vpop.f32.mrf.mxu3 }
 0x560   : > { %v4399_v25 = vadd.f32 %v4398_v15, %v4350_v56  ;;  %v4357_v2 = vpop.f32.mrf.mxu2  ;;  %5112 = vmatpush.bf16.msra.mxu0 %v10734_v21  ;;  %v4703_v34 = vpop.f32.mrf.mxu0 }
 0x561   : > { %v4358_v23 = vadd.f32 %v4357_v2, %v4309_v0 }
 0x562   : > { %v4434_v38 = vmul.f32 0.2, %v4399_v25 }
 0x564   : > { %v4466_v43 = vmax.f32 %v4399_v25, %v4434_v38  ;;  %5113 = vmatpush.bf16.msra.mxu0 %v10726_v9  ;;  %v12283_v25 = vld [vmem:[%s18519_s8 + $0x4] sm:$0xf0] }
 0x565   : > { %v4310_v58 = vpop.f32.mrf.mxu1  ;;  %v10718_v38 = vor.u32 %v12283_v25, %v10717_v39 }
 0x566   : > { %v4486_v48 = vpack.c.bf16 %v4466_v43, %v4464_v44  ;;  %v4311_v4 = vadd.f32 %v4310_v58, %v4262_v49  ;;  %v4699_v44 = vadd.f32 %v4698_v35, %v15784_v24  ;;  %v10722_v43 = vor.u32 %v12282_v11, %v10719_v53 }
 0x567   : > { %v4401_v17 = vpop.f32.mrf.mxu3 }
 0x568   : > { %4771 = vmatmul.bf16.gmra.mxu1 %v4486_v48  ;;  %4869 = vmatmul.bf16.gmra.mxu3 %v4486_v48  ;;  %v4402_v55 = vadd.f32 %v4401_v17, %v4353_v62  ;;  %v4359_v1 = vpop.f32.mrf.mxu2  ;;  %v4705_v15 = vpop.f32.mrf.mxu0  ;;  %v15805_v48 = vperm.slane %v4523_v47, 1 }
 0x569   : > { %v4360_v10 = vadd.f32 %v4359_v1, %v4311_v4  ;;  %5114 = vmatpush.bf16.msra.mxu0 %v10718_v38  ;;  %5163 = vmatpush.bf16.msra.mxu1 %v10722_v43  ;;  %v4706_v9 = vadd.f32 %v4705_v15, %v15784_v24 }
 0x56a   : > { %v4436_v42 = vmul.f32 0.2, %v4402_v55 }
 0x56c   : > { %v4468_v40 = vmax.f32 %v4402_v55, %v4436_v42 }
 0x56f   : > { %v4403_v57 = vpop.f32.mrf.mxu3 }
 0x570   : > { %v4404_v12 = vadd.f32 %v4403_v57, %v4355_v63  ;;  %v4796_v20 = vpop.f32.mrf.mxu2  ;;  %v4708_v17 = vpop.f32.mrf.mxu0  ;;  %v4704_v63 = vadd.f32 %v4703_v34, %v15784_v24 }
 0x571   : > { %v4797_v50 = vadd.f32 %v4796_v20, %v15805_v48  ;;  %v4709_v15 = vadd.f32 %v4708_v17, %v15784_v24  ;;  %v10877_v17 = vld [vmem:[%s18521_s10 + $0xc0] sm:$0xf] }
 0x572   : > { %v4438_v29 = vmul.f32 0.2, %v4404_v12 }
 0x574   : > { %v4470_v61 = vmax.f32 %v4404_v12, %v4438_v29  ;;  %v12587_v29 = vld [vmem:[%s15822_s29] sm:$0xff]  }
 0x575   : > { %v12588_v0 = vunpack.c.l.bf16 %v12587_v29  ;;  %v12589_v41 = vunpack.c.h.bf16 %v12587_v29 }
 0x576   : > { %v4488_v32 = vpack.c.bf16 %v4470_v61, %v4468_v40  ;;  %v10893_v40 = vld [vmem:[%s18521_s10 + $0xe0] sm:$0xf]  ;;  %v12328_v61 = vld [vmem:[%s18521_s10 + $0xec] sm:$0xf0] }
 0x577   : > { %v4406_v27 = vpop.f32.mrf.mxu3  ;;  %v10894_v46 = vor.u32 %v12328_v61, %v10893_v40 }
 0x578   : > { %4776 = vmatmul.bf16.gmra.mxu1 %v4488_v32  ;;  %4874 = vmatmul.bf16.gmra.mxu3 %v4488_v32  ;;  %v4407_v31 = vadd.f32 %v4406_v27, %v4358_v23  ;;  %v4798_v60 = vpop.f32.mrf.mxu2  ;;  %v15817_v57 = vpop.f32.mrf.mxu0  ;;  %v11021_v32 = vld [vmem:[%s18521_s10 + $0x1e0] sm:$0xf] }
 0x579   : > { %v4799_v18 = vadd.f32 %v4798_v60, %v15805_v48  ;;  %v11022_v5 = vor.u32 %v12360_v33, %v11021_v32  ;;  %5679 = vmatpush.bf16.msrb.mxu2 %v10894_v46  ;;  %v10895_v60 = vld [vmem:[%s18521_s10 + $0xf0] sm:$0xf0]  ;;  %v12322_v32 = vld [vmem:[%s18521_s10 + $0xc4] sm:$0xf] }
 0x57a   : > { %v4440_v52 = vmul.f32 0.2, %v4407_v31 }
 0x57b   : > { %5728 = vmatpush.bf16.msrb.mxu3 %v11022_v5 }
 0x57c   : > { %v4472_v7 = vmax.f32 %v4407_v31, %v4440_v52 }
 0x57f   : > { %v4408_v3 = vpop.f32.mrf.mxu3 }
 0x580   : > { %v4409_v45 = vadd.f32 %v4408_v3, %v4360_v10  ;;  %v4801_v56 = vpop.f32.mrf.mxu2  ;;  %v15849_v31 = vpop.f32.mrf.mxu0 }
 0x581   : > { %v4802_v19 = vadd.f32 %v4801_v56, %v15805_v48  ;;  %v11023_v56 = vld [vmem:[%s18521_s10 + $0x1f0] sm:$0xf0]  ;;  %v4714_v5 = vadd.f32 %v15849_v31, %v15784_v24 }
 0x582   : > { %v4442_v59 = vmul.f32 0.2, %v4409_v45 }
 0x584   : > { %v4474_v13 = vmax.f32 %v4409_v45, %v4442_v59  ;;  %v12326_v59 = vld [vmem:[%s18521_s10 + $0xe4] sm:$0xf] }
 0x585   : > { %v10898_v47 = vor.u32 %v12326_v59, %v10895_v60  ;;  %v12320_v59 = vld [vmem:[%s18521_s10 + $0xac] sm:$0xf0]  ;;  %v10989_v60 = vld [vmem:[%s18521_s10 + $0x1a0] sm:$0xf] }
 0x586   : > { %v4490_v16 = vpack.c.bf16 %v4474_v13, %v4472_v7  ;;  %v12358_v7 = vld [vmem:[%s18521_s10 + $0x1e4] sm:$0xf] }
 0x587   : > { %v11026_v25 = vor.u32 %v12358_v7, %v11023_v56  ;;  %5777 = vmatpush.bf16.msrb.mxu0 %v10898_v47 }
 0x588   : > { %4781 = vmatmul.bf16.gmra.mxu1 %v4490_v16  ;;  %4879 = vmatmul.bf16.gmra.mxu3 %v4490_v16  ;;  %v4803_v22 = vpop.f32.mrf.mxu2 }
 0x589   : > { %v4804_v45 = vadd.f32 %v4803_v22, %v15805_v48  ;;  %5826 = vmatpush.bf16.msrb.mxu1 %v11026_v25  ;;  %v15875_v22 = vpop.f32.mrf.mxu0 }
 0x58a   : > { %v4716_v56 = vadd.f32 %v15875_v22, %v15784_v24  ;;  %v12318_v22 = vld [vmem:[%s18521_s10 + $0xa4] sm:$0xf] }
 0x590   : > { %v15812_v51 = vpop.f32.mrf.mxu2 }
 0x591   : > { %v4718_v46 = vpop.f32.mrf.mxu0 }
 0x595   : > { %v4747_v2 = vpop.f32.mrf.mxu1 }
 0x596   : > { %v4748_v54 = vadd.f32 %v4747_v2, %v4699_v44 }
 0x598   : > { %9139 = vst [vmem:[%s15803_s16] sm:$0xff] %v4748_v54  ;;  %v15840_v27 = vpop.f32.mrf.mxu2 }
 0x599   : > { %v4720_v25 = vpop.f32.mrf.mxu0 }
 0x59b   : > { %v4845_v21 = vpop.f32.mrf.mxu3 }
 0x59c   : > { %v4846_v26 = vadd.f32 %v4845_v21, %v4797_v50  ;;  %v4807_v50 = vadd.f32 %v15812_v51, %v15805_v48  ;;  %v12324_v21 = vld [vmem:[%s18521_s10 + $0xcc] sm:$0xf0] }
 0x59d   : > { %v4749_v62 = vpop.f32.mrf.mxu1 }
 0x59e   : > { %v4885_v6 = vmul.f32 0.5, %v4846_v26  ;;  %9140 = vst [vmem:[%s15803_s16 + $0x8] sm:$0xff] %v4846_v26  ;;  %v4750_v36 = vadd.f32 %v4749_v62, %v4701_v28  ;;  %v11005_v28 = vld [vmem:[%s18521_s10 + $0x1c0] sm:$0xf] }
 0x5a0   : > { %9141 = vst [vmem:[%s15803_s16 + $0x10] sm:$0xff] %v4750_v36  ;;  %v4901_v37 = vmul.f32 1.442695, %v4885_v6  ;;  %v15867_v11 = vpop.f32.mrf.mxu2  ;;  %v10878_v6 = vor.u32 %v12324_v21, %v10877_v17 }
 0x5a1   : > { %v4812_v31 = vadd.f32 %v15867_v11, %v15805_v48 }
 0x5a2   : > { %12651 = vpow2.f32 %v4901_v37  ;;  %5680 = vmatpush.bf16.msrb.mxu2 %v10878_v6 }
 0x5a3   : > { %v4847_v55 = vpop.f32.mrf.mxu3 }
 0x5a4   : > { %v4848_v1 = vadd.f32 %v4847_v55, %v4799_v18  ;;  %v4711_v18 = vadd.f32 %v15817_v57, %v15784_v24  ;;  %v4809_v57 = vadd.f32 %v15840_v27, %v15805_v48 }
 0x5a5   : > { %v4752_v42 = vpop.f32.mrf.mxu1 }
 0x5a6   : > { %v4886_v12 = vmul.f32 0.5, %v4848_v1  ;;  %9142 = vst [vmem:[%s15803_s16 + $0x18] sm:$0xff] %v4848_v1  ;;  %v15825_v30 = vadd.f32 %v4752_v42, %v4704_v63 }
 0x5a8   : > { %v4903_v35 = vmul.f32 1.442695, %v4886_v12  ;;  %9143 = vst [vmem:[%s15803_s16 + $0x20] sm:$0xff] %v15825_v30  ;;  %v12652_v20 = vpop.eup %12651  ;;  %v4813_v29 = vpop.f32.mrf.mxu2 }
 0x5a9   : > { %v4965_v8 = vmul.f32 %v12652_v20, %v12588_v0  ;;  %v10879_v0 = vld [vmem:[%s18521_s10 + $0xd0] sm:$0xf0]  ;;  %v4814_v21 = vadd.f32 %v4813_v29, %v15805_v48 }
 0x5aa   : > { %12653 = vpow2.f32 %v4903_v35  ;;  %v10882_v27 = vor.u32 %v12322_v32, %v10879_v0  ;;  %v12316_v32 = vld [vmem:[%s18521_s10 + $0x8c] sm:$0xf0]  ;;  %v10973_v0 = vld [vmem:[%s18521_s10 + $0x180] sm:$0xf] }
 0x5ab   : > { %v4850_v49 = vpop.f32.mrf.mxu3  ;;  %v4981_v13 = vadd.f32 %v4965_v8, %v4748_v54  ;;  %v12618_v54 = vld [vmem:[%s15822_s29 + $0x8] sm:$0xff]  }
 0x5ac   : > { %v4851_v23 = vadd.f32 %v4850_v49, %v4802_v19  ;;  %v12592_v62 = vunpack.c.l.bf16 %v12618_v54  ;;  %v12593_v1 = vunpack.c.h.bf16 %v12618_v54  ;;  %v12354_v49 = vld [vmem:[%s18521_s10 + $0x1c4] sm:$0xf]  ;;  %5778 = vmatpush.bf16.msrb.mxu0 %v10882_v27  ;;  %v4721_v27 = vadd.f32 %v4720_v25, %v15784_v24 }
 0x5ad   : > { %v4754_v58 = vpop.f32.mrf.mxu1 }
 0x5ae   : > { %v4887_v14 = vmul.f32 0.5, %v4851_v23  ;;  %9144 = vst [vmem:[%s15803_s16 + $0x28] sm:$0xff] %v4851_v23  ;;  %v15847_v4 = vadd.f32 %v4754_v58, %v4706_v9  ;;  %v11007_v23 = vld [vmem:[%s18521_s10 + $0x1d0] sm:$0xf0] }
 0x5af   : > { %v11010_v58 = vor.u32 %v12354_v49, %v11007_v23 }
 0x5b0   : > { %v12654_v10 = vpop.eup %12653  ;;  %9145 = vst [vmem:[%s15803_s16 + $0x30] sm:$0xff] %v15847_v4  ;;  %v4905_v52 = vmul.f32 1.442695, %v4887_v14 }
 0x5b1   : > { %v4966_v3 = vmul.f32 %v12654_v10, %v12589_v41  ;;  %5827 = vmatpush.bf16.msrb.mxu1 %v11010_v58 }
 0x5b2   : > { %12655 = vpow2.f32 %v4905_v52  ;;  %v4816_v52 = vpop.f32.mrf.mxu2 }
 0x5b3   : > { %v4982_v16 = vadd.f32 %v4966_v3, %v4750_v36  ;;  %v4852_v34 = vpop.f32.mrf.mxu3  ;;  %v12356_v36 = vld [vmem:[%s18521_s10 + $0x1cc] sm:$0xf0] }
 0x5b4   : > { %v4853_v39 = vadd.f32 %v4852_v34, %v4804_v45  ;;  %v11006_v55 = vor.u32 %v12356_v36, %v11005_v28  ;;  %v12619_v3 = vld [vmem:[%s15822_s29 + $0x10] sm:$0xff]   ;;  %v10861_v45 = vld [vmem:[%s18521_s10 + $0xa0] sm:$0xf] }
 0x5b5   : > { %v4757_v38 = vpop.f32.mrf.mxu1  ;;  %v4997_v53 = vpack.c.bf16 %v4982_v16, %v4981_v13  ;;  %v12596_v13 = vunpack.c.l.bf16 %v12619_v3  ;;  %v10862_v16 = vor.u32 %v12320_v59, %v10861_v45  ;;  %v12352_v34 = vld [vmem:[%s18521_s10 + $0x1ac] sm:$0xf0]  ;;  %v10863_v28 = vld [vmem:[%s18521_s10 + $0xb0] sm:$0xf0] }
 0x5b6   : > { %v4888_v44 = vmul.f32 0.5, %v4853_v39  ;;  %9146 = vst [vmem:[%s15803_s16 + $0x38] sm:$0xff] %v4853_v39  ;;  %v15870_v43 = vadd.f32 %v4757_v38, %v4709_v15  ;;  %5729 = vmatpush.bf16.msrb.mxu3 %v11006_v55  ;;  %v10990_v39 = vor.u32 %v12352_v34, %v10989_v60  ;;  %v12597_v38 = vunpack.c.h.bf16 %v12619_v3  ;;  %v12314_v60 = vld [vmem:[%s18521_s10 + $0x84] sm:$0xf] }
 0x5b7   : > { %5115 = vmatmul.bf16.vlgmr.msra.gmra.mxu0 %v4997_v53  ;;  %5164 = vmatmul.bf16.vlgmr.msra.gmra.mxu1 %v4997_v53  ;;  %v4719_v55 = vadd.f32 %v4718_v46, %v15784_v24 }
 0x5b8   : > { %v4907_v2 = vmul.f32 1.442695, %v4888_v44  ;;  %9147 = vst [vmem:[%s15803_s16 + $0x40] sm:$0xff] %v15870_v43  ;;  %v12656_v51 = vpop.eup %12655  ;;  %5681 = vmatpush.bf16.msrb.mxu2 %v10862_v16 }
 0x5b9   : > { %v4967_v35 = vmul.f32 %v12656_v51, %v12592_v62 }
 0x5ba   : > { %12657 = vpow2.f32 %v4907_v2  ;;  %5730 = vmatpush.bf16.msrb.mxu3 %v10990_v39  ;;  %v4818_v62 = vpop.f32.mrf.mxu2 }
 0x5bb   : > { %v4855_v26 = vpop.f32.mrf.mxu3  ;;  %v4983_v20 = vadd.f32 %v4967_v35, %v15825_v30  ;;  %v4819_v59 = vadd.f32 %v4818_v62, %v15805_v48 }
 0x5bc   : > { %v4856_v37 = vadd.f32 %v4855_v26, %v4807_v50  ;;  %v12350_v26 = vld [vmem:[%s18521_s10 + $0x1a4] sm:$0xf] }
 0x5bd   : > { %v4759_v63 = vpop.f32.mrf.mxu1 }
 0x5be   : > { %v4889_v42 = vmul.f32 0.5, %v4856_v37  ;;  %9148 = vst [vmem:[%s15803_s16 + $0x48] sm:$0xff] %v4856_v37  ;;  %v15894_v12 = vadd.f32 %v4759_v63, %v4711_v18  ;;  %v10866_v18 = vor.u32 %v12318_v22, %v10863_v28  ;;  %v10991_v37 = vld [vmem:[%s18521_s10 + $0x1b0] sm:$0xf0]  ;;  %v12312_v22 = vld [vmem:[%s18521_s10 + $0x6c] sm:$0xf0] }
 0x5bf   : > { %v10957_v28 = vld [vmem:[%s18521_s10 + $0x160] sm:$0xf] }
 0x5c0   : > { %v12658_v19 = vpop.eup %12657  ;;  %9149 = vst [vmem:[%s15803_s16 + $0x50] sm:$0xff] %v15894_v12  ;;  %v4909_v40 = vmul.f32 1.442695, %v4889_v42  ;;  %5779 = vmatpush.bf16.msrb.mxu0 %v10866_v18 }
 0x5c1   : > { %v4968_v61 = vmul.f32 %v12658_v19, %v12593_v1  ;;  %v10994_v1 = vor.u32 %v12350_v26, %v10991_v37 }
 0x5c2   : > { %12659 = vpow2.f32 %v4909_v40  ;;  %v12620_v40 = vld [vmem:[%s15822_s29 + $0x18] sm:$0xff]  }
 0x5c3   : > { %v4857_v33 = vpop.f32.mrf.mxu3  ;;  %v4984_v9 = vadd.f32 %v4968_v61, %v15847_v4  ;;  %5828 = vmatpush.bf16.msrb.mxu1 %v10994_v1  ;;  %v4817_v61 = vadd.f32 %v4816_v52, %v15805_v48  ;;  %v12600_v46 = vunpack.c.l.bf16 %v12620_v40 }
 0x5c4   : > { %v4858_v41 = vadd.f32 %v4857_v33, %v4809_v57  ;;  %v10845_v57 = vld [vmem:[%s18521_s10 + $0x80] sm:$0xf] }
 0x5c5   : > { %v4762_v14 = vpop.f32.mrf.mxu1  ;;  %v4998_v8 = vpack.c.bf16 %v4984_v9, %v4983_v20  ;;  %v10846_v33 = vor.u32 %v12316_v32, %v10845_v57  ;;  %v12348_v20 = vld [vmem:[%s18521_s10 + $0x18c] sm:$0xf0] }
 0x5c6   : > { %v4890_v10 = vmul.f32 0.5, %v4858_v41  ;;  %9150 = vst [vmem:[%s15803_s16 + $0x58] sm:$0xff] %v4858_v41  ;;  %v15917_v30 = vadd.f32 %v4762_v14, %v4714_v5  ;;  %v10974_v5 = vor.u32 %v12348_v20, %v10973_v0  ;;  %v4821_v41 = vpop.f32.mrf.mxu2  ;;  %v12601_v14 = vunpack.c.h.bf16 %v12620_v40  ;;  %v12310_v0 = vld [vmem:[%s18521_s10 + $0x64] sm:$0xf] }
 0x5c7   : > { %5120 = vmatmul.bf16.gmra.mxu0 %v4998_v8  ;;  %5169 = vmatmul.bf16.gmra.mxu1 %v4998_v8 }
 0x5c8   : > { %v4911_v4 = vmul.f32 1.442695, %v4890_v10  ;;  %9151 = vst [vmem:[%s15803_s16 + $0x60] sm:$0xff] %v15917_v30  ;;  %v12660_v47 = vpop.eup %12659  ;;  %5682 = vmatpush.bf16.msrb.mxu2 %v10846_v33  ;;  %5731 = vmatpush.bf16.msrb.mxu3 %v10974_v5 }
 0x5c9   : > { %v4969_v2 = vmul.f32 %v12660_v47, %v12596_v13  ;;  %v12346_v13 = vld [vmem:[%s18521_s10 + $0x184] sm:$0xf] }
 0x5ca   : > { %12661 = vpow2.f32 %v4911_v4 }
 0x5cb   : > { %v4860_v7 = vpop.f32.mrf.mxu3  ;;  %v4985_v36 = vadd.f32 %v4969_v2, %v15870_v43 }
 0x5cc   : > { %v4861_v15 = vadd.f32 %v4860_v7, %v4812_v31  ;;  %v10847_v7 = vld [vmem:[%s18521_s10 + $0x90] sm:$0xf0] }
 0x5cd   : > { %v4764_v11 = vpop.f32.mrf.mxu1 }
 0x5ce   : > { %v4891_v53 = vmul.f32 0.5, %v4861_v15  ;;  %9152 = vst [vmem:[%s15803_s16 + $0x68] sm:$0xff] %v4861_v15  ;;  %v15939_v44 = vadd.f32 %v4764_v11, %v4716_v56  ;;  %v10850_v56 = vor.u32 %v12314_v60, %v10847_v7  ;;  %v10975_v15 = vld [vmem:[%s18521_s10 + $0x190] sm:$0xf0]  ;;  %v10941_v60 = vld [vmem:[%s18521_s10 + $0x140] sm:$0xf] }
 0x5cf   : > { %v10978_v11 = vor.u32 %v12346_v13, %v10975_v15  ;;  %v10815_v15 = vld [vmem:[%s18521_s10 + $0x50] sm:$0xf0] }
 0x5d0   : > { %v12662_v54 = vpop.eup %12661  ;;  %9153 = vst [vmem:[%s15803_s16 + $0x70] sm:$0xff] %v15939_v44  ;;  %v4913_v50 = vmul.f32 1.442695, %v4891_v53  ;;  %5780 = vmatpush.bf16.msrb.mxu0 %v10850_v56  ;;  %v12306_v56 = vld [vmem:[%s18521_s10 + $0x44] sm:$0xf] }
 0x5d1   : > { %v4970_v17 = vmul.f32 %v12662_v54, %v12597_v38  ;;  %5829 = vmatpush.bf16.msrb.mxu1 %v10978_v11 }
 0x5d2   : > { %12663 = vpow2.f32 %v4913_v50  ;;  %v12621_v50 = vld [vmem:[%s15822_s29 + $0x20] sm:$0xff]  }
 0x5d3   : > { %v4862_v6 = vpop.f32.mrf.mxu3  ;;  %v4986_v51 = vadd.f32 %v4970_v17, %v15894_v12  ;;  %v4723_v12 = vpop.f32.mrf.mxu0  ;;  %v4822_v17 = vadd.f32 %v4821_v41, %v15805_v48 }
 0x5d4   : > { %v4863_v63 = vadd.f32 %v4862_v6, %v4814_v21  ;;  %v4724_v39 = vadd.f32 %v4723_v12, %v15784_v24  ;;  %v10829_v21 = vld [vmem:[%s18521_s10 + $0x60] sm:$0xf]  ;;  %v12604_v6 = vunpack.c.l.bf16 %v12621_v50 }
 0x5d5   : > { %v4767_v42 = vpop.f32.mrf.mxu1  ;;  %v4999_v29 = vpack.c.bf16 %v4986_v51, %v4985_v36  ;;  %v10830_v36 = vor.u32 %v12312_v22, %v10829_v21  ;;  %v12344_v51 = vld [vmem:[%s18521_s10 + $0x16c] sm:$0xf0] }
 0x5d6   : > { %v4892_v35 = vmul.f32 0.5, %v4863_v63  ;;  %9154 = vst [vmem:[%s15803_s16 + $0x78] sm:$0xff] %v4863_v63  ;;  %v15960_v43 = vadd.f32 %v4767_v42, %v4719_v55  ;;  %v10958_v63 = vor.u32 %v12344_v51, %v10957_v28  ;;  %v12605_v42 = vunpack.c.h.bf16 %v12621_v50  ;;  %v12304_v22 = vld [vmem:[%s18521_s10 + $0x2c] sm:$0xf0] }
 0x5d7   : > { %5125 = vmatmul.bf16.gmra.mxu0 %v4999_v29  ;;  %5174 = vmatmul.bf16.gmra.mxu1 %v4999_v29 }
 0x5d8   : > { %v4915_v19 = vmul.f32 1.442695, %v4892_v35  ;;  %9155 = vst [vmem:[%s15803_s16 + $0x80] sm:$0xff] %v15960_v43  ;;  %v12664_v9 = vpop.eup %12663  ;;  %5683 = vmatpush.bf16.msrb.mxu2 %v10830_v36  ;;  %5732 = vmatpush.bf16.msrb.mxu3 %v10958_v63 }
 0x5d9   : > { %v4971_v4 = vmul.f32 %v12664_v9, %v12600_v46  ;;  %v12342_v46 = vld [vmem:[%s18521_s10 + $0x164] sm:$0xf] }
 0x5da   : > { %12665 = vpow2.f32 %v4915_v19 }
 0x5db   : > { %v4865_v49 = vpop.f32.mrf.mxu3  ;;  %v4725_v52 = vpop.f32.mrf.mxu0  ;;  %v4987_v34 = vadd.f32 %v4971_v4, %v15917_v30 }
 0x5dc   : > { %v4866_v23 = vadd.f32 %v4865_v49, %v4817_v61  ;;  %v4726_v37 = vadd.f32 %v4725_v52, %v15784_v24  ;;  %v10831_v49 = vld [vmem:[%s18521_s10 + $0x70] sm:$0xf0]  ;;  %v12622_v52 = vld [vmem:[%s15822_s29 + $0x28] sm:$0xff]  }
 0x5dd   : > { %v4769_v58 = vpop.f32.mrf.mxu1 }
 0x5de   : > { %v4893_v8 = vmul.f32 0.5, %v4866_v23  ;;  %9156 = vst [vmem:[%s15803_s16 + $0x88] sm:$0xff] %v4866_v23  ;;  %v15980_v10 = vadd.f32 %v4769_v58, %v4721_v27  ;;  %v10834_v27 = vor.u32 %v12310_v0, %v10831_v49  ;;  %v10959_v23 = vld [vmem:[%s18521_s10 + $0x170] sm:$0xf0]  ;;  %v12302_v0 = vld [vmem:[%s18521_s10 + $0x24] sm:$0xf] }
 0x5df   : > { %v10962_v58 = vor.u32 %v12342_v46, %v10959_v23  ;;  %v12623_v46 = vld [vmem:[%s15822_s29 + $0x30] sm:$0xff]   ;;  %v12334_v23 = vld [vmem:[%s18521_s10 + $0x124] sm:$0xf] }
 0x5e0   : > { %v12666_v3 = vpop.eup %12665  ;;  %9157 = vst [vmem:[%s15803_s16 + $0x90] sm:$0xff] %v15980_v10  ;;  %v4917_v31 = vmul.f32 1.442695, %v4893_v8  ;;  %5781 = vmatpush.bf16.msrb.mxu0 %v10834_v27 }
 0x5e1   : > { %v4972_v45 = vmul.f32 %v12666_v3, %v12601_v14  ;;  %5830 = vmatpush.bf16.msrb.mxu1 %v10962_v58 }
 0x5e2   : > { %12667 = vpow2.f32 %v4917_v31 }
 0x5e3   : > { %v4867_v16 = vpop.f32.mrf.mxu3  ;;  %v4988_v47 = vadd.f32 %v4972_v45, %v15939_v44  ;;  %v4823_v44 = vpop.f32.mrf.mxu2  ;;  %v10813_v45 = vld [vmem:[%s18521_s10 + $0x40] sm:$0xf] }
 0x5e4   : > { %v4868_v25 = vadd.f32 %v4867_v16, %v4819_v59  ;;  %v4728_v26 = vpop.f32.mrf.mxu0  ;;  %v4824_v32 = vadd.f32 %v4823_v44, %v15805_v48  ;;  %v12308_v59 = vld [vmem:[%s18521_s10 + $0x4c] sm:$0xf0]  ;;  %v12608_v16 = vunpack.c.l.bf16 %v12622_v52  ;;  %v10943_v44 = vld [vmem:[%s18521_s10 + $0x150] sm:$0xf0] }
 0x5e5   : > { %v4772_v38 = vpop.f32.mrf.mxu1  ;;  %v5000_v53 = vpack.c.bf16 %v4988_v47, %v4987_v34  ;;  %v4729_v5 = vadd.f32 %v4728_v26, %v15784_v24  ;;  %v10814_v34 = vor.u32 %v12308_v59, %v10813_v45  ;;  %v12340_v47 = vld [vmem:[%s18521_s10 + $0x14c] sm:$0xf0] }
 0x5e6   : > { %v4894_v2 = vmul.f32 0.5, %v4868_v25  ;;  %9158 = vst [vmem:[%s15803_s16 + $0x98] sm:$0xff] %v4868_v25  ;;  %v16001_v30 = vadd.f32 %v4772_v38, %v4724_v39  ;;  %v10942_v38 = vor.u32 %v12340_v47, %v10941_v60 }
 0x5e7   : > { %5130 = vmatmul.bf16.gmra.mxu0 %v5000_v53  ;;  %5179 = vmatmul.bf16.gmra.mxu1 %v5000_v53  ;;  %v10818_v53 = vor.u32 %v12306_v56, %v10815_v15 }
 0x5e8   : > { %v4919_v54 = vmul.f32 1.442695, %v4894_v2  ;;  %9159 = vst [vmem:[%s15803_s16 + $0xa0] sm:$0xff] %v16001_v30  ;;  %v12668_v18 = vpop.eup %12667  ;;  %v12338_v2 = vld [vmem:[%s18521_s10 + $0x144] sm:$0xf]  ;;  %5684 = vmatpush.bf16.msrb.mxu2 %v10814_v34  ;;  %5733 = vmatpush.bf16.msrb.mxu3 %v10942_v38 }
 0x5e9   : > { %v4973_v12 = vmul.f32 %v12668_v18, %v12604_v6  ;;  %v10946_v21 = vor.u32 %v12338_v2, %v10943_v44  ;;  %5782 = vmatpush.bf16.msrb.mxu0 %v10818_v53  ;;  %v12624_v53 = vld [vmem:[%s15822_s29 + $0x38] sm:$0xff]   ;;  %v10781_v2 = vld [vmem:[%s18521_s10] sm:$0xf] }
 0x5ea   : > { %12669 = vpow2.f32 %v4919_v54  ;;  %v10797_v54 = vld [vmem:[%s18521_s10 + $0x20] sm:$0xf] }
 0x5eb   : > { %v4870_v62 = vpop.f32.mrf.mxu3  ;;  %v4826_v40 = vpop.f32.mrf.mxu2  ;;  %v4989_v20 = vadd.f32 %v4973_v12, %v15960_v43  ;;  %5831 = vmatpush.bf16.msrb.mxu1 %v10946_v21 }
 0x5ec   : > { %v4871_v55 = vadd.f32 %v4870_v62, %v4822_v17  ;;  %v4730_v14 = vpop.f32.mrf.mxu0  ;;  %v4827_v31 = vadd.f32 %v4826_v40, %v15805_v48  ;;  %v12609_v17 = vunpack.c.h.bf16 %v12622_v52  ;;  %v10798_v62 = vor.u32 %v12304_v22, %v10797_v54  ;;  %v12332_v54 = vld [vmem:[%s18521_s10 + $0x10c] sm:$0xf0] }
 0x5ed   : > { %v4774_v1 = vpop.f32.mrf.mxu1  ;;  %v4731_v25 = vadd.f32 %v4730_v14, %v15784_v24  ;;  %v12617_v22 = vunpack.c.h.bf16 %v12624_v53 }
 0x5ee   : > { %v4895_v29 = vmul.f32 0.5, %v4871_v55  ;;  %9160 = vst [vmem:[%s15803_s16 + $0xa8] sm:$0xff] %v4871_v55  ;;  %v16021_v35 = vadd.f32 %v4774_v1, %v4726_v37  ;;  %5685 = vmatpush.bf16.msrb.mxu2 %v10798_v62  ;;  %v12298_v62 = vld [vmem:[%s18521_s10 + $0x4] sm:$0xf] }
 0x5f0   : > { %v12670_v19 = vpop.eup %12669  ;;  %9161 = vst [vmem:[%s15803_s16 + $0xb0] sm:$0xff] %v16021_v35  ;;  %v4921_v61 = vmul.f32 1.442695, %v4895_v29 }
 0x5f1   : > { %v4974_v57 = vmul.f32 %v12670_v19, %v12605_v42 }
 0x5f2   : > { %12671 = vpow2.f32 %v4921_v61 }
 0x5f3   : > { %v4872_v33 = vpop.f32.mrf.mxu3  ;;  %v4990_v9 = vadd.f32 %v4974_v57, %v15980_v10  ;;  %v4828_v7 = vpop.f32.mrf.mxu2 }
 0x5f4   : > { %v4873_v41 = vadd.f32 %v4872_v33, %v4824_v32  ;;  %v4733_v6 = vpop.f32.mrf.mxu0  ;;  %v4829_v37 = vadd.f32 %v4828_v7, %v15805_v48 }
 0x5f5   : > { %v4777_v8 = vpop.f32.mrf.mxu1  ;;  %v5001_v4 = vpack.c.bf16 %v4990_v9, %v4989_v20  ;;  %v4734_v29 = vadd.f32 %v4733_v6, %v15784_v24  ;;  %v10799_v20 = vld [vmem:[%s18521_s10 + $0x30] sm:$0xf0] }
 0x5f6   : > { %v4896_v3 = vmul.f32 0.5, %v4873_v41  ;;  %9162 = vst [vmem:[%s15803_s16 + $0xb8] sm:$0xff] %v4873_v41  ;;  %v16042_v43 = vadd.f32 %v4777_v8, %v4729_v5  ;;  %v10802_v27 = vor.u32 %v12302_v0, %v10799_v20  ;;  %v10927_v5 = vld [vmem:[%s18521_s10 + $0x130] sm:$0xf0]  ;;  %v12612_v8 = vunpack.c.l.bf16 %v12623_v46  ;;  %v12359_v0 = vld [vmem:[%s18521_s10 + $0x1ec] sm:$0xf] }
 0x5f7   : > { %5135 = vmatmul.bf16.gmra.mxu0 %v5001_v4  ;;  %5184 = vmatmul.bf16.gmra.mxu1 %v5001_v4  ;;  %v10930_v58 = vor.u32 %v12334_v23, %v10927_v5  ;;  %v10783_v6 = vld [vmem:[%s18521_s10 + $0x10] sm:$0xf0]  ;;  %v11031_v20 = vld [vmem:[%s18521_s10 + $0x1f8] sm:$0xf0] }
 0x5f8   : > { %v4923_v10 = vmul.f32 1.442695, %v4896_v3  ;;  %9163 = vst [vmem:[%s15803_s16 + $0xc0] sm:$0xff] %v16042_v43  ;;  %v12672_v39 = vpop.eup %12671  ;;  %5783 = vmatpush.bf16.msrb.mxu0 %v10802_v27  ;;  %v11034_v23 = vor.u32 %v12359_v0, %v11031_v20 }
 0x5f9   : > { %v4975_v36 = vmul.f32 %v12672_v39, %v12608_v16  ;;  %5832 = vmatpush.bf16.msrb.mxu1 %v10930_v58  ;;  %v10885_v58 = vld [vmem:[%s18521_s10 + $0xc8] sm:$0xf] }
 0x5fa   : > { %12673 = vpow2.f32 %v4923_v10 }
 0x5fb   : > { %v4875_v13 = vpop.f32.mrf.mxu3  ;;  %v4991_v1 = vadd.f32 %v4975_v36, %v16001_v30  ;;  %v4831_v19 = vpop.f32.mrf.mxu2  ;;  %v10925_v30 = vld [vmem:[%s18521_s10 + $0x120] sm:$0xf]  ;;  %v12330_v36 = vld [vmem:[%s18521_s10 + $0x104] sm:$0xf] }
 0x5fc   : > { %v4876_v11 = vadd.f32 %v4875_v13, %v4827_v31  ;;  %v4735_v9 = vpop.f32.mrf.mxu0  ;;  %v4832_v41 = vadd.f32 %v4831_v19, %v15805_v48  ;;  %v12613_v31 = vunpack.c.h.bf16 %v12623_v46  ;;  %v11029_v19 = vld [vmem:[%s18521_s10 + $0x1e8] sm:$0xf] }
 0x5fd   : > { %v4779_v50 = vpop.f32.mrf.mxu1  ;;  %v4736_v3 = vadd.f32 %v4735_v9, %v15784_v24 }
 0x5fe   : > { %v4897_v28 = vmul.f32 0.5, %v4876_v11  ;;  %9164 = vst [vmem:[%s15803_s16 + $0xc8] sm:$0xff] %v4876_v11  ;;  %v16080_v26 = vadd.f32 %v4779_v50, %v4731_v25  ;;  %v12616_v50 = vunpack.c.l.bf16 %v12624_v53 }
 0x600   : > { %v12674_v51 = vpop.eup %12673  ;;  %9165 = vst [vmem:[%s15803_s16 + $0xd0] sm:$0xff] %v16080_v26  ;;  %v4925_v55 = vmul.f32 1.442695, %v4897_v28 }
 0x601   : > { %v4976_v18 = vmul.f32 %v12674_v51, %v12609_v17 }
 0x602   : > { %12675 = vpow2.f32 %v4925_v55 }
 0x603   : > { %v4877_v63 = vpop.f32.mrf.mxu3  ;;  %v4992_v42 = vadd.f32 %v4976_v18, %v16021_v35  ;;  %v12336_v35 = vld [vmem:[%s18521_s10 + $0x12c] sm:$0xf0]  ;;  %v4833_v60 = vpop.f32.mrf.mxu2  ;;  %v10786_v18 = vor.u32 %v12298_v62, %v10783_v6 }
 0x604   : > { %v4878_v12 = vadd.f32 %v4877_v63, %v4829_v37  ;;  %v10926_v33 = vor.u32 %v12336_v35, %v10925_v30  ;;  %v4834_v34 = vadd.f32 %v4833_v60, %v15805_v48  ;;  %v12300_v48 = vld [vmem:[%s18521_s10 + $0xc] sm:$0xf0]  ;;  %v10911_v37 = vld [vmem:[%s18521_s10 + $0x110] sm:$0xf0]  ;;  %v12327_v30 = vld [vmem:[%s18521_s10 + $0xec] sm:$0xf] }
 0x605   : > { %v4782_v40 = vpop.f32.mrf.mxu1  ;;  %v5002_v61 = vpack.c.bf16 %v4992_v42, %v4991_v1  ;;  %v10782_v44 = vor.u32 %v12300_v48, %v10781_v2  ;;  %v10914_v55 = vor.u32 %v12330_v36, %v10911_v37  ;;  %5784 = vmatpush.bf16.msrb.mxu0 %v10786_v18  ;;  %v10903_v35 = vld [vmem:[%s18521_s10 + $0xf8] sm:$0xf0] }
 0x606   : > { %v4898_v57 = vmul.f32 0.5, %v4878_v12  ;;  %9166 = vst [vmem:[%s15803_s16 + $0xd8] sm:$0xff] %v4878_v12  ;;  %v16089_v32 = vadd.f32 %v4782_v40, %v4734_v29  ;;  %5734 = vmatpush.bf16.msrb.mxu3 %v10926_v33  ;;  %v10901_v29 = vld [vmem:[%s18521_s10 + $0xe8] sm:$0xf]  ;;  %v12329_v12 = vld [vmem:[%s18521_s10 + $0xf4] sm:$0xf0]  ;;  %v10906_v33 = vor.u32 %v12327_v30, %v10903_v35 }
 0x607   : > { %5140 = vmatmul.bf16.gmra.mxu0 %v5002_v61  ;;  %5189 = vmatmul.bf16.gmra.mxu1 %v5002_v61  ;;  %v10902_v40 = vor.u32 %v12329_v12, %v10901_v29  ;;  %v12361_v61 = vld [vmem:[%s18521_s10 + $0x1f4] sm:$0xf0]  ;;  %v12351_v30 = vld [vmem:[%s18521_s10 + $0x1ac] sm:$0xf] }
 0x608   : > { %v4927_v49 = vmul.f32 1.442695, %v4898_v57  ;;  %9167 = vst [vmem:[%s15803_s16 + $0xe0] sm:$0xff] %v16089_v32  ;;  %v12676_v4 = vpop.eup %12675  ;;  %5686 = vmatpush.bf16.msrb.mxu2 %v10782_v44  ;;  %5833 = vmatpush.bf16.msrb.mxu1 %v10914_v55  ;;  %v11030_v57 = vor.u32 %v12361_v61, %v11029_v19 }
 0x609   : > { %v4977_v7 = vmul.f32 %v12676_v4, %v12612_v8  ;;  %5973 = vmatpush.bf16.msra.mxu0 %v10906_v33  ;;  %v11013_v8 = vld [vmem:[%s18521_s10 + $0x1c8] sm:$0xf] }
 0x60a   : > { %12677 = vpow2.f32 %v4927_v49 }
 0x60b   : > { %v4880_v14 = vpop.f32.mrf.mxu3  ;;  %v4993_v24 = vadd.f32 %v4977_v7, %v16042_v43  ;;  %v10909_v43 = vld [vmem:[%s18521_s10 + $0x100] sm:$0xf] }
 0x60c   : > { %v4881_v10 = vadd.f32 %v4880_v14, %v4832_v41  ;;  %v10910_v17 = vor.u32 %v12332_v54, %v10909_v43  ;;  %5875 = vmatpush.bf16.msra.mxu2 %v10902_v40  ;;  %6022 = vmatpush.bf16.msra.mxu1 %v11034_v23  ;;  %v12325_v14 = vld [vmem:[%s18521_s10 + $0xd4] sm:$0xf0]  ;;  %v11015_v43 = vld [vmem:[%s18521_s10 + $0x1d8] sm:$0xf0] }
 0x60d   : > { %v4784_v52 = vpop.f32.mrf.mxu1  ;;  %v10886_v4 = vor.u32 %v12325_v14, %v10885_v58  ;;  %v10981_v58 = vld [vmem:[%s18521_s10 + $0x188] sm:$0xf] }
 0x60e   : > { %v4899_v45 = vmul.f32 0.5, %v4881_v10  ;;  %9168 = vst [vmem:[%s15803_s16 + $0xe8] sm:$0xff] %v4881_v10  ;;  %v4785_v59 = vadd.f32 %v4784_v52, %v4736_v3  ;;  %5735 = vmatpush.bf16.msrb.mxu3 %v10910_v17  ;;  %v12357_v3 = vld [vmem:[%s18521_s10 + $0x1d4] sm:$0xf0]  ;;  %v10869_v17 = vld [vmem:[%s18521_s10 + $0xa8] sm:$0xf] }
 0x60f   : > { %v11014_v10 = vor.u32 %v12357_v3, %v11013_v8  ;;  %v12349_v8 = vld [vmem:[%s18521_s10 + $0x194] sm:$0xf0] }
 0x610   : > { %v12678_v13 = vpop.eup %12677  ;;  %9169 = vst [vmem:[%s15803_s16 + $0xf0] sm:$0xff] %v4785_v59  ;;  %v4929_v47 = vmul.f32 1.442695, %v4899_v45  ;;  %5876 = vmatpush.bf16.msra.mxu2 %v10886_v4  ;;  %v10982_v4 = vor.u32 %v12349_v8, %v10981_v58  ;;  %v10821_v58 = vld [vmem:[%s18521_s10 + $0x48] sm:$0xf] }
 0x611   : > { %v4978_v16 = vmul.f32 %v12678_v13, %v12613_v31  ;;  %v10949_v8 = vld [vmem:[%s18521_s10 + $0x148] sm:$0xf] }
 0x612   : > { %12679 = vpow2.f32 %v4929_v47  ;;  %5924 = vmatpush.bf16.msra.mxu3 %v11030_v57  ;;  %v12319_v57 = vld [vmem:[%s18521_s10 + $0xac] sm:$0xf] }
 0x613   : > { %v4882_v56 = vpop.f32.mrf.mxu3  ;;  %v4994_v15 = vadd.f32 %v4978_v16, %v16080_v26 }
 0x614   : > { %v4883_v39 = vadd.f32 %v4882_v56, %v4834_v34 }
 0x615   : > { %v5003_v25 = vpack.c.bf16 %v4994_v15, %v4993_v24 }
 0x616   : > { %v4900_v11 = vmul.f32 0.5, %v4883_v39  ;;  %9170 = vst [vmem:[%s15803_s16 + $0xf8] sm:$0xff] %v4883_v39  ;;  %5925 = vmatpush.bf16.msra.mxu3 %v11014_v10  ;;  %s17152_s16 = scalar_lea.vmem %s18525_s14, %s12642_s22 }
 0x617   : > { %5145 = vmatmul.bf16.gmra.mxu0 %v5003_v25  ;;  %5194 = vmatmul.bf16.gmra.mxu1 %v5003_v25  ;;  %v12323_v25 = vld [vmem:[%s18521_s10 + $0xcc] sm:$0xf] }
 0x618   : > { %v4931_v38 = vmul.f32 1.442695, %v4900_v11  ;;  %v12680_v21 = vpop.eup %12679  ;;  %v10887_v11 = vld [vmem:[%s18521_s10 + $0xd8] sm:$0xf0] }
 0x619   : > { %v4979_v28 = vmul.f32 %v12680_v21, %v12616_v50  ;;  %v10890_v48 = vor.u32 %v12323_v25, %v10887_v11  ;;  %v12321_v21 = vld [vmem:[%s18521_s10 + $0xb4] sm:$0xf0]  ;;  %v12315_v25 = vld [vmem:[%s18521_s10 + $0x8c] sm:$0xf]  ;;  %v10855_v11 = vld [vmem:[%s18521_s10 + $0x98] sm:$0xf0] }
 0x61a   : > { %12681 = vpow2.f32 %v4931_v38  ;;  %v12355_v38 = vld [vmem:[%s18521_s10 + $0x1cc] sm:$0xf] }
 0x61b   : > { %v4995_v63 = vadd.f32 %v4979_v28, %v16089_v32  ;;  %v5021_v32 = vld [vmem:[%s18520_s9] sm:$0x3]  ;;  %v11018_v44 = vor.u32 %v12355_v38, %v11015_v43  ;;  %5974 = vmatpush.bf16.msra.mxu0 %v10890_v48  ;;  %v10870_v28 = vor.u32 %v12321_v21, %v10869_v17  ;;  %v12347_v38 = vld [vmem:[%s18521_s10 + $0x18c] sm:$0xf]  ;;  %v10858_v48 = vor.u32 %v12315_v25, %v10855_v11  ;;  %v10983_v43 = vld [vmem:[%s18521_s10 + $0x198] sm:$0xf0] }
 0x61c   : > { %v16173_v9 = vperm.slane %v5021_v32, 0  ;;  %v16175_v27 = vperm.slane %v5021_v32, 1  ;;  %v10871_v32 = vld [vmem:[%s18521_s10 + $0xb8] sm:$0xf0]  ;;  %v10837_v17 = vld [vmem:[%s18521_s10 + $0x68] sm:$0xf] }
 0x61d   : > { %6023 = vmatpush.bf16.msra.mxu1 %v11018_v44  ;;  %5877 = vmatpush.bf16.msra.mxu2 %v10870_v28  ;;  %v10986_v44 = vor.u32 %v12347_v38, %v10983_v43  ;;  %v12313_v21 = vld [vmem:[%s18521_s10 + $0x74] sm:$0xf0]  ;;  %v12339_v43 = vld [vmem:[%s18521_s10 + $0x14c] sm:$0xf] }
 0x61e   : > { %v10838_v28 = vor.u32 %v12313_v21, %v10837_v17  ;;  %v10951_v17 = vld [vmem:[%s18521_s10 + $0x158] sm:$0xf0] }
 0x61f   : > { %v10954_v21 = vor.u32 %v12339_v43, %v10951_v17 }
 0x620   : > { %v12682_v26 = vpop.eup %12681 }
 0x621   : > { %v4980_v51 = vmul.f32 %v12682_v26, %v12617_v22  ;;  %v10997_v22 = vld [vmem:[%s18521_s10 + $0x1a8] sm:$0xf]  ;;  %v12353_v26 = vld [vmem:[%s18521_s10 + $0x1b4] sm:$0xf0] }
 0x622   : > { %v10998_v62 = vor.u32 %v12353_v26, %v10997_v22  ;;  %v10965_v22 = vld [vmem:[%s18521_s10 + $0x168] sm:$0xf]  ;;  %v12345_v26 = vld [vmem:[%s18521_s10 + $0x174] sm:$0xf0] }
 0x623   : > { %v4996_v1 = vadd.f32 %v4980_v51, %v4785_v59 }
 0x624   : > { %5926 = vmatpush.bf16.msra.mxu3 %v10998_v62  ;;  %v10966_v62 = vor.u32 %v12345_v26, %v10965_v22  ;;  %v10805_v26 = vld [vmem:[%s18521_s10 + $0x28] sm:$0xf] }
 0x625   : > { %v5004_v42 = vpack.c.bf16 %v4996_v1, %v4995_v63 }
 0x627   : > { %5150 = vmatmul.bf16.gmra.mxu0 %v5004_v42  ;;  %5199 = vmatmul.bf16.gmra.mxu1 %v5004_v42 }
 0x628   : > { %5927 = vmatpush.bf16.msra.mxu3 %v10982_v4 }
 0x62c   : > { %5928 = vmatpush.bf16.msra.mxu3 %v10966_v62  ;;  %v12305_v62 = vld [vmem:[%s18521_s10 + $0x34] sm:$0xf0] }
 0x634   : > { %v5116_v49 = vpop.f32.mrf.mxu0  ;;  %v5165_v46 = vpop.f32.mrf.mxu1 }
 0x635   : > { %v5117_v5 = vadd.f32 %v5116_v49, %v16173_v9  ;;  %v5166_v41 = vadd.f32 %v5165_v46, %v16175_v27  ;;  %v10874_v49 = vor.u32 %v12319_v57, %v10871_v32  ;;  %v10999_v46 = vld [vmem:[%s18521_s10 + $0x1b8] sm:$0xf0] }
 0x636   : > { %v11002_v33 = vor.u32 %v12351_v30, %v10999_v46  ;;  %v12311_v30 = vld [vmem:[%s18521_s10 + $0x6c] sm:$0xf] }
 0x637   : > { %v5205_v45 = vmul.f32 0.2, %v5117_v5  ;;  %v5206_v59 = vmul.f32 0.2, %v5166_v41  ;;  %5975 = vmatpush.bf16.msra.mxu0 %v10874_v49 }
 0x638   : > { %6024 = vmatpush.bf16.msra.mxu1 %v11002_v33 }
 0x639   : > { %v5237_v34 = vmax.f32 %v5117_v5, %v5205_v45  ;;  %v5238_v47 = vmax.f32 %v5166_v41, %v5206_v59  ;;  %v10853_v5 = vld [vmem:[%s18521_s10 + $0x88] sm:$0xf]  ;;  %v12317_v41 = vld [vmem:[%s18521_s10 + $0x94] sm:$0xf0] }
 0x63a   : > { %v10854_v14 = vor.u32 %v12317_v41, %v10853_v5 }
 0x63b   : > { %5976 = vmatpush.bf16.msra.mxu0 %v10858_v48  ;;  %v10823_v48 = vld [vmem:[%s18521_s10 + $0x58] sm:$0xf0] }
 0x63c   : > { %v5118_v52 = vpop.f32.mrf.mxu0  ;;  %v5167_v31 = vpop.f32.mrf.mxu1  ;;  %5878 = vmatpush.bf16.msra.mxu2 %v10854_v14  ;;  %6025 = vmatpush.bf16.msra.mxu1 %v10986_v44  ;;  %v12309_v14 = vld [vmem:[%s18521_s10 + $0x54] sm:$0xf0] }
 0x63d   : > { %v5119_v60 = vadd.f32 %v5118_v52, %v16173_v9  ;;  %v5168_v7 = vadd.f32 %v5167_v31, %v16175_v27  ;;  %v10822_v4 = vor.u32 %v12309_v14, %v10821_v58 }
 0x63f   : > { %v5207_v13 = vmul.f32 0.2, %v5119_v60  ;;  %v5208_v16 = vmul.f32 0.2, %v5168_v7 }
 0x640   : > { %5879 = vmatpush.bf16.msra.mxu2 %v10838_v28 }
 0x641   : > { %v5239_v56 = vmax.f32 %v5119_v60, %v5207_v13  ;;  %v5240_v24 = vmax.f32 %v5168_v7, %v5208_v16 }
 0x643   : > { %v16193_v15 = vpack.c.bf16 %v5239_v56, %v5237_v34  ;;  %v16195_v39 = vpack.c.bf16 %v5240_v24, %v5238_v47 }
 0x644   : > { %v5121_v53 = vpop.f32.mrf.mxu0  ;;  %v5170_v2 = vpop.f32.mrf.mxu1  ;;  %5880 = vmatpush.bf16.msra.mxu2 %v10822_v4 }
 0x645   : > { %5687 = vmatmul.bf16.vlgmr.msrb.gmra.mxu2 %v16193_v15  ;;  %5736 = vmatmul.bf16.vlgmr.msrb.gmra.mxu3 %v16195_v39  ;;  %v5122_v54 = vadd.f32 %v5121_v53, %v16173_v9  ;;  %v5171_v50 = vadd.f32 %v5170_v2, %v16175_v27 }
 0x646   : > { %5785 = vmatmul.bf16.vlgmr.msrb.gmra.mxu0 %v16193_v15  ;;  %5834 = vmatmul.bf16.vlgmr.msrb.gmra.mxu1 %v16195_v39 }
 0x647   : > { %v5209_v51 = vmul.f32 0.2, %v5122_v54  ;;  %v5210_v18 = vmul.f32 0.2, %v5171_v50 }
 0x649   : > { %v5241_v42 = vmax.f32 %v5122_v54, %v5209_v51  ;;  %v5242_v29 = vmax.f32 %v5171_v50, %v5210_v18 }
 0x64c   : > { %v5123_v6 = vpop.f32.mrf.mxu0  ;;  %v5172_v36 = vpop.f32.mrf.mxu1 }
 0x64d   : > { %v5124_v37 = vadd.f32 %v5123_v6, %v16173_v9  ;;  %v5173_v55 = vadd.f32 %v5172_v36, %v16175_v27 }
 0x64f   : > { %v5211_v63 = vmul.f32 0.2, %v5124_v37  ;;  %v5212_v1 = vmul.f32 0.2, %v5173_v55 }
 0x651   : > { %v5243_v12 = vmax.f32 %v5124_v37, %v5211_v63  ;;  %v5244_v19 = vmax.f32 %v5173_v55, %v5212_v1 }
 0x653   : > { %v16229_v40 = vpack.c.bf16 %v5243_v12, %v5241_v42  ;;  %v16231_v61 = vpack.c.bf16 %v5244_v19, %v5242_v29 }
 0x654   : > { %v5126_v35 = vpop.f32.mrf.mxu0  ;;  %v5175_v0 = vpop.f32.mrf.mxu1 }
 0x655   : > { %5692 = vmatmul.bf16.gmra.mxu2 %v16229_v40  ;;  %5741 = vmatmul.bf16.gmra.mxu3 %v16231_v61  ;;  %v5127_v20 = vadd.f32 %v5126_v35, %v16173_v9  ;;  %v5176_v23 = vadd.f32 %v5175_v0, %v16175_v27  ;;  %v10839_v35 = vld [vmem:[%s18521_s10 + $0x78] sm:$0xf0]  ;;  %v12343_v0 = vld [vmem:[%s18521_s10 + $0x16c] sm:$0xf] }
 0x656   : > { %5790 = vmatmul.bf16.gmra.mxu0 %v16229_v40  ;;  %5839 = vmatmul.bf16.gmra.mxu1 %v16231_v61  ;;  %v10842_v33 = vor.u32 %v12311_v30, %v10839_v35 }
 0x657   : > { %v5213_v52 = vmul.f32 0.2, %v5127_v20  ;;  %v5214_v31 = vmul.f32 0.2, %v5176_v23 }
 0x658   : > { %5977 = vmatpush.bf16.msra.mxu0 %v10842_v33 }
 0x659   : > { %v5245_v13 = vmax.f32 %v5127_v20, %v5213_v52  ;;  %v5246_v16 = vmax.f32 %v5176_v23, %v5214_v31  ;;  %v10967_v20 = vld [vmem:[%s18521_s10 + $0x178] sm:$0xf0] }
 0x65a   : > { %v10970_v23 = vor.u32 %v12343_v0, %v10967_v20  ;;  %v12303_v20 = vld [vmem:[%s18521_s10 + $0x2c] sm:$0xf] }
 0x65c   : > { %v5128_v3 = vpop.f32.mrf.mxu0  ;;  %v5177_v10 = vpop.f32.mrf.mxu1  ;;  %6026 = vmatpush.bf16.msra.mxu1 %v10970_v23  ;;  %v10807_v23 = vld [vmem:[%s18521_s10 + $0x38] sm:$0xf0] }
 0x65d   : > { %v5129_v45 = vadd.f32 %v5128_v3, %v16173_v9  ;;  %v5178_v59 = vadd.f32 %v5177_v10, %v16175_v27  ;;  %v12341_v3 = vld [vmem:[%s18521_s10 + $0x154] sm:$0xf0]  ;;  %v10810_v14 = vor.u32 %v12303_v20, %v10807_v23 }
 0x65e   : > { %v10950_v10 = vor.u32 %v12341_v3, %v10949_v8  ;;  %v10935_v8 = vld [vmem:[%s18521_s10 + $0x138] sm:$0xf0]  ;;  %v10789_v3 = vld [vmem:[%s18521_s10 + $0x8] sm:$0xf] }
 0x65f   : > { %v5215_v60 = vmul.f32 0.2, %v5129_v45  ;;  %v5216_v7 = vmul.f32 0.2, %v5178_v59 }
 0x660   : > { %5929 = vmatpush.bf16.msra.mxu3 %v10950_v10  ;;  %6027 = vmatpush.bf16.msra.mxu1 %v10954_v21  ;;  %v12301_v10 = vld [vmem:[%s18521_s10 + $0x14] sm:$0xf0] }
 0x661   : > { %v5247_v34 = vmax.f32 %v5129_v45, %v5215_v60  ;;  %v5248_v47 = vmax.f32 %v5178_v59, %v5216_v7 }
 0x663   : > { %v16265_v56 = vpack.c.bf16 %v5247_v34, %v5245_v13  ;;  %v16267_v24 = vpack.c.bf16 %v5248_v47, %v5246_v16 }
 0x664   : > { %v5131_v53 = vpop.f32.mrf.mxu0  ;;  %v5180_v2 = vpop.f32.mrf.mxu1 }
 0x665   : > { %5697 = vmatmul.bf16.gmra.mxu2 %v16265_v56  ;;  %5746 = vmatmul.bf16.gmra.mxu3 %v16267_v24  ;;  %v5132_v54 = vadd.f32 %v5131_v53, %v16173_v9  ;;  %v5181_v50 = vadd.f32 %v5180_v2, %v16175_v27  ;;  %v12307_v2 = vld [vmem:[%s18521_s10 + $0x4c] sm:$0xf] }
 0x666   : > { %5795 = vmatmul.bf16.gmra.mxu0 %v16265_v56  ;;  %5844 = vmatmul.bf16.gmra.mxu1 %v16267_v24 }
 0x667   : > { %v5217_v51 = vmul.f32 0.2, %v5132_v54  ;;  %v5218_v18 = vmul.f32 0.2, %v5181_v50 }
 0x669   : > { %v5249_v42 = vmax.f32 %v5132_v54, %v5217_v51  ;;  %v5250_v29 = vmax.f32 %v5181_v50, %v5218_v18  ;;  %v10826_v50 = vor.u32 %v12307_v2, %v10823_v48  ;;  %v12337_v51 = vld [vmem:[%s18521_s10 + $0x134] sm:$0xf0] }
 0x66b   : > { %5978 = vmatpush.bf16.msra.mxu0 %v10826_v50 }
 0x66c   : > { %v5133_v6 = vpop.f32.mrf.mxu0  ;;  %v5182_v36 = vpop.f32.mrf.mxu1 }
 0x66d   : > { %v5134_v37 = vadd.f32 %v5133_v6, %v16173_v9  ;;  %v5183_v55 = vadd.f32 %v5182_v36, %v16175_v27  ;;  %v10933_v6 = vld [vmem:[%s18521_s10 + $0x128] sm:$0xf]  ;;  %v10806_v36 = vor.u32 %v12305_v62, %v10805_v26 }
 0x66e   : > { %v10934_v18 = vor.u32 %v12337_v51, %v10933_v6 }
 0x66f   : > { %v5219_v63 = vmul.f32 0.2, %v5134_v37  ;;  %v5220_v1 = vmul.f32 0.2, %v5183_v55  ;;  %5881 = vmatpush.bf16.msra.mxu2 %v10806_v36  ;;  %5979 = vmatpush.bf16.msra.mxu0 %v10810_v14  ;;  %v11457_v14 = vld [vmem:[%s18523_s12 + $0x348] sm:$0xf] }
 0x670   : > { %5930 = vmatpush.bf16.msra.mxu3 %v10934_v18 }
 0x671   : > { %v5251_v12 = vmax.f32 %v5134_v37, %v5219_v63  ;;  %v5252_v19 = vmax.f32 %v5183_v55, %v5220_v1 }
 0x673   : > { %v16301_v57 = vpack.c.bf16 %v5251_v12, %v5249_v42  ;;  %v16303_v32 = vpack.c.bf16 %v5252_v19, %v5250_v29 }
 0x674   : > { %v5136_v49 = vpop.f32.mrf.mxu0  ;;  %v5185_v46 = vpop.f32.mrf.mxu1 }
 0x675   : > { %5702 = vmatmul.bf16.gmra.mxu2 %v16301_v57  ;;  %5751 = vmatmul.bf16.gmra.mxu3 %v16303_v32  ;;  %v5137_v5 = vadd.f32 %v5136_v49, %v16173_v9  ;;  %v5186_v41 = vadd.f32 %v5185_v46, %v16175_v27 }
 0x676   : > { %5800 = vmatmul.bf16.gmra.mxu0 %v16301_v57  ;;  %5849 = vmatmul.bf16.gmra.mxu1 %v16303_v32 }
 0x677   : > { %v5221_v45 = vmul.f32 0.2, %v5137_v5  ;;  %v5222_v59 = vmul.f32 0.2, %v5186_v41 }
 0x679   : > { %v5253_v34 = vmax.f32 %v5137_v5, %v5221_v45  ;;  %v5254_v47 = vmax.f32 %v5186_v41, %v5222_v59  ;;  %v12335_v5 = vld [vmem:[%s18521_s10 + $0x12c] sm:$0xf]  ;;  %v12333_v45 = vld [vmem:[%s18521_s10 + $0x114] sm:$0xf0] }
 0x67a   : > { %v10938_v4 = vor.u32 %v12335_v5, %v10935_v8  ;;  %v12470_v8 = vld [vmem:[%s18523_s12 + $0x360] sm:$0xf0] }
 0x67c   : > { %v5138_v52 = vpop.f32.mrf.mxu0  ;;  %v5187_v31 = vpop.f32.mrf.mxu1  ;;  %6028 = vmatpush.bf16.msra.mxu1 %v10938_v4  ;;  %v11458_v4 = vor.u32 %v12470_v8, %v11457_v14 }
 0x67d   : > { %v5139_v60 = vadd.f32 %v5138_v52, %v16173_v9  ;;  %v5188_v7 = vadd.f32 %v5187_v31, %v16175_v27  ;;  %v10917_v52 = vld [vmem:[%s18521_s10 + $0x108] sm:$0xf]  ;;  %v10790_v31 = vor.u32 %v12301_v10, %v10789_v3  ;;  %v16456_v3 = vld [vmem:[%s18522_s11] sm:$0xf] }
 0x67e   : > { %v10918_v59 = vor.u32 %v12333_v45, %v10917_v52  ;;  %v16459_v10 = vperm.slane %v16456_v3, 1 }
 0x67f   : > { %v5223_v13 = vmul.f32 0.2, %v5139_v60  ;;  %v5224_v16 = vmul.f32 0.2, %v5188_v7  ;;  %5882 = vmatpush.bf16.msra.mxu2 %v10790_v31 }
 0x680   : > { %5931 = vmatpush.bf16.msra.mxu3 %v10918_v59  ;;  %v11681_v59 = vld [vmem:[%s18523_s12 + $0x508] sm:$0xf] }
 0x681   : > { %v5255_v25 = vmax.f32 %v5139_v60, %v5223_v13  ;;  %v5256_v11 = vmax.f32 %v5188_v7, %v5224_v16  ;;  %v12299_v60 = vld [vmem:[%s18521_s10 + $0xc] sm:$0xf]  ;;  %v10791_v7 = vld [vmem:[%s18521_s10 + $0x18] sm:$0xf0] }
 0x682   : > { %v12331_v13 = vld [vmem:[%s18521_s10 + $0x10c] sm:$0xf] }
 0x683   : > { %v16337_v38 = vpack.c.bf16 %v5255_v25, %v5253_v34  ;;  %v16339_v53 = vpack.c.bf16 %v5256_v11, %v5254_v47  ;;  %v10794_v47 = vor.u32 %v12299_v60, %v10791_v7  ;;  %v10919_v25 = vld [vmem:[%s18521_s10 + $0x118] sm:$0xf0]  ;;  %v12526_v60 = vld [vmem:[%s18523_s12 + $0x520] sm:$0xf0]  ;;  %v11905_v7 = vld [vmem:[%s18523_s12 + $0x6c8] sm:$0xf] }
 0x684   : > { %v5141_v44 = vpop.f32.mrf.mxu0  ;;  %v5190_v54 = vpop.f32.mrf.mxu1  ;;  %v10922_v11 = vor.u32 %v12331_v13, %v10919_v25  ;;  %7704 = vmatpush.bf16.msrb.mxu3 %v11458_v4  ;;  %v16474_v13 = vperm.slane %v16456_v3, 0 }
 0x685   : > { %5707 = vmatmul.bf16.gmra.mxu2 %v16337_v38  ;;  %5756 = vmatmul.bf16.gmra.mxu3 %v16339_v53  ;;  %v5142_v22 = vadd.f32 %v5141_v44, %v16173_v9  ;;  %v5191_v28 = vadd.f32 %v5190_v54, %v16175_v27 }
 0x686   : > { %5805 = vmatmul.bf16.gmra.mxu0 %v16337_v38  ;;  %5854 = vmatmul.bf16.gmra.mxu1 %v16339_v53 }
 0x687   : > { %v5225_v63 = vmul.f32 0.2, %v5142_v22  ;;  %v5226_v1 = vmul.f32 0.2, %v5191_v28  ;;  %5980 = vmatpush.bf16.msra.mxu0 %v10794_v47  ;;  %6029 = vmatpush.bf16.msra.mxu1 %v10922_v11 }
 0x689   : > { %v5257_v30 = vmax.f32 %v5142_v22, %v5225_v63  ;;  %v5258_v35 = vmax.f32 %v5191_v28, %v5226_v1 }
 0x68c   : > { %v5143_v37 = vpop.f32.mrf.mxu0  ;;  %v5192_v55 = vpop.f32.mrf.mxu1 }
 0x68d   : > { %v5144_v42 = vadd.f32 %v5143_v37, %v16173_v9  ;;  %v5193_v29 = vadd.f32 %v5192_v55, %v16175_v27 }
 0x68f   : > { %v5227_v12 = vmul.f32 0.2, %v5144_v42  ;;  %v5228_v19 = vmul.f32 0.2, %v5193_v29 }
 0x691   : > { %v5259_v0 = vmax.f32 %v5144_v42, %v5227_v12  ;;  %v5260_v49 = vmax.f32 %v5193_v29, %v5228_v19 }
 0x693   : > { %v16373_v46 = vpack.c.bf16 %v5259_v0, %v5257_v30  ;;  %v16375_v33 = vpack.c.bf16 %v5260_v49, %v5258_v35 }
 0x694   : > { %v5146_v41 = vpop.f32.mrf.mxu0  ;;  %v5195_v58 = vpop.f32.mrf.mxu1 }
 0x695   : > { %5712 = vmatmul.bf16.gmra.mxu2 %v16373_v46  ;;  %5761 = vmatmul.bf16.gmra.mxu3 %v16375_v33  ;;  %v5147_v16 = vadd.f32 %v5146_v41, %v16173_v9  ;;  %v5196_v34 = vadd.f32 %v5195_v58, %v16175_v27 }
 0x696   : > { %5810 = vmatmul.bf16.gmra.mxu0 %v16373_v46  ;;  %5859 = vmatmul.bf16.gmra.mxu1 %v16375_v33 }
 0x697   : > { %v5229_v43 = vmul.f32 0.2, %v5147_v16  ;;  %v5230_v44 = vmul.f32 0.2, %v5196_v34 }
 0x699   : > { %v5261_v22 = vmax.f32 %v5147_v16, %v5229_v43  ;;  %v5262_v28 = vmax.f32 %v5196_v34, %v5230_v44  ;;  %v11682_v16 = vor.u32 %v12526_v60, %v11681_v59  ;;  %v12582_v34 = vld [vmem:[%s18523_s12 + $0x6e0] sm:$0xf0]  ;;  %v11205_v43 = vld [vmem:[%s18523_s12 + $0x150] sm:$0xf]  ;;  %v12407_v44 = vld [vmem:[%s18523_s12 + $0x168] sm:$0xf0] }
 0x69a   : > { %v11906_v25 = vor.u32 %v12582_v34, %v11905_v7  ;;  %v11177_v60 = vld [vmem:[%s18523_s12 + $0x118] sm:$0xf] }
 0x69b   : > { %7753 = vmatpush.bf16.msrb.mxu0 %v11682_v16  ;;  %v11401_v7 = vld [vmem:[%s18523_s12 + $0x2d8] sm:$0xf]  ;;  %v12456_v16 = vld [vmem:[%s18523_s12 + $0x2f0] sm:$0xf0] }
 0x69c   : > { %v5148_v2 = vpop.f32.mrf.mxu0  ;;  %v5197_v48 = vpop.f32.mrf.mxu1  ;;  %7802 = vmatpush.bf16.msrb.mxu1 %v11906_v25 }
 0x69d   : > { %v5149_v54 = vadd.f32 %v5148_v2, %v16173_v9  ;;  %v5198_v50 = vadd.f32 %v5197_v48, %v16175_v27 }
 0x69f   : > { %v5231_v17 = vmul.f32 0.2, %v5149_v54  ;;  %v5232_v21 = vmul.f32 0.2, %v5198_v50 }
 0x6a1   : > { %v5263_v26 = vmax.f32 %v5149_v54, %v5231_v17  ;;  %v5264_v62 = vmax.f32 %v5198_v50, %v5232_v21  ;;  %v11206_v54 = vor.u32 %v12407_v44, %v11205_v43 }
 0x6a3   : > { %v16421_v6 = vpack.c.bf16 %v5263_v26, %v5261_v22  ;;  %v16423_v36 = vpack.c.bf16 %v5264_v62, %v5262_v28 }
 0x6a4   : > { %v5151_v51 = vpop.f32.mrf.mxu0  ;;  %v5200_v18 = vpop.f32.mrf.mxu1 }
 0x6a5   : > { %5717 = vmatmul.bf16.gmra.mxu2 %v16421_v6  ;;  %5766 = vmatmul.bf16.gmra.mxu3 %v16423_v36  ;;  %v5152_v37 = vadd.f32 %v5151_v51, %v16173_v9  ;;  %v5201_v55 = vadd.f32 %v5200_v18, %v16175_v27 }
 0x6a6   : > { %5815 = vmatmul.bf16.gmra.mxu0 %v16421_v6  ;;  %5864 = vmatmul.bf16.gmra.mxu1 %v16423_v36 }
 0x6a7   : > { %v5233_v42 = vmul.f32 0.2, %v5152_v37  ;;  %v5234_v29 = vmul.f32 0.2, %v5201_v55 }
 0x6a9   : > { %v5265_v0 = vmax.f32 %v5152_v37, %v5233_v42  ;;  %v5266_v49 = vmax.f32 %v5201_v55, %v5234_v29 }
 0x6ac   : > { %v5153_v63 = vpop.f32.mrf.mxu0  ;;  %v5202_v1 = vpop.f32.mrf.mxu1 }
 0x6ad   : > { %v5154_v12 = vadd.f32 %v5153_v63, %v16173_v9  ;;  %v5203_v19 = vadd.f32 %v5202_v1, %v16175_v27  ;;  %v11233_v9 = vld [vmem:[%s18523_s12 + $0x188] sm:$0xf]  ;;  %v12414_v27 = vld [vmem:[%s18523_s12 + $0x1a0] sm:$0xf0] }
 0x6ae   : > { %v11234_v58 = vor.u32 %v12414_v27, %v11233_v9  ;;  %v12575_v27 = vld [vmem:[%s18523_s12 + $0x6a8] sm:$0xf0] }
 0x6af   : > { %v5235_v30 = vmul.f32 0.2, %v5154_v12  ;;  %v5236_v35 = vmul.f32 0.2, %v5203_v19 }
 0x6b0   : > { %7655 = vmatpush.bf16.msrb.mxu2 %v11234_v58 }
 0x6b1   : > { %v5267_v20 = vmax.f32 %v5154_v12, %v5235_v30  ;;  %v5268_v23 = vmax.f32 %v5203_v19, %v5236_v35 }
 0x6b3   : > { %v16433_v5 = vpack.c.bf16 %v5267_v20, %v5265_v0  ;;  %v16435_v41 = vpack.c.bf16 %v5268_v23, %v5266_v49  ;;  %v11653_v0 = vld [vmem:[%s18523_s12 + $0x4d0] sm:$0xf]  ;;  %v12519_v49 = vld [vmem:[%s18523_s12 + $0x4e8] sm:$0xf0] }
 0x6b4   : > { %7656 = vmatpush.bf16.msrb.mxu2 %v11206_v54  ;;  %v11877_v20 = vld [vmem:[%s18523_s12 + $0x690] sm:$0xf]  ;;  %v11654_v9 = vor.u32 %v12519_v49, %v11653_v0 }
 0x6b5   : > { %5722 = vmatmul.bf16.gmra.mxu2 %v16433_v5  ;;  %5771 = vmatmul.bf16.gmra.mxu3 %v16435_v41  ;;  %v11878_v14 = vor.u32 %v12575_v27, %v11877_v20  ;;  %v11373_v27 = vld [vmem:[%s18523_s12 + $0x2a0] sm:$0xf] }
 0x6b6   : > { %5820 = vmatmul.bf16.gmra.mxu0 %v16433_v5  ;;  %5869 = vmatmul.bf16.gmra.mxu1 %v16435_v41 }
 0x6b7   : > { %7754 = vmatpush.bf16.msrb.mxu0 %v11654_v9  ;;  %7803 = vmatpush.bf16.msrb.mxu1 %v11878_v14  ;;  %v11149_v9 = vld [vmem:[%s18523_s12 + $0xe0] sm:$0xf] }
 0x6c3   : > { %v5786_v52 = vpop.f32.mrf.mxu0  ;;  %v5835_v31 = vpop.f32.mrf.mxu1 }
 0x6c4   : > { %v5787_v45 = vadd.f32 %v5786_v52, %v16459_v10 }
 0x6c5   : > { %5883 = vmatmul.bf16.vlgmr.msra.gmra.mxu2 %v16193_v15  ;;  %5932 = vmatmul.bf16.vlgmr.msra.gmra.mxu3 %v16195_v39 }
 0x6c6   : > { %v5836_v47 = vadd.f32 %v5835_v31, %v5787_v45  ;;  %5981 = vmatmul.bf16.vlgmr.msra.gmra.mxu0 %v16193_v15  ;;  %6030 = vmatmul.bf16.vlgmr.msra.gmra.mxu1 %v16195_v39  ;;  %v11429_v15 = vld [vmem:[%s18523_s12 + $0x310] sm:$0xf]  ;;  %v12463_v39 = vld [vmem:[%s18523_s12 + $0x328] sm:$0xf0] }
 0x6c7   : > { %v11430_v22 = vor.u32 %v12463_v39, %v11429_v15 }
 0x6c8   : > { %v5688_v11 = vpop.f32.mrf.mxu2  ;;  %v5737_v2 = vpop.f32.mrf.mxu3  ;;  %v6072_v26 = vmul.f32 0.2, %v5836_v47 }
 0x6c9   : > { %v5689_v48 = vadd.f32 %v5688_v11, %v16474_v13  ;;  %7705 = vmatpush.bf16.msrb.mxu3 %v11430_v22  ;;  %v11402_v11 = vor.u32 %v12456_v16, %v11401_v7 }
 0x6ca   : > { %v6136_v63 = vmax.f32 %v5836_v47, %v6072_v26 }
 0x6cb   : > { %v5738_v50 = vadd.f32 %v5737_v2, %v5689_v48  ;;  %v5788_v17 = vpop.f32.mrf.mxu0  ;;  %v5837_v21 = vpop.f32.mrf.mxu1 }
 0x6cc   : > { %v5789_v28 = vadd.f32 %v5788_v17, %v16459_v10 }
 0x6cd   : > { %v6071_v42 = vmul.f32 0.2, %v5738_v50  ;;  %7706 = vmatpush.bf16.msrb.mxu3 %v11402_v11 }
 0x6ce   : > { %v5838_v62 = vadd.f32 %v5837_v21, %v5789_v28 }
 0x6cf   : > { %v6135_v8 = vmax.f32 %v5738_v50, %v6071_v42  ;;  %v12568_v42 = vld [vmem:[%s18523_s12 + $0x670] sm:$0xf0] }
 0x6d0   : > { %v6076_v51 = vmul.f32 0.2, %v5838_v62  ;;  %v5690_v18 = vpop.f32.mrf.mxu2  ;;  %v5739_v37 = vpop.f32.mrf.mxu3 }
 0x6d1   : > { %v5691_v55 = vadd.f32 %v5690_v18, %v16474_v13  ;;  %v11625_v18 = vld [vmem:[%s18523_s12 + $0x498] sm:$0xf] }
 0x6d2   : > { %v6140_v1 = vmax.f32 %v5838_v62, %v6076_v51 }
 0x6d3   : > { %v5740_v29 = vadd.f32 %v5739_v37, %v5691_v55  ;;  %v5791_v12 = vpop.f32.mrf.mxu0  ;;  %v5840_v19 = vpop.f32.mrf.mxu1  ;;  %v12512_v37 = vld [vmem:[%s18523_s12 + $0x4b0] sm:$0xf0]  ;;  %v11849_v55 = vld [vmem:[%s18523_s12 + $0x658] sm:$0xf] }
 0x6d4   : > { %v16496_v30 = vpack.c.bf16 %v6140_v1, %v6136_v63  ;;  %v5792_v35 = vadd.f32 %v5791_v12, %v16459_v10  ;;  %v11626_v1 = vor.u32 %v12512_v37, %v11625_v18  ;;  %v11850_v12 = vor.u32 %v12568_v42, %v11849_v55  ;;  %v11345_v42 = vld [vmem:[%s18523_s12 + $0x268] sm:$0xf] }
 0x6d5   : > { %v6075_v23 = vmul.f32 0.2, %v5740_v29  ;;  %5888 = vmatmul.bf16.gmra.mxu2 %v16229_v40  ;;  %5937 = vmatmul.bf16.gmra.mxu3 %v16231_v61 }
 0x6d6   : > { %v5841_v58 = vadd.f32 %v5840_v19, %v5792_v35  ;;  %5986 = vmatmul.bf16.gmra.mxu0 %v16229_v40  ;;  %6035 = vmatmul.bf16.gmra.mxu1 %v16231_v61  ;;  %v12400_v40 = vld [vmem:[%s18523_s12 + $0x130] sm:$0xf0] }
 0x6d7   : > { %v6139_v4 = vmax.f32 %v5740_v29, %v6075_v23  ;;  %v11178_v61 = vor.u32 %v12400_v40, %v11177_v60  ;;  %7755 = vmatpush.bf16.msrb.mxu0 %v11626_v1  ;;  %7804 = vmatpush.bf16.msrb.mxu1 %v11850_v12  ;;  %v11121_v1 = vld [vmem:[%s18523_s12 + $0xa8] sm:$0xf] }
 0x6d8   : > { %v5693_v52 = vpop.f32.mrf.mxu2  ;;  %v5742_v31 = vpop.f32.mrf.mxu3  ;;  %v6080_v48 = vmul.f32 0.2, %v5841_v58 }
 0x6d9   : > { %v16515_v45 = vpack.c.bf16 %v6139_v4, %v6135_v8  ;;  %v5694_v59 = vadd.f32 %v5693_v52, %v16474_v13  ;;  %7657 = vmatpush.bf16.msrb.mxu2 %v11178_v61 }
 0x6da   : > { %v6144_v50 = vmax.f32 %v5841_v58, %v6080_v48  ;;  %v12449_v58 = vld [vmem:[%s18523_s12 + $0x2b8] sm:$0xf0] }
 0x6db   : > { %v5743_v34 = vadd.f32 %v5742_v31, %v5694_v59  ;;  %v5793_v47 = vpop.f32.mrf.mxu0  ;;  %v5842_v25 = vpop.f32.mrf.mxu1  ;;  %v11374_v52 = vor.u32 %v12449_v58, %v11373_v27 }
 0x6dc   : > { %v5794_v2 = vadd.f32 %v5793_v47, %v16459_v10 }
 0x6dd   : > { %v6079_v21 = vmul.f32 0.2, %v5743_v34  ;;  %7707 = vmatpush.bf16.msrb.mxu3 %v11374_v52 }
 0x6de   : > { %v5843_v43 = vadd.f32 %v5842_v25, %v5794_v2 }
 0x6df   : > { %v6143_v19 = vmax.f32 %v5743_v34, %v6079_v21  ;;  %v12561_v21 = vld [vmem:[%s18523_s12 + $0x638] sm:$0xf0] }
 0x6e0   : > { %v6084_v44 = vmul.f32 0.2, %v5843_v43  ;;  %v5695_v54 = vpop.f32.mrf.mxu2  ;;  %v5744_v15 = vpop.f32.mrf.mxu3 }
 0x6e1   : > { %v5696_v39 = vadd.f32 %v5695_v54, %v16474_v13  ;;  %v11597_v54 = vld [vmem:[%s18523_s12 + $0x460] sm:$0xf] }
 0x6e2   : > { %v6148_v17 = vmax.f32 %v5843_v43, %v6084_v44 }
 0x6e3   : > { %v5745_v22 = vadd.f32 %v5744_v15, %v5696_v39  ;;  %v5796_v28 = vpop.f32.mrf.mxu0  ;;  %v5845_v26 = vpop.f32.mrf.mxu1  ;;  %v12505_v15 = vld [vmem:[%s18523_s12 + $0x478] sm:$0xf0]  ;;  %v11821_v39 = vld [vmem:[%s18523_s12 + $0x620] sm:$0xf] }
 0x6e4   : > { %v16532_v62 = vpack.c.bf16 %v6148_v17, %v6144_v50  ;;  %v5797_v51 = vadd.f32 %v5796_v28, %v16459_v10  ;;  %v11598_v17 = vor.u32 %v12505_v15, %v11597_v54  ;;  %v11822_v28 = vor.u32 %v12561_v21, %v11821_v39  ;;  %v11317_v21 = vld [vmem:[%s18523_s12 + $0x230] sm:$0xf] }
 0x6e5   : > { %v6083_v63 = vmul.f32 0.2, %v5745_v22  ;;  %5893 = vmatmul.bf16.gmra.mxu2 %v16265_v56  ;;  %5942 = vmatmul.bf16.gmra.mxu3 %v16267_v24 }
 0x6e6   : > { %v5846_v29 = vadd.f32 %v5845_v26, %v5797_v51  ;;  %5991 = vmatmul.bf16.gmra.mxu0 %v16265_v56  ;;  %6040 = vmatmul.bf16.gmra.mxu1 %v16267_v24  ;;  %v12393_v56 = vld [vmem:[%s18523_s12 + $0xf8] sm:$0xf0] }
 0x6e7   : > { %v6147_v35 = vmax.f32 %v5745_v22, %v6083_v63  ;;  %v11150_v24 = vor.u32 %v12393_v56, %v11149_v9  ;;  %7756 = vmatpush.bf16.msrb.mxu0 %v11598_v17  ;;  %7805 = vmatpush.bf16.msrb.mxu1 %v11822_v28  ;;  %v11093_v17 = vld [vmem:[%s18523_s12 + $0x70] sm:$0xf] }
 0x6e8   : > { %v5698_v0 = vpop.f32.mrf.mxu2  ;;  %v5747_v49 = vpop.f32.mrf.mxu3  ;;  %v6088_v59 = vmul.f32 0.2, %v5846_v29 }
 0x6e9   : > { %v16551_v20 = vpack.c.bf16 %v6147_v35, %v6143_v19  ;;  %v5699_v23 = vadd.f32 %v5698_v0, %v16474_v13  ;;  %7658 = vmatpush.bf16.msrb.mxu2 %v11150_v24 }
 0x6ea   : > { %v6152_v34 = vmax.f32 %v5846_v29, %v6088_v59  ;;  %v12442_v29 = vld [vmem:[%s18523_s12 + $0x280] sm:$0xf0] }
 0x6eb   : > { %v5748_v14 = vadd.f32 %v5747_v49, %v5699_v23  ;;  %v5798_v8 = vpop.f32.mrf.mxu0  ;;  %v5847_v4 = vpop.f32.mrf.mxu1  ;;  %v11346_v0 = vor.u32 %v12442_v29, %v11345_v42 }
 0x6ec   : > { %v5799_v31 = vadd.f32 %v5798_v8, %v16459_v10 }
 0x6ed   : > { %v6087_v25 = vmul.f32 0.2, %v5748_v14  ;;  %7708 = vmatpush.bf16.msrb.mxu3 %v11346_v0  ;;  %v11765_v0 = vld [vmem:[%s18523_s12 + $0x5b0] sm:$0xf] }
 0x6ee   : > { %v5848_v60 = vadd.f32 %v5847_v4, %v5799_v31 }
 0x6ef   : > { %v6151_v26 = vmax.f32 %v5748_v14, %v6087_v25  ;;  %v12554_v25 = vld [vmem:[%s18523_s12 + $0x600] sm:$0xf0] }
 0x6f0   : > { %v6092_v40 = vmul.f32 0.2, %v5848_v60  ;;  %v5700_v61 = vpop.f32.mrf.mxu2  ;;  %v5749_v7 = vpop.f32.mrf.mxu3 }
 0x6f1   : > { %v5701_v16 = vadd.f32 %v5700_v61, %v16474_v13  ;;  %v11569_v61 = vld [vmem:[%s18523_s12 + $0x428] sm:$0xf] }
 0x6f2   : > { %v6156_v47 = vmax.f32 %v5848_v60, %v6092_v40 }
 0x6f3   : > { %v5750_v11 = vadd.f32 %v5749_v7, %v5701_v16  ;;  %v5801_v2 = vpop.f32.mrf.mxu0  ;;  %v5850_v48 = vpop.f32.mrf.mxu1  ;;  %v12498_v7 = vld [vmem:[%s18523_s12 + $0x440] sm:$0xf0]  ;;  %v11793_v16 = vld [vmem:[%s18523_s12 + $0x5e8] sm:$0xf] }
 0x6f4   : > { %v16568_v43 = vpack.c.bf16 %v6156_v47, %v6152_v34  ;;  %v5802_v44 = vadd.f32 %v5801_v2, %v16459_v10  ;;  %v11570_v47 = vor.u32 %v12498_v7, %v11569_v61  ;;  %v11794_v2 = vor.u32 %v12554_v25, %v11793_v16 }
 0x6f5   : > { %v6091_v50 = vmul.f32 0.2, %v5750_v11  ;;  %5898 = vmatmul.bf16.gmra.mxu2 %v16301_v57  ;;  %5947 = vmatmul.bf16.gmra.mxu3 %v16303_v32 }
 0x6f6   : > { %v5851_v22 = vadd.f32 %v5850_v48, %v5802_v44  ;;  %5996 = vmatmul.bf16.gmra.mxu0 %v16301_v57  ;;  %6045 = vmatmul.bf16.gmra.mxu1 %v16303_v32  ;;  %v12386_v57 = vld [vmem:[%s18523_s12 + $0xc0] sm:$0xf0] }
 0x6f7   : > { %v6155_v51 = vmax.f32 %v5750_v11, %v6091_v50  ;;  %v11122_v32 = vor.u32 %v12386_v57, %v11121_v1  ;;  %7757 = vmatpush.bf16.msrb.mxu0 %v11570_v47  ;;  %7806 = vmatpush.bf16.msrb.mxu1 %v11794_v2  ;;  %v11037_v2 = vld [vmem:[%s18523_s12] sm:$0xf] }
 0x6f8   : > { %v5703_v18 = vpop.f32.mrf.mxu2  ;;  %v5752_v37 = vpop.f32.mrf.mxu3  ;;  %v6096_v23 = vmul.f32 0.2, %v5851_v22 }
 0x6f9   : > { %v16587_v55 = vpack.c.bf16 %v6155_v51, %v6151_v26  ;;  %v5704_v63 = vadd.f32 %v5703_v18, %v16474_v13  ;;  %7659 = vmatpush.bf16.msrb.mxu2 %v11122_v32 }
 0x6fa   : > { %v6160_v14 = vmax.f32 %v5851_v22, %v6096_v23  ;;  %v12435_v22 = vld [vmem:[%s18523_s12 + $0x248] sm:$0xf0] }
 0x6fb   : > { %v5753_v12 = vadd.f32 %v5752_v37, %v5704_v63  ;;  %v5803_v19 = vpop.f32.mrf.mxu0  ;;  %v5852_v35 = vpop.f32.mrf.mxu1  ;;  %v11318_v18 = vor.u32 %v12435_v22, %v11317_v21 }
 0x6fc   : > { %v5804_v49 = vadd.f32 %v5803_v19, %v16459_v10  ;;  %v11541_v19 = vld [vmem:[%s18523_s12 + $0x3f0] sm:$0xf] }
 0x6fd   : > { %v6095_v4 = vmul.f32 0.2, %v5753_v12  ;;  %7709 = vmatpush.bf16.msrb.mxu3 %v11318_v18  ;;  %v11513_v18 = vld [vmem:[%s18523_s12 + $0x3b8] sm:$0xf] }
 0x6fe   : > { %v5853_v9 = vadd.f32 %v5852_v35, %v5804_v49  ;;  %v12491_v35 = vld [vmem:[%s18523_s12 + $0x408] sm:$0xf0] }
 0x6ff   : > { %v6159_v48 = vmax.f32 %v5753_v12, %v6095_v4  ;;  %v11542_v23 = vor.u32 %v12491_v35, %v11541_v19 }
 0x700   : > { %v6100_v56 = vmul.f32 0.2, %v5853_v9  ;;  %v5705_v24 = vpop.f32.mrf.mxu2  ;;  %v5754_v27 = vpop.f32.mrf.mxu3 }
 0x701   : > { %v5706_v58 = vadd.f32 %v5705_v24, %v16474_v13  ;;  %7758 = vmatpush.bf16.msrb.mxu0 %v11542_v23 }
 0x702   : > { %v6164_v8 = vmax.f32 %v5853_v9, %v6100_v56  ;;  %v12547_v9 = vld [vmem:[%s18523_s12 + $0x5c8] sm:$0xf0] }
 0x703   : > { %v5755_v52 = vadd.f32 %v5754_v27, %v5706_v58  ;;  %v5806_v31 = vpop.f32.mrf.mxu0  ;;  %v5855_v59 = vpop.f32.mrf.mxu1  ;;  %v11766_v24 = vor.u32 %v12547_v9, %v11765_v0 }
 0x704   : > { %v16604_v60 = vpack.c.bf16 %v6164_v8, %v6160_v14  ;;  %v5807_v40 = vadd.f32 %v5806_v31, %v16459_v10  ;;  %v11065_v31 = vld [vmem:[%s18523_s12 + $0x38] sm:$0xf] }
 0x705   : > { %v6099_v34 = vmul.f32 0.2, %v5755_v52  ;;  %5903 = vmatmul.bf16.gmra.mxu2 %v16337_v38  ;;  %5952 = vmatmul.bf16.gmra.mxu3 %v16339_v53 }
 0x706   : > { %v16621_v11 = vadd.f32 %v5855_v59, %v5807_v40  ;;  %6001 = vmatmul.bf16.gmra.mxu0 %v16337_v38  ;;  %6050 = vmatmul.bf16.gmra.mxu1 %v16339_v53  ;;  %v12379_v38 = vld [vmem:[%s18523_s12 + $0x88] sm:$0xf0]  ;;  %v11289_v59 = vld [vmem:[%s18523_s12 + $0x1f8] sm:$0xf]  ;;  %v12428_v40 = vld [vmem:[%s18523_s12 + $0x210] sm:$0xf0] }
 0x707   : > { %v6163_v44 = vmax.f32 %v5755_v52, %v6099_v34  ;;  %v11094_v53 = vor.u32 %v12379_v38, %v11093_v17  ;;  %7807 = vmatpush.bf16.msrb.mxu1 %v11766_v24  ;;  %v11290_v34 = vor.u32 %v12428_v40, %v11289_v59 }
 0x708   : > { %v5708_v54 = vpop.f32.mrf.mxu2  ;;  %v5757_v15 = vpop.f32.mrf.mxu3 }
 0x709   : > { %v16625_v39 = vpack.c.bf16 %v6163_v44, %v6159_v48  ;;  %v5709_v50 = vadd.f32 %v5708_v54, %v16474_v13  ;;  %7660 = vmatpush.bf16.msrb.mxu2 %v11094_v53  ;;  %7710 = vmatpush.bf16.msrb.mxu3 %v11290_v34  ;;  %v12365_v48 = vld [vmem:[%s18523_s12 + $0x18] sm:$0xf0] }
 0x70a   : > { %v11038_v54 = vor.u32 %v12365_v48, %v11037_v2  ;;  %v12477_v34 = vld [vmem:[%s18523_s12 + $0x398] sm:$0xf0] }
 0x70b   : > { %v5758_v28 = vadd.f32 %v5757_v15, %v5709_v50  ;;  %v16640_v26 = vpop.f32.mrf.mxu0  ;;  %v16642_v51 = vpop.f32.mrf.mxu1  ;;  %v11261_v15 = vld [vmem:[%s18523_s12 + $0x1c0] sm:$0xf]  ;;  %v12421_v50 = vld [vmem:[%s18523_s12 + $0x1d8] sm:$0xf0] }
 0x70c   : > { %v11262_v17 = vor.u32 %v12421_v50, %v11261_v15 }
 0x70d   : > { %v6103_v57 = vmul.f32 0.2, %v5758_v28 }
 0x70e   : > { %7711 = vmatpush.bf16.msrb.mxu3 %v11262_v17 }
 0x70f   : > { %v6167_v27 = vmax.f32 %v5758_v28, %v6103_v57 }
 0x710   : > { %v5710_v37 = vpop.f32.mrf.mxu2  ;;  %v5759_v63 = vpop.f32.mrf.mxu3 }
 0x711   : > { %v5711_v1 = vadd.f32 %v5710_v37, %v16474_v13  ;;  %v12484_v37 = vld [vmem:[%s18523_s12 + $0x3d0] sm:$0xf0] }
 0x712   : > { %v11514_v57 = vor.u32 %v12484_v37, %v11513_v18 }
 0x713   : > { %v5760_v32 = vadd.f32 %v5759_v63, %v5711_v1  ;;  %v5811_v42 = vpop.f32.mrf.mxu0  ;;  %v5860_v29 = vpop.f32.mrf.mxu1  ;;  %v11737_v63 = vld [vmem:[%s18523_s12 + $0x578] sm:$0xf] }
 0x714   : > { %v5812_v12 = vadd.f32 %v5811_v42, %v16459_v10  ;;  %7759 = vmatpush.bf16.msrb.mxu0 %v11514_v57 }
 0x715   : > { %v6107_v49 = vmul.f32 0.2, %v5760_v32  ;;  %5908 = vmatmul.bf16.gmra.mxu2 %v16373_v46  ;;  %5957 = vmatmul.bf16.gmra.mxu3 %v16375_v33 }
 0x716   : > { %v16660_v56 = vadd.f32 %v5860_v29, %v5812_v12  ;;  %6006 = vmatmul.bf16.gmra.mxu0 %v16373_v46  ;;  %6055 = vmatmul.bf16.gmra.mxu1 %v16375_v33  ;;  %v12372_v46 = vld [vmem:[%s18523_s12 + $0x50] sm:$0xf0] }
 0x717   : > { %v6171_v58 = vmax.f32 %v5760_v32, %v6107_v49  ;;  %v11066_v33 = vor.u32 %v12372_v46, %v11065_v31  ;;  %v12540_v32 = vld [vmem:[%s18523_s12 + $0x590] sm:$0xf0] }
 0x718   : > { %v5713_v14 = vpop.f32.mrf.mxu2  ;;  %v5762_v8 = vpop.f32.mrf.mxu3  ;;  %v11738_v29 = vor.u32 %v12540_v32, %v11737_v63  ;;  %v16763_v32 = vperm.slane %v16456_v3, 3 }
 0x719   : > { %v16664_v4 = vpack.c.bf16 %v6171_v58, %v6167_v27  ;;  %v5714_v52 = vadd.f32 %v5713_v14, %v16474_v13  ;;  %7661 = vmatpush.bf16.msrb.mxu2 %v11066_v33  ;;  %v12533_v14 = vld [vmem:[%s18523_s12 + $0x558] sm:$0xf0] }
 0x71a   : > { %7808 = vmatpush.bf16.msrb.mxu1 %v11738_v29 }
 0x71b   : > { %v5763_v61 = vadd.f32 %v5762_v8, %v5714_v52  ;;  %v16679_v7 = vpop.f32.mrf.mxu0  ;;  %v16681_v16 = vpop.f32.mrf.mxu1 }
 0x71d   : > { %v6111_v38 = vmul.f32 0.2, %v5763_v61  ;;  %7662 = vmatpush.bf16.msrb.mxu2 %v11038_v54 }
 0x71f   : > { %v6175_v12 = vmax.f32 %v5763_v61, %v6111_v38  ;;  %v11485_v61 = vld [vmem:[%s18523_s12 + $0x380] sm:$0xf]  ;;  %v12411_v38 = vld [vmem:[%s18523_s12 + $0x18c] sm:$0xf] }
 0x720   : > { %v5715_v47 = vpop.f32.mrf.mxu2  ;;  %v5764_v25 = vpop.f32.mrf.mxu3 }
 0x721   : > { %v5716_v44 = vadd.f32 %v5715_v47, %v16474_v13 }
 0x723   : > { %v5765_v53 = vadd.f32 %v5764_v25, %v5716_v44  ;;  %v5816_v21 = vpop.f32.mrf.mxu0  ;;  %v5865_v22 = vpop.f32.mrf.mxu1  ;;  %v11486_v25 = vor.u32 %v12477_v34, %v11485_v61  ;;  %v11207_v61 = vld [vmem:[%s18523_s12 + $0x16c] sm:$0xf0] }
 0x724   : > { %v5817_v28 = vadd.f32 %v5816_v21, %v16459_v10  ;;  %v11459_v21 = vld [vmem:[%s18523_s12 + $0x364] sm:$0xf0] }
 0x725   : > { %v6115_v1 = vmul.f32 0.2, %v5765_v53  ;;  %5913 = vmatmul.bf16.gmra.mxu2 %v16421_v6  ;;  %5962 = vmatmul.bf16.gmra.mxu3 %v16423_v36 }
 0x726   : > { %v16711_v42 = vadd.f32 %v5865_v22, %v5817_v28  ;;  %6011 = vmatmul.bf16.gmra.mxu0 %v16421_v6  ;;  %6060 = vmatmul.bf16.gmra.mxu1 %v16423_v36  ;;  %v11709_v36 = vld [vmem:[%s18523_s12 + $0x540] sm:$0xf] }
 0x727   : > { %v6179_v19 = vmax.f32 %v5765_v53, %v6115_v1  ;;  %v11710_v52 = vor.u32 %v12533_v14, %v11709_v36  ;;  %7760 = vmatpush.bf16.msrb.mxu0 %v11486_v25  ;;  %v11235_v53 = vld [vmem:[%s18523_s12 + $0x1a4] sm:$0xf0]  ;;  %v11431_v25 = vld [vmem:[%s18523_s12 + $0x32c] sm:$0xf0] }
 0x728   : > { %v5718_v35 = vpop.f32.mrf.mxu2  ;;  %v5767_v0 = vpop.f32.mrf.mxu3 }
 0x729   : > { %v16715_v49 = vpack.c.bf16 %v6179_v19, %v6175_v12  ;;  %v5719_v23 = vadd.f32 %v5718_v35, %v16474_v13  ;;  %7809 = vmatpush.bf16.msrb.mxu1 %v11710_v52 }
 0x72b   : > { %v5768_v9 = vadd.f32 %v5767_v0, %v5719_v23  ;;  %v16718_v24 = vpop.f32.mrf.mxu0  ;;  %v16720_v27 = vpop.f32.mrf.mxu1  ;;  %v12523_v0 = vld [vmem:[%s18523_s12 + $0x50c] sm:$0xf]  ;;  %v11683_v23 = vld [vmem:[%s18523_s12 + $0x524] sm:$0xf0] }
 0x72d   : > { %v6119_v31 = vmul.f32 0.2, %v5768_v9 }
 0x72f   : > { %v6183_v48 = vmax.f32 %v5768_v9, %v6119_v31  ;;  %v12579_v9 = vld [vmem:[%s18523_s12 + $0x6cc] sm:$0xf]  ;;  %v16781_v31 = vperm.slane %v16456_v3, 2  ;;  %v12460_v3 = vld [vmem:[%s18523_s12 + $0x314] sm:$0xf] }
 0x730   : > { %v5720_v58 = vpop.f32.mrf.mxu2  ;;  %v5769_v6 = vpop.f32.mrf.mxu3 }
 0x731   : > { %v5721_v8 = vadd.f32 %v5720_v58, %v16474_v13  ;;  %v11686_v58 = vor.u32 %v12523_v0, %v11683_v23  ;;  %v12516_v0 = vld [vmem:[%s18523_s12 + $0x4d4] sm:$0xf]  ;;  %v11655_v23 = vld [vmem:[%s18523_s12 + $0x4ec] sm:$0xf0] }
 0x733   : > { %v5770_v46 = vadd.f32 %v5769_v6, %v5721_v8  ;;  %v5821_v33 = vpop.f32.mrf.mxu0  ;;  %v5870_v59 = vpop.f32.mrf.mxu1  ;;  %v11907_v6 = vld [vmem:[%s18523_s12 + $0x6e4] sm:$0xf0]  ;;  %7949 = vmatpush.bf16.msra.mxu0 %v11686_v58  ;;  %v11658_v58 = vor.u32 %v12516_v0, %v11655_v23 }
 0x734   : > { %v5822_v40 = vadd.f32 %v5821_v33, %v16459_v10  ;;  %v11910_v14 = vor.u32 %v12579_v9, %v11907_v6  ;;  %v12572_v9 = vld [vmem:[%s18523_s12 + $0x694] sm:$0xf]  ;;  %v11879_v6 = vld [vmem:[%s18523_s12 + $0x6ac] sm:$0xf0] }
 0x735   : > { %v6123_v47 = vmul.f32 0.2, %v5770_v46  ;;  %5918 = vmatmul.bf16.gmra.mxu2 %v16433_v5  ;;  %5967 = vmatmul.bf16.gmra.mxu3 %v16435_v41 }
 0x736   : > { %v16738_v2 = vadd.f32 %v5870_v59, %v5822_v40  ;;  %6016 = vmatmul.bf16.gmra.mxu0 %v16433_v5  ;;  %6065 = vmatmul.bf16.gmra.mxu1 %v16435_v41  ;;  %v11238_v5 = vor.u32 %v12411_v38, %v11235_v53  ;;  %v12467_v41 = vld [vmem:[%s18523_s12 + $0x34c] sm:$0xf]  ;;  %v12404_v40 = vld [vmem:[%s18523_s12 + $0x154] sm:$0xf] }
 0x737   : > { %v6187_v44 = vmax.f32 %v5770_v46, %v6123_v47  ;;  %v11462_v37 = vor.u32 %v12467_v41, %v11459_v21  ;;  %7998 = vmatpush.bf16.msra.mxu1 %v11910_v14  ;;  %v11210_v47 = vor.u32 %v12404_v40, %v11207_v61  ;;  %v11882_v14 = vor.u32 %v12572_v9, %v11879_v6  ;;  %v12397_v61 = vld [vmem:[%s18523_s12 + $0x11c] sm:$0xf] }
 0x738   : > { %v5723_v54 = vpop.f32.mrf.mxu2  ;;  %v5772_v15 = vpop.f32.mrf.mxu3  ;;  %7851 = vmatpush.bf16.msra.mxu2 %v11238_v5  ;;  %7950 = vmatpush.bf16.msra.mxu0 %v11658_v58  ;;  %v12509_v9 = vld [vmem:[%s18523_s12 + $0x49c] sm:$0xf] }
 0x739   : > { %v16742_v50 = vpack.c.bf16 %v6187_v44, %v6183_v48  ;;  %v5724_v17 = vadd.f32 %v5723_v54, %v16474_v13  ;;  %7900 = vmatpush.bf16.msra.mxu3 %v11462_v37  ;;  %v12565_v58 = vld [vmem:[%s18523_s12 + $0x65c] sm:$0xf] }
 0x73b   : > { %v5773_v22 = vadd.f32 %v5772_v15, %v5724_v17  ;;  %v16757_v28 = vpop.f32.mrf.mxu0  ;;  %v16759_v18 = vpop.f32.mrf.mxu1  ;;  %v11434_v15 = vor.u32 %v12460_v3, %v11431_v25  ;;  %7999 = vmatpush.bf16.msra.mxu1 %v11882_v14  ;;  %v12453_v25 = vld [vmem:[%s18523_s12 + $0x2dc] sm:$0xf]  ;;  %v11851_v14 = vld [vmem:[%s18523_s12 + $0x674] sm:$0xf0] }
 0x73c   : > { %7852 = vmatpush.bf16.msra.mxu2 %v11210_v47 }
 0x73d   : > { %v6127_v29 = vmul.f32 0.2, %v5773_v22  ;;  %7901 = vmatpush.bf16.msra.mxu3 %v11434_v15 }
 0x73f   : > { %v6191_v8 = vmax.f32 %v5773_v22, %v6127_v29 }
 0x740   : > { %v5725_v63 = vpop.f32.mrf.mxu2  ;;  %v5774_v1 = vpop.f32.mrf.mxu3 }
 0x741   : > { %v5726_v57 = vadd.f32 %v5725_v63, %v16474_v13 }
 0x743   : > { %v5775_v12 = vadd.f32 %v5774_v1, %v5726_v57  ;;  %v5982_v19 = vpop.f32.mrf.mxu0  ;;  %v6031_v35 = vpop.f32.mrf.mxu1 }
 0x744   : > { %v5983_v36 = vadd.f32 %v5982_v19, %v16763_v32 }
 0x745   : > { %v6131_v13 = vmul.f32 0.2, %v5775_v12  ;;  %7663 = vmatmul.bf16.vlgmr.msrb.gmra.mxu2 %v16515_v45  ;;  %7712 = vmatmul.bf16.vlgmr.msrb.gmra.mxu3 %v16496_v30 }
 0x746   : > { %v6032_v34 = vadd.f32 %v6031_v35, %v5983_v36 }
 0x747   : > { %v6195_v52 = vmax.f32 %v5775_v12, %v6131_v13 }
 0x748   : > { %v5884_v46 = vpop.f32.mrf.mxu2  ;;  %v5933_v33 = vpop.f32.mrf.mxu3  ;;  %v6074_v38 = vmul.f32 0.2, %v6032_v34 }
 0x749   : > { %v16783_v59 = vpack.c.bf16 %v6195_v52, %v6191_v8  ;;  %v5885_v48 = vadd.f32 %v5884_v46, %v16781_v31 }
 0x74a   : > { %v6138_v63 = vmax.f32 %v6032_v34, %v6074_v38  ;;  %v11179_v34 = vld [vmem:[%s18523_s12 + $0x134] sm:$0xf0] }
 0x74b   : > { %v5984_v44 = vpop.f32.mrf.mxu0  ;;  %v6033_v54 = vpop.f32.mrf.mxu1  ;;  %v5934_v5 = vadd.f32 %v5933_v33, %v5885_v48  ;;  %v11182_v3 = vor.u32 %v12397_v61, %v11179_v34  ;;  %v11403_v48 = vld [vmem:[%s18523_s12 + $0x2f4] sm:$0xf0] }
 0x74c   : > { %v5985_v17 = vadd.f32 %v5984_v44, %v16763_v32 }
 0x74d   : > { %v6073_v57 = vmul.f32 0.2, %v5934_v5  ;;  %7853 = vmatpush.bf16.msra.mxu2 %v11182_v3  ;;  %v12390_v3 = vld [vmem:[%s18523_s12 + $0xe4] sm:$0xf] }
 0x74e   : > { %v6034_v53 = vadd.f32 %v6033_v54, %v5985_v17  ;;  %v11406_v17 = vor.u32 %v12453_v25, %v11403_v48  ;;  %v11151_v25 = vld [vmem:[%s18523_s12 + $0xfc] sm:$0xf0] }
 0x74f   : > { %v6137_v8 = vmax.f32 %v5934_v5, %v6073_v57 }
 0x750   : > { %v6078_v41 = vmul.f32 0.2, %v6034_v53  ;;  %v5886_v21 = vpop.f32.mrf.mxu2  ;;  %v5935_v22 = vpop.f32.mrf.mxu3  ;;  %7902 = vmatpush.bf16.msra.mxu3 %v11406_v17 }
 0x751   : > { %v5887_v37 = vadd.f32 %v5886_v21, %v16781_v31 }
 0x752   : > { %v6142_v1 = vmax.f32 %v6034_v53, %v6078_v41 }
 0x753   : > { %v5936_v29 = vadd.f32 %v5935_v22, %v5887_v37  ;;  %v5987_v12 = vpop.f32.mrf.mxu0  ;;  %v6036_v19 = vpop.f32.mrf.mxu1 }
 0x754   : > { %v16800_v35 = vpack.c.bf16 %v6142_v1, %v6138_v63  ;;  %v5988_v36 = vadd.f32 %v5987_v12, %v16763_v32 }
 0x755   : > { %v6077_v13 = vmul.f32 0.2, %v5936_v29  ;;  %7668 = vmatmul.bf16.gmra.mxu2 %v16551_v20  ;;  %7717 = vmatmul.bf16.gmra.mxu3 %v16532_v62 }
 0x756   : > { %7810 = vmatmul.bf16.vlgmr.msrb.gmra.mxu1 %v16800_v35  ;;  %v6037_v47 = vadd.f32 %v6036_v19, %v5988_v36 }
 0x757   : > { %v6141_v52 = vmax.f32 %v5936_v29, %v6077_v13  ;;  %v11627_v13 = vld [vmem:[%s18523_s12 + $0x4b4] sm:$0xf0] }
 0x758   : > { %v5889_v46 = vpop.f32.mrf.mxu2  ;;  %v5938_v33 = vpop.f32.mrf.mxu3  ;;  %v6082_v53 = vmul.f32 0.2, %v6037_v47  ;;  %v11630_v36 = vor.u32 %v12509_v9, %v11627_v13 }
 0x759   : > { %v16818_v40 = vpack.c.bf16 %v6141_v52, %v6137_v8  ;;  %v5890_v44 = vadd.f32 %v5889_v46, %v16781_v31  ;;  %v11854_v52 = vor.u32 %v12565_v58, %v11851_v14  ;;  %v12502_v14 = vld [vmem:[%s18523_s12 + $0x464] sm:$0xf] }
 0x75a   : > { %v6146_v1 = vmax.f32 %v6037_v47, %v6082_v53  ;;  %7951 = vmatpush.bf16.msra.mxu0 %v11630_v36 }
 0x75b   : > { %v5989_v54 = vpop.f32.mrf.mxu0  ;;  %v6038_v15 = vpop.f32.mrf.mxu1  ;;  %7761 = vmatmul.bf16.vlgmr.msrb.gmra.mxu0 %v16818_v40  ;;  %v5939_v41 = vadd.f32 %v5938_v33, %v5890_v44  ;;  %8000 = vmatpush.bf16.msra.mxu1 %v11854_v52  ;;  %v11154_v44 = vor.u32 %v12390_v3, %v11151_v25  ;;  %v12558_v52 = vld [vmem:[%s18523_s12 + $0x624] sm:$0xf] }
 0x75c   : > { %v5990_v38 = vadd.f32 %v5989_v54, %v16763_v32  ;;  %v12446_v54 = vld [vmem:[%s18523_s12 + $0x2a4] sm:$0xf] }
 0x75d   : > { %v6081_v29 = vmul.f32 0.2, %v5939_v41  ;;  %7854 = vmatpush.bf16.msra.mxu2 %v11154_v44 }
 0x75e   : > { %v6039_v5 = vadd.f32 %v6038_v15, %v5990_v38  ;;  %v11375_v15 = vld [vmem:[%s18523_s12 + $0x2bc] sm:$0xf0] }
 0x75f   : > { %v6145_v46 = vmax.f32 %v5939_v41, %v6081_v29 }
 0x760   : > { %v6086_v21 = vmul.f32 0.2, %v6039_v5  ;;  %v5891_v22 = vpop.f32.mrf.mxu2  ;;  %v5940_v37 = vpop.f32.mrf.mxu3 }
 0x761   : > { %v5892_v63 = vadd.f32 %v5891_v22, %v16781_v31 }
 0x762   : > { %v6150_v57 = vmax.f32 %v6039_v5, %v6086_v21  ;;  %v11378_v5 = vor.u32 %v12446_v54, %v11375_v15 }
 0x763   : > { %v5941_v12 = vadd.f32 %v5940_v37, %v5892_v63  ;;  %v5992_v19 = vpop.f32.mrf.mxu0  ;;  %v6041_v0 = vpop.f32.mrf.mxu1 }
 0x764   : > { %v16836_v23 = vpack.c.bf16 %v6150_v57, %v6146_v1  ;;  %v5993_v8 = vadd.f32 %v5992_v19, %v16763_v32  ;;  %7903 = vmatpush.bf16.msra.mxu3 %v11378_v5 }
 0x765   : > { %v6085_v6 = vmul.f32 0.2, %v5941_v12  ;;  %7673 = vmatmul.bf16.gmra.mxu2 %v16587_v55  ;;  %7722 = vmatmul.bf16.gmra.mxu3 %v16568_v43 }
 0x766   : > { %7815 = vmatmul.bf16.gmra.mxu1 %v16836_v23  ;;  %v6042_v48 = vadd.f32 %v6041_v0, %v5993_v8  ;;  %v5809_v0 = vadd.f32 %v16640_v26, %v16459_v10  ;;  %v11599_v8 = vld [vmem:[%s18523_s12 + $0x47c] sm:$0xf0] }
 0x767   : > { %v6149_v33 = vmax.f32 %v5941_v12, %v6085_v6  ;;  %v11602_v26 = vor.u32 %v12502_v14, %v11599_v8 }
 0x768   : > { %v5894_v61 = vpop.f32.mrf.mxu2  ;;  %v5943_v34 = vpop.f32.mrf.mxu3  ;;  %v6090_v21 = vmul.f32 0.2, %v6042_v48  ;;  %v5858_v3 = vadd.f32 %v16642_v51, %v5809_v0  ;;  %v12439_v51 = vld [vmem:[%s18523_s12 + $0x26c] sm:$0xf] }
 0x769   : > { %v16854_v47 = vpack.c.bf16 %v6149_v33, %v6145_v46  ;;  %v5895_v17 = vadd.f32 %v5894_v61, %v16781_v31  ;;  %v11823_v33 = vld [vmem:[%s18523_s12 + $0x63c] sm:$0xf0]  ;;  %7952 = vmatpush.bf16.msra.mxu0 %v11602_v26 }
 0x76a   : > { %v6154_v12 = vmax.f32 %v6042_v48, %v6090_v21  ;;  %v6108_v21 = vmul.f32 0.2, %v5858_v3 }
 0x76b   : > { %v5994_v38 = vpop.f32.mrf.mxu0  ;;  %v6043_v53 = vpop.f32.mrf.mxu1  ;;  %7766 = vmatmul.bf16.gmra.mxu0 %v16854_v47  ;;  %v5944_v37 = vadd.f32 %v5943_v34, %v5895_v17  ;;  %v11826_v34 = vor.u32 %v12558_v52, %v11823_v33  ;;  %v12383_v17 = vld [vmem:[%s18523_s12 + $0xac] sm:$0xf]  ;;  %v5814_v33 = vadd.f32 %v16679_v7, %v16459_v10 }
 0x76c   : > { %v5995_v41 = vadd.f32 %v5994_v38, %v16763_v32  ;;  %v11123_v38 = vld [vmem:[%s18523_s12 + $0xc4] sm:$0xf0]  ;;  %v6172_v0 = vmax.f32 %v5858_v3, %v6108_v21 }
 0x76d   : > { %v6089_v9 = vmul.f32 0.2, %v5944_v37  ;;  %8001 = vmatpush.bf16.msra.mxu1 %v11826_v34  ;;  %v11126_v5 = vor.u32 %v12383_v17, %v11123_v38  ;;  %v11795_v38 = vld [vmem:[%s18523_s12 + $0x604] sm:$0xf0] }
 0x76e   : > { %v6044_v22 = vadd.f32 %v6043_v53, %v5995_v41  ;;  %v11347_v41 = vld [vmem:[%s18523_s12 + $0x284] sm:$0xf0] }
 0x76f   : > { %v6153_v25 = vmax.f32 %v5944_v37, %v6089_v9  ;;  %7855 = vmatpush.bf16.msra.mxu2 %v11126_v5 }
 0x770   : > { %v6094_v63 = vmul.f32 0.2, %v6044_v22  ;;  %v5896_v1 = vpop.f32.mrf.mxu2  ;;  %v5945_v57 = vpop.f32.mrf.mxu3 }
 0x771   : > { %v5897_v29 = vadd.f32 %v5896_v1, %v16781_v31  ;;  %v11350_v1 = vor.u32 %v12439_v51, %v11347_v41  ;;  %v5863_v51 = vadd.f32 %v16681_v16, %v5814_v33  ;;  %v12432_v16 = vld [vmem:[%s18523_s12 + $0x234] sm:$0xf] }
 0x772   : > { %v6158_v19 = vmax.f32 %v6044_v22, %v6094_v63 }
 0x773   : > { %v5946_v13 = vadd.f32 %v5945_v57, %v5897_v29  ;;  %v5997_v58 = vpop.f32.mrf.mxu0  ;;  %v6046_v6 = vpop.f32.mrf.mxu1  ;;  %v6104_v29 = vmul.f32 0.2, %v16621_v11  ;;  %7904 = vmatpush.bf16.msra.mxu3 %v11350_v1  ;;  %v12376_v1 = vld [vmem:[%s18523_s12 + $0x74] sm:$0xf] }
 0x774   : > { %v16874_v36 = vpack.c.bf16 %v6158_v19, %v6154_v12  ;;  %v5998_v61 = vadd.f32 %v5997_v58, %v16763_v32 }
 0x775   : > { %v6093_v46 = vmul.f32 0.2, %v5946_v13  ;;  %7678 = vmatmul.bf16.gmra.mxu2 %v16625_v39  ;;  %7727 = vmatmul.bf16.gmra.mxu3 %v16604_v60  ;;  %v6168_v14 = vmax.f32 %v16621_v11, %v6104_v29  ;;  %v11571_v11 = vld [vmem:[%s18523_s12 + $0x444] sm:$0xf0] }
 0x776   : > { %7820 = vmatmul.bf16.gmra.mxu1 %v16874_v36  ;;  %v6047_v53 = vadd.f32 %v6046_v6, %v5998_v61 }
 0x777   : > { %v6157_v48 = vmax.f32 %v5946_v13, %v6093_v46  ;;  %v16913_v26 = vpack.c.bf16 %v6172_v0, %v6168_v14  ;;  %v6116_v0 = vmul.f32 0.2, %v5863_v51 }
 0x778   : > { %v5899_v44 = vpop.f32.mrf.mxu2  ;;  %v5948_v54 = vpop.f32.mrf.mxu3  ;;  %v6098_v12 = vmul.f32 0.2, %v6047_v53 }
 0x779   : > { %v16893_v15 = vpack.c.bf16 %v6157_v48, %v6153_v25  ;;  %v5900_v22 = vadd.f32 %v5899_v44, %v16781_v31  ;;  %v12495_v44 = vld [vmem:[%s18523_s12 + $0x42c] sm:$0xf]  ;;  %v6180_v33 = vmax.f32 %v5863_v51, %v6116_v0 }
 0x77a   : > { %v6162_v52 = vmax.f32 %v6047_v53, %v6098_v12  ;;  %v11574_v7 = vor.u32 %v12495_v44, %v11571_v11 }
 0x77b   : > { %v5999_v37 = vpop.f32.mrf.mxu0  ;;  %v6048_v63 = vpop.f32.mrf.mxu1  ;;  %7771 = vmatmul.bf16.gmra.mxu0 %v16893_v15  ;;  %v5949_v9 = vadd.f32 %v5948_v54, %v5900_v22  ;;  %v12551_v54 = vld [vmem:[%s18523_s12 + $0x5ec] sm:$0xf] }
 0x77c   : > { %v6000_v57 = vadd.f32 %v5999_v37, %v16763_v32  ;;  %v11798_v5 = vor.u32 %v12551_v54, %v11795_v38  ;;  %7953 = vmatpush.bf16.msra.mxu0 %v11574_v7  ;;  %v5819_v38 = vadd.f32 %v16718_v24, %v16459_v10 }
 0x77d   : > { %v6097_v61 = vmul.f32 0.2, %v5949_v9 }
 0x77e   : > { %v6049_v19 = vadd.f32 %v6048_v63, %v6000_v57  ;;  %8002 = vmatpush.bf16.msra.mxu1 %v11798_v5  ;;  %v11095_v57 = vld [vmem:[%s18523_s12 + $0x8c] sm:$0xf0] }
 0x77f   : > { %v6161_v41 = vmax.f32 %v5949_v9, %v6097_v61  ;;  %v11098_v12 = vor.u32 %v12376_v1, %v11095_v57  ;;  %v11767_v57 = vld [vmem:[%s18523_s12 + $0x5cc] sm:$0xf0] }
 0x780   : > { %v6102_v13 = vmul.f32 0.2, %v6049_v19  ;;  %v5901_v58 = vpop.f32.mrf.mxu2  ;;  %v5950_v6 = vpop.f32.mrf.mxu3 }
 0x781   : > { %v5902_v8 = vadd.f32 %v5901_v58, %v16781_v31  ;;  %7856 = vmatpush.bf16.msra.mxu2 %v11098_v12 }
 0x782   : > { %v6166_v46 = vmax.f32 %v6049_v19, %v6102_v13  ;;  %v11319_v19 = vld [vmem:[%s18523_s12 + $0x24c] sm:$0xf0] }
 0x783   : > { %v5951_v34 = vadd.f32 %v5950_v6, %v5902_v8  ;;  %v6002_v25 = vpop.f32.mrf.mxu0  ;;  %v6051_v48 = vpop.f32.mrf.mxu1  ;;  %v11322_v6 = vor.u32 %v12432_v16, %v11319_v19  ;;  %v6112_v8 = vmul.f32 0.2, %v16660_v56  ;;  %v5868_v16 = vadd.f32 %v16720_v27, %v5819_v38  ;;  %v12425_v27 = vld [vmem:[%s18523_s12 + $0x1fc] sm:$0xf] }
 0x784   : > { %v16917_v3 = vpack.c.bf16 %v6166_v46, %v6162_v52  ;;  %v6003_v53 = vadd.f32 %v6002_v25, %v16763_v32 }
 0x785   : > { %v6101_v17 = vmul.f32 0.2, %v5951_v34  ;;  %7683 = vmatmul.bf16.gmra.mxu2 %v16664_v4  ;;  %7732 = vmatmul.bf16.gmra.mxu3 %v16913_v26  ;;  %v6176_v44 = vmax.f32 %v16660_v56, %v6112_v8  ;;  %v11543_v56 = vld [vmem:[%s18523_s12 + $0x40c] sm:$0xf0] }
 0x786   : > { %7825 = vmatmul.bf16.gmra.mxu1 %v16917_v3  ;;  %v6052_v29 = vadd.f32 %v6051_v48, %v6003_v53  ;;  %7905 = vmatpush.bf16.msra.mxu3 %v11322_v6  ;;  %v12369_v6 = vld [vmem:[%s18523_s12 + $0x3c] sm:$0xf] }
 0x787   : > { %v6165_v21 = vmax.f32 %v5951_v34, %v6101_v17  ;;  %v16956_v7 = vpack.c.bf16 %v6180_v33, %v6176_v44  ;;  %v6124_v33 = vmul.f32 0.2, %v5868_v16 }
 0x788   : > { %v5904_v22 = vpop.f32.mrf.mxu2  ;;  %v5953_v37 = vpop.f32.mrf.mxu3  ;;  %v6106_v52 = vmul.f32 0.2, %v6052_v29 }
 0x789   : > { %v16936_v63 = vpack.c.bf16 %v6165_v21, %v6161_v41  ;;  %v5905_v9 = vadd.f32 %v5904_v22, %v16781_v31  ;;  %v12488_v22 = vld [vmem:[%s18523_s12 + $0x3f4] sm:$0xf]  ;;  %v6188_v38 = vmax.f32 %v5868_v16, %v6124_v33  ;;  %v11739_v33 = vld [vmem:[%s18523_s12 + $0x594] sm:$0xf0] }
 0x78a   : > { %v6170_v54 = vmax.f32 %v6052_v29, %v6106_v52  ;;  %v11546_v24 = vor.u32 %v12488_v22, %v11543_v56  ;;  %v12362_v22 = vld [vmem:[%s18523_s12 + $0x4] sm:$0xf]  ;;  %v11039_v56 = vld [vmem:[%s18523_s12 + $0x1c] sm:$0xf0] }
 0x78b   : > { %v6004_v13 = vpop.f32.mrf.mxu0  ;;  %v6053_v58 = vpop.f32.mrf.mxu1  ;;  %7776 = vmatmul.bf16.gmra.mxu0 %v16936_v63  ;;  %v5954_v61 = vadd.f32 %v5953_v37, %v5905_v9  ;;  %v12544_v37 = vld [vmem:[%s18523_s12 + $0x5b4] sm:$0xf] }
 0x78c   : > { %v6005_v14 = vadd.f32 %v6004_v13, %v16763_v32  ;;  %v11770_v12 = vor.u32 %v12544_v37, %v11767_v57  ;;  %7954 = vmatpush.bf16.msra.mxu0 %v11546_v24  ;;  %v11042_v24 = vor.u32 %v12362_v22, %v11039_v56  ;;  %v12418_v57 = vld [vmem:[%s18523_s12 + $0x1c4] sm:$0xf] }
 0x78d   : > { %v6105_v53 = vmul.f32 0.2, %v5954_v61  ;;  %v12530_v56 = vld [vmem:[%s18523_s12 + $0x544] sm:$0xf] }
 0x78e   : > { %v6054_v46 = vadd.f32 %v6053_v58, %v6005_v14  ;;  %8003 = vmatpush.bf16.msra.mxu1 %v11770_v12  ;;  %v11067_v14 = vld [vmem:[%s18523_s12 + $0x54] sm:$0xf0]  ;;  %v5824_v12 = vadd.f32 %v16757_v28, %v16459_v10  ;;  %v12537_v28 = vld [vmem:[%s18523_s12 + $0x57c] sm:$0xf] }
 0x78f   : > { %v6169_v19 = vmax.f32 %v5954_v61, %v6105_v53  ;;  %v11070_v52 = vor.u32 %v12369_v6, %v11067_v14  ;;  %v11515_v10 = vld [vmem:[%s18523_s12 + $0x3d4] sm:$0xf0] }
 0x790   : > { %v6110_v34 = vmul.f32 0.2, %v6054_v46  ;;  %v5906_v25 = vpop.f32.mrf.mxu2  ;;  %v5955_v48 = vpop.f32.mrf.mxu3 }
 0x791   : > { %v5907_v11 = vadd.f32 %v5906_v25, %v16781_v31  ;;  %7857 = vmatpush.bf16.msra.mxu2 %v11070_v52 }
 0x792   : > { %v6174_v17 = vmax.f32 %v6054_v46, %v6110_v34  ;;  %v11291_v46 = vld [vmem:[%s18523_s12 + $0x214] sm:$0xf0] }
 0x793   : > { %v5956_v5 = vadd.f32 %v5955_v48, %v5907_v11  ;;  %v6007_v41 = vpop.f32.mrf.mxu0  ;;  %v6056_v21 = vpop.f32.mrf.mxu1  ;;  %v11294_v48 = vor.u32 %v12425_v27, %v11291_v46  ;;  %v6120_v11 = vmul.f32 0.2, %v16711_v42  ;;  %v12481_v27 = vld [vmem:[%s18523_s12 + $0x3bc] sm:$0xf] }
 0x794   : > { %v16960_v51 = vpack.c.bf16 %v6174_v17, %v6170_v54  ;;  %v6008_v29 = vadd.f32 %v6007_v41, %v16763_v32  ;;  %v11518_v46 = vor.u32 %v12481_v27, %v11515_v10 }
 0x795   : > { %v6109_v1 = vmul.f32 0.2, %v5956_v5  ;;  %7688 = vmatmul.bf16.gmra.mxu2 %v16715_v49  ;;  %7737 = vmatmul.bf16.gmra.mxu3 %v16956_v7  ;;  %v6184_v37 = vmax.f32 %v16711_v42, %v6120_v11 }
 0x796   : > { %7830 = vmatmul.bf16.gmra.mxu1 %v16960_v51  ;;  %v6057_v8 = vadd.f32 %v6056_v21, %v6008_v29  ;;  %7906 = vmatpush.bf16.msra.mxu3 %v11294_v48  ;;  %v11263_v29 = vld [vmem:[%s18523_s12 + $0x1dc] sm:$0xf0] }
 0x797   : > { %v6173_v0 = vmax.f32 %v5956_v5, %v6109_v1  ;;  %7858 = vmatpush.bf16.msra.mxu2 %v11042_v24  ;;  %7955 = vmatpush.bf16.msra.mxu0 %v11518_v46  ;;  %v11711_v24 = vld [vmem:[%s18523_s12 + $0x55c] sm:$0xf0] }
 0x798   : > { %v5909_v9 = vpop.f32.mrf.mxu2  ;;  %v5958_v13 = vpop.f32.mrf.mxu3  ;;  %v6114_v54 = vmul.f32 0.2, %v6057_v8 }
 0x799   : > { %v16979_v58 = vpack.c.bf16 %v6173_v0, %v6169_v19  ;;  %v5910_v61 = vadd.f32 %v5909_v9, %v16781_v31  ;;  %v11266_v0 = vor.u32 %v12418_v57, %v11263_v29  ;;  %v17013_v9 = vpack.c.bf16 %v6188_v38, %v6184_v37 }
 0x79a   : > { %v6178_v16 = vmax.f32 %v6057_v8, %v6114_v54  ;;  %v6128_v57 = vmul.f32 0.2, %v16738_v2  ;;  %v11714_v29 = vor.u32 %v12530_v56, %v11711_v24 }
 0x79b   : > { %v6009_v34 = vpop.f32.mrf.mxu0  ;;  %v6058_v25 = vpop.f32.mrf.mxu1  ;;  %7781 = vmatmul.bf16.gmra.mxu0 %v16979_v58  ;;  %v5959_v53 = vadd.f32 %v5958_v13, %v5910_v61  ;;  %7907 = vmatpush.bf16.msra.mxu3 %v11266_v0  ;;  %v5873_v61 = vadd.f32 %v16759_v18, %v5824_v12  ;;  %v12474_v18 = vld [vmem:[%s18523_s12 + $0x384] sm:$0xf] }
 0x79c   : > { %v6010_v44 = vadd.f32 %v6009_v34, %v16763_v32 }
 0x79d   : > { %v6113_v42 = vmul.f32 0.2, %v5959_v53  ;;  %v6132_v38 = vmul.f32 0.2, %v5873_v61 }
 0x79e   : > { %v6059_v17 = vadd.f32 %v6058_v25, %v6010_v44  ;;  %v11742_v25 = vor.u32 %v12537_v28, %v11739_v33 }
 0x79f   : > { %v6177_v48 = vmax.f32 %v5959_v53, %v6113_v42  ;;  %v11487_v53 = vld [vmem:[%s18523_s12 + $0x39c] sm:$0xf0]  ;;  %v6196_v0 = vmax.f32 %v5873_v61, %v6132_v38  ;;  %v11241_v61 = vld [vmem:[%s18523_s12 + $0x190] sm:$0xf] }
 0x7a0   : > { %v6118_v5 = vmul.f32 0.2, %v6059_v17  ;;  %v5911_v41 = vpop.f32.mrf.mxu2  ;;  %v5960_v21 = vpop.f32.mrf.mxu3  ;;  %8004 = vmatpush.bf16.msra.mxu1 %v11742_v25 }
 0x7a1   : > { %v5912_v1 = vadd.f32 %v5911_v41, %v16781_v31 }
 0x7a2   : > { %v6182_v19 = vmax.f32 %v6059_v17, %v6118_v5 }
 0x7a3   : > { %v5961_v13 = vadd.f32 %v5960_v21, %v5912_v1  ;;  %v6012_v6 = vpop.f32.mrf.mxu0  ;;  %v6061_v14 = vpop.f32.mrf.mxu1  ;;  %v11490_v1 = vor.u32 %v12474_v18, %v11487_v53 }
 0x7a4   : > { %v17015_v52 = vpack.c.bf16 %v6182_v19, %v6178_v16  ;;  %v6013_v34 = vadd.f32 %v6012_v6, %v16763_v32  ;;  %8005 = vmatpush.bf16.msra.mxu1 %v11714_v29 }
 0x7a5   : > { %v6117_v8 = vmul.f32 0.2, %v5961_v13  ;;  %7693 = vmatmul.bf16.gmra.mxu2 %v16742_v50  ;;  %7742 = vmatmul.bf16.gmra.mxu3 %v17013_v9 }
 0x7a6   : > { %7835 = vmatmul.bf16.gmra.mxu1 %v17015_v52  ;;  %v6062_v5 = vadd.f32 %v6061_v14, %v6013_v34  ;;  %7956 = vmatpush.bf16.msra.mxu0 %v11490_v1  ;;  %v6192_v14 = vmax.f32 %v16738_v2, %v6128_v57  ;;  %v11465_v2 = vld [vmem:[%s18523_s12 + $0x350] sm:$0xf] }
 0x7a7   : > { %v6181_v44 = vmax.f32 %v5961_v13, %v6117_v8 }
 0x7a8   : > { %v5914_v11 = vpop.f32.mrf.mxu2  ;;  %v5963_v54 = vpop.f32.mrf.mxu3  ;;  %v6122_v12 = vmul.f32 0.2, %v6062_v5  ;;  %v17054_v46 = vpack.c.bf16 %v6196_v0, %v6192_v14  ;;  %v12527_v0 = vld [vmem:[%s18523_s12 + $0x528] sm:$0xf0] }
 0x7a9   : > { %v17034_v17 = vpack.c.bf16 %v6181_v44, %v6177_v48  ;;  %v5915_v41 = vadd.f32 %v5914_v11, %v16781_v31  ;;  %v12415_v48 = vld [vmem:[%s18523_s12 + $0x1a8] sm:$0xf0] }
 0x7aa   : > { %v6186_v10 = vmax.f32 %v6062_v5, %v6122_v12  ;;  %v11242_v11 = vor.u32 %v12415_v48, %v11241_v61 }
 0x7ab   : > { %v6014_v21 = vpop.f32.mrf.mxu0  ;;  %v6063_v22 = vpop.f32.mrf.mxu1  ;;  %7786 = vmatmul.bf16.gmra.mxu0 %v17034_v17  ;;  %v5964_v16 = vadd.f32 %v5963_v54, %v5915_v41  ;;  %v12471_v54 = vld [vmem:[%s18523_s12 + $0x368] sm:$0xf0] }
 0x7ac   : > { %v6015_v37 = vadd.f32 %v6014_v21, %v16763_v32  ;;  %v11466_v41 = vor.u32 %v12471_v54, %v11465_v2  ;;  %8047 = vmatpush.bf16.msrb.mxu2 %v11242_v11  ;;  %v11213_v11 = vld [vmem:[%s18523_s12 + $0x158] sm:$0xf] }
 0x7ad   : > { %v6121_v28 = vmul.f32 0.2, %v5964_v16  ;;  %v11437_v54 = vld [vmem:[%s18523_s12 + $0x318] sm:$0xf] }
 0x7ae   : > { %v6064_v19 = vadd.f32 %v6063_v22, %v6015_v37  ;;  %8096 = vmatpush.bf16.msrb.mxu3 %v11466_v41 }
 0x7af   : > { %v6185_v21 = vmax.f32 %v5964_v16, %v6121_v28  ;;  %v11689_v16 = vld [vmem:[%s18523_s12 + $0x510] sm:$0xf] }
 0x7b0   : > { %v6126_v42 = vmul.f32 0.2, %v6064_v19  ;;  %v5916_v13 = vpop.f32.mrf.mxu2  ;;  %v5965_v6 = vpop.f32.mrf.mxu3 }
 0x7b1   : > { %v5917_v27 = vadd.f32 %v5916_v13, %v16781_v31 }
 0x7b2   : > { %v6190_v8 = vmax.f32 %v6064_v19, %v6126_v42  ;;  %v11913_v42 = vld [vmem:[%s18523_s12 + $0x6d0] sm:$0xf] }
 0x7b3   : > { %v5966_v33 = vadd.f32 %v5965_v6, %v5917_v27  ;;  %v6017_v34 = vpop.f32.mrf.mxu0  ;;  %v6066_v25 = vpop.f32.mrf.mxu1  ;;  %v11690_v6 = vor.u32 %v12527_v0, %v11689_v16 }
 0x7b4   : > { %v17065_v44 = vpack.c.bf16 %v6190_v8, %v6186_v10  ;;  %v6018_v5 = vadd.f32 %v6017_v34, %v16763_v32 }
 0x7b5   : > { %v6125_v38 = vmul.f32 0.2, %v5966_v33  ;;  %7698 = vmatmul.bf16.gmra.mxu2 %v16783_v59  ;;  %7747 = vmatmul.bf16.gmra.mxu3 %v17054_v46 }
 0x7b6   : > { %7840 = vmatmul.bf16.gmra.mxu1 %v17065_v44  ;;  %v6067_v37 = vadd.f32 %v6066_v25, %v6018_v5  ;;  %8145 = vmatpush.bf16.msrb.mxu0 %v11690_v6 }
 0x7b7   : > { %v6189_v22 = vmax.f32 %v5966_v33, %v6125_v38 }
 0x7b8   : > { %v5919_v18 = vpop.f32.mrf.mxu2  ;;  %v5968_v53 = vpop.f32.mrf.mxu3  ;;  %v6130_v29 = vmul.f32 0.2, %v6067_v37 }
 0x7b9   : > { %v17074_v56 = vpack.c.bf16 %v6189_v22, %v6185_v21  ;;  %v5920_v1 = vadd.f32 %v5919_v18, %v16781_v31  ;;  %v12464_v21 = vld [vmem:[%s18523_s12 + $0x330] sm:$0xf0] }
 0x7ba   : > { %v6194_v33 = vmax.f32 %v6067_v37, %v6130_v29  ;;  %v11885_v29 = vld [vmem:[%s18523_s12 + $0x698] sm:$0xf] }
 0x7bb   : > { %v6019_v24 = vpop.f32.mrf.mxu0  ;;  %7791 = vmatmul.bf16.gmra.mxu0 %v17074_v56  ;;  %v6068_v12 = vpop.f32.mrf.mxu1  ;;  %v5969_v13 = vadd.f32 %v5968_v53, %v5920_v1  ;;  %v11438_v53 = vor.u32 %v12464_v21, %v11437_v54  ;;  %v17115_v1 = vld [vmem:[%s18524_s13] sm:$0x7f] }
 0x7bc   : > { %v6020_v57 = vadd.f32 %v6019_v24, %v16763_v32  ;;  %v12583_v32 = vld [vmem:[%s18523_s12 + $0x6e8] sm:$0xf0]  ;;  %v11661_v24 = vld [vmem:[%s18523_s12 + $0x4d8] sm:$0xf]  ;;  %v17130_v16 = vperm.slane %v17115_v1, 0 }
 0x7bd   : > { %v11914_v28 = vor.u32 %v12583_v32, %v11913_v42  ;;  %v6129_v25 = vmul.f32 0.2, %v5969_v13  ;;  %8097 = vmatpush.bf16.msrb.mxu3 %v11438_v53  ;;  %v11857_v21 = vld [vmem:[%s18523_s12 + $0x660] sm:$0xf] }
 0x7be   : > { %v6069_v19 = vadd.f32 %v6068_v12, %v6020_v57  ;;  %v12520_v57 = vld [vmem:[%s18523_s12 + $0x4f0] sm:$0xf0] }
 0x7bf   : > { %8194 = vmatpush.bf16.msrb.mxu1 %v11914_v28  ;;  %v6193_v38 = vmax.f32 %v5969_v13, %v6129_v25  ;;  %v11662_v12 = vor.u32 %v12520_v57, %v11661_v24 }
 0x7c0   : > { %v6134_v14 = vmul.f32 0.2, %v6069_v19  ;;  %v5921_v27 = vpop.f32.mrf.mxu2  ;;  %v5970_v10 = vpop.f32.mrf.mxu3 }
 0x7c1   : > { %v5922_v8 = vadd.f32 %v5921_v27, %v16781_v31  ;;  %v12408_v31 = vld [vmem:[%s18523_s12 + $0x170] sm:$0xf0]  ;;  %8146 = vmatpush.bf16.msrb.mxu0 %v11662_v12  ;;  %v12401_v27 = vld [vmem:[%s18523_s12 + $0x138] sm:$0xf0] }
 0x7c2   : > { %v6198_v34 = vmax.f32 %v6069_v19, %v6134_v14  ;;  %v11214_v41 = vor.u32 %v12408_v31, %v11213_v11  ;;  %v12576_v19 = vld [vmem:[%s18523_s12 + $0x6b0] sm:$0xf0]  ;;  %v11185_v14 = vld [vmem:[%s18523_s12 + $0x120] sm:$0xf] }
 0x7c3   : > { %v5971_v61 = vadd.f32 %v5970_v10, %v5922_v8  ;;  %v11886_v13 = vor.u32 %v12576_v19, %v11885_v29  ;;  %v11409_v10 = vld [vmem:[%s18523_s12 + $0x2e0] sm:$0xf]  ;;  %v11186_v28 = vor.u32 %v12401_v27, %v11185_v14  ;;  %v12457_v8 = vld [vmem:[%s18523_s12 + $0x2f8] sm:$0xf0]  ;;  %v11381_v27 = vld [vmem:[%s18523_s12 + $0x2a8] sm:$0xf] }
 0x7c4   : > { %v17092_v48 = vpack.c.bf16 %v6198_v34, %v6194_v33  ;;  %8048 = vmatpush.bf16.msrb.mxu2 %v11214_v41  ;;  %v12513_v41 = vld [vmem:[%s18523_s12 + $0x4b8] sm:$0xf0] }
 0x7c5   : > { %v6133_v2 = vmul.f32 0.2, %v5971_v61  ;;  %7859 = vmatmul.bf16.vlgmr.msra.gmra.mxu2 %v16515_v45  ;;  %7908 = vmatmul.bf16.vlgmr.msra.gmra.mxu3 %v16496_v30 }
 0x7c6   : > { %7845 = vmatmul.bf16.gmra.mxu1 %v17092_v48 }
 0x7c7   : > { %v6197_v5 = vmax.f32 %v5971_v61, %v6133_v2  ;;  %8195 = vmatpush.bf16.msrb.mxu1 %v11886_v13  ;;  %v11410_v61 = vor.u32 %v12457_v8, %v11409_v10  ;;  %v12450_v10 = vld [vmem:[%s18523_s12 + $0x2c0] sm:$0xf0] }
 0x7c8   : > { %v7664_v22 = vpop.f32.mrf.mxu2  ;;  %v7713_v18 = vpop.f32.mrf.mxu3  ;;  %8049 = vmatpush.bf16.msrb.mxu2 %v11186_v28 }
 0x7c9   : > { %v17109_v37 = vpack.c.bf16 %v6197_v5, %v6193_v38  ;;  %v7665_v32 = vadd.f32 %v7664_v22, %v17130_v16  ;;  %8098 = vmatpush.bf16.msrb.mxu3 %v11410_v61  ;;  %v11633_v5 = vld [vmem:[%s18523_s12 + $0x4a0] sm:$0xf] }
 0x7ca   : > { %v11634_v22 = vor.u32 %v12513_v41, %v11633_v5  ;;  %v11829_v41 = vld [vmem:[%s18523_s12 + $0x628] sm:$0xf] }
 0x7cb   : > { %7796 = vmatmul.bf16.gmra.mxu0 %v17109_v37  ;;  %v7714_v33 = vadd.f32 %v7713_v18, %v7665_v32  ;;  %v12569_v18 = vld [vmem:[%s18523_s12 + $0x678] sm:$0xf0]  ;;  %v12394_v32 = vld [vmem:[%s18523_s12 + $0x100] sm:$0xf0] }
 0x7cc   : > { %v11858_v29 = vor.u32 %v12569_v18, %v11857_v21  ;;  %8147 = vmatpush.bf16.msrb.mxu0 %v11634_v22  ;;  %v12562_v21 = vld [vmem:[%s18523_s12 + $0x640] sm:$0xf0] }
 0x7ce   : > { %8196 = vmatpush.bf16.msrb.mxu1 %v11858_v29 }
 0x7d0   : > { %v7666_v0 = vpop.f32.mrf.mxu2  ;;  %v7715_v42 = vpop.f32.mrf.mxu3 }
 0x7d1   : > { %v7667_v54 = vadd.f32 %v7666_v0, %v17130_v16 }
 0x7d3   : > { %v7811_v6 = vpop.f32.mrf.mxu1  ;;  %v7716_v53 = vadd.f32 %v7715_v42, %v7667_v54  ;;  %v11157_v42 = vld [vmem:[%s18523_s12 + $0xe8] sm:$0xf] }
 0x7d4   : > { %v11158_v14 = vor.u32 %v12394_v32, %v11157_v42  ;;  %v11353_v32 = vld [vmem:[%s18523_s12 + $0x270] sm:$0xf] }
 0x7d5   : > { %7864 = vmatmul.bf16.gmra.mxu2 %v16551_v20  ;;  %7913 = vmatmul.bf16.gmra.mxu3 %v16532_v62 }
 0x7d6   : > { %8006 = vmatmul.bf16.vlgmr.msra.gmra.mxu1 %v16800_v35  ;;  %8050 = vmatpush.bf16.msrb.mxu2 %v11158_v14  ;;  %v12443_v14 = vld [vmem:[%s18523_s12 + $0x288] sm:$0xf0] }
 0x7d8   : > { %v7669_v34 = vpop.f32.mrf.mxu2  ;;  %v7718_v25 = vpop.f32.mrf.mxu3 }
 0x7d9   : > { %v7762_v2 = vpop.f32.mrf.mxu0  ;;  %v7670_v13 = vadd.f32 %v7669_v34, %v17130_v16  ;;  %v11382_v34 = vor.u32 %v12450_v10, %v11381_v27 }
 0x7da   : > { %v7763_v11 = vadd.f32 %v7762_v2, %v7714_v33 }
 0x7db   : > { %v7813_v31 = vpop.f32.mrf.mxu1  ;;  %7957 = vmatmul.bf16.vlgmr.msra.gmra.mxu0 %v16818_v40  ;;  %v7719_v28 = vadd.f32 %v7718_v25, %v7670_v13  ;;  %8099 = vmatpush.bf16.msrb.mxu3 %v11382_v34  ;;  %v12506_v25 = vld [vmem:[%s18523_s12 + $0x480] sm:$0xf0] }
 0x7dc   : > { %v7812_v38 = vadd.f32 %v7811_v6, %v7763_v11 }
 0x7de   : > { %9027 = vst [vmem:[%s17152_s16] sm:$0xff] %v7812_v38  ;;  %v11605_v38 = vld [vmem:[%s18523_s12 + $0x468] sm:$0xf] }
 0x7df   : > { %v11606_v5 = vor.u32 %v12506_v25, %v11605_v38  ;;  %v11801_v25 = vld [vmem:[%s18523_s12 + $0x5f0] sm:$0xf] }
 0x7e0   : > { %v7671_v24 = vpop.f32.mrf.mxu2  ;;  %v7720_v57 = vpop.f32.mrf.mxu3 }
 0x7e1   : > { %v7764_v12 = vpop.f32.mrf.mxu0  ;;  %8148 = vmatpush.bf16.msrb.mxu0 %v11606_v5  ;;  %v12555_v5 = vld [vmem:[%s18523_s12 + $0x608] sm:$0xf0] }
 0x7e2   : > { %v7765_v19 = vadd.f32 %v7764_v12, %v7716_v53 }
 0x7e3   : > { %v7816_v0 = vpop.f32.mrf.mxu1 }
 0x7e4   : > { %v7814_v6 = vadd.f32 %v7813_v31, %v7765_v19  ;;  %v7672_v31 = vadd.f32 %v7671_v24, %v17130_v16  ;;  %v11830_v24 = vor.u32 %v12562_v21, %v11829_v41 }
 0x7e5   : > { %7869 = vmatmul.bf16.gmra.mxu2 %v16587_v55  ;;  %7918 = vmatmul.bf16.gmra.mxu3 %v16568_v43 }
 0x7e6   : > { %9034 = vst [vmem:[%s17152_s16 + $0x38] sm:$0xff] %v7814_v6  ;;  %8011 = vmatmul.bf16.gmra.mxu1 %v16836_v23  ;;  %v7721_v22 = vadd.f32 %v7720_v57, %v7672_v31  ;;  %v11129_v57 = vld [vmem:[%s18523_s12 + $0xb0] sm:$0xf]  ;;  %v12387_v6 = vld [vmem:[%s18523_s12 + $0xc8] sm:$0xf0] }
 0x7e7   : > { %8197 = vmatpush.bf16.msrb.mxu1 %v11830_v24  ;;  %v11130_v42 = vor.u32 %v12387_v6, %v11129_v57  ;;  %v11325_v6 = vld [vmem:[%s18523_s12 + $0x238] sm:$0xf] }
 0x7e8   : > { %v7674_v8 = vpop.f32.mrf.mxu2  ;;  %v7723_v33 = vpop.f32.mrf.mxu3 }
 0x7e9   : > { %v7767_v61 = vpop.f32.mrf.mxu0  ;;  %8051 = vmatpush.bf16.msrb.mxu2 %v11130_v42  ;;  %v12436_v42 = vld [vmem:[%s18523_s12 + $0x250] sm:$0xf0] }
 0x7ea   : > { %v7768_v2 = vadd.f32 %v7767_v61, %v7719_v28 }
 0x7eb   : > { %v7818_v11 = vpop.f32.mrf.mxu1  ;;  %7962 = vmatmul.bf16.gmra.mxu0 %v16854_v47 }
 0x7ec   : > { %v7817_v54 = vadd.f32 %v7816_v0, %v7768_v2  ;;  %v7675_v0 = vadd.f32 %v7674_v8, %v17130_v16  ;;  %v11354_v8 = vor.u32 %v12443_v14, %v11353_v32 }
 0x7ee   : > { %9041 = vst [vmem:[%s17152_s16 + $0x70] sm:$0xff] %v7817_v54  ;;  %v7724_v27 = vadd.f32 %v7723_v33, %v7675_v0  ;;  %8100 = vmatpush.bf16.msrb.mxu3 %v11354_v8  ;;  %v11577_v54 = vld [vmem:[%s18523_s12 + $0x430] sm:$0xf]  ;;  %v12499_v33 = vld [vmem:[%s18523_s12 + $0x448] sm:$0xf0] }
 0x7ef   : > { %v11578_v38 = vor.u32 %v12499_v33, %v11577_v54  ;;  %v11773_v33 = vld [vmem:[%s18523_s12 + $0x5b8] sm:$0xf] }
 0x7f0   : > { %v7676_v18 = vpop.f32.mrf.mxu2  ;;  %v7725_v53 = vpop.f32.mrf.mxu3 }
 0x7f1   : > { %v7769_v29 = vpop.f32.mrf.mxu0  ;;  %8149 = vmatpush.bf16.msrb.mxu0 %v11578_v38  ;;  %v12548_v38 = vld [vmem:[%s18523_s12 + $0x5d0] sm:$0xf0] }
 0x7f2   : > { %v7770_v12 = vadd.f32 %v7769_v29, %v7721_v22 }
 0x7f3   : > { %v7821_v19 = vpop.f32.mrf.mxu1 }
 0x7f4   : > { %v7819_v13 = vadd.f32 %v7818_v11, %v7770_v12  ;;  %v7677_v11 = vadd.f32 %v7676_v18, %v17130_v16  ;;  %v11802_v18 = vor.u32 %v12555_v5, %v11801_v25 }
 0x7f5   : > { %7874 = vmatmul.bf16.gmra.mxu2 %v16625_v39  ;;  %7923 = vmatmul.bf16.gmra.mxu3 %v16604_v60 }
 0x7f6   : > { %9048 = vst [vmem:[%s17152_s16 + $0xa8] sm:$0xff] %v7819_v13  ;;  %8016 = vmatmul.bf16.gmra.mxu1 %v16874_v36  ;;  %v7726_v41 = vadd.f32 %v7725_v53, %v7677_v11  ;;  %v11101_v53 = vld [vmem:[%s18523_s12 + $0x78] sm:$0xf]  ;;  %v12380_v13 = vld [vmem:[%s18523_s12 + $0x90] sm:$0xf0] }
 0x7f7   : > { %8198 = vmatpush.bf16.msrb.mxu1 %v11802_v18  ;;  %v11102_v57 = vor.u32 %v12380_v13, %v11101_v53  ;;  %v11297_v13 = vld [vmem:[%s18523_s12 + $0x200] sm:$0xf] }
 0x7f8   : > { %v7679_v10 = vpop.f32.mrf.mxu2  ;;  %v7728_v28 = vpop.f32.mrf.mxu3 }
 0x7f9   : > { %v7772_v34 = vpop.f32.mrf.mxu0  ;;  %8052 = vmatpush.bf16.msrb.mxu2 %v11102_v57  ;;  %v12429_v57 = vld [vmem:[%s18523_s12 + $0x218] sm:$0xf0] }
 0x7fa   : > { %v7773_v61 = vadd.f32 %v7772_v34, %v7724_v27 }
 0x7fb   : > { %v7823_v2 = vpop.f32.mrf.mxu1  ;;  %7967 = vmatmul.bf16.gmra.mxu0 %v16893_v15 }
 0x7fc   : > { %v7822_v31 = vadd.f32 %v7821_v19, %v7773_v61  ;;  %v7680_v19 = vadd.f32 %v7679_v10, %v17130_v16  ;;  %v11326_v10 = vor.u32 %v12436_v42, %v11325_v6 }
 0x7fe   : > { %9055 = vst [vmem:[%s17152_s16 + $0xe0] sm:$0xff] %v7822_v31  ;;  %v7729_v32 = vadd.f32 %v7728_v28, %v7680_v19  ;;  %8101 = vmatpush.bf16.msrb.mxu3 %v11326_v10  ;;  %v11549_v31 = vld [vmem:[%s18523_s12 + $0x3f8] sm:$0xf]  ;;  %v12492_v28 = vld [vmem:[%s18523_s12 + $0x410] sm:$0xf0] }
 0x7ff   : > { %v11550_v54 = vor.u32 %v12492_v28, %v11549_v31  ;;  %v11745_v28 = vld [vmem:[%s18523_s12 + $0x580] sm:$0xf] }
 0x800   : > { %v7681_v21 = vpop.f32.mrf.mxu2  ;;  %v7730_v22 = vpop.f32.mrf.mxu3 }
 0x801   : > { %v7774_v24 = vpop.f32.mrf.mxu0  ;;  %8150 = vmatpush.bf16.msrb.mxu0 %v11550_v54  ;;  %v12541_v54 = vld [vmem:[%s18523_s12 + $0x598] sm:$0xf0] }
 0x802   : > { %v7775_v29 = vadd.f32 %v7774_v24, %v7726_v41 }
 0x803   : > { %v7826_v12 = vpop.f32.mrf.mxu1 }
 0x804   : > { %v7824_v0 = vadd.f32 %v7823_v2, %v7775_v29  ;;  %v7682_v2 = vadd.f32 %v7681_v21, %v17130_v16  ;;  %v11774_v21 = vor.u32 %v12548_v38, %v11773_v33 }
 0x805   : > { %7879 = vmatmul.bf16.gmra.mxu2 %v16664_v4  ;;  %7928 = vmatmul.bf16.gmra.mxu3 %v16913_v26 }
 0x806   : > { %9062 = vst [vmem:[%s17152_s16 + $0x118] sm:$0xff] %v7824_v0  ;;  %8021 = vmatmul.bf16.gmra.mxu1 %v16917_v3  ;;  %v7731_v25 = vadd.f32 %v7730_v22, %v7682_v2  ;;  %v11073_v22 = vld [vmem:[%s18523_s12 + $0x40] sm:$0xf]  ;;  %v12373_v0 = vld [vmem:[%s18523_s12 + $0x58] sm:$0xf0] }
 0x807   : > { %8199 = vmatpush.bf16.msrb.mxu1 %v11774_v21  ;;  %v11074_v53 = vor.u32 %v12373_v0, %v11073_v22  ;;  %v11045_v21 = vld [vmem:[%s18523_s12 + $0x8] sm:$0xf] }
 0x808   : > { %v7684_v14 = vpop.f32.mrf.mxu2  ;;  %v7733_v27 = vpop.f32.mrf.mxu3 }
 0x809   : > { %v7777_v8 = vpop.f32.mrf.mxu0  ;;  %8053 = vmatpush.bf16.msrb.mxu2 %v11074_v53 }
 0x80a   : > { %v7778_v34 = vadd.f32 %v7777_v8, %v7729_v32 }
 0x80b   : > { %v7828_v61 = vpop.f32.mrf.mxu1  ;;  %7972 = vmatmul.bf16.gmra.mxu0 %v16936_v63 }
 0x80c   : > { %v7827_v11 = vadd.f32 %v7826_v12, %v7778_v34  ;;  %v7685_v12 = vadd.f32 %v7684_v14, %v17130_v16  ;;  %v11298_v14 = vor.u32 %v12429_v57, %v11297_v13 }
 0x80e   : > { %9069 = vst [vmem:[%s17152_s16 + $0x150] sm:$0xff] %v7827_v11  ;;  %v7734_v6 = vadd.f32 %v7733_v27, %v7685_v12  ;;  %8102 = vmatpush.bf16.msrb.mxu3 %v11298_v14  ;;  %v11521_v11 = vld [vmem:[%s18523_s12 + $0x3c0] sm:$0xf]  ;;  %v12485_v27 = vld [vmem:[%s18523_s12 + $0x3d8] sm:$0xf0] }
 0x80f   : > { %v11522_v31 = vor.u32 %v12485_v27, %v11521_v11  ;;  %v12478_v11 = vld [vmem:[%s18523_s12 + $0x3a0] sm:$0xf0]  ;;  %v11717_v27 = vld [vmem:[%s18523_s12 + $0x548] sm:$0xf] }
 0x810   : > { %v7686_v5 = vpop.f32.mrf.mxu2  ;;  %v7735_v41 = vpop.f32.mrf.mxu3 }
 0x811   : > { %v7779_v18 = vpop.f32.mrf.mxu0  ;;  %8151 = vmatpush.bf16.msrb.mxu0 %v11522_v31  ;;  %v12534_v31 = vld [vmem:[%s18523_s12 + $0x560] sm:$0xf0] }
 0x812   : > { %v7780_v24 = vadd.f32 %v7779_v18, %v7731_v25  ;;  %v12366_v18 = vld [vmem:[%s18523_s12 + $0x20] sm:$0xf0] }
 0x813   : > { %v7831_v29 = vpop.f32.mrf.mxu1  ;;  %v11046_v12 = vor.u32 %v12366_v18, %v11045_v21 }
 0x814   : > { %v7829_v19 = vadd.f32 %v7828_v61, %v7780_v24  ;;  %v7687_v61 = vadd.f32 %v7686_v5, %v17130_v16  ;;  %v11746_v5 = vor.u32 %v12541_v54, %v11745_v28  ;;  %v11269_v24 = vld [vmem:[%s18523_s12 + $0x1c8] sm:$0xf] }
 0x815   : > { %7884 = vmatmul.bf16.gmra.mxu2 %v16715_v49  ;;  %7933 = vmatmul.bf16.gmra.mxu3 %v16956_v7 }
 0x816   : > { %9076 = vst [vmem:[%s17152_s16 + $0x188] sm:$0xff] %v7829_v19  ;;  %8026 = vmatmul.bf16.gmra.mxu1 %v16960_v51  ;;  %v7736_v33 = vadd.f32 %v7735_v41, %v7687_v61  ;;  %v12422_v41 = vld [vmem:[%s18523_s12 + $0x1e0] sm:$0xf0]  ;;  %8054 = vmatpush.bf16.msrb.mxu2 %v11046_v12  ;;  %v11243_v12 = vld [vmem:[%s18523_s12 + $0x1ac] sm:$0xf0] }
 0x817   : > { %8200 = vmatpush.bf16.msrb.mxu1 %v11746_v5  ;;  %v11270_v22 = vor.u32 %v12422_v41, %v11269_v24 }
 0x818   : > { %v7689_v42 = vpop.f32.mrf.mxu2  ;;  %v7738_v32 = vpop.f32.mrf.mxu3 }
 0x819   : > { %v7782_v10 = vpop.f32.mrf.mxu0  ;;  %v7690_v53 = vadd.f32 %v7689_v42, %v17130_v16  ;;  %8103 = vmatpush.bf16.msrb.mxu3 %v11270_v22  ;;  %v11467_v22 = vld [vmem:[%s18523_s12 + $0x36c] sm:$0xf0] }
 0x81a   : > { %v7783_v8 = vadd.f32 %v7782_v10, %v7734_v6 }
 0x81b   : > { %v7833_v34 = vpop.f32.mrf.mxu1  ;;  %7977 = vmatmul.bf16.gmra.mxu0 %v16979_v58  ;;  %v7739_v57 = vadd.f32 %v7738_v32, %v7690_v53 }
 0x81c   : > { %v7832_v2 = vadd.f32 %v7831_v29, %v7783_v8 }
 0x81e   : > { %9083 = vst [vmem:[%s17152_s16 + $0x1c0] sm:$0xff] %v7832_v2 }
 0x820   : > { %v7691_v38 = vpop.f32.mrf.mxu2  ;;  %v7740_v25 = vpop.f32.mrf.mxu3 }
 0x821   : > { %v7784_v29 = vpop.f32.mrf.mxu0  ;;  %v7692_v42 = vadd.f32 %v7691_v38, %v17130_v16  ;;  %v11718_v38 = vor.u32 %v12534_v31, %v11717_v27 }
 0x822   : > { %v7785_v19 = vadd.f32 %v7784_v29, %v7736_v33 }
 0x823   : > { %v7836_v0 = vpop.f32.mrf.mxu1  ;;  %v7741_v28 = vadd.f32 %v7740_v25, %v7692_v42  ;;  %8201 = vmatpush.bf16.msrb.mxu1 %v11718_v38  ;;  %v12412_v25 = vld [vmem:[%s18523_s12 + $0x194] sm:$0xf] }
 0x824   : > { %v7834_v13 = vadd.f32 %v7833_v34, %v7785_v19  ;;  %v11493_v34 = vld [vmem:[%s18523_s12 + $0x388] sm:$0xf]  ;;  %v11246_v41 = vor.u32 %v12412_v25, %v11243_v12  ;;  %v12468_v19 = vld [vmem:[%s18523_s12 + $0x354] sm:$0xf]  ;;  %v12461_v12 = vld [vmem:[%s18523_s12 + $0x31c] sm:$0xf] }
 0x825   : > { %7889 = vmatmul.bf16.gmra.mxu2 %v16742_v50  ;;  %7938 = vmatmul.bf16.gmra.mxu3 %v17013_v9  ;;  %v11494_v32 = vor.u32 %v12478_v11, %v11493_v34  ;;  %v12580_v11 = vld [vmem:[%s18523_s12 + $0x6d4] sm:$0xf] }
 0x826   : > { %9090 = vst [vmem:[%s17152_s16 + $0x1f8] sm:$0xff] %v7834_v13  ;;  %8031 = vmatmul.bf16.gmra.mxu1 %v17015_v52  ;;  %8243 = vmatpush.bf16.msra.mxu2 %v11246_v41  ;;  %v11439_v41 = vld [vmem:[%s18523_s12 + $0x334] sm:$0xf0] }
 0x827   : > { %8152 = vmatpush.bf16.msrb.mxu0 %v11494_v32  ;;  %v11915_v32 = vld [vmem:[%s18523_s12 + $0x6ec] sm:$0xf0] }
 0x828   : > { %v7694_v6 = vpop.f32.mrf.mxu2  ;;  %v7743_v14 = vpop.f32.mrf.mxu3 }
 0x829   : > { %v7787_v10 = vpop.f32.mrf.mxu0  ;;  %v7695_v24 = vadd.f32 %v7694_v6, %v17130_v16 }
 0x82a   : > { %v7788_v8 = vadd.f32 %v7787_v10, %v7739_v57  ;;  %v11470_v57 = vor.u32 %v12468_v19, %v11467_v22 }
 0x82b   : > { %v7838_v61 = vpop.f32.mrf.mxu1  ;;  %7982 = vmatmul.bf16.gmra.mxu0 %v17034_v17 }
 0x82c   : > { %v7837_v2 = vadd.f32 %v7836_v0, %v7788_v8  ;;  %v7744_v0 = vadd.f32 %v7743_v14, %v7695_v24  ;;  %8292 = vmatpush.bf16.msra.mxu3 %v11470_v57  ;;  %v11691_v14 = vld [vmem:[%s18523_s12 + $0x52c] sm:$0xf0] }
 0x82e   : > { %9097 = vst [vmem:[%s17152_s16 + $0x230] sm:$0xff] %v7837_v2  ;;  %v12524_v2 = vld [vmem:[%s18523_s12 + $0x514] sm:$0xf] }
 0x82f   : > { %v11694_v34 = vor.u32 %v12524_v2, %v11691_v14  ;;  %v12573_v14 = vld [vmem:[%s18523_s12 + $0x69c] sm:$0xf] }
 0x830   : > { %v7696_v54 = vpop.f32.mrf.mxu2  ;;  %v7745_v33 = vpop.f32.mrf.mxu3 }
 0x831   : > { %v7789_v5 = vpop.f32.mrf.mxu0  ;;  %8341 = vmatpush.bf16.msra.mxu0 %v11694_v34 }
 0x832   : > { %v7790_v21 = vadd.f32 %v7789_v5, %v7741_v28 }
 0x833   : > { %v7841_v18 = vpop.f32.mrf.mxu1 }
 0x834   : > { %v7839_v29 = vadd.f32 %v7838_v61, %v7790_v21  ;;  %v7697_v61 = vadd.f32 %v7696_v54, %v17130_v16  ;;  %v11918_v54 = vor.u32 %v12580_v11, %v11915_v32  ;;  %v17394_v11 = vperm.slane %v17115_v1, 1  ;;  %v12398_v1 = vld [vmem:[%s18523_s12 + $0x124] sm:$0xf] }
 0x835   : > { %7894 = vmatmul.bf16.gmra.mxu2 %v16783_v59  ;;  %7943 = vmatmul.bf16.gmra.mxu3 %v17054_v46 }
 0x836   : > { %9104 = vst [vmem:[%s17152_s16 + $0x268] sm:$0xff] %v7839_v29  ;;  %8036 = vmatmul.bf16.gmra.mxu1 %v17065_v44  ;;  %v7746_v27 = vadd.f32 %v7745_v33, %v7697_v61  ;;  %v12405_v33 = vld [vmem:[%s18523_s12 + $0x15c] sm:$0xf]  ;;  %v11215_v29 = vld [vmem:[%s18523_s12 + $0x174] sm:$0xf0] }
 0x837   : > { %8390 = vmatpush.bf16.msra.mxu1 %v11918_v54  ;;  %v11218_v25 = vor.u32 %v12405_v33, %v11215_v29  ;;  %v12454_v33 = vld [vmem:[%s18523_s12 + $0x2e4] sm:$0xf]  ;;  %v11411_v29 = vld [vmem:[%s18523_s12 + $0x2fc] sm:$0xf0] }
 0x838   : > { %v7699_v53 = vpop.f32.mrf.mxu2  ;;  %v7748_v13 = vpop.f32.mrf.mxu3 }
 0x839   : > { %v7792_v6 = vpop.f32.mrf.mxu0  ;;  %8244 = vmatpush.bf16.msra.mxu2 %v11218_v25 }
 0x83a   : > { %v7793_v10 = vadd.f32 %v7792_v6, %v7744_v0 }
 0x83b   : > { %v7843_v8 = vpop.f32.mrf.mxu1  ;;  %7987 = vmatmul.bf16.gmra.mxu0 %v17074_v56 }
 0x83c   : > { %v7842_v42 = vadd.f32 %v7841_v18, %v7793_v10  ;;  %v7700_v18 = vadd.f32 %v7699_v53, %v17130_v16  ;;  %v11442_v53 = vor.u32 %v12461_v12, %v11439_v41 }
 0x83e   : > { %9111 = vst [vmem:[%s17152_s16 + $0x2a0] sm:$0xff] %v7842_v42  ;;  %v7749_v19 = vadd.f32 %v7748_v13, %v7700_v18  ;;  %8293 = vmatpush.bf16.msra.mxu3 %v11442_v53  ;;  %v12517_v42 = vld [vmem:[%s18523_s12 + $0x4dc] sm:$0xf]  ;;  %v11663_v13 = vld [vmem:[%s18523_s12 + $0x4f4] sm:$0xf0] }
 0x83f   : > { %v11666_v2 = vor.u32 %v12517_v42, %v11663_v13  ;;  %v12566_v42 = vld [vmem:[%s18523_s12 + $0x664] sm:$0xf]  ;;  %v11859_v13 = vld [vmem:[%s18523_s12 + $0x67c] sm:$0xf0] }
 0x840   : > { %v7701_v31 = vpop.f32.mrf.mxu2  ;;  %v7750_v28 = vpop.f32.mrf.mxu3 }
 0x841   : > { %v7794_v38 = vpop.f32.mrf.mxu0  ;;  %8342 = vmatpush.bf16.msra.mxu0 %v11666_v2 }
 0x842   : > { %v7795_v5 = vadd.f32 %v7794_v38, %v7746_v27 }
 0x843   : > { %v7846_v21 = vpop.f32.mrf.mxu1 }
 0x844   : > { %v7844_v24 = vadd.f32 %v7843_v8, %v7795_v5  ;;  %v7702_v8 = vadd.f32 %v7701_v31, %v17130_v16  ;;  %v11887_v16 = vld [vmem:[%s18523_s12 + $0x6b4] sm:$0xf0] }
 0x845   : > { %8055 = vmatmul.bf16.vlgmr.msrb.gmra.mxu2 %v16515_v45  ;;  %8104 = vmatmul.bf16.vlgmr.msrb.gmra.mxu3 %v16496_v30  ;;  %v11890_v31 = vor.u32 %v12573_v14, %v11887_v16 }
 0x846   : > { %9118 = vst [vmem:[%s17152_s16 + $0x2d8] sm:$0xff] %v7844_v24  ;;  %8041 = vmatmul.bf16.gmra.mxu1 %v17092_v48  ;;  %v7751_v34 = vadd.f32 %v7750_v28, %v7702_v8  ;;  %v11187_v28 = vld [vmem:[%s18523_s12 + $0x13c] sm:$0xf0]  ;;  %v12510_v8 = vld [vmem:[%s18523_s12 + $0x4a4] sm:$0xf] }
 0x847   : > { %8391 = vmatpush.bf16.msra.mxu1 %v11890_v31  ;;  %v11190_v24 = vor.u32 %v12398_v1, %v11187_v28  ;;  %v12447_v1 = vld [vmem:[%s18523_s12 + $0x2ac] sm:$0xf]  ;;  %v11383_v28 = vld [vmem:[%s18523_s12 + $0x2c4] sm:$0xf0] }
 0x848   : > { %v7860_v22 = vpop.f32.mrf.mxu2  ;;  %v7909_v0 = vpop.f32.mrf.mxu3 }
 0x849   : > { %v7797_v57 = vpop.f32.mrf.mxu0  ;;  %8245 = vmatpush.bf16.msra.mxu2 %v11190_v24 }
 0x84a   : > { %v7798_v6 = vadd.f32 %v7797_v57, %v7749_v19  ;;  %v11414_v19 = vor.u32 %v12454_v33, %v11411_v29 }
 0x84b   : > { %v7848_v10 = vpop.f32.mrf.mxu1  ;;  %7992 = vmatmul.bf16.gmra.mxu0 %v17109_v37 }
 0x84c   : > { %v7847_v61 = vadd.f32 %v7846_v21, %v7798_v6  ;;  %v7861_v21 = vadd.f32 %v7860_v22, %v17394_v11  ;;  %8294 = vmatpush.bf16.msra.mxu3 %v11414_v19 }
 0x84e   : > { %9125 = vst [vmem:[%s17152_s16 + $0x310] sm:$0xff] %v7847_v61  ;;  %v7910_v25 = vadd.f32 %v7909_v0, %v7861_v21  ;;  %v11635_v0 = vld [vmem:[%s18523_s12 + $0x4bc] sm:$0xf0]  ;;  %v11159_v21 = vld [vmem:[%s18523_s12 + $0x104] sm:$0xf0] }
 0x84f   : > { %v11638_v61 = vor.u32 %v12510_v8, %v11635_v0  ;;  %v12559_v8 = vld [vmem:[%s18523_s12 + $0x62c] sm:$0xf]  ;;  %v11831_v0 = vld [vmem:[%s18523_s12 + $0x644] sm:$0xf0] }
 0x850   : > { %v7862_v32 = vpop.f32.mrf.mxu2  ;;  %v7911_v27 = vpop.f32.mrf.mxu3 }
 0x851   : > { %v7799_v54 = vpop.f32.mrf.mxu0  ;;  %v7863_v6 = vadd.f32 %v7862_v32, %v17394_v11  ;;  %8343 = vmatpush.bf16.msra.mxu0 %v11638_v61 }
 0x852   : > { %v7800_v38 = vadd.f32 %v7799_v54, %v7751_v34  ;;  %v11862_v34 = vor.u32 %v12566_v42, %v11859_v13 }
 0x853   : > { %v8007_v5 = vpop.f32.mrf.mxu1  ;;  %v7912_v2 = vadd.f32 %v7911_v27, %v7863_v6  ;;  %v12391_v27 = vld [vmem:[%s18523_s12 + $0xec] sm:$0xf] }
 0x854   : > { %v7849_v18 = vadd.f32 %v7848_v10, %v7800_v38  ;;  %8392 = vmatpush.bf16.msra.mxu1 %v11862_v34  ;;  %v12503_v6 = vld [vmem:[%s18523_s12 + $0x46c] sm:$0xf] }
 0x855   : > { %8060 = vmatmul.bf16.gmra.mxu2 %v16551_v20  ;;  %8109 = vmatmul.bf16.gmra.mxu3 %v16532_v62 }
 0x856   : > { %9132 = vst [vmem:[%s17152_s16 + $0x348] sm:$0xff] %v7849_v18  ;;  %8202 = vmatmul.bf16.vlgmr.msrb.gmra.mxu1 %v16800_v35  ;;  %v11162_v18 = vor.u32 %v12391_v27, %v11159_v21  ;;  %v12440_v27 = vld [vmem:[%s18523_s12 + $0x274] sm:$0xf]  ;;  %v11355_v21 = vld [vmem:[%s18523_s12 + $0x28c] sm:$0xf0] }
 0x858   : > { %v7865_v12 = vpop.f32.mrf.mxu2  ;;  %v7914_v41 = vpop.f32.mrf.mxu3  ;;  %8246 = vmatpush.bf16.msra.mxu2 %v11162_v18 }
 0x859   : > { %v7958_v22 = vpop.f32.mrf.mxu0  ;;  %v7866_v38 = vadd.f32 %v7865_v12, %v17394_v11 }
 0x85a   : > { %v7959_v53 = vadd.f32 %v7958_v22, %v7910_v25  ;;  %v11386_v25 = vor.u32 %v12447_v1, %v11383_v28 }
 0x85b   : > { %v8009_v57 = vpop.f32.mrf.mxu1  ;;  %8153 = vmatmul.bf16.vlgmr.msrb.gmra.mxu0 %v16818_v40  ;;  %v7915_v24 = vadd.f32 %v7914_v41, %v7866_v38  ;;  %v11607_v41 = vld [vmem:[%s18523_s12 + $0x484] sm:$0xf0]  ;;  %v11131_v38 = vld [vmem:[%s18523_s12 + $0xcc] sm:$0xf0] }
 0x85c   : > { %v8008_v10 = vadd.f32 %v8007_v5, %v7959_v53  ;;  %8295 = vmatpush.bf16.msra.mxu3 %v11386_v25 }
 0x85e   : > { %9028 = vst [vmem:[%s17152_s16 + $0x8] sm:$0xff] %v8008_v10  ;;  %v11610_v10 = vor.u32 %v12503_v6, %v11607_v41  ;;  %v12552_v6 = vld [vmem:[%s18523_s12 + $0x5f4] sm:$0xf]  ;;  %v11803_v41 = vld [vmem:[%s18523_s12 + $0x60c] sm:$0xf0] }
 0x860   : > { %v7867_v14 = vpop.f32.mrf.mxu2  ;;  %v7916_v16 = vpop.f32.mrf.mxu3  ;;  %8344 = vmatpush.bf16.msra.mxu0 %v11610_v10 }
 0x861   : > { %v7960_v32 = vpop.f32.mrf.mxu0  ;;  %v7868_v53 = vadd.f32 %v7867_v14, %v17394_v11 }
 0x862   : > { %v7961_v31 = vadd.f32 %v7960_v32, %v7912_v2  ;;  %v11834_v2 = vor.u32 %v12559_v8, %v11831_v0 }
 0x863   : > { %v8012_v54 = vpop.f32.mrf.mxu1  ;;  %v7917_v61 = vadd.f32 %v7916_v16, %v7868_v53  ;;  %v12384_v16 = vld [vmem:[%s18523_s12 + $0xb4] sm:$0xf] }
 0x864   : > { %v8010_v5 = vadd.f32 %v8009_v57, %v7961_v31  ;;  %8393 = vmatpush.bf16.msra.mxu1 %v11834_v2  ;;  %v12496_v53 = vld [vmem:[%s18523_s12 + $0x434] sm:$0xf] }
 0x865   : > { %8065 = vmatmul.bf16.gmra.mxu2 %v16587_v55  ;;  %8114 = vmatmul.bf16.gmra.mxu3 %v16568_v43 }
 0x866   : > { %9035 = vst [vmem:[%s17152_s16 + $0x40] sm:$0xff] %v8010_v5  ;;  %8207 = vmatmul.bf16.gmra.mxu1 %v16836_v23  ;;  %v11134_v5 = vor.u32 %v12384_v16, %v11131_v38  ;;  %v12433_v16 = vld [vmem:[%s18523_s12 + $0x23c] sm:$0xf]  ;;  %v11327_v38 = vld [vmem:[%s18523_s12 + $0x254] sm:$0xf0] }
 0x868   : > { %v7870_v33 = vpop.f32.mrf.mxu2  ;;  %v7919_v29 = vpop.f32.mrf.mxu3  ;;  %8247 = vmatpush.bf16.msra.mxu2 %v11134_v5 }
 0x869   : > { %v7963_v12 = vpop.f32.mrf.mxu0  ;;  %v7871_v31 = vadd.f32 %v7870_v33, %v17394_v11 }
 0x86a   : > { %v7964_v19 = vadd.f32 %v7963_v12, %v7915_v24  ;;  %v11358_v24 = vor.u32 %v12440_v27, %v11355_v21 }
 0x86b   : > { %v8014_v22 = vpop.f32.mrf.mxu1  ;;  %8158 = vmatmul.bf16.gmra.mxu0 %v16854_v47  ;;  %v7920_v18 = vadd.f32 %v7919_v29, %v7871_v31  ;;  %v11579_v29 = vld [vmem:[%s18523_s12 + $0x44c] sm:$0xf0]  ;;  %v11103_v31 = vld [vmem:[%s18523_s12 + $0x94] sm:$0xf0] }
 0x86c   : > { %v8013_v57 = vadd.f32 %v8012_v54, %v7964_v19  ;;  %8296 = vmatpush.bf16.msra.mxu3 %v11358_v24 }
 0x86e   : > { %9042 = vst [vmem:[%s17152_s16 + $0x78] sm:$0xff] %v8013_v57  ;;  %v11582_v57 = vor.u32 %v12496_v53, %v11579_v29  ;;  %v12545_v53 = vld [vmem:[%s18523_s12 + $0x5bc] sm:$0xf]  ;;  %v11775_v29 = vld [vmem:[%s18523_s12 + $0x5d4] sm:$0xf0] }
 0x870   : > { %v7872_v42 = vpop.f32.mrf.mxu2  ;;  %v7921_v13 = vpop.f32.mrf.mxu3  ;;  %8345 = vmatpush.bf16.msra.mxu0 %v11582_v57 }
 0x871   : > { %v7965_v14 = vpop.f32.mrf.mxu0  ;;  %v7873_v19 = vadd.f32 %v7872_v42, %v17394_v11 }
 0x872   : > { %v7966_v34 = vadd.f32 %v7965_v14, %v7917_v61  ;;  %v11806_v61 = vor.u32 %v12552_v6, %v11803_v41 }
 0x873   : > { %v8017_v32 = vpop.f32.mrf.mxu1  ;;  %v7922_v10 = vadd.f32 %v7921_v13, %v7873_v19  ;;  %v12377_v13 = vld [vmem:[%s18523_s12 + $0x7c] sm:$0xf] }
 0x874   : > { %v8015_v54 = vadd.f32 %v8014_v22, %v7966_v34  ;;  %8394 = vmatpush.bf16.msra.mxu1 %v11806_v61  ;;  %v12489_v19 = vld [vmem:[%s18523_s12 + $0x3fc] sm:$0xf] }
 0x875   : > { %8070 = vmatmul.bf16.gmra.mxu2 %v16625_v39  ;;  %8119 = vmatmul.bf16.gmra.mxu3 %v16604_v60 }
 0x876   : > { %9049 = vst [vmem:[%s17152_s16 + $0xb0] sm:$0xff] %v8015_v54  ;;  %8212 = vmatmul.bf16.gmra.mxu1 %v16874_v36  ;;  %v11106_v54 = vor.u32 %v12377_v13, %v11103_v31  ;;  %v12426_v13 = vld [vmem:[%s18523_s12 + $0x204] sm:$0xf]  ;;  %v11299_v31 = vld [vmem:[%s18523_s12 + $0x21c] sm:$0xf0] }
 0x878   : > { %v7875_v1 = vpop.f32.mrf.mxu2  ;;  %v7924_v28 = vpop.f32.mrf.mxu3  ;;  %8248 = vmatpush.bf16.msra.mxu2 %v11106_v54 }
 0x879   : > { %v7968_v33 = vpop.f32.mrf.mxu0  ;;  %v7876_v34 = vadd.f32 %v7875_v1, %v17394_v11 }
 0x87a   : > { %v7969_v25 = vadd.f32 %v7968_v33, %v7920_v18  ;;  %v11330_v18 = vor.u32 %v12433_v16, %v11327_v38 }
 0x87b   : > { %v8019_v12 = vpop.f32.mrf.mxu1  ;;  %8163 = vmatmul.bf16.gmra.mxu0 %v16893_v15  ;;  %v7925_v5 = vadd.f32 %v7924_v28, %v7876_v34  ;;  %v11551_v28 = vld [vmem:[%s18523_s12 + $0x414] sm:$0xf0]  ;;  %v11075_v34 = vld [vmem:[%s18523_s12 + $0x5c] sm:$0xf0] }
 0x87c   : > { %v8018_v22 = vadd.f32 %v8017_v32, %v7969_v25  ;;  %8297 = vmatpush.bf16.msra.mxu3 %v11330_v18 }
 0x87e   : > { %9056 = vst [vmem:[%s17152_s16 + $0xe8] sm:$0xff] %v8018_v22  ;;  %v11554_v22 = vor.u32 %v12489_v19, %v11551_v28  ;;  %v12538_v19 = vld [vmem:[%s18523_s12 + $0x584] sm:$0xf]  ;;  %v11747_v28 = vld [vmem:[%s18523_s12 + $0x59c] sm:$0xf0] }
 0x880   : > { %v7877_v8 = vpop.f32.mrf.mxu2  ;;  %v7926_v0 = vpop.f32.mrf.mxu3  ;;  %8346 = vmatpush.bf16.msra.mxu0 %v11554_v22 }
 0x881   : > { %v7970_v42 = vpop.f32.mrf.mxu0  ;;  %v7878_v25 = vadd.f32 %v7877_v8, %v17394_v11 }
 0x882   : > { %v7971_v2 = vadd.f32 %v7970_v42, %v7922_v10  ;;  %v11778_v10 = vor.u32 %v12545_v53, %v11775_v29 }
 0x883   : > { %v8022_v14 = vpop.f32.mrf.mxu1  ;;  %v7927_v57 = vadd.f32 %v7926_v0, %v7878_v25  ;;  %v12370_v0 = vld [vmem:[%s18523_s12 + $0x44] sm:$0xf] }
 0x884   : > { %v8020_v32 = vadd.f32 %v8019_v12, %v7971_v2  ;;  %8395 = vmatpush.bf16.msra.mxu1 %v11778_v10  ;;  %v12482_v25 = vld [vmem:[%s18523_s12 + $0x3c4] sm:$0xf]  ;;  %v11047_v10 = vld [vmem:[%s18523_s12 + $0x24] sm:$0xf0] }
 0x885   : > { %8075 = vmatmul.bf16.gmra.mxu2 %v16664_v4  ;;  %8124 = vmatmul.bf16.gmra.mxu3 %v16913_v26 }
 0x886   : > { %9063 = vst [vmem:[%s17152_s16 + $0x120] sm:$0xff] %v8020_v32  ;;  %8217 = vmatmul.bf16.gmra.mxu1 %v16917_v3  ;;  %v11078_v32 = vor.u32 %v12370_v0, %v11075_v34 }
 0x888   : > { %v7880_v27 = vpop.f32.mrf.mxu2  ;;  %v7929_v21 = vpop.f32.mrf.mxu3  ;;  %8249 = vmatpush.bf16.msra.mxu2 %v11078_v32 }
 0x889   : > { %v7973_v1 = vpop.f32.mrf.mxu0  ;;  %v7881_v2 = vadd.f32 %v7880_v27, %v17394_v11 }
 0x88a   : > { %v7974_v24 = vadd.f32 %v7973_v1, %v7925_v5  ;;  %v11302_v5 = vor.u32 %v12426_v13, %v11299_v31 }
 0x88b   : > { %v8024_v33 = vpop.f32.mrf.mxu1  ;;  %8168 = vmatmul.bf16.gmra.mxu0 %v16936_v63  ;;  %v7930_v54 = vadd.f32 %v7929_v21, %v7881_v2  ;;  %v11523_v21 = vld [vmem:[%s18523_s12 + $0x3dc] sm:$0xf0] }
 0x88c   : > { %v8023_v12 = vadd.f32 %v8022_v14, %v7974_v24  ;;  %8298 = vmatpush.bf16.msra.mxu3 %v11302_v5 }
 0x88e   : > { %9070 = vst [vmem:[%s17152_s16 + $0x158] sm:$0xff] %v8023_v12  ;;  %v11526_v12 = vor.u32 %v12482_v25, %v11523_v21  ;;  %v12531_v25 = vld [vmem:[%s18523_s12 + $0x54c] sm:$0xf]  ;;  %v11719_v21 = vld [vmem:[%s18523_s12 + $0x564] sm:$0xf0] }
 0x890   : > { %v7882_v6 = vpop.f32.mrf.mxu2  ;;  %v7931_v41 = vpop.f32.mrf.mxu3  ;;  %8347 = vmatpush.bf16.msra.mxu0 %v11526_v12 }
 0x891   : > { %v7975_v8 = vpop.f32.mrf.mxu0  ;;  %v7883_v24 = vadd.f32 %v7882_v6, %v17394_v11  ;;  %v12363_v6 = vld [vmem:[%s18523_s12 + $0xc] sm:$0xf] }
 0x892   : > { %v7976_v61 = vadd.f32 %v7975_v8, %v7927_v57  ;;  %v11750_v57 = vor.u32 %v12538_v19, %v11747_v28  ;;  %v12419_v8 = vld [vmem:[%s18523_s12 + $0x1cc] sm:$0xf] }
 0x893   : > { %v8027_v42 = vpop.f32.mrf.mxu1  ;;  %v7932_v22 = vadd.f32 %v7931_v41, %v7883_v24  ;;  %v11271_v41 = vld [vmem:[%s18523_s12 + $0x1e4] sm:$0xf0] }
 0x894   : > { %v8025_v14 = vadd.f32 %v8024_v33, %v7976_v61  ;;  %8396 = vmatpush.bf16.msra.mxu1 %v11750_v57 }
 0x895   : > { %8080 = vmatmul.bf16.gmra.mxu2 %v16715_v49  ;;  %8129 = vmatmul.bf16.gmra.mxu3 %v16956_v7 }
 0x896   : > { %9077 = vst [vmem:[%s17152_s16 + $0x190] sm:$0xff] %v8025_v14  ;;  %8222 = vmatmul.bf16.gmra.mxu1 %v16960_v51  ;;  %v11274_v14 = vor.u32 %v12419_v8, %v11271_v41  ;;  %v11473_v41 = vld [vmem:[%s18523_s12 + $0x358] sm:$0xf] }
 0x898   : > { %v7885_v16 = vpop.f32.mrf.mxu2  ;;  %v7934_v38 = vpop.f32.mrf.mxu3  ;;  %8299 = vmatpush.bf16.msra.mxu3 %v11274_v14 }
 0x899   : > { %v7978_v27 = vpop.f32.mrf.mxu0  ;;  %v7886_v34 = vadd.f32 %v7885_v16, %v17394_v11 }
 0x89a   : > { %v7979_v18 = vadd.f32 %v7978_v27, %v7930_v54 }
 0x89b   : > { %v8029_v1 = vpop.f32.mrf.mxu1  ;;  %8173 = vmatmul.bf16.gmra.mxu0 %v16979_v58  ;;  %v7935_v13 = vadd.f32 %v7934_v38, %v7886_v34 }
 0x89c   : > { %v8028_v33 = vadd.f32 %v8027_v42, %v7979_v18  ;;  %v11050_v42 = vor.u32 %v12363_v6, %v11047_v10 }
 0x89e   : > { %9084 = vst [vmem:[%s17152_s16 + $0x1c8] sm:$0xff] %v8028_v33  ;;  %8250 = vmatpush.bf16.msra.mxu2 %v11050_v42  ;;  %v11495_v33 = vld [vmem:[%s18523_s12 + $0x3a4] sm:$0xf0] }
 0x8a0   : > { %v7887_v53 = vpop.f32.mrf.mxu2  ;;  %v7936_v29 = vpop.f32.mrf.mxu3 }
 0x8a1   : > { %v7980_v61 = vpop.f32.mrf.mxu0  ;;  %v7888_v16 = vadd.f32 %v7887_v53, %v17394_v11 }
 0x8a2   : > { %v7981_v2 = vadd.f32 %v7980_v61, %v7932_v22  ;;  %v11722_v22 = vor.u32 %v12531_v25, %v11719_v21  ;;  %v12416_v61 = vld [vmem:[%s18523_s12 + $0x1b0] sm:$0xf0] }
 0x8a3   : > { %v8032_v0 = vpop.f32.mrf.mxu1  ;;  %v7937_v12 = vadd.f32 %v7936_v29, %v7888_v16  ;;  %v11249_v29 = vld [vmem:[%s18523_s12 + $0x198] sm:$0xf] }
 0x8a4   : > { %v8030_v32 = vadd.f32 %v8029_v1, %v7981_v2  ;;  %v12475_v1 = vld [vmem:[%s18523_s12 + $0x38c] sm:$0xf]  ;;  %8397 = vmatpush.bf16.msra.mxu1 %v11722_v22  ;;  %v11250_v42 = vor.u32 %v12416_v61, %v11249_v29  ;;  %v12472_v2 = vld [vmem:[%s18523_s12 + $0x370] sm:$0xf0]  ;;  %v11697_v16 = vld [vmem:[%s18523_s12 + $0x518] sm:$0xf] }
 0x8a5   : > { %8085 = vmatmul.bf16.gmra.mxu2 %v16742_v50  ;;  %8134 = vmatmul.bf16.gmra.mxu3 %v17013_v9  ;;  %v11498_v38 = vor.u32 %v12475_v1, %v11495_v33  ;;  %v11921_v1 = vld [vmem:[%s18523_s12 + $0x6d8] sm:$0xf]  ;;  %v12584_v33 = vld [vmem:[%s18523_s12 + $0x6f0] sm:$0xf0]  ;;  %v11445_v29 = vld [vmem:[%s18523_s12 + $0x320] sm:$0xf] }
 0x8a6   : > { %9091 = vst [vmem:[%s17152_s16 + $0x200] sm:$0xff] %v8030_v32  ;;  %8227 = vmatmul.bf16.gmra.mxu1 %v17015_v52  ;;  %v11474_v32 = vor.u32 %v12472_v2, %v11473_v41  ;;  %8439 = vmatpush.bf16.msrb.mxu2 %v11250_v42  ;;  %v12465_v61 = vld [vmem:[%s18523_s12 + $0x338] sm:$0xf0] }
 0x8a7   : > { %8348 = vmatpush.bf16.msra.mxu0 %v11498_v38 }
 0x8a8   : > { %v7890_v31 = vpop.f32.mrf.mxu2  ;;  %v7939_v54 = vpop.f32.mrf.mxu3  ;;  %8488 = vmatpush.bf16.msrb.mxu3 %v11474_v32 }
 0x8a9   : > { %v7983_v5 = vpop.f32.mrf.mxu0  ;;  %v7891_v10 = vadd.f32 %v7890_v31, %v17394_v11 }
 0x8aa   : > { %v7984_v27 = vadd.f32 %v7983_v5, %v7935_v13 }
 0x8ab   : > { %v8034_v18 = vpop.f32.mrf.mxu1  ;;  %8178 = vmatmul.bf16.gmra.mxu0 %v17034_v17  ;;  %v7940_v14 = vadd.f32 %v7939_v54, %v7891_v10  ;;  %v12528_v54 = vld [vmem:[%s18523_s12 + $0x530] sm:$0xf0]  ;;  %v12409_v10 = vld [vmem:[%s18523_s12 + $0x178] sm:$0xf0] }
 0x8ac   : > { %v8033_v24 = vadd.f32 %v8032_v0, %v7984_v27 }
 0x8ae   : > { %9098 = vst [vmem:[%s17152_s16 + $0x238] sm:$0xff] %v8033_v24  ;;  %v11698_v24 = vor.u32 %v12528_v54, %v11697_v16  ;;  %v11893_v16 = vld [vmem:[%s18523_s12 + $0x6a0] sm:$0xf]  ;;  %v12577_v54 = vld [vmem:[%s18523_s12 + $0x6b8] sm:$0xf0] }
 0x8b0   : > { %v7892_v19 = vpop.f32.mrf.mxu2  ;;  %v7941_v28 = vpop.f32.mrf.mxu3  ;;  %8537 = vmatpush.bf16.msrb.mxu0 %v11698_v24  ;;  %v17655_v24 = vld [vmem:[%s18524_s13] sm:$0x7f] }
 0x8b1   : > { %v7985_v53 = vpop.f32.mrf.mxu0  ;;  %v7893_v27 = vadd.f32 %v7892_v19, %v17394_v11 }
 0x8b2   : > { %v7986_v57 = vadd.f32 %v7985_v53, %v7937_v12  ;;  %v11922_v12 = vor.u32 %v12584_v33, %v11921_v1  ;;  %v17658_v1 = vperm.slane %v17655_v24, 2 }
 0x8b3   : > { %v8037_v6 = vpop.f32.mrf.mxu1  ;;  %v7942_v38 = vadd.f32 %v7941_v28, %v7893_v27  ;;  %v11221_v28 = vld [vmem:[%s18523_s12 + $0x160] sm:$0xf] }
 0x8b4   : > { %v8035_v8 = vadd.f32 %v8034_v18, %v7986_v57  ;;  %8586 = vmatpush.bf16.msrb.mxu1 %v11922_v12  ;;  %v11669_v27 = vld [vmem:[%s18523_s12 + $0x4e0] sm:$0xf] }
 0x8b5   : > { %8090 = vmatmul.bf16.gmra.mxu2 %v16783_v59  ;;  %8139 = vmatmul.bf16.gmra.mxu3 %v17054_v46 }
 0x8b6   : > { %9105 = vst [vmem:[%s17152_s16 + $0x270] sm:$0xff] %v8035_v8  ;;  %8232 = vmatmul.bf16.gmra.mxu1 %v17065_v44  ;;  %v11222_v8 = vor.u32 %v12409_v10, %v11221_v28  ;;  %v11417_v10 = vld [vmem:[%s18523_s12 + $0x2e8] sm:$0xf] }
 0x8b8   : > { %v7895_v0 = vpop.f32.mrf.mxu2  ;;  %v7944_v34 = vpop.f32.mrf.mxu3  ;;  %8440 = vmatpush.bf16.msrb.mxu2 %v11222_v8  ;;  %v12458_v8 = vld [vmem:[%s18523_s12 + $0x300] sm:$0xf0] }
 0x8b9   : > { %v7988_v13 = vpop.f32.mrf.mxu0  ;;  %v7896_v57 = vadd.f32 %v7895_v0, %v17394_v11 }
 0x8ba   : > { %v7989_v31 = vadd.f32 %v7988_v13, %v7940_v14  ;;  %v11446_v14 = vor.u32 %v12465_v61, %v11445_v29 }
 0x8bb   : > { %v8039_v5 = vpop.f32.mrf.mxu1  ;;  %8183 = vmatmul.bf16.gmra.mxu0 %v17074_v56  ;;  %v7945_v42 = vadd.f32 %v7944_v34, %v7896_v57  ;;  %v12521_v34 = vld [vmem:[%s18523_s12 + $0x4f8] sm:$0xf0] }
 0x8bc   : > { %v8038_v18 = vadd.f32 %v8037_v6, %v7989_v31  ;;  %8489 = vmatpush.bf16.msrb.mxu3 %v11446_v14 }
 0x8be   : > { %9112 = vst [vmem:[%s17152_s16 + $0x2a8] sm:$0xff] %v8038_v18  ;;  %v11670_v18 = vor.u32 %v12521_v34, %v11669_v27  ;;  %v11865_v34 = vld [vmem:[%s18523_s12 + $0x668] sm:$0xf] }
 0x8c0   : > { %v7897_v25 = vpop.f32.mrf.mxu2  ;;  %v7946_v21 = vpop.f32.mrf.mxu3  ;;  %8538 = vmatpush.bf16.msrb.mxu0 %v11670_v18  ;;  %v12570_v18 = vld [vmem:[%s18523_s12 + $0x680] sm:$0xf0] }
 0x8c1   : > { %v7990_v19 = vpop.f32.mrf.mxu0  ;;  %v7898_v31 = vadd.f32 %v7897_v25, %v17394_v11  ;;  %v11894_v25 = vor.u32 %v12577_v54, %v11893_v16 }
 0x8c2   : > { %v7991_v22 = vadd.f32 %v7990_v19, %v7942_v38 }
 0x8c3   : > { %v8042_v53 = vpop.f32.mrf.mxu1  ;;  %v7947_v11 = vadd.f32 %v7946_v21, %v7898_v31  ;;  %8587 = vmatpush.bf16.msrb.mxu1 %v11894_v25  ;;  %v11193_v21 = vld [vmem:[%s18523_s12 + $0x128] sm:$0xf] }
 0x8c4   : > { %v8040_v6 = vadd.f32 %v8039_v5, %v7991_v22 }
 0x8c5   : > { %8251 = vmatmul.bf16.vlgmr.msra.gmra.mxu2 %v16515_v45  ;;  %8300 = vmatmul.bf16.vlgmr.msra.gmra.mxu3 %v16496_v30 }
 0x8c6   : > { %9119 = vst [vmem:[%s17152_s16 + $0x2e0] sm:$0xff] %v8040_v6  ;;  %8237 = vmatmul.bf16.gmra.mxu1 %v17092_v48  ;;  %v12402_v6 = vld [vmem:[%s18523_s12 + $0x140] sm:$0xf0] }
 0x8c7   : > { %v11194_v28 = vor.u32 %v12402_v6, %v11193_v21  ;;  %v11389_v6 = vld [vmem:[%s18523_s12 + $0x2b0] sm:$0xf] }
 0x8c8   : > { %v8056_v41 = vpop.f32.mrf.mxu2  ;;  %v8105_v2 = vpop.f32.mrf.mxu3 }
 0x8c9   : > { %v7993_v0 = vpop.f32.mrf.mxu0  ;;  %8441 = vmatpush.bf16.msrb.mxu2 %v11194_v28  ;;  %v12451_v28 = vld [vmem:[%s18523_s12 + $0x2c8] sm:$0xf0] }
 0x8ca   : > { %v7994_v32 = vadd.f32 %v7993_v0, %v7945_v42 }
 0x8cb   : > { %v8044_v13 = vpop.f32.mrf.mxu1  ;;  %8188 = vmatmul.bf16.gmra.mxu0 %v17109_v37 }
 0x8cc   : > { %v8043_v5 = vadd.f32 %v8042_v53, %v7994_v32  ;;  %v8057_v53 = vadd.f32 %v8056_v41, %v17658_v1  ;;  %v11418_v41 = vor.u32 %v12458_v8, %v11417_v10 }
 0x8ce   : > { %9126 = vst [vmem:[%s17152_s16 + $0x318] sm:$0xff] %v8043_v5  ;;  %v8106_v29 = vadd.f32 %v8105_v2, %v8057_v53  ;;  %8490 = vmatpush.bf16.msrb.mxu3 %v11418_v41  ;;  %v11641_v5 = vld [vmem:[%s18523_s12 + $0x4a8] sm:$0xf]  ;;  %v12514_v2 = vld [vmem:[%s18523_s12 + $0x4c0] sm:$0xf0] }
 0x8cf   : > { %v11642_v27 = vor.u32 %v12514_v2, %v11641_v5  ;;  %v11837_v2 = vld [vmem:[%s18523_s12 + $0x630] sm:$0xf] }
 0x8d0   : > { %v8058_v33 = vpop.f32.mrf.mxu2  ;;  %v8107_v38 = vpop.f32.mrf.mxu3 }
 0x8d1   : > { %v7995_v12 = vpop.f32.mrf.mxu0  ;;  %8539 = vmatpush.bf16.msrb.mxu0 %v11642_v27  ;;  %v12563_v27 = vld [vmem:[%s18523_s12 + $0x648] sm:$0xf0] }
 0x8d2   : > { %v7996_v19 = vadd.f32 %v7995_v12, %v7947_v11 }
 0x8d3   : > { %v8203_v22 = vpop.f32.mrf.mxu1 }
 0x8d4   : > { %v8045_v57 = vadd.f32 %v8044_v13, %v7996_v19  ;;  %v8059_v13 = vadd.f32 %v8058_v33, %v17658_v1  ;;  %v11866_v33 = vor.u32 %v12570_v18, %v11865_v34 }
 0x8d5   : > { %8256 = vmatmul.bf16.gmra.mxu2 %v16551_v20  ;;  %8305 = vmatmul.bf16.gmra.mxu3 %v16532_v62 }
 0x8d6   : > { %9133 = vst [vmem:[%s17152_s16 + $0x350] sm:$0xff] %v8045_v57  ;;  %8398 = vmatmul.bf16.vlgmr.msra.gmra.mxu1 %v16800_v35  ;;  %v8108_v16 = vadd.f32 %v8107_v38, %v8059_v13  ;;  %v11165_v38 = vld [vmem:[%s18523_s12 + $0xf0] sm:$0xf]  ;;  %v12395_v57 = vld [vmem:[%s18523_s12 + $0x108] sm:$0xf0] }
 0x8d7   : > { %8588 = vmatpush.bf16.msrb.mxu1 %v11866_v33  ;;  %v11166_v21 = vor.u32 %v12395_v57, %v11165_v38  ;;  %v11361_v57 = vld [vmem:[%s18523_s12 + $0x278] sm:$0xf] }
 0x8d8   : > { %v8061_v61 = vpop.f32.mrf.mxu2  ;;  %v8110_v42 = vpop.f32.mrf.mxu3 }
 0x8d9   : > { %v8154_v14 = vpop.f32.mrf.mxu0  ;;  %8442 = vmatpush.bf16.msrb.mxu2 %v11166_v21  ;;  %v12444_v21 = vld [vmem:[%s18523_s12 + $0x290] sm:$0xf0] }
 0x8da   : > { %v8155_v0 = vadd.f32 %v8154_v14, %v8106_v29 }
 0x8db   : > { %v8205_v32 = vpop.f32.mrf.mxu1  ;;  %8349 = vmatmul.bf16.vlgmr.msra.gmra.mxu0 %v16818_v40 }
 0x8dc   : > { %v8204_v31 = vadd.f32 %v8203_v22, %v8155_v0  ;;  %v8062_v22 = vadd.f32 %v8061_v61, %v17658_v1  ;;  %v11390_v61 = vor.u32 %v12451_v28, %v11389_v6 }
 0x8de   : > { %9029 = vst [vmem:[%s17152_s16 + $0x10] sm:$0xff] %v8204_v31  ;;  %v8111_v10 = vadd.f32 %v8110_v42, %v8062_v22  ;;  %8491 = vmatpush.bf16.msrb.mxu3 %v11390_v61  ;;  %v11613_v31 = vld [vmem:[%s18523_s12 + $0x470] sm:$0xf]  ;;  %v12507_v42 = vld [vmem:[%s18523_s12 + $0x488] sm:$0xf0] }
 0x8df   : > { %v11614_v5 = vor.u32 %v12507_v42, %v11613_v31  ;;  %v11809_v42 = vld [vmem:[%s18523_s12 + $0x5f8] sm:$0xf] }
 0x8e0   : > { %v8063_v54 = vpop.f32.mrf.mxu2  ;;  %v8112_v11 = vpop.f32.mrf.mxu3 }
 0x8e1   : > { %v8156_v25 = vpop.f32.mrf.mxu0  ;;  %8540 = vmatpush.bf16.msrb.mxu0 %v11614_v5  ;;  %v12556_v5 = vld [vmem:[%s18523_s12 + $0x610] sm:$0xf0] }
 0x8e2   : > { %v8157_v12 = vadd.f32 %v8156_v25, %v8108_v16 }
 0x8e3   : > { %v8208_v19 = vpop.f32.mrf.mxu1 }
 0x8e4   : > { %v8206_v53 = vadd.f32 %v8205_v32, %v8157_v12  ;;  %v8064_v32 = vadd.f32 %v8063_v54, %v17658_v1  ;;  %v11838_v54 = vor.u32 %v12563_v27, %v11837_v2 }
 0x8e5   : > { %8261 = vmatmul.bf16.gmra.mxu2 %v16587_v55  ;;  %8310 = vmatmul.bf16.gmra.mxu3 %v16568_v43 }
 0x8e6   : > { %9036 = vst [vmem:[%s17152_s16 + $0x48] sm:$0xff] %v8206_v53  ;;  %8403 = vmatmul.bf16.gmra.mxu1 %v16836_v23  ;;  %v8113_v34 = vadd.f32 %v8112_v11, %v8064_v32  ;;  %v11137_v11 = vld [vmem:[%s18523_s12 + $0xb8] sm:$0xf]  ;;  %v12388_v53 = vld [vmem:[%s18523_s12 + $0xd0] sm:$0xf0] }
 0x8e7   : > { %8589 = vmatpush.bf16.msrb.mxu1 %v11838_v54  ;;  %v11138_v38 = vor.u32 %v12388_v53, %v11137_v11  ;;  %v11333_v53 = vld [vmem:[%s18523_s12 + $0x240] sm:$0xf] }
 0x8e8   : > { %v8066_v8 = vpop.f32.mrf.mxu2  ;;  %v8115_v29 = vpop.f32.mrf.mxu3 }
 0x8e9   : > { %v8159_v41 = vpop.f32.mrf.mxu0  ;;  %8443 = vmatpush.bf16.msrb.mxu2 %v11138_v38  ;;  %v12437_v38 = vld [vmem:[%s18523_s12 + $0x258] sm:$0xf0] }
 0x8ea   : > { %v8160_v14 = vadd.f32 %v8159_v41, %v8111_v10 }
 0x8eb   : > { %v8210_v0 = vpop.f32.mrf.mxu1  ;;  %8354 = vmatmul.bf16.gmra.mxu0 %v16854_v47 }
 0x8ec   : > { %v8209_v13 = vadd.f32 %v8208_v19, %v8160_v14  ;;  %v8067_v19 = vadd.f32 %v8066_v8, %v17658_v1  ;;  %v11362_v8 = vor.u32 %v12444_v21, %v11361_v57 }
 0x8ee   : > { %9043 = vst [vmem:[%s17152_s16 + $0x80] sm:$0xff] %v8209_v13  ;;  %v8116_v6 = vadd.f32 %v8115_v29, %v8067_v19  ;;  %8492 = vmatpush.bf16.msrb.mxu3 %v11362_v8  ;;  %v11585_v13 = vld [vmem:[%s18523_s12 + $0x438] sm:$0xf]  ;;  %v12500_v29 = vld [vmem:[%s18523_s12 + $0x450] sm:$0xf0] }
 0x8ef   : > { %v11586_v31 = vor.u32 %v12500_v29, %v11585_v13  ;;  %v11781_v29 = vld [vmem:[%s18523_s12 + $0x5c0] sm:$0xf] }
 0x8f0   : > { %v8068_v18 = vpop.f32.mrf.mxu2  ;;  %v8117_v16 = vpop.f32.mrf.mxu3 }
 0x8f1   : > { %v8161_v33 = vpop.f32.mrf.mxu0  ;;  %8541 = vmatpush.bf16.msrb.mxu0 %v11586_v31  ;;  %v12549_v31 = vld [vmem:[%s18523_s12 + $0x5d8] sm:$0xf0] }
 0x8f2   : > { %v8162_v25 = vadd.f32 %v8161_v33, %v8113_v34 }
 0x8f3   : > { %v8213_v12 = vpop.f32.mrf.mxu1 }
 0x8f4   : > { %v8211_v22 = vadd.f32 %v8210_v0, %v8162_v25  ;;  %v8069_v0 = vadd.f32 %v8068_v18, %v17658_v1  ;;  %v11810_v18 = vor.u32 %v12556_v5, %v11809_v42 }
 0x8f5   : > { %8266 = vmatmul.bf16.gmra.mxu2 %v16625_v39  ;;  %8315 = vmatmul.bf16.gmra.mxu3 %v16604_v60 }
 0x8f6   : > { %9050 = vst [vmem:[%s17152_s16 + $0xb8] sm:$0xff] %v8211_v22  ;;  %8408 = vmatmul.bf16.gmra.mxu1 %v16874_v36  ;;  %v8118_v2 = vadd.f32 %v8117_v16, %v8069_v0  ;;  %v11109_v16 = vld [vmem:[%s18523_s12 + $0x80] sm:$0xf]  ;;  %v12381_v22 = vld [vmem:[%s18523_s12 + $0x98] sm:$0xf0] }
 0x8f7   : > { %8590 = vmatpush.bf16.msrb.mxu1 %v11810_v18  ;;  %v11110_v11 = vor.u32 %v12381_v22, %v11109_v16  ;;  %v11305_v22 = vld [vmem:[%s18523_s12 + $0x208] sm:$0xf] }
 0x8f8   : > { %v8071_v28 = vpop.f32.mrf.mxu2  ;;  %v8120_v10 = vpop.f32.mrf.mxu3 }
 0x8f9   : > { %v8164_v61 = vpop.f32.mrf.mxu0  ;;  %8444 = vmatpush.bf16.msrb.mxu2 %v11110_v11  ;;  %v12430_v11 = vld [vmem:[%s18523_s12 + $0x220] sm:$0xf0] }
 0x8fa   : > { %v8165_v41 = vadd.f32 %v8164_v61, %v8116_v6 }
 0x8fb   : > { %v8215_v14 = vpop.f32.mrf.mxu1  ;;  %8359 = vmatmul.bf16.gmra.mxu0 %v16893_v15 }
 0x8fc   : > { %v8214_v32 = vadd.f32 %v8213_v12, %v8165_v41  ;;  %v8072_v12 = vadd.f32 %v8071_v28, %v17658_v1  ;;  %v11334_v28 = vor.u32 %v12437_v38, %v11333_v53 }
 0x8fe   : > { %9057 = vst [vmem:[%s17152_s16 + $0xf0] sm:$0xff] %v8214_v32  ;;  %v8121_v57 = vadd.f32 %v8120_v10, %v8072_v12  ;;  %8493 = vmatpush.bf16.msrb.mxu3 %v11334_v28  ;;  %v11557_v32 = vld [vmem:[%s18523_s12 + $0x400] sm:$0xf]  ;;  %v12493_v10 = vld [vmem:[%s18523_s12 + $0x418] sm:$0xf0] }
 0x8ff   : > { %v11558_v13 = vor.u32 %v12493_v10, %v11557_v32  ;;  %v11753_v10 = vld [vmem:[%s18523_s12 + $0x588] sm:$0xf] }
 0x900   : > { %v8073_v27 = vpop.f32.mrf.mxu2  ;;  %v8122_v34 = vpop.f32.mrf.mxu3 }
 0x901   : > { %v8166_v54 = vpop.f32.mrf.mxu0  ;;  %8542 = vmatpush.bf16.msrb.mxu0 %v11558_v13  ;;  %v12542_v13 = vld [vmem:[%s18523_s12 + $0x5a0] sm:$0xf0] }
 0x902   : > { %v8167_v33 = vadd.f32 %v8166_v54, %v8118_v2 }
 0x903   : > { %v8218_v25 = vpop.f32.mrf.mxu1 }
 0x904   : > { %v8216_v19 = vadd.f32 %v8215_v14, %v8167_v33  ;;  %v8074_v14 = vadd.f32 %v8073_v27, %v17658_v1  ;;  %v11782_v27 = vor.u32 %v12549_v31, %v11781_v29 }
 0x905   : > { %8271 = vmatmul.bf16.gmra.mxu2 %v16664_v4  ;;  %8320 = vmatmul.bf16.gmra.mxu3 %v16913_v26 }
 0x906   : > { %9064 = vst [vmem:[%s17152_s16 + $0x128] sm:$0xff] %v8216_v19  ;;  %8413 = vmatmul.bf16.gmra.mxu1 %v16917_v3  ;;  %v8123_v42 = vadd.f32 %v8122_v34, %v8074_v14  ;;  %v11081_v34 = vld [vmem:[%s18523_s12 + $0x48] sm:$0xf]  ;;  %v12374_v19 = vld [vmem:[%s18523_s12 + $0x60] sm:$0xf0] }
 0x907   : > { %8591 = vmatpush.bf16.msrb.mxu1 %v11782_v27  ;;  %v11082_v16 = vor.u32 %v12374_v19, %v11081_v34  ;;  %v11053_v27 = vld [vmem:[%s18523_s12 + $0x10] sm:$0xf] }
 0x908   : > { %v8076_v21 = vpop.f32.mrf.mxu2  ;;  %v8125_v6 = vpop.f32.mrf.mxu3 }
 0x909   : > { %v8169_v8 = vpop.f32.mrf.mxu0  ;;  %8445 = vmatpush.bf16.msrb.mxu2 %v11082_v16 }
 0x90a   : > { %v8170_v61 = vadd.f32 %v8169_v8, %v8121_v57 }
 0x90b   : > { %v8220_v41 = vpop.f32.mrf.mxu1  ;;  %8364 = vmatmul.bf16.gmra.mxu0 %v16936_v63 }
 0x90c   : > { %v8219_v0 = vadd.f32 %v8218_v25, %v8170_v61  ;;  %v8077_v25 = vadd.f32 %v8076_v21, %v17658_v1  ;;  %v11306_v21 = vor.u32 %v12430_v11, %v11305_v22 }
 0x90e   : > { %9071 = vst [vmem:[%s17152_s16 + $0x160] sm:$0xff] %v8219_v0  ;;  %v8126_v53 = vadd.f32 %v8125_v6, %v8077_v25  ;;  %8494 = vmatpush.bf16.msrb.mxu3 %v11306_v21  ;;  %v11529_v0 = vld [vmem:[%s18523_s12 + $0x3c8] sm:$0xf]  ;;  %v12486_v6 = vld [vmem:[%s18523_s12 + $0x3e0] sm:$0xf0] }
 0x90f   : > { %v11530_v32 = vor.u32 %v12486_v6, %v11529_v0  ;;  %v12479_v0 = vld [vmem:[%s18523_s12 + $0x3a8] sm:$0xf0]  ;;  %v11725_v6 = vld [vmem:[%s18523_s12 + $0x550] sm:$0xf] }
 0x910   : > { %v8078_v5 = vpop.f32.mrf.mxu2  ;;  %v8127_v2 = vpop.f32.mrf.mxu3 }
 0x911   : > { %v8171_v18 = vpop.f32.mrf.mxu0  ;;  %8543 = vmatpush.bf16.msrb.mxu0 %v11530_v32  ;;  %v12535_v32 = vld [vmem:[%s18523_s12 + $0x568] sm:$0xf0] }
 0x912   : > { %v8172_v54 = vadd.f32 %v8171_v18, %v8123_v42  ;;  %v12367_v18 = vld [vmem:[%s18523_s12 + $0x28] sm:$0xf0] }
 0x913   : > { %v8223_v33 = vpop.f32.mrf.mxu1  ;;  %v11054_v25 = vor.u32 %v12367_v18, %v11053_v27 }
 0x914   : > { %v8221_v12 = vadd.f32 %v8220_v41, %v8172_v54  ;;  %v8079_v41 = vadd.f32 %v8078_v5, %v17658_v1  ;;  %v11754_v5 = vor.u32 %v12542_v13, %v11753_v10  ;;  %v11277_v54 = vld [vmem:[%s18523_s12 + $0x1d0] sm:$0xf] }
 0x915   : > { %8276 = vmatmul.bf16.gmra.mxu2 %v16715_v49  ;;  %8325 = vmatmul.bf16.gmra.mxu3 %v16956_v7 }
 0x916   : > { %9078 = vst [vmem:[%s17152_s16 + $0x198] sm:$0xff] %v8221_v12  ;;  %8418 = vmatmul.bf16.gmra.mxu1 %v16960_v51  ;;  %v8128_v29 = vadd.f32 %v8127_v2, %v8079_v41  ;;  %v12423_v2 = vld [vmem:[%s18523_s12 + $0x1e8] sm:$0xf0]  ;;  %8446 = vmatpush.bf16.msrb.mxu2 %v11054_v25  ;;  %v11251_v25 = vld [vmem:[%s18523_s12 + $0x1b4] sm:$0xf0] }
 0x917   : > { %8592 = vmatpush.bf16.msrb.mxu1 %v11754_v5  ;;  %v11278_v34 = vor.u32 %v12423_v2, %v11277_v54 }
 0x918   : > { %v8081_v38 = vpop.f32.mrf.mxu2  ;;  %v8130_v57 = vpop.f32.mrf.mxu3 }
 0x919   : > { %v8174_v28 = vpop.f32.mrf.mxu0  ;;  %v8082_v16 = vadd.f32 %v8081_v38, %v17658_v1  ;;  %8495 = vmatpush.bf16.msrb.mxu3 %v11278_v34  ;;  %v11475_v34 = vld [vmem:[%s18523_s12 + $0x374] sm:$0xf0] }
 0x91a   : > { %v8175_v8 = vadd.f32 %v8174_v28, %v8126_v53 }
 0x91b   : > { %v8225_v61 = vpop.f32.mrf.mxu1  ;;  %8369 = vmatmul.bf16.gmra.mxu0 %v16979_v58  ;;  %v8131_v11 = vadd.f32 %v8130_v57, %v8082_v16 }
 0x91c   : > { %v8224_v14 = vadd.f32 %v8223_v33, %v8175_v8 }
 0x91e   : > { %9085 = vst [vmem:[%s17152_s16 + $0x1d0] sm:$0xff] %v8224_v14 }
 0x920   : > { %v8083_v31 = vpop.f32.mrf.mxu2  ;;  %v8132_v42 = vpop.f32.mrf.mxu3 }
 0x921   : > { %v8176_v33 = vpop.f32.mrf.mxu0  ;;  %v8084_v38 = vadd.f32 %v8083_v31, %v17658_v1  ;;  %v11726_v31 = vor.u32 %v12535_v32, %v11725_v6 }
 0x922   : > { %v8177_v12 = vadd.f32 %v8176_v33, %v8128_v29 }
 0x923   : > { %v8228_v19 = vpop.f32.mrf.mxu1  ;;  %v8133_v10 = vadd.f32 %v8132_v42, %v8084_v38  ;;  %8593 = vmatpush.bf16.msrb.mxu1 %v11726_v31  ;;  %v12413_v42 = vld [vmem:[%s18523_s12 + $0x19c] sm:$0xf] }
 0x924   : > { %v8226_v22 = vadd.f32 %v8225_v61, %v8177_v12  ;;  %v11501_v61 = vld [vmem:[%s18523_s12 + $0x390] sm:$0xf]  ;;  %v11254_v2 = vor.u32 %v12413_v42, %v11251_v25  ;;  %v12469_v12 = vld [vmem:[%s18523_s12 + $0x35c] sm:$0xf]  ;;  %v12462_v25 = vld [vmem:[%s18523_s12 + $0x324] sm:$0xf] }
 0x925   : > { %8281 = vmatmul.bf16.gmra.mxu2 %v16742_v50  ;;  %8330 = vmatmul.bf16.gmra.mxu3 %v17013_v9  ;;  %v11502_v57 = vor.u32 %v12479_v0, %v11501_v61  ;;  %v12581_v0 = vld [vmem:[%s18523_s12 + $0x6dc] sm:$0xf] }
 0x926   : > { %9092 = vst [vmem:[%s17152_s16 + $0x208] sm:$0xff] %v8226_v22  ;;  %8423 = vmatmul.bf16.gmra.mxu1 %v17015_v52  ;;  %8635 = vmatpush.bf16.msra.mxu2 %v11254_v2  ;;  %v11447_v2 = vld [vmem:[%s18523_s12 + $0x33c] sm:$0xf0] }
 0x927   : > { %8544 = vmatpush.bf16.msrb.mxu0 %v11502_v57  ;;  %v11923_v57 = vld [vmem:[%s18523_s12 + $0x6f4] sm:$0xf0] }
 0x928   : > { %v8086_v53 = vpop.f32.mrf.mxu2  ;;  %v8135_v21 = vpop.f32.mrf.mxu3 }
 0x929   : > { %v8179_v28 = vpop.f32.mrf.mxu0  ;;  %v8087_v54 = vadd.f32 %v8086_v53, %v17658_v1 }
 0x92a   : > { %v8180_v8 = vadd.f32 %v8179_v28, %v8131_v11  ;;  %v11478_v11 = vor.u32 %v12469_v12, %v11475_v34 }
 0x92b   : > { %v8230_v41 = vpop.f32.mrf.mxu1  ;;  %8374 = vmatmul.bf16.gmra.mxu0 %v17034_v17 }
 0x92c   : > { %v8229_v14 = vadd.f32 %v8228_v19, %v8180_v8  ;;  %v8136_v19 = vadd.f32 %v8135_v21, %v8087_v54  ;;  %8684 = vmatpush.bf16.msra.mxu3 %v11478_v11  ;;  %v11699_v21 = vld [vmem:[%s18523_s12 + $0x534] sm:$0xf0] }
 0x92e   : > { %9099 = vst [vmem:[%s17152_s16 + $0x240] sm:$0xff] %v8229_v14  ;;  %v12525_v14 = vld [vmem:[%s18523_s12 + $0x51c] sm:$0xf] }
 0x92f   : > { %v11702_v61 = vor.u32 %v12525_v14, %v11699_v21  ;;  %v12574_v21 = vld [vmem:[%s18523_s12 + $0x6a4] sm:$0xf] }
 0x930   : > { %v8088_v13 = vpop.f32.mrf.mxu2  ;;  %v8137_v29 = vpop.f32.mrf.mxu3 }
 0x931   : > { %v8181_v5 = vpop.f32.mrf.mxu0  ;;  %8733 = vmatpush.bf16.msra.mxu0 %v11702_v61 }
 0x932   : > { %v8182_v27 = vadd.f32 %v8181_v5, %v8133_v10 }
 0x933   : > { %v8233_v18 = vpop.f32.mrf.mxu1 }
 0x934   : > { %v8231_v33 = vadd.f32 %v8230_v41, %v8182_v27  ;;  %v8089_v41 = vadd.f32 %v8088_v13, %v17658_v1  ;;  %v11926_v13 = vor.u32 %v12581_v0, %v11923_v57  ;;  %v17917_v0 = vperm.slane %v17655_v24, 3  ;;  %v12399_v24 = vld [vmem:[%s18523_s12 + $0x12c] sm:$0xf] }
 0x935   : > { %8286 = vmatmul.bf16.gmra.mxu2 %v16783_v59  ;;  %8335 = vmatmul.bf16.gmra.mxu3 %v17054_v46 }
 0x936   : > { %9106 = vst [vmem:[%s17152_s16 + $0x278] sm:$0xff] %v8231_v33  ;;  %8428 = vmatmul.bf16.gmra.mxu1 %v17065_v44  ;;  %v8138_v6 = vadd.f32 %v8137_v29, %v8089_v41  ;;  %v12406_v29 = vld [vmem:[%s18523_s12 + $0x164] sm:$0xf]  ;;  %v11223_v33 = vld [vmem:[%s18523_s12 + $0x17c] sm:$0xf0] }
 0x937   : > { %8782 = vmatpush.bf16.msra.mxu1 %v11926_v13  ;;  %v11226_v42 = vor.u32 %v12406_v29, %v11223_v33  ;;  %v12455_v29 = vld [vmem:[%s18523_s12 + $0x2ec] sm:$0xf]  ;;  %v11419_v33 = vld [vmem:[%s18523_s12 + $0x304] sm:$0xf0] }
 0x938   : > { %v8091_v16 = vpop.f32.mrf.mxu2  ;;  %v8140_v22 = vpop.f32.mrf.mxu3 }
 0x939   : > { %v8184_v53 = vpop.f32.mrf.mxu0  ;;  %8636 = vmatpush.bf16.msra.mxu2 %v11226_v42 }
 0x93a   : > { %v8185_v28 = vadd.f32 %v8184_v53, %v8136_v19 }
 0x93b   : > { %v8235_v8 = vpop.f32.mrf.mxu1  ;;  %8379 = vmatmul.bf16.gmra.mxu0 %v17074_v56 }
 0x93c   : > { %v8234_v38 = vadd.f32 %v8233_v18, %v8185_v28  ;;  %v8092_v18 = vadd.f32 %v8091_v16, %v17658_v1  ;;  %v11450_v16 = vor.u32 %v12462_v25, %v11447_v2 }
 0x93e   : > { %9113 = vst [vmem:[%s17152_s16 + $0x2b0] sm:$0xff] %v8234_v38  ;;  %v8141_v12 = vadd.f32 %v8140_v22, %v8092_v18  ;;  %8685 = vmatpush.bf16.msra.mxu3 %v11450_v16  ;;  %v12518_v38 = vld [vmem:[%s18523_s12 + $0x4e4] sm:$0xf]  ;;  %v11671_v22 = vld [vmem:[%s18523_s12 + $0x4fc] sm:$0xf0] }
 0x93f   : > { %v11674_v14 = vor.u32 %v12518_v38, %v11671_v22  ;;  %v12567_v38 = vld [vmem:[%s18523_s12 + $0x66c] sm:$0xf]  ;;  %v11867_v22 = vld [vmem:[%s18523_s12 + $0x684] sm:$0xf0] }
 0x940   : > { %v8093_v32 = vpop.f32.mrf.mxu2  ;;  %v8142_v10 = vpop.f32.mrf.mxu3 }
 0x941   : > { %v8186_v31 = vpop.f32.mrf.mxu0  ;;  %8734 = vmatpush.bf16.msra.mxu0 %v11674_v14 }
 0x942   : > { %v8187_v5 = vadd.f32 %v8186_v31, %v8138_v6 }
 0x943   : > { %v8238_v27 = vpop.f32.mrf.mxu1 }
 0x944   : > { %v8236_v54 = vadd.f32 %v8235_v8, %v8187_v5  ;;  %v8094_v8 = vadd.f32 %v8093_v32, %v17658_v1  ;;  %v11895_v1 = vld [vmem:[%s18523_s12 + $0x6bc] sm:$0xf0] }
 0x945   : > { %8447 = vmatmul.bf16.vlgmr.msrb.gmra.mxu2 %v16515_v45  ;;  %8496 = vmatmul.bf16.vlgmr.msrb.gmra.mxu3 %v16496_v30  ;;  %v11898_v32 = vor.u32 %v12574_v21, %v11895_v1 }
 0x946   : > { %9120 = vst [vmem:[%s17152_s16 + $0x2e8] sm:$0xff] %v8236_v54  ;;  %8433 = vmatmul.bf16.gmra.mxu1 %v17092_v48  ;;  %v8143_v61 = vadd.f32 %v8142_v10, %v8094_v8  ;;  %v11195_v10 = vld [vmem:[%s18523_s12 + $0x144] sm:$0xf0]  ;;  %v12511_v8 = vld [vmem:[%s18523_s12 + $0x4ac] sm:$0xf] }
 0x947   : > { %8783 = vmatpush.bf16.msra.mxu1 %v11898_v32  ;;  %v11198_v54 = vor.u32 %v12399_v24, %v11195_v10  ;;  %v12448_v24 = vld [vmem:[%s18523_s12 + $0x2b4] sm:$0xf]  ;;  %v11391_v10 = vld [vmem:[%s18523_s12 + $0x2cc] sm:$0xf0] }
 0x948   : > { %v8252_v34 = vpop.f32.mrf.mxu2  ;;  %v8301_v19 = vpop.f32.mrf.mxu3 }
 0x949   : > { %v8189_v11 = vpop.f32.mrf.mxu0  ;;  %8637 = vmatpush.bf16.msra.mxu2 %v11198_v54 }
 0x94a   : > { %v8190_v53 = vadd.f32 %v8189_v11, %v8141_v12  ;;  %v11422_v12 = vor.u32 %v12455_v29, %v11419_v33 }
 0x94b   : > { %v8240_v28 = vpop.f32.mrf.mxu1  ;;  %8384 = vmatmul.bf16.gmra.mxu0 %v17109_v37 }
 0x94c   : > { %v8239_v41 = vadd.f32 %v8238_v27, %v8190_v53  ;;  %v8253_v27 = vadd.f32 %v8252_v34, %v17917_v0  ;;  %8686 = vmatpush.bf16.msra.mxu3 %v11422_v12 }
 0x94e   : > { %9127 = vst [vmem:[%s17152_s16 + $0x320] sm:$0xff] %v8239_v41  ;;  %v8302_v42 = vadd.f32 %v8301_v19, %v8253_v27  ;;  %v11643_v19 = vld [vmem:[%s18523_s12 + $0x4c4] sm:$0xf0]  ;;  %v11167_v27 = vld [vmem:[%s18523_s12 + $0x10c] sm:$0xf0] }
 0x94f   : > { %v11646_v41 = vor.u32 %v12511_v8, %v11643_v19  ;;  %v12560_v8 = vld [vmem:[%s18523_s12 + $0x634] sm:$0xf]  ;;  %v11839_v19 = vld [vmem:[%s18523_s12 + $0x64c] sm:$0xf0] }
 0x950   : > { %v8254_v57 = vpop.f32.mrf.mxu2  ;;  %v8303_v6 = vpop.f32.mrf.mxu3 }
 0x951   : > { %v8191_v13 = vpop.f32.mrf.mxu0  ;;  %v8255_v53 = vadd.f32 %v8254_v57, %v17917_v0  ;;  %8735 = vmatpush.bf16.msra.mxu0 %v11646_v41 }
 0x952   : > { %v8192_v31 = vadd.f32 %v8191_v13, %v8143_v61  ;;  %v11870_v61 = vor.u32 %v12567_v38, %v11867_v22 }
 0x953   : > { %v8399_v5 = vpop.f32.mrf.mxu1  ;;  %v8304_v14 = vadd.f32 %v8303_v6, %v8255_v53  ;;  %v12392_v6 = vld [vmem:[%s18523_s12 + $0xf4] sm:$0xf] }
 0x954   : > { %v8241_v18 = vadd.f32 %v8240_v28, %v8192_v31  ;;  %8784 = vmatpush.bf16.msra.mxu1 %v11870_v61  ;;  %v12504_v53 = vld [vmem:[%s18523_s12 + $0x474] sm:$0xf] }
 0x955   : > { %8452 = vmatmul.bf16.gmra.mxu2 %v16551_v20  ;;  %8501 = vmatmul.bf16.gmra.mxu3 %v16532_v62 }
 0x956   : > { %9134 = vst [vmem:[%s17152_s16 + $0x358] sm:$0xff] %v8241_v18  ;;  %8594 = vmatmul.bf16.vlgmr.msrb.gmra.mxu1 %v16800_v35  ;;  %v11170_v18 = vor.u32 %v12392_v6, %v11167_v27  ;;  %v12441_v6 = vld [vmem:[%s18523_s12 + $0x27c] sm:$0xf]  ;;  %v11363_v27 = vld [vmem:[%s18523_s12 + $0x294] sm:$0xf0] }
 0x958   : > { %v8257_v25 = vpop.f32.mrf.mxu2  ;;  %v8306_v2 = vpop.f32.mrf.mxu3  ;;  %8638 = vmatpush.bf16.msra.mxu2 %v11170_v18 }
 0x959   : > { %v8350_v34 = vpop.f32.mrf.mxu0  ;;  %v8258_v31 = vadd.f32 %v8257_v25, %v17917_v0 }
 0x95a   : > { %v8351_v16 = vadd.f32 %v8350_v34, %v8302_v42  ;;  %v11394_v42 = vor.u32 %v12448_v24, %v11391_v10 }
 0x95b   : > { %v8401_v11 = vpop.f32.mrf.mxu1  ;;  %8545 = vmatmul.bf16.vlgmr.msrb.gmra.mxu0 %v16818_v40  ;;  %v8307_v54 = vadd.f32 %v8306_v2, %v8258_v31  ;;  %v11615_v2 = vld [vmem:[%s18523_s12 + $0x48c] sm:$0xf0]  ;;  %v11139_v31 = vld [vmem:[%s18523_s12 + $0xd4] sm:$0xf0] }
 0x95c   : > { %v8400_v28 = vadd.f32 %v8399_v5, %v8351_v16  ;;  %8687 = vmatpush.bf16.msra.mxu3 %v11394_v42 }
 0x95e   : > { %9030 = vst [vmem:[%s17152_s16 + $0x18] sm:$0xff] %v8400_v28  ;;  %v11618_v28 = vor.u32 %v12504_v53, %v11615_v2  ;;  %v12553_v53 = vld [vmem:[%s18523_s12 + $0x5fc] sm:$0xf]  ;;  %v11811_v2 = vld [vmem:[%s18523_s12 + $0x614] sm:$0xf0] }
 0x960   : > { %v8259_v21 = vpop.f32.mrf.mxu2  ;;  %v8308_v1 = vpop.f32.mrf.mxu3  ;;  %8736 = vmatpush.bf16.msra.mxu0 %v11618_v28 }
 0x961   : > { %v8352_v57 = vpop.f32.mrf.mxu0  ;;  %v8260_v16 = vadd.f32 %v8259_v21, %v17917_v0 }
 0x962   : > { %v8353_v32 = vadd.f32 %v8352_v57, %v8304_v14  ;;  %v11842_v14 = vor.u32 %v12560_v8, %v11839_v19 }
 0x963   : > { %v8404_v13 = vpop.f32.mrf.mxu1  ;;  %v8309_v41 = vadd.f32 %v8308_v1, %v8260_v16  ;;  %v12385_v1 = vld [vmem:[%s18523_s12 + $0xbc] sm:$0xf] }
 0x964   : > { %v8402_v5 = vadd.f32 %v8401_v11, %v8353_v32  ;;  %8785 = vmatpush.bf16.msra.mxu1 %v11842_v14  ;;  %v12497_v16 = vld [vmem:[%s18523_s12 + $0x43c] sm:$0xf] }
 0x965   : > { %8457 = vmatmul.bf16.gmra.mxu2 %v16587_v55  ;;  %8506 = vmatmul.bf16.gmra.mxu3 %v16568_v43 }
 0x966   : > { %9037 = vst [vmem:[%s17152_s16 + $0x50] sm:$0xff] %v8402_v5  ;;  %8599 = vmatmul.bf16.gmra.mxu1 %v16836_v23  ;;  %v11142_v5 = vor.u32 %v12385_v1, %v11139_v31  ;;  %v12434_v1 = vld [vmem:[%s18523_s12 + $0x244] sm:$0xf]  ;;  %v11335_v31 = vld [vmem:[%s18523_s12 + $0x25c] sm:$0xf0] }
 0x968   : > { %v8262_v29 = vpop.f32.mrf.mxu2  ;;  %v8311_v33 = vpop.f32.mrf.mxu3  ;;  %8639 = vmatpush.bf16.msra.mxu2 %v11142_v5 }
 0x969   : > { %v8355_v25 = vpop.f32.mrf.mxu0  ;;  %v8263_v32 = vadd.f32 %v8262_v29, %v17917_v0 }
 0x96a   : > { %v8356_v12 = vadd.f32 %v8355_v25, %v8307_v54  ;;  %v11366_v54 = vor.u32 %v12441_v6, %v11363_v27 }
 0x96b   : > { %v8406_v34 = vpop.f32.mrf.mxu1  ;;  %8550 = vmatmul.bf16.gmra.mxu0 %v16854_v47  ;;  %v8312_v18 = vadd.f32 %v8311_v33, %v8263_v32  ;;  %v11587_v33 = vld [vmem:[%s18523_s12 + $0x454] sm:$0xf0]  ;;  %v11111_v32 = vld [vmem:[%s18523_s12 + $0x9c] sm:$0xf0] }
 0x96c   : > { %v8405_v11 = vadd.f32 %v8404_v13, %v8356_v12  ;;  %8688 = vmatpush.bf16.msra.mxu3 %v11366_v54 }
 0x96e   : > { %9044 = vst [vmem:[%s17152_s16 + $0x88] sm:$0xff] %v8405_v11  ;;  %v11590_v11 = vor.u32 %v12497_v16, %v11587_v33  ;;  %v12546_v16 = vld [vmem:[%s18523_s12 + $0x5c4] sm:$0xf]  ;;  %v11783_v33 = vld [vmem:[%s18523_s12 + $0x5dc] sm:$0xf0] }
 0x970   : > { %v8264_v38 = vpop.f32.mrf.mxu2  ;;  %v8313_v22 = vpop.f32.mrf.mxu3  ;;  %8737 = vmatpush.bf16.msra.mxu0 %v11590_v11 }
 0x971   : > { %v8357_v21 = vpop.f32.mrf.mxu0  ;;  %v8265_v12 = vadd.f32 %v8264_v38, %v17917_v0 }
 0x972   : > { %v8358_v61 = vadd.f32 %v8357_v21, %v8309_v41  ;;  %v11814_v41 = vor.u32 %v12553_v53, %v11811_v2 }
 0x973   : > { %v8409_v57 = vpop.f32.mrf.mxu1  ;;  %v8314_v28 = vadd.f32 %v8313_v22, %v8265_v12  ;;  %v12378_v22 = vld [vmem:[%s18523_s12 + $0x84] sm:$0xf] }
 0x974   : > { %v8407_v13 = vadd.f32 %v8406_v34, %v8358_v61  ;;  %8786 = vmatpush.bf16.msra.mxu1 %v11814_v41  ;;  %v12490_v12 = vld [vmem:[%s18523_s12 + $0x404] sm:$0xf] }
 0x975   : > { %8462 = vmatmul.bf16.gmra.mxu2 %v16625_v39  ;;  %8511 = vmatmul.bf16.gmra.mxu3 %v16604_v60 }
 0x976   : > { %9051 = vst [vmem:[%s17152_s16 + $0xc0] sm:$0xff] %v8407_v13  ;;  %8604 = vmatmul.bf16.gmra.mxu1 %v16874_v36  ;;  %v11114_v13 = vor.u32 %v12378_v22, %v11111_v32  ;;  %v12427_v22 = vld [vmem:[%s18523_s12 + $0x20c] sm:$0xf]  ;;  %v11307_v32 = vld [vmem:[%s18523_s12 + $0x224] sm:$0xf0] }
 0x978   : > { %v8267_v24 = vpop.f32.mrf.mxu2  ;;  %v8316_v10 = vpop.f32.mrf.mxu3  ;;  %8640 = vmatpush.bf16.msra.mxu2 %v11114_v13 }
 0x979   : > { %v8360_v29 = vpop.f32.mrf.mxu0  ;;  %v8268_v61 = vadd.f32 %v8267_v24, %v17917_v0 }
 0x97a   : > { %v8361_v42 = vadd.f32 %v8360_v29, %v8312_v18  ;;  %v11338_v18 = vor.u32 %v12434_v1, %v11335_v31 }
 0x97b   : > { %v8411_v25 = vpop.f32.mrf.mxu1  ;;  %8555 = vmatmul.bf16.gmra.mxu0 %v16893_v15  ;;  %v8317_v5 = vadd.f32 %v8316_v10, %v8268_v61  ;;  %v11559_v10 = vld [vmem:[%s18523_s12 + $0x41c] sm:$0xf0]  ;;  %v11083_v61 = vld [vmem:[%s18523_s12 + $0x64] sm:$0xf0] }
 0x97c   : > { %v8410_v34 = vadd.f32 %v8409_v57, %v8361_v42  ;;  %8689 = vmatpush.bf16.msra.mxu3 %v11338_v18 }
 0x97e   : > { %9058 = vst [vmem:[%s17152_s16 + $0xf8] sm:$0xff] %v8410_v34  ;;  %v11562_v34 = vor.u32 %v12490_v12, %v11559_v10  ;;  %v12539_v12 = vld [vmem:[%s18523_s12 + $0x58c] sm:$0xf]  ;;  %v11755_v10 = vld [vmem:[%s18523_s12 + $0x5a4] sm:$0xf0] }
 0x980   : > { %v8269_v8 = vpop.f32.mrf.mxu2  ;;  %v8318_v19 = vpop.f32.mrf.mxu3  ;;  %8738 = vmatpush.bf16.msra.mxu0 %v11562_v34 }
 0x981   : > { %v8362_v38 = vpop.f32.mrf.mxu0  ;;  %v8270_v42 = vadd.f32 %v8269_v8, %v17917_v0 }
 0x982   : > { %v8363_v14 = vadd.f32 %v8362_v38, %v8314_v28  ;;  %v11786_v28 = vor.u32 %v12546_v16, %v11783_v33 }
 0x983   : > { %v8414_v21 = vpop.f32.mrf.mxu1  ;;  %v8319_v11 = vadd.f32 %v8318_v19, %v8270_v42  ;;  %v12371_v19 = vld [vmem:[%s18523_s12 + $0x4c] sm:$0xf] }
 0x984   : > { %v8412_v57 = vadd.f32 %v8411_v25, %v8363_v14  ;;  %8787 = vmatpush.bf16.msra.mxu1 %v11786_v28  ;;  %v12483_v42 = vld [vmem:[%s18523_s12 + $0x3cc] sm:$0xf]  ;;  %v11055_v28 = vld [vmem:[%s18523_s12 + $0x2c] sm:$0xf0] }
 0x985   : > { %8467 = vmatmul.bf16.gmra.mxu2 %v16664_v4  ;;  %8516 = vmatmul.bf16.gmra.mxu3 %v16913_v26 }
 0x986   : > { %9065 = vst [vmem:[%s17152_s16 + $0x130] sm:$0xff] %v8412_v57  ;;  %8609 = vmatmul.bf16.gmra.mxu1 %v16917_v3  ;;  %v11086_v57 = vor.u32 %v12371_v19, %v11083_v61 }
 0x988   : > { %v8272_v6 = vpop.f32.mrf.mxu2  ;;  %v8321_v27 = vpop.f32.mrf.mxu3  ;;  %8641 = vmatpush.bf16.msra.mxu2 %v11086_v57 }
 0x989   : > { %v8365_v24 = vpop.f32.mrf.mxu0  ;;  %v8273_v14 = vadd.f32 %v8272_v6, %v17917_v0 }
 0x98a   : > { %v8366_v54 = vadd.f32 %v8365_v24, %v8317_v5  ;;  %v11310_v5 = vor.u32 %v12427_v22, %v11307_v32 }
 0x98b   : > { %v8416_v29 = vpop.f32.mrf.mxu1  ;;  %8560 = vmatmul.bf16.gmra.mxu0 %v16936_v63  ;;  %v8322_v13 = vadd.f32 %v8321_v27, %v8273_v14  ;;  %v11531_v27 = vld [vmem:[%s18523_s12 + $0x3e4] sm:$0xf0] }
 0x98c   : > { %v8415_v25 = vadd.f32 %v8414_v21, %v8366_v54  ;;  %8690 = vmatpush.bf16.msra.mxu3 %v11310_v5 }
 0x98e   : > { %9072 = vst [vmem:[%s17152_s16 + $0x168] sm:$0xff] %v8415_v25  ;;  %v11534_v25 = vor.u32 %v12483_v42, %v11531_v27  ;;  %v12532_v42 = vld [vmem:[%s18523_s12 + $0x554] sm:$0xf]  ;;  %v11727_v27 = vld [vmem:[%s18523_s12 + $0x56c] sm:$0xf0] }
 0x990   : > { %v8274_v53 = vpop.f32.mrf.mxu2  ;;  %v8323_v2 = vpop.f32.mrf.mxu3  ;;  %8739 = vmatpush.bf16.msra.mxu0 %v11534_v25 }
 0x991   : > { %v8367_v8 = vpop.f32.mrf.mxu0  ;;  %v8275_v54 = vadd.f32 %v8274_v53, %v17917_v0  ;;  %v12364_v53 = vld [vmem:[%s18523_s12 + $0x14] sm:$0xf] }
 0x992   : > { %v8368_v41 = vadd.f32 %v8367_v8, %v8319_v11  ;;  %v11758_v11 = vor.u32 %v12539_v12, %v11755_v10  ;;  %v12420_v8 = vld [vmem:[%s18523_s12 + $0x1d4] sm:$0xf] }
 0x993   : > { %v8419_v38 = vpop.f32.mrf.mxu1  ;;  %v8324_v34 = vadd.f32 %v8323_v2, %v8275_v54  ;;  %v11279_v2 = vld [vmem:[%s18523_s12 + $0x1ec] sm:$0xf0] }
 0x994   : > { %v8417_v21 = vadd.f32 %v8416_v29, %v8368_v41  ;;  %8788 = vmatpush.bf16.msra.mxu1 %v11758_v11 }
 0x995   : > { %8472 = vmatmul.bf16.gmra.mxu2 %v16715_v49  ;;  %8521 = vmatmul.bf16.gmra.mxu3 %v16956_v7 }
 0x996   : > { %9079 = vst [vmem:[%s17152_s16 + $0x1a0] sm:$0xff] %v8417_v21  ;;  %8614 = vmatmul.bf16.gmra.mxu1 %v16960_v51  ;;  %v11282_v21 = vor.u32 %v12420_v8, %v11279_v2  ;;  %v11481_v2 = vld [vmem:[%s18523_s12 + $0x360] sm:$0xf] }
 0x998   : > { %v8277_v1 = vpop.f32.mrf.mxu2  ;;  %v8326_v31 = vpop.f32.mrf.mxu3  ;;  %8691 = vmatpush.bf16.msra.mxu3 %v11282_v21 }
 0x999   : > { %v8370_v6 = vpop.f32.mrf.mxu0  ;;  %v8278_v61 = vadd.f32 %v8277_v1, %v17917_v0 }
 0x99a   : > { %v8371_v18 = vadd.f32 %v8370_v6, %v8322_v13 }
 0x99b   : > { %v8421_v24 = vpop.f32.mrf.mxu1  ;;  %8565 = vmatmul.bf16.gmra.mxu0 %v16979_v58  ;;  %v8327_v22 = vadd.f32 %v8326_v31, %v8278_v61 }
 0x99c   : > { %v8420_v29 = vadd.f32 %v8419_v38, %v8371_v18  ;;  %v11058_v38 = vor.u32 %v12364_v53, %v11055_v28 }
 0x99e   : > { %9086 = vst [vmem:[%s17152_s16 + $0x1d8] sm:$0xff] %v8420_v29  ;;  %8642 = vmatpush.bf16.msra.mxu2 %v11058_v38  ;;  %v11503_v29 = vld [vmem:[%s18523_s12 + $0x3ac] sm:$0xf0] }
 0x9a0   : > { %v8279_v16 = vpop.f32.mrf.mxu2  ;;  %v8328_v33 = vpop.f32.mrf.mxu3 }
 0x9a1   : > { %v8372_v41 = vpop.f32.mrf.mxu0  ;;  %v8280_v1 = vadd.f32 %v8279_v16, %v17917_v0 }
 0x9a2   : > { %v8373_v14 = vadd.f32 %v8372_v41, %v8324_v34  ;;  %v11730_v34 = vor.u32 %v12532_v42, %v11727_v27  ;;  %v12417_v41 = vld [vmem:[%s18523_s12 + $0x1b8] sm:$0xf0] }
 0x9a3   : > { %v8424_v19 = vpop.f32.mrf.mxu1  ;;  %v8329_v25 = vadd.f32 %v8328_v33, %v8280_v1  ;;  %v11257_v33 = vld [vmem:[%s18523_s12 + $0x1a0] sm:$0xf] }
 0x9a4   : > { %v8422_v57 = vadd.f32 %v8421_v24, %v8373_v14  ;;  %v12476_v24 = vld [vmem:[%s18523_s12 + $0x394] sm:$0xf]  ;;  %8789 = vmatpush.bf16.msra.mxu1 %v11730_v34  ;;  %v11258_v38 = vor.u32 %v12417_v41, %v11257_v33  ;;  %v12473_v14 = vld [vmem:[%s18523_s12 + $0x378] sm:$0xf0]  ;;  %v11705_v1 = vld [vmem:[%s18523_s12 + $0x520] sm:$0xf] }
 0x9a5   : > { %8477 = vmatmul.bf16.gmra.mxu2 %v16742_v50  ;;  %8526 = vmatmul.bf16.gmra.mxu3 %v17013_v9  ;;  %v11506_v31 = vor.u32 %v12476_v24, %v11503_v29  ;;  %v11929_v24 = vld [vmem:[%s18523_s12 + $0x6e0] sm:$0xf]  ;;  %v12585_v29 = vld [vmem:[%s18523_s12 + $0x6f8] sm:$0xf0]  ;;  %v11453_v33 = vld [vmem:[%s18523_s12 + $0x328] sm:$0xf] }
 0x9a6   : > { %9093 = vst [vmem:[%s17152_s16 + $0x210] sm:$0xff] %v8422_v57  ;;  %8619 = vmatmul.bf16.gmra.mxu1 %v17015_v52  ;;  %v11482_v57 = vor.u32 %v12473_v14, %v11481_v2  ;;  %8831 = vmatpush.bf16.msrb.mxu2 %v11258_v38  ;;  %v12466_v41 = vld [vmem:[%s18523_s12 + $0x340] sm:$0xf0] }
 0x9a7   : > { %8740 = vmatpush.bf16.msra.mxu0 %v11506_v31 }
 0x9a8   : > { %v8282_v32 = vpop.f32.mrf.mxu2  ;;  %v8331_v13 = vpop.f32.mrf.mxu3  ;;  %8880 = vmatpush.bf16.msrb.mxu3 %v11482_v57 }
 0x9a9   : > { %v8375_v5 = vpop.f32.mrf.mxu0  ;;  %v8283_v28 = vadd.f32 %v8282_v32, %v17917_v0 }
 0x9aa   : > { %v8376_v6 = vadd.f32 %v8375_v5, %v8327_v22 }
 0x9ab   : > { %v8426_v18 = vpop.f32.mrf.mxu1  ;;  %8570 = vmatmul.bf16.gmra.mxu0 %v17034_v17  ;;  %v8332_v21 = vadd.f32 %v8331_v13, %v8283_v28  ;;  %v12529_v13 = vld [vmem:[%s18523_s12 + $0x538] sm:$0xf0]  ;;  %v12410_v28 = vld [vmem:[%s18523_s12 + $0x180] sm:$0xf0] }
 0x9ac   : > { %v8425_v54 = vadd.f32 %v8424_v19, %v8376_v6 }
 0x9ae   : > { %9100 = vst [vmem:[%s17152_s16 + $0x248] sm:$0xff] %v8425_v54  ;;  %v11706_v54 = vor.u32 %v12529_v13, %v11705_v1  ;;  %v11901_v1 = vld [vmem:[%s18523_s12 + $0x6a8] sm:$0xf]  ;;  %v12578_v13 = vld [vmem:[%s18523_s12 + $0x6c0] sm:$0xf0] }
 0x9b0   : > { %v8284_v12 = vpop.f32.mrf.mxu2  ;;  %v8333_v10 = vpop.f32.mrf.mxu3  ;;  %8929 = vmatpush.bf16.msrb.mxu0 %v11706_v54  ;;  %v18178_v54 = vld [vmem:[%s18524_s13] sm:$0x7f] }
 0x9b1   : > { %v8377_v16 = vpop.f32.mrf.mxu0  ;;  %v8285_v6 = vadd.f32 %v8284_v12, %v17917_v0 }
 0x9b2   : > { %v8378_v11 = vadd.f32 %v8377_v16, %v8329_v25  ;;  %v11930_v25 = vor.u32 %v12585_v29, %v11929_v24  ;;  %v18181_v24 = vperm.slane %v18178_v54, 4 }
 0x9b3   : > { %v8429_v53 = vpop.f32.mrf.mxu1  ;;  %v8334_v31 = vadd.f32 %v8333_v10, %v8285_v6  ;;  %v11229_v10 = vld [vmem:[%s18523_s12 + $0x168] sm:$0xf] }
 0x9b4   : > { %v8427_v8 = vadd.f32 %v8426_v18, %v8378_v11  ;;  %8978 = vmatpush.bf16.msrb.mxu1 %v11930_v25  ;;  %v11677_v6 = vld [vmem:[%s18523_s12 + $0x4e8] sm:$0xf] }
 0x9b5   : > { %8482 = vmatmul.bf16.gmra.mxu2 %v16783_v59  ;;  %8531 = vmatmul.bf16.gmra.mxu3 %v17054_v46 }
 0x9b6   : > { %9107 = vst [vmem:[%s17152_s16 + $0x280] sm:$0xff] %v8427_v8  ;;  %8624 = vmatmul.bf16.gmra.mxu1 %v17065_v44  ;;  %v11230_v8 = vor.u32 %v12410_v28, %v11229_v10  ;;  %v11425_v28 = vld [vmem:[%s18523_s12 + $0x2f0] sm:$0xf] }
 0x9b8   : > { %v8287_v19 = vpop.f32.mrf.mxu2  ;;  %v8336_v61 = vpop.f32.mrf.mxu3  ;;  %8832 = vmatpush.bf16.msrb.mxu2 %v11230_v8  ;;  %v12459_v8 = vld [vmem:[%s18523_s12 + $0x308] sm:$0xf0] }
 0x9b9   : > { %v8380_v22 = vpop.f32.mrf.mxu0  ;;  %v8288_v11 = vadd.f32 %v8287_v19, %v17917_v0 }
 0x9ba   : > { %v8381_v32 = vadd.f32 %v8380_v22, %v8332_v21  ;;  %v11454_v21 = vor.u32 %v12466_v41, %v11453_v33 }
 0x9bb   : > { %v8431_v5 = vpop.f32.mrf.mxu1  ;;  %8575 = vmatmul.bf16.gmra.mxu0 %v17074_v56  ;;  %v8337_v38 = vadd.f32 %v8336_v61, %v8288_v11  ;;  %v12522_v61 = vld [vmem:[%s18523_s12 + $0x500] sm:$0xf0] }
 0x9bc   : > { %v8430_v18 = vadd.f32 %v8429_v53, %v8381_v32  ;;  %8881 = vmatpush.bf16.msrb.mxu3 %v11454_v21 }
 0x9be   : > { %9114 = vst [vmem:[%s17152_s16 + $0x2b8] sm:$0xff] %v8430_v18  ;;  %v11678_v18 = vor.u32 %v12522_v61, %v11677_v6  ;;  %v11873_v61 = vld [vmem:[%s18523_s12 + $0x670] sm:$0xf] }
 0x9c0   : > { %v8289_v42 = vpop.f32.mrf.mxu2  ;;  %v8338_v27 = vpop.f32.mrf.mxu3  ;;  %8930 = vmatpush.bf16.msrb.mxu0 %v11678_v18  ;;  %v12571_v18 = vld [vmem:[%s18523_s12 + $0x688] sm:$0xf0] }
 0x9c1   : > { %v8382_v12 = vpop.f32.mrf.mxu0  ;;  %v8290_v32 = vadd.f32 %v8289_v42, %v17917_v0  ;;  %v11902_v42 = vor.u32 %v12578_v13, %v11901_v1 }
 0x9c2   : > { %v8383_v34 = vadd.f32 %v8382_v12, %v8334_v31 }
 0x9c3   : > { %v8434_v16 = vpop.f32.mrf.mxu1  ;;  %v8339_v0 = vadd.f32 %v8338_v27, %v8290_v32  ;;  %8979 = vmatpush.bf16.msrb.mxu1 %v11902_v42  ;;  %v11201_v27 = vld [vmem:[%s18523_s12 + $0x130] sm:$0xf] }
 0x9c4   : > { %v8432_v53 = vadd.f32 %v8431_v5, %v8383_v34 }
 0x9c5   : > { %8643 = vmatmul.bf16.vlgmr.msra.gmra.mxu2 %v16515_v45  ;;  %8692 = vmatmul.bf16.vlgmr.msra.gmra.mxu3 %v16496_v30 }
 0x9c6   : > { %9121 = vst [vmem:[%s17152_s16 + $0x2f0] sm:$0xff] %v8432_v53  ;;  %8629 = vmatmul.bf16.gmra.mxu1 %v17092_v48  ;;  %v12403_v53 = vld [vmem:[%s18523_s12 + $0x148] sm:$0xf0] }
 0x9c7   : > { %v11202_v10 = vor.u32 %v12403_v53, %v11201_v27  ;;  %v11397_v53 = vld [vmem:[%s18523_s12 + $0x2b8] sm:$0xf] }
 0x9c8   : > { %v8448_v2 = vpop.f32.mrf.mxu2  ;;  %v8497_v14 = vpop.f32.mrf.mxu3 }
 0x9c9   : > { %v8385_v19 = vpop.f32.mrf.mxu0  ;;  %8833 = vmatpush.bf16.msrb.mxu2 %v11202_v10  ;;  %v12452_v10 = vld [vmem:[%s18523_s12 + $0x2d0] sm:$0xf0] }
 0x9ca   : > { %v8386_v57 = vadd.f32 %v8385_v19, %v8337_v38 }
 0x9cb   : > { %v8436_v22 = vpop.f32.mrf.mxu1  ;;  %8580 = vmatmul.bf16.gmra.mxu0 %v17109_v37 }
 0x9cc   : > { %v8435_v5 = vadd.f32 %v8434_v16, %v8386_v57  ;;  %v8449_v16 = vadd.f32 %v8448_v2, %v18181_v24  ;;  %v11426_v2 = vor.u32 %v12459_v8, %v11425_v28 }
 0x9ce   : > { %9128 = vst [vmem:[%s17152_s16 + $0x328] sm:$0xff] %v8435_v5  ;;  %v8498_v33 = vadd.f32 %v8497_v14, %v8449_v16  ;;  %8882 = vmatpush.bf16.msrb.mxu3 %v11426_v2  ;;  %v11649_v5 = vld [vmem:[%s18523_s12 + $0x4b0] sm:$0xf]  ;;  %v12515_v14 = vld [vmem:[%s18523_s12 + $0x4c8] sm:$0xf0] }
 0x9cf   : > { %v11650_v6 = vor.u32 %v12515_v14, %v11649_v5  ;;  %v11845_v14 = vld [vmem:[%s18523_s12 + $0x638] sm:$0xf] }
 0x9d0   : > { %v8450_v29 = vpop.f32.mrf.mxu2  ;;  %v8499_v31 = vpop.f32.mrf.mxu3 }
 0x9d1   : > { %v8387_v25 = vpop.f32.mrf.mxu0  ;;  %8931 = vmatpush.bf16.msrb.mxu0 %v11650_v6  ;;  %v12564_v6 = vld [vmem:[%s18523_s12 + $0x650] sm:$0xf0] }
 0x9d2   : > { %v8388_v12 = vadd.f32 %v8387_v25, %v8339_v0 }
 0x9d3   : > { %v8595_v34 = vpop.f32.mrf.mxu1 }
 0x9d4   : > { %v8437_v11 = vadd.f32 %v8436_v22, %v8388_v12  ;;  %v8451_v22 = vadd.f32 %v8450_v29, %v18181_v24  ;;  %v11874_v29 = vor.u32 %v12571_v18, %v11873_v61 }
 0x9d5   : > { %8648 = vmatmul.bf16.gmra.mxu2 %v16551_v20  ;;  %8697 = vmatmul.bf16.gmra.mxu3 %v16532_v62 }
 0x9d6   : > { %9135 = vst [vmem:[%s17152_s16 + $0x360] sm:$0xff] %v8437_v11  ;;  %8790 = vmatmul.bf16.vlgmr.msra.gmra.mxu1 %v16800_v35  ;;  %v8500_v1 = vadd.f32 %v8499_v31, %v8451_v22  ;;  %v11173_v31 = vld [vmem:[%s18523_s12 + $0xf8] sm:$0xf]  ;;  %v12396_v11 = vld [vmem:[%s18523_s12 + $0x110] sm:$0xf0] }
 0x9d7   : > { %8980 = vmatpush.bf16.msrb.mxu1 %v11874_v29  ;;  %v11174_v27 = vor.u32 %v12396_v11, %v11173_v31  ;;  %v11369_v11 = vld [vmem:[%s18523_s12 + $0x280] sm:$0xf] }
 0x9d8   : > { %v8453_v41 = vpop.f32.mrf.mxu2  ;;  %v8502_v38 = vpop.f32.mrf.mxu3 }
 0x9d9   : > { %v8546_v21 = vpop.f32.mrf.mxu0  ;;  %8834 = vmatpush.bf16.msrb.mxu2 %v11174_v27  ;;  %v12445_v27 = vld [vmem:[%s18523_s12 + $0x298] sm:$0xf0] }
 0x9da   : > { %v8547_v19 = vadd.f32 %v8546_v21, %v8498_v33 }
 0x9db   : > { %v8597_v57 = vpop.f32.mrf.mxu1  ;;  %8741 = vmatmul.bf16.vlgmr.msra.gmra.mxu0 %v16818_v40 }
 0x9dc   : > { %v8596_v32 = vadd.f32 %v8595_v34, %v8547_v19  ;;  %v8454_v34 = vadd.f32 %v8453_v41, %v18181_v24  ;;  %v11398_v41 = vor.u32 %v12452_v10, %v11397_v53 }
 0x9de   : > { %9031 = vst [vmem:[%s17152_s16 + $0x20] sm:$0xff] %v8596_v32  ;;  %v8503_v28 = vadd.f32 %v8502_v38, %v8454_v34  ;;  %8883 = vmatpush.bf16.msrb.mxu3 %v11398_v41  ;;  %v11621_v32 = vld [vmem:[%s18523_s12 + $0x478] sm:$0xf]  ;;  %v12508_v38 = vld [vmem:[%s18523_s12 + $0x490] sm:$0xf0] }
 0x9df   : > { %v11622_v5 = vor.u32 %v12508_v38, %v11621_v32  ;;  %v11817_v38 = vld [vmem:[%s18523_s12 + $0x600] sm:$0xf] }
 0x9e0   : > { %v8455_v13 = vpop.f32.mrf.mxu2  ;;  %v8504_v0 = vpop.f32.mrf.mxu3 }
 0x9e1   : > { %v8548_v42 = vpop.f32.mrf.mxu0  ;;  %8932 = vmatpush.bf16.msrb.mxu0 %v11622_v5  ;;  %v12557_v5 = vld [vmem:[%s18523_s12 + $0x618] sm:$0xf0] }
 0x9e2   : > { %v8549_v25 = vadd.f32 %v8548_v42, %v8500_v1 }
 0x9e3   : > { %v8600_v12 = vpop.f32.mrf.mxu1 }
 0x9e4   : > { %v8598_v16 = vadd.f32 %v8597_v57, %v8549_v25  ;;  %v8456_v57 = vadd.f32 %v8455_v13, %v18181_v24  ;;  %v11846_v13 = vor.u32 %v12564_v6, %v11845_v14 }
 0x9e5   : > { %8653 = vmatmul.bf16.gmra.mxu2 %v16587_v55  ;;  %8702 = vmatmul.bf16.gmra.mxu3 %v16568_v43 }
 0x9e6   : > { %9038 = vst [vmem:[%s17152_s16 + $0x58] sm:$0xff] %v8598_v16  ;;  %8795 = vmatmul.bf16.gmra.mxu1 %v16836_v23  ;;  %v8505_v61 = vadd.f32 %v8504_v0, %v8456_v57  ;;  %v11145_v0 = vld [vmem:[%s18523_s12 + $0xc0] sm:$0xf]  ;;  %v12389_v16 = vld [vmem:[%s18523_s12 + $0xd8] sm:$0xf0] }
 0x9e7   : > { %8981 = vmatpush.bf16.msrb.mxu1 %v11846_v13  ;;  %v11146_v31 = vor.u32 %v12389_v16, %v11145_v0  ;;  %v11341_v16 = vld [vmem:[%s18523_s12 + $0x248] sm:$0xf] }
 0x9e8   : > { %v8458_v8 = vpop.f32.mrf.mxu2  ;;  %v8507_v33 = vpop.f32.mrf.mxu3 }
 0x9e9   : > { %v8551_v2 = vpop.f32.mrf.mxu0  ;;  %8835 = vmatpush.bf16.msrb.mxu2 %v11146_v31  ;;  %v12438_v31 = vld [vmem:[%s18523_s12 + $0x260] sm:$0xf0] }
 0x9ea   : > { %v8552_v21 = vadd.f32 %v8551_v2, %v8503_v28 }
 0x9eb   : > { %v8602_v19 = vpop.f32.mrf.mxu1  ;;  %8746 = vmatmul.bf16.gmra.mxu0 %v16854_v47 }
 0x9ec   : > { %v8601_v22 = vadd.f32 %v8600_v12, %v8552_v21  ;;  %v8459_v12 = vadd.f32 %v8458_v8, %v18181_v24  ;;  %v11370_v8 = vor.u32 %v12445_v27, %v11369_v11 }
 0x9ee   : > { %9045 = vst [vmem:[%s17152_s16 + $0x90] sm:$0xff] %v8601_v22  ;;  %v8508_v53 = vadd.f32 %v8507_v33, %v8459_v12  ;;  %8884 = vmatpush.bf16.msrb.mxu3 %v11370_v8  ;;  %v11593_v22 = vld [vmem:[%s18523_s12 + $0x440] sm:$0xf]  ;;  %v12501_v33 = vld [vmem:[%s18523_s12 + $0x458] sm:$0xf0] }
 0x9ef   : > { %v11594_v32 = vor.u32 %v12501_v33, %v11593_v22  ;;  %v11789_v33 = vld [vmem:[%s18523_s12 + $0x5c8] sm:$0xf] }
 0x9f0   : > { %v8460_v18 = vpop.f32.mrf.mxu2  ;;  %v8509_v1 = vpop.f32.mrf.mxu3 }
 0x9f1   : > { %v8553_v29 = vpop.f32.mrf.mxu0  ;;  %8933 = vmatpush.bf16.msrb.mxu0 %v11594_v32  ;;  %v12550_v32 = vld [vmem:[%s18523_s12 + $0x5e0] sm:$0xf0] }
 0x9f2   : > { %v8554_v42 = vadd.f32 %v8553_v29, %v8505_v61 }
 0x9f3   : > { %v8605_v25 = vpop.f32.mrf.mxu1 }
 0x9f4   : > { %v8603_v34 = vadd.f32 %v8602_v19, %v8554_v42  ;;  %v8461_v19 = vadd.f32 %v8460_v18, %v18181_v24  ;;  %v11818_v18 = vor.u32 %v12557_v5, %v11817_v38 }
 0x9f5   : > { %8658 = vmatmul.bf16.gmra.mxu2 %v16625_v39  ;;  %8707 = vmatmul.bf16.gmra.mxu3 %v16604_v60 }
 0x9f6   : > { %9052 = vst [vmem:[%s17152_s16 + $0xc8] sm:$0xff] %v8603_v34  ;;  %8800 = vmatmul.bf16.gmra.mxu1 %v16874_v36  ;;  %v8510_v14 = vadd.f32 %v8509_v1, %v8461_v19  ;;  %v11117_v1 = vld [vmem:[%s18523_s12 + $0x88] sm:$0xf]  ;;  %v12382_v34 = vld [vmem:[%s18523_s12 + $0xa0] sm:$0xf0] }
 0x9f7   : > { %8982 = vmatpush.bf16.msrb.mxu1 %v11818_v18  ;;  %v11118_v0 = vor.u32 %v12382_v34, %v11117_v1  ;;  %v11313_v34 = vld [vmem:[%s18523_s12 + $0x210] sm:$0xf] }
 0x9f8   : > { %v8463_v10 = vpop.f32.mrf.mxu2  ;;  %v8512_v28 = vpop.f32.mrf.mxu3 }
 0x9f9   : > { %v8556_v41 = vpop.f32.mrf.mxu0  ;;  %8836 = vmatpush.bf16.msrb.mxu2 %v11118_v0  ;;  %v12431_v0 = vld [vmem:[%s18523_s12 + $0x228] sm:$0xf0] }
 0x9fa   : > { %v8557_v2 = vadd.f32 %v8556_v41, %v8508_v53 }
 0x9fb   : > { %v8607_v21 = vpop.f32.mrf.mxu1  ;;  %8751 = vmatmul.bf16.gmra.mxu0 %v16893_v15 }
 0x9fc   : > { %v8606_v57 = vadd.f32 %v8605_v25, %v8557_v2  ;;  %v8464_v25 = vadd.f32 %v8463_v10, %v18181_v24  ;;  %v11342_v10 = vor.u32 %v12438_v31, %v11341_v16 }
 0x9fe   : > { %9059 = vst [vmem:[%s17152_s16 + $0x100] sm:$0xff] %v8606_v57  ;;  %v8513_v11 = vadd.f32 %v8512_v28, %v8464_v25  ;;  %8885 = vmatpush.bf16.msrb.mxu3 %v11342_v10  ;;  %v11565_v57 = vld [vmem:[%s18523_s12 + $0x408] sm:$0xf]  ;;  %v12494_v28 = vld [vmem:[%s18523_s12 + $0x420] sm:$0xf0] }
 0x9ff   : > { %v11566_v22 = vor.u32 %v12494_v28, %v11565_v57  ;;  %v11761_v28 = vld [vmem:[%s18523_s12 + $0x590] sm:$0xf] }
 0xa00   : > { %v8465_v6 = vpop.f32.mrf.mxu2  ;;  %v8514_v61 = vpop.f32.mrf.mxu3 }
 0xa01   : > { %v8558_v13 = vpop.f32.mrf.mxu0  ;;  %8934 = vmatpush.bf16.msrb.mxu0 %v11566_v22  ;;  %v12543_v22 = vld [vmem:[%s18523_s12 + $0x5a8] sm:$0xf0] }
 0xa02   : > { %v8559_v29 = vadd.f32 %v8558_v13, %v8510_v14 }
 0xa03   : > { %v8610_v42 = vpop.f32.mrf.mxu1 }
 0xa04   : > { %v8608_v12 = vadd.f32 %v8607_v21, %v8559_v29  ;;  %v8466_v21 = vadd.f32 %v8465_v6, %v18181_v24  ;;  %v11790_v6 = vor.u32 %v12550_v32, %v11789_v33 }
 0xa05   : > { %8663 = vmatmul.bf16.gmra.mxu2 %v16664_v4  ;;  %8712 = vmatmul.bf16.gmra.mxu3 %v16913_v26 }
 0xa06   : > { %9066 = vst [vmem:[%s17152_s16 + $0x138] sm:$0xff] %v8608_v12  ;;  %8805 = vmatmul.bf16.gmra.mxu1 %v16917_v3  ;;  %v8515_v38 = vadd.f32 %v8514_v61, %v8466_v21  ;;  %v11089_v61 = vld [vmem:[%s18523_s12 + $0x50] sm:$0xf]  ;;  %v12375_v12 = vld [vmem:[%s18523_s12 + $0x68] sm:$0xf0] }
 0xa07   : > { %8983 = vmatpush.bf16.msrb.mxu1 %v11790_v6  ;;  %v11090_v1 = vor.u32 %v12375_v12, %v11089_v61  ;;  %v11061_v6 = vld [vmem:[%s18523_s12 + $0x18] sm:$0xf] }
 0xa08   : > { %v8468_v27 = vpop.f32.mrf.mxu2  ;;  %v8517_v53 = vpop.f32.mrf.mxu3 }
 0xa09   : > { %v8561_v8 = vpop.f32.mrf.mxu0  ;;  %8837 = vmatpush.bf16.msrb.mxu2 %v11090_v1 }
 0xa0a   : > { %v8562_v41 = vadd.f32 %v8561_v8, %v8513_v11 }
 0xa0b   : > { %v8612_v2 = vpop.f32.mrf.mxu1  ;;  %8756 = vmatmul.bf16.gmra.mxu0 %v16936_v63 }
 0xa0c   : > { %v8611_v19 = vadd.f32 %v8610_v42, %v8562_v41  ;;  %v8469_v42 = vadd.f32 %v8468_v27, %v18181_v24  ;;  %v11314_v27 = vor.u32 %v12431_v0, %v11313_v34 }
 0xa0e   : > { %9073 = vst [vmem:[%s17152_s16 + $0x170] sm:$0xff] %v8611_v19  ;;  %v8518_v16 = vadd.f32 %v8517_v53, %v8469_v42  ;;  %8886 = vmatpush.bf16.msrb.mxu3 %v11314_v27  ;;  %v11537_v19 = vld [vmem:[%s18523_s12 + $0x3d0] sm:$0xf]  ;;  %v12487_v53 = vld [vmem:[%s18523_s12 + $0x3e8] sm:$0xf0] }
 0xa0f   : > { %v11538_v57 = vor.u32 %v12487_v53, %v11537_v19  ;;  %v12480_v19 = vld [vmem:[%s18523_s12 + $0x3b0] sm:$0xf0]  ;;  %v11733_v53 = vld [vmem:[%s18523_s12 + $0x558] sm:$0xf] }
 0xa10   : > { %v8470_v5 = vpop.f32.mrf.mxu2  ;;  %v8519_v14 = vpop.f32.mrf.mxu3 }
 0xa11   : > { %v8563_v18 = vpop.f32.mrf.mxu0  ;;  %8935 = vmatpush.bf16.msrb.mxu0 %v11538_v57  ;;  %v12536_v57 = vld [vmem:[%s18523_s12 + $0x570] sm:$0xf0] }
 0xa12   : > { %v8564_v13 = vadd.f32 %v8563_v18, %v8515_v38  ;;  %v12368_v18 = vld [vmem:[%s18523_s12 + $0x30] sm:$0xf0] }
 0xa13   : > { %v8615_v29 = vpop.f32.mrf.mxu1  ;;  %v11062_v42 = vor.u32 %v12368_v18, %v11061_v6 }
 0xa14   : > { %v8613_v25 = vadd.f32 %v8612_v2, %v8564_v13  ;;  %v8471_v2 = vadd.f32 %v8470_v5, %v18181_v24  ;;  %v11762_v5 = vor.u32 %v12543_v22, %v11761_v28  ;;  %v11285_v13 = vld [vmem:[%s18523_s12 + $0x1d8] sm:$0xf] }
 0xa15   : > { %8668 = vmatmul.bf16.gmra.mxu2 %v16715_v49  ;;  %8717 = vmatmul.bf16.gmra.mxu3 %v16956_v7 }
 0xa16   : > { %9080 = vst [vmem:[%s17152_s16 + $0x1a8] sm:$0xff] %v8613_v25  ;;  %8810 = vmatmul.bf16.gmra.mxu1 %v16960_v51  ;;  %v8520_v33 = vadd.f32 %v8519_v14, %v8471_v2  ;;  %v12424_v14 = vld [vmem:[%s18523_s12 + $0x1f0] sm:$0xf0]  ;;  %8838 = vmatpush.bf16.msrb.mxu2 %v11062_v42 }
 0xa17   : > { %8984 = vmatpush.bf16.msrb.mxu1 %v11762_v5  ;;  %v11286_v61 = vor.u32 %v12424_v14, %v11285_v13 }
 0xa18   : > { %v8473_v31 = vpop.f32.mrf.mxu2  ;;  %v8522_v11 = vpop.f32.mrf.mxu3 }
 0xa19   : > { %v8566_v10 = vpop.f32.mrf.mxu0  ;;  %v8474_v1 = vadd.f32 %v8473_v31, %v18181_v24  ;;  %8887 = vmatpush.bf16.msrb.mxu3 %v11286_v61 }
 0xa1a   : > { %v8567_v8 = vadd.f32 %v8566_v10, %v8518_v16 }
 0xa1b   : > { %v8617_v41 = vpop.f32.mrf.mxu1  ;;  %8761 = vmatmul.bf16.gmra.mxu0 %v16979_v58  ;;  %v8523_v0 = vadd.f32 %v8522_v11, %v8474_v1 }
 0xa1c   : > { %v8616_v21 = vadd.f32 %v8615_v29, %v8567_v8 }
 0xa1e   : > { %9087 = vst [vmem:[%s17152_s16 + $0x1e0] sm:$0xff] %v8616_v21 }
 0xa20   : > { %v8475_v32 = vpop.f32.mrf.mxu2  ;;  %v8524_v38 = vpop.f32.mrf.mxu3 }
 0xa21   : > { %v8568_v29 = vpop.f32.mrf.mxu0  ;;  %v8476_v31 = vadd.f32 %v8475_v32, %v18181_v24  ;;  %v11734_v32 = vor.u32 %v12536_v57, %v11733_v53 }
 0xa22   : > { %v8569_v25 = vadd.f32 %v8568_v29, %v8520_v33 }
 0xa23   : > { %v8620_v12 = vpop.f32.mrf.mxu1  ;;  %v8525_v28 = vadd.f32 %v8524_v38, %v8476_v31  ;;  %8985 = vmatpush.bf16.msrb.mxu1 %v11734_v32 }
 0xa24   : > { %v8618_v34 = vadd.f32 %v8617_v41, %v8569_v25  ;;  %v11509_v41 = vld [vmem:[%s18523_s12 + $0x398] sm:$0xf] }
 0xa25   : > { %8673 = vmatmul.bf16.gmra.mxu2 %v16742_v50  ;;  %8722 = vmatmul.bf16.gmra.mxu3 %v17013_v9  ;;  %v11510_v11 = vor.u32 %v12480_v19, %v11509_v41 }
 0xa26   : > { %9094 = vst [vmem:[%s17152_s16 + $0x218] sm:$0xff] %v8618_v34  ;;  %8815 = vmatmul.bf16.gmra.mxu1 %v17015_v52 }
 0xa27   : > { %8936 = vmatpush.bf16.msrb.mxu0 %v11510_v11 }
 0xa28   : > { %v8478_v16 = vpop.f32.mrf.mxu2  ;;  %v8527_v27 = vpop.f32.mrf.mxu3 }
 0xa29   : > { %v8571_v10 = vpop.f32.mrf.mxu0  ;;  %v8479_v13 = vadd.f32 %v8478_v16, %v18181_v24 }
 0xa2a   : > { %v8572_v8 = vadd.f32 %v8571_v10, %v8523_v0 }
 0xa2b   : > { %v8622_v2 = vpop.f32.mrf.mxu1  ;;  %8766 = vmatmul.bf16.gmra.mxu0 %v17034_v17  ;;  %v8528_v38 = vadd.f32 %v8527_v27, %v8479_v13 }
 0xa2c   : > { %v8621_v21 = vadd.f32 %v8620_v12, %v8572_v8 }
 0xa2e   : > { %9101 = vst [vmem:[%s17152_s16 + $0x250] sm:$0xff] %v8621_v21 }
 0xa30   : > { %v8480_v22 = vpop.f32.mrf.mxu2  ;;  %v8529_v33 = vpop.f32.mrf.mxu3 }
 0xa31   : > { %v8573_v5 = vpop.f32.mrf.mxu0  ;;  %v8481_v1 = vadd.f32 %v8480_v22, %v18181_v24 }
 0xa32   : > { %v8574_v6 = vadd.f32 %v8573_v5, %v8525_v28 }
 0xa33   : > { %v8625_v18 = vpop.f32.mrf.mxu1  ;;  %v8530_v0 = vadd.f32 %v8529_v33, %v8481_v1 }
 0xa34   : > { %v8623_v29 = vadd.f32 %v8622_v2, %v8574_v6 }
 0xa35   : > { %8678 = vmatmul.bf16.gmra.mxu2 %v16783_v59  ;;  %8727 = vmatmul.bf16.gmra.mxu3 %v17054_v46 }
 0xa36   : > { %9108 = vst [vmem:[%s17152_s16 + $0x288] sm:$0xff] %v8623_v29  ;;  %8820 = vmatmul.bf16.gmra.mxu1 %v17065_v44 }
 0xa38   : > { %v8483_v42 = vpop.f32.mrf.mxu2  ;;  %v8532_v14 = vpop.f32.mrf.mxu3 }
 0xa39   : > { %v8576_v25 = vpop.f32.mrf.mxu0  ;;  %v8484_v27 = vadd.f32 %v8483_v42, %v18181_v24 }
 0xa3a   : > { %v8577_v61 = vadd.f32 %v8576_v25, %v8528_v38 }
 0xa3b   : > { %v8627_v12 = vpop.f32.mrf.mxu1  ;;  %8771 = vmatmul.bf16.gmra.mxu0 %v17074_v56  ;;  %v8533_v41 = vadd.f32 %v8532_v14, %v8484_v27 }
 0xa3c   : > { %v8626_v34 = vadd.f32 %v8625_v18, %v8577_v61 }
 0xa3e   : > { %9115 = vst [vmem:[%s17152_s16 + $0x2c0] sm:$0xff] %v8626_v34 }
 0xa40   : > { %v8485_v16 = vpop.f32.mrf.mxu2  ;;  %v8534_v10 = vpop.f32.mrf.mxu3 }
 0xa41   : > { %v8578_v8 = vpop.f32.mrf.mxu0  ;;  %v8486_v22 = vadd.f32 %v8485_v16, %v18181_v24 }
 0xa42   : > { %v8579_v2 = vadd.f32 %v8578_v8, %v8530_v0 }
 0xa43   : > { %v8630_v31 = vpop.f32.mrf.mxu1  ;;  %v8535_v32 = vadd.f32 %v8534_v10, %v8486_v22 }
 0xa44   : > { %v8628_v21 = vadd.f32 %v8627_v12, %v8579_v2 }
 0xa45   : > { %8839 = vmatmul.bf16.vlgmr.msrb.gmra.mxu2 %v16515_v45  ;;  %8888 = vmatmul.bf16.vlgmr.msrb.gmra.mxu3 %v16496_v30  ;;  %v18392_v45 = vperm.slane %v18178_v54, 5 }
 0xa46   : > { %9122 = vst [vmem:[%s17152_s16 + $0x2f8] sm:$0xff] %v8628_v21  ;;  %8825 = vmatmul.bf16.gmra.mxu1 %v17092_v48 }
 0xa48   : > { %v8644_v19 = vpop.f32.mrf.mxu2  ;;  %v8693_v11 = vpop.f32.mrf.mxu3 }
 0xa49   : > { %v8581_v53 = vpop.f32.mrf.mxu0  ;;  %v8645_v29 = vadd.f32 %v8644_v19, %v18392_v45 }
 0xa4a   : > { %v8582_v57 = vadd.f32 %v8581_v53, %v8533_v41 }
 0xa4b   : > { %v8632_v28 = vpop.f32.mrf.mxu1  ;;  %8776 = vmatmul.bf16.gmra.mxu0 %v17109_v37  ;;  %v8694_v24 = vadd.f32 %v8693_v11, %v8645_v29 }
 0xa4c   : > { %v8631_v33 = vadd.f32 %v8630_v31, %v8582_v57 }
 0xa4e   : > { %9129 = vst [vmem:[%s17152_s16 + $0x330] sm:$0xff] %v8631_v33 }
 0xa50   : > { %v8646_v30 = vpop.f32.mrf.mxu2  ;;  %v8695_v5 = vpop.f32.mrf.mxu3 }
 0xa51   : > { %v8583_v6 = vpop.f32.mrf.mxu0  ;;  %v8647_v1 = vadd.f32 %v8646_v30, %v18392_v45 }
 0xa52   : > { %v8584_v18 = vadd.f32 %v8583_v6, %v8535_v32 }
 0xa53   : > { %v8791_v13 = vpop.f32.mrf.mxu1  ;;  %v8696_v0 = vadd.f32 %v8695_v5, %v8647_v1 }
 0xa54   : > { %v8633_v38 = vadd.f32 %v8632_v28, %v8584_v18 }
 0xa55   : > { %8844 = vmatmul.bf16.gmra.mxu2 %v16551_v20  ;;  %8893 = vmatmul.bf16.gmra.mxu3 %v16532_v62 }
 0xa56   : > { %9136 = vst [vmem:[%s17152_s16 + $0x368] sm:$0xff] %v8633_v38  ;;  %8986 = vmatmul.bf16.vlgmr.msrb.gmra.mxu1 %v16800_v35 }
 0xa58   : > { %v8649_v42 = vpop.f32.mrf.mxu2  ;;  %v8698_v14 = vpop.f32.mrf.mxu3 }
 0xa59   : > { %v8742_v25 = vpop.f32.mrf.mxu0  ;;  %v8650_v35 = vadd.f32 %v8649_v42, %v18392_v45 }
 0xa5a   : > { %v8743_v61 = vadd.f32 %v8742_v25, %v8694_v24 }
 0xa5b   : > { %v8793_v12 = vpop.f32.mrf.mxu1  ;;  %8937 = vmatmul.bf16.vlgmr.msrb.gmra.mxu0 %v16818_v40  ;;  %v8699_v40 = vadd.f32 %v8698_v14, %v8650_v35 }
 0xa5c   : > { %v8792_v34 = vadd.f32 %v8791_v13, %v8743_v61 }
 0xa5e   : > { %9032 = vst [vmem:[%s17152_s16 + $0x28] sm:$0xff] %v8792_v34 }
 0xa60   : > { %v8651_v20 = vpop.f32.mrf.mxu2  ;;  %v8700_v16 = vpop.f32.mrf.mxu3 }
 0xa61   : > { %v8744_v62 = vpop.f32.mrf.mxu0  ;;  %v8652_v11 = vadd.f32 %v8651_v20, %v18392_v45 }
 0xa62   : > { %v8745_v10 = vadd.f32 %v8744_v62, %v8696_v0 }
 0xa63   : > { %v8796_v8 = vpop.f32.mrf.mxu1  ;;  %v8701_v57 = vadd.f32 %v8700_v16, %v8652_v11 }
 0xa64   : > { %v8794_v2 = vadd.f32 %v8793_v12, %v8745_v10 }
 0xa65   : > { %8849 = vmatmul.bf16.gmra.mxu2 %v16587_v55  ;;  %8898 = vmatmul.bf16.gmra.mxu3 %v16568_v43 }
 0xa66   : > { %9039 = vst [vmem:[%s17152_s16 + $0x60] sm:$0xff] %v8794_v2  ;;  %8991 = vmatmul.bf16.gmra.mxu1 %v16836_v23 }
 0xa68   : > { %v8654_v31 = vpop.f32.mrf.mxu2  ;;  %v8703_v27 = vpop.f32.mrf.mxu3 }
 0xa69   : > { %v8747_v21 = vpop.f32.mrf.mxu0  ;;  %v8655_v23 = vadd.f32 %v8654_v31, %v18392_v45 }
 0xa6a   : > { %v8748_v41 = vadd.f32 %v8747_v21, %v8699_v40 }
 0xa6b   : > { %v8798_v19 = vpop.f32.mrf.mxu1  ;;  %8942 = vmatmul.bf16.gmra.mxu0 %v16854_v47  ;;  %v8704_v47 = vadd.f32 %v8703_v27, %v8655_v23 }
 0xa6c   : > { %v8797_v53 = vadd.f32 %v8796_v8, %v8748_v41 }
 0xa6e   : > { %9046 = vst [vmem:[%s17152_s16 + $0x98] sm:$0xff] %v8797_v53 }
 0xa70   : > { %v8656_v55 = vpop.f32.mrf.mxu2  ;;  %v8705_v28 = vpop.f32.mrf.mxu3 }
 0xa71   : > { %v8749_v43 = vpop.f32.mrf.mxu0  ;;  %v8657_v29 = vadd.f32 %v8656_v55, %v18392_v45 }
 0xa72   : > { %v8750_v22 = vadd.f32 %v8749_v43, %v8701_v57 }
 0xa73   : > { %v8801_v33 = vpop.f32.mrf.mxu1  ;;  %v8706_v24 = vadd.f32 %v8705_v28, %v8657_v29 }
 0xa74   : > { %v8799_v32 = vadd.f32 %v8798_v19, %v8750_v22 }
 0xa75   : > { %8854 = vmatmul.bf16.gmra.mxu2 %v16625_v39  ;;  %8903 = vmatmul.bf16.gmra.mxu3 %v16604_v60 }
 0xa76   : > { %9053 = vst [vmem:[%s17152_s16 + $0xd0] sm:$0xff] %v8799_v32  ;;  %8996 = vmatmul.bf16.gmra.mxu1 %v16874_v36 }
 0xa78   : > { %v8659_v30 = vpop.f32.mrf.mxu2  ;;  %v8708_v5 = vpop.f32.mrf.mxu3 }
 0xa79   : > { %v8752_v6 = vpop.f32.mrf.mxu0  ;;  %v8660_v36 = vadd.f32 %v8659_v30, %v18392_v45 }
 0xa7a   : > { %v8753_v18 = vadd.f32 %v8752_v6, %v8704_v47 }
 0xa7b   : > { %v8803_v13 = vpop.f32.mrf.mxu1  ;;  %8947 = vmatmul.bf16.gmra.mxu0 %v16893_v15  ;;  %v8709_v15 = vadd.f32 %v8708_v5, %v8660_v36 }
 0xa7c   : > { %v8802_v38 = vadd.f32 %v8801_v33, %v8753_v18 }
 0xa7e   : > { %9060 = vst [vmem:[%s17152_s16 + $0x108] sm:$0xff] %v8802_v38 }
 0xa80   : > { %v8661_v39 = vpop.f32.mrf.mxu2  ;;  %v8710_v42 = vpop.f32.mrf.mxu3 }
 0xa81   : > { %v8754_v60 = vpop.f32.mrf.mxu0  ;;  %v8662_v16 = vadd.f32 %v8661_v39, %v18392_v45 }
 0xa82   : > { %v8755_v14 = vadd.f32 %v8754_v60, %v8706_v24 }
 0xa83   : > { %v8806_v25 = vpop.f32.mrf.mxu1  ;;  %v8711_v10 = vadd.f32 %v8710_v42, %v8662_v16 }
 0xa84   : > { %v8804_v61 = vadd.f32 %v8803_v13, %v8755_v14 }
 0xa85   : > { %8859 = vmatmul.bf16.gmra.mxu2 %v16664_v4  ;;  %8908 = vmatmul.bf16.gmra.mxu3 %v16913_v26 }
 0xa86   : > { %9067 = vst [vmem:[%s17152_s16 + $0x140] sm:$0xff] %v8804_v61  ;;  %9001 = vmatmul.bf16.gmra.mxu1 %v16917_v3 }
 0xa88   : > { %v8664_v12 = vpop.f32.mrf.mxu2  ;;  %v8713_v1 = vpop.f32.mrf.mxu3 }
 0xa89   : > { %v8757_v34 = vpop.f32.mrf.mxu0  ;;  %v8665_v3 = vadd.f32 %v8664_v12, %v18392_v45 }
 0xa8a   : > { %v8758_v0 = vadd.f32 %v8757_v34, %v8709_v15 }
 0xa8b   : > { %v8808_v20 = vpop.f32.mrf.mxu1  ;;  %8952 = vmatmul.bf16.gmra.mxu0 %v16936_v63  ;;  %v8714_v63 = vadd.f32 %v8713_v1, %v8665_v3 }
 0xa8c   : > { %v8807_v62 = vadd.f32 %v8806_v25, %v8758_v0 }
 0xa8e   : > { %9074 = vst [vmem:[%s17152_s16 + $0x178] sm:$0xff] %v8807_v62 }
 0xa90   : > { %v8666_v4 = vpop.f32.mrf.mxu2  ;;  %v8715_v8 = vpop.f32.mrf.mxu3 }
 0xa91   : > { %v8759_v26 = vpop.f32.mrf.mxu0  ;;  %v8667_v11 = vadd.f32 %v8666_v4, %v18392_v45 }
 0xa92   : > { %v8760_v35 = vadd.f32 %v8759_v26, %v8711_v10 }
 0xa93   : > { %v8811_v2 = vpop.f32.mrf.mxu1  ;;  %v8716_v57 = vadd.f32 %v8715_v8, %v8667_v11 }
 0xa94   : > { %v8809_v40 = vadd.f32 %v8808_v20, %v8760_v35 }
 0xa95   : > { %8864 = vmatmul.bf16.gmra.mxu2 %v16715_v49  ;;  %8913 = vmatmul.bf16.gmra.mxu3 %v16956_v7 }
 0xa96   : > { %9081 = vst [vmem:[%s17152_s16 + $0x1b0] sm:$0xff] %v8809_v40  ;;  %9006 = vmatmul.bf16.gmra.mxu1 %v16960_v51 }
 0xa98   : > { %v8669_v31 = vpop.f32.mrf.mxu2  ;;  %v8718_v27 = vpop.f32.mrf.mxu3 }
 0xa99   : > { %v8762_v21 = vpop.f32.mrf.mxu0  ;;  %v8670_v51 = vadd.f32 %v8669_v31, %v18392_v45 }
 0xa9a   : > { %v8763_v41 = vadd.f32 %v8762_v21, %v8714_v63 }
 0xa9b   : > { %v8813_v19 = vpop.f32.mrf.mxu1  ;;  %8957 = vmatmul.bf16.gmra.mxu0 %v16979_v58  ;;  %v8719_v58 = vadd.f32 %v8718_v27, %v8670_v51 }
 0xa9c   : > { %v8812_v53 = vadd.f32 %v8811_v2, %v8763_v41  ;;  %v18457_v2 = vperm.slane %v18178_v54, 6 }
 0xa9e   : > { %9088 = vst [vmem:[%s17152_s16 + $0x1e8] sm:$0xff] %v8812_v53 }
 0xaa0   : > { %v8671_v49 = vpop.f32.mrf.mxu2  ;;  %v8720_v55 = vpop.f32.mrf.mxu3 }
 0xaa1   : > { %v8764_v7 = vpop.f32.mrf.mxu0  ;;  %v8672_v5 = vadd.f32 %v8671_v49, %v18392_v45 }
 0xaa2   : > { %v8765_v28 = vadd.f32 %v8764_v7, %v8716_v57 }
 0xaa3   : > { %v8816_v43 = vpop.f32.mrf.mxu1  ;;  %v8721_v18 = vadd.f32 %v8720_v55, %v8672_v5 }
 0xaa4   : > { %v8814_v22 = vadd.f32 %v8813_v19, %v8765_v28 }
 0xaa5   : > { %8869 = vmatmul.bf16.gmra.mxu2 %v16742_v50  ;;  %8918 = vmatmul.bf16.gmra.mxu3 %v17013_v9 }
 0xaa6   : > { %9095 = vst [vmem:[%s17152_s16 + $0x220] sm:$0xff] %v8814_v22  ;;  %9011 = vmatmul.bf16.gmra.mxu1 %v17015_v52 }
 0xaa8   : > { %v8674_v33 = vpop.f32.mrf.mxu2  ;;  %v8723_v23 = vpop.f32.mrf.mxu3 }
 0xaa9   : > { %v8767_v32 = vpop.f32.mrf.mxu0  ;;  %v8675_v52 = vadd.f32 %v8674_v33, %v18392_v45 }
 0xaaa   : > { %v8768_v47 = vadd.f32 %v8767_v32, %v8719_v58 }
 0xaab   : > { %v8818_v30 = vpop.f32.mrf.mxu1  ;;  %8962 = vmatmul.bf16.gmra.mxu0 %v17034_v17  ;;  %v8724_v17 = vadd.f32 %v8723_v23, %v8675_v52 }
 0xaac   : > { %v8817_v6 = vadd.f32 %v8816_v43, %v8768_v47 }
 0xaae   : > { %9102 = vst [vmem:[%s17152_s16 + $0x258] sm:$0xff] %v8817_v6 }
 0xab0   : > { %v8676_v50 = vpop.f32.mrf.mxu2  ;;  %v8725_v13 = vpop.f32.mrf.mxu3 }
 0xab1   : > { %v8769_v9 = vpop.f32.mrf.mxu0  ;;  %v8677_v36 = vadd.f32 %v8676_v50, %v18392_v45 }
 0xab2   : > { %v8770_v29 = vadd.f32 %v8769_v9, %v8721_v18 }
 0xab3   : > { %v8821_v38 = vpop.f32.mrf.mxu1  ;;  %v8726_v15 = vadd.f32 %v8725_v13, %v8677_v36 }
 0xab4   : > { %v8819_v24 = vadd.f32 %v8818_v30, %v8770_v29 }
 0xab5   : > { %8874 = vmatmul.bf16.gmra.mxu2 %v16783_v59  ;;  %8923 = vmatmul.bf16.gmra.mxu3 %v17054_v46 }
 0xab6   : > { %9109 = vst [vmem:[%s17152_s16 + $0x290] sm:$0xff] %v8819_v24  ;;  %9016 = vmatmul.bf16.gmra.mxu1 %v17065_v44 }
 0xab8   : > { %v8679_v39 = vpop.f32.mrf.mxu2  ;;  %v8728_v42 = vpop.f32.mrf.mxu3 }
 0xab9   : > { %v8772_v60 = vpop.f32.mrf.mxu0  ;;  %v8680_v34 = vadd.f32 %v8679_v39, %v18392_v45 }
 0xaba   : > { %v8773_v14 = vadd.f32 %v8772_v60, %v8724_v17 }
 0xabb   : > { %v8823_v25 = vpop.f32.mrf.mxu1  ;;  %8967 = vmatmul.bf16.gmra.mxu0 %v17074_v56  ;;  %v8729_v20 = vadd.f32 %v8728_v42, %v8680_v34 }
 0xabc   : > { %v8822_v61 = vadd.f32 %v8821_v38, %v8773_v14 }
 0xabe   : > { %9116 = vst [vmem:[%s17152_s16 + $0x2c8] sm:$0xff] %v8822_v61 }
 0xac0   : > { %v8681_v59 = vpop.f32.mrf.mxu2  ;;  %v8730_v12 = vpop.f32.mrf.mxu3 }
 0xac1   : > { %v8774_v46 = vpop.f32.mrf.mxu0  ;;  %v8682_v8 = vadd.f32 %v8681_v59, %v18392_v45 }
 0xac2   : > { %v8775_v1 = vadd.f32 %v8774_v46, %v8726_v15 }
 0xac3   : > { %v8826_v44 = vpop.f32.mrf.mxu1  ;;  %v8731_v35 = vadd.f32 %v8730_v12, %v8682_v8 }
 0xac4   : > { %v8824_v0 = vadd.f32 %v8823_v25, %v8775_v1 }
 0xac6   : > { %9123 = vst [vmem:[%s17152_s16 + $0x300] sm:$0xff] %v8824_v0  ;;  %9021 = vmatmul.bf16.gmra.mxu1 %v17092_v48 }
 0xac8   : > { %v8840_v16 = vpop.f32.mrf.mxu2  ;;  %v8889_v56 = vpop.f32.mrf.mxu3 }
 0xac9   : > { %v8777_v62 = vpop.f32.mrf.mxu0  ;;  %v8841_v27 = vadd.f32 %v8840_v16, %v18457_v2 }
 0xaca   : > { %v8778_v10 = vadd.f32 %v8777_v62, %v8729_v20 }
 0xacb   : > { %v8828_v4 = vpop.f32.mrf.mxu1  ;;  %8972 = vmatmul.bf16.gmra.mxu0 %v17109_v37  ;;  %v8890_v41 = vadd.f32 %v8889_v56, %v8841_v27 }
 0xacc   : > { %v8827_v26 = vadd.f32 %v8826_v44, %v8778_v10 }
 0xace   : > { %9130 = vst [vmem:[%s17152_s16 + $0x338] sm:$0xff] %v8827_v26 }
 0xad0   : > { %v8842_v3 = vpop.f32.mrf.mxu2  ;;  %v8891_v48 = vpop.f32.mrf.mxu3 }
 0xad1   : > { %v8779_v40 = vpop.f32.mrf.mxu0  ;;  %v8843_v54 = vadd.f32 %v8842_v3, %v18457_v2 }
 0xad2   : > { %v8780_v63 = vadd.f32 %v8779_v40, %v8731_v35 }
 0xad3   : > { %v8987_v31 = vpop.f32.mrf.mxu1  ;;  %v8892_v49 = vadd.f32 %v8891_v48, %v8843_v54 }
 0xad4   : > { %v8829_v21 = vadd.f32 %v8828_v4, %v8780_v63 }
 0xad6   : > { %9137 = vst [vmem:[%s17152_s16 + $0x370] sm:$0xff] %v8829_v21 }
 0xad8   : > { %v8845_v37 = vpop.f32.mrf.mxu2  ;;  %v8894_v45 = vpop.f32.mrf.mxu3 }
 0xad9   : > { %v8938_v19 = vpop.f32.mrf.mxu0  ;;  %v8846_v22 = vadd.f32 %v8845_v37, %v18457_v2 }
 0xada   : > { %v8939_v11 = vadd.f32 %v8938_v19, %v8890_v41 }
 0xadb   : > { %v8989_v53 = vpop.f32.mrf.mxu1  ;;  %v8895_v33 = vadd.f32 %v8894_v45, %v8846_v22 }
 0xadc   : > { %v8988_v57 = vadd.f32 %v8987_v31, %v8939_v11 }
 0xade   : > { %9033 = vst.msk [vmem:[%s17152_s16 + $0x30] sm:$0xff] %vm2072_vm0, %v8988_v57 }
 0xae0   : > { %v8847_v55 = vpop.f32.mrf.mxu2  ;;  %v8896_v7 = vpop.f32.mrf.mxu3 }
 0xae1   : > { %v8940_v28 = vpop.f32.mrf.mxu0  ;;  %v8848_v6 = vadd.f32 %v8847_v55, %v18457_v2 }
 0xae2   : > { %v8941_v43 = vadd.f32 %v8940_v28, %v8892_v49 }
 0xae3   : > { %v8992_v51 = vpop.f32.mrf.mxu1  ;;  %v8897_v50 = vadd.f32 %v8896_v7, %v8848_v6 }
 0xae4   : > { %v8990_v58 = vadd.f32 %v8989_v53, %v8941_v43 }
 0xae6   : > { %9040 = vst.msk [vmem:[%s17152_s16 + $0x68] sm:$0xff] %vm2072_vm0, %v8990_v58 }
 0xae8   : > { %v8850_v23 = vpop.f32.mrf.mxu2  ;;  %v8899_v32 = vpop.f32.mrf.mxu3 }
 0xae9   : > { %v8943_v47 = vpop.f32.mrf.mxu0  ;;  %v8851_v24 = vadd.f32 %v8850_v23, %v18457_v2 }
 0xaea   : > { %v8944_v30 = vadd.f32 %v8943_v47, %v8895_v33 }
 0xaeb   : > { %v8994_v5 = vpop.f32.mrf.mxu1  ;;  %v8900_v39 = vadd.f32 %v8899_v32, %v8851_v24 }
 0xaec   : > { %v8993_v18 = vadd.f32 %v8992_v51, %v8944_v30 }
 0xaee   : > { %9047 = vst.msk [vmem:[%s17152_s16 + $0xa0] sm:$0xff] %vm2072_vm0, %v8993_v18 }
 0xaf0   : > { %v8852_v13 = vpop.f32.mrf.mxu2  ;;  %v8901_v9 = vpop.f32.mrf.mxu3 }
 0xaf1   : > { %v8945_v29 = vpop.f32.mrf.mxu0  ;;  %v8853_v61 = vadd.f32 %v8852_v13, %v18457_v2 }
 0xaf2   : > { %v8946_v38 = vadd.f32 %v8945_v29, %v8897_v50 }
 0xaf3   : > { %v8997_v52 = vpop.f32.mrf.mxu1  ;;  %v8902_v59 = vadd.f32 %v8901_v9, %v8853_v61 }
 0xaf4   : > { %v8995_v17 = vadd.f32 %v8994_v5, %v8946_v38 }
 0xaf6   : > { %9054 = vst.msk [vmem:[%s17152_s16 + $0xd8] sm:$0xff] %vm2072_vm0, %v8995_v17 }
 0xaf8   : > { %v8855_v42 = vpop.f32.mrf.mxu2  ;;  %v8904_v60 = vpop.f32.mrf.mxu3 }
 0xaf9   : > { %v8948_v14 = vpop.f32.mrf.mxu0  ;;  %v8856_v0 = vadd.f32 %v8855_v42, %v18457_v2 }
 0xafa   : > { %v8949_v25 = vadd.f32 %v8948_v14, %v8900_v39 }
 0xafb   : > { %v8999_v36 = vpop.f32.mrf.mxu1  ;;  %v8905_v16 = vadd.f32 %v8904_v60, %v8856_v0 }
 0xafc   : > { %v8998_v15 = vadd.f32 %v8997_v52, %v8949_v25 }
 0xafe   : > { %9061 = vst.msk [vmem:[%s17152_s16 + $0x110] sm:$0xff] %vm2072_vm0, %v8998_v15 }
 0xb00   : > { %v8857_v12 = vpop.f32.mrf.mxu2  ;;  %v8906_v46 = vpop.f32.mrf.mxu3 }
 0xb01   : > { %v8950_v1 = vpop.f32.mrf.mxu0  ;;  %v8858_v26 = vadd.f32 %v8857_v12, %v18457_v2 }
 0xb02   : > { %v8951_v44 = vadd.f32 %v8950_v1, %v8902_v59 }
 0xb03   : > { %v9002_v34 = vpop.f32.mrf.mxu1  ;;  %v8907_v3 = vadd.f32 %v8906_v46, %v8858_v26 }
 0xb04   : > { %v9000_v20 = vadd.f32 %v8999_v36, %v8951_v44 }
 0xb06   : > { %9068 = vst.msk [vmem:[%s17152_s16 + $0x148] sm:$0xff] %vm2072_vm0, %v9000_v20 }
 0xb08   : > { %v8860_v56 = vpop.f32.mrf.mxu2  ;;  %v8909_v62 = vpop.f32.mrf.mxu3 }
 0xb09   : > { %v8953_v10 = vpop.f32.mrf.mxu0  ;;  %v8861_v21 = vadd.f32 %v8860_v56, %v18457_v2 }
 0xb0a   : > { %v8954_v4 = vadd.f32 %v8953_v10, %v8905_v16 }
 0xb0b   : > { %v9004_v8 = vpop.f32.mrf.mxu1  ;;  %v8910_v37 = vadd.f32 %v8909_v62, %v8861_v21 }
 0xb0c   : > { %v9003_v35 = vadd.f32 %v9002_v34, %v8954_v4 }
 0xb0e   : > { %9075 = vst.msk [vmem:[%s17152_s16 + $0x180] sm:$0xff] %vm2072_vm0, %v9003_v35 }
 0xb10   : > { %v8862_v48 = vpop.f32.mrf.mxu2  ;;  %v8911_v31 = vpop.f32.mrf.mxu3 }
 0xb11   : > { %v8955_v40 = vpop.f32.mrf.mxu0  ;;  %v8863_v54 = vadd.f32 %v8862_v48, %v18457_v2 }
 0xb12   : > { %v8956_v63 = vadd.f32 %v8955_v40, %v8907_v3 }
 0xb13   : > { %v9007_v27 = vpop.f32.mrf.mxu1  ;;  %v8912_v55 = vadd.f32 %v8911_v31, %v8863_v54 }
 0xb14   : > { %v9005_v41 = vadd.f32 %v9004_v8, %v8956_v63 }
 0xb16   : > { %9082 = vst.msk [vmem:[%s17152_s16 + $0x1b8] sm:$0xff] %vm2072_vm0, %v9005_v41 }
 0xb18   : > { %v8865_v45 = vpop.f32.mrf.mxu2  ;;  %v8914_v49 = vpop.f32.mrf.mxu3 }
 0xb19   : > { %v8958_v19 = vpop.f32.mrf.mxu0  ;;  %v8866_v22 = vadd.f32 %v8865_v45, %v18457_v2 }
 0xb1a   : > { %v8959_v11 = vadd.f32 %v8958_v19, %v8910_v37 }
 0xb1b   : > { %v9009_v53 = vpop.f32.mrf.mxu1  ;;  %v8915_v23 = vadd.f32 %v8914_v49, %v8866_v22 }
 0xb1c   : > { %v9008_v57 = vadd.f32 %v9007_v27, %v8959_v11 }
 0xb1e   : > { %9089 = vst.msk [vmem:[%s17152_s16 + $0x1f0] sm:$0xff] %vm2072_vm0, %v9008_v57 }
 0xb20   : > { %v8867_v7 = vpop.f32.mrf.mxu2  ;;  %v8916_v33 = vpop.f32.mrf.mxu3 }
 0xb21   : > { %v8960_v28 = vpop.f32.mrf.mxu0  ;;  %v8868_v6 = vadd.f32 %v8867_v7, %v18457_v2 }
 0xb22   : > { %v8961_v43 = vadd.f32 %v8960_v28, %v8912_v55 }
 0xb23   : > { %v9012_v51 = vpop.f32.mrf.mxu1  ;;  %v8917_v50 = vadd.f32 %v8916_v33, %v8868_v6 }
 0xb24   : > { %v9010_v58 = vadd.f32 %v9009_v53, %v8961_v43 }
 0xb26   : > { %9096 = vst.msk [vmem:[%s17152_s16 + $0x228] sm:$0xff] %vm2072_vm0, %v9010_v58 }
 0xb28   : > { %v8870_v47 = vpop.f32.mrf.mxu2  ;;  %v8919_v13 = vpop.f32.mrf.mxu3 }
 0xb29   : > { %v8963_v32 = vpop.f32.mrf.mxu0  ;;  %v8871_v38 = vadd.f32 %v8870_v47, %v18457_v2 }
 0xb2a   : > { %v8964_v30 = vadd.f32 %v8963_v32, %v8915_v23 }
 0xb2b   : > { %v9014_v5 = vpop.f32.mrf.mxu1  ;;  %v8920_v39 = vadd.f32 %v8919_v13, %v8871_v38 }
 0xb2c   : > { %v9013_v18 = vadd.f32 %v9012_v51, %v8964_v30 }
 0xb2e   : > { %9103 = vst.msk [vmem:[%s17152_s16 + $0x260] sm:$0xff] %vm2072_vm0, %v9013_v18 }
 0xb30   : > { %v8872_v52 = vpop.f32.mrf.mxu2  ;;  %v8921_v14 = vpop.f32.mrf.mxu3 }
 0xb31   : > { %v8965_v9 = vpop.f32.mrf.mxu0  ;;  %v8873_v25 = vadd.f32 %v8872_v52, %v18457_v2 }
 0xb32   : > { %v8966_v29 = vadd.f32 %v8965_v9, %v8917_v50 }
 0xb33   : > { %v9017_v17 = vpop.f32.mrf.mxu1  ;;  %v8922_v59 = vadd.f32 %v8921_v14, %v8873_v25 }
 0xb34   : > { %v9015_v24 = vadd.f32 %v9014_v5, %v8966_v29 }
 0xb36   : > { %9110 = vst.msk [vmem:[%s17152_s16 + $0x298] sm:$0xff] %vm2072_vm0, %v9015_v24 }
 0xb38   : > { %v8875_v61 = vpop.f32.mrf.mxu2  ;;  %v8924_v34 = vpop.f32.mrf.mxu3 }
 0xb39   : > { %v8968_v42 = vpop.f32.mrf.mxu0  ;;  %v8876_v1 = vadd.f32 %v8875_v61, %v18457_v2 }
 0xb3a   : > { %v8969_v60 = vadd.f32 %v8968_v42, %v8920_v39 }
 0xb3b   : > { %v9019_v15 = vpop.f32.mrf.mxu1  ;;  %v8925_v0 = vadd.f32 %v8924_v34, %v8876_v1 }
 0xb3c   : > { %v9018_v36 = vadd.f32 %v9017_v17, %v8969_v60 }
 0xb3e   : > { %9117 = vst.msk [vmem:[%s17152_s16 + $0x2d0] sm:$0xff] %vm2072_vm0, %v9018_v36 }
 0xb40   : > { %v8877_v20 = vpop.f32.mrf.mxu2  ;;  %v8926_v8 = vpop.f32.mrf.mxu3 }
 0xb41   : > { %v8970_v12 = vpop.f32.mrf.mxu0  ;;  %v8878_v10 = vadd.f32 %v8877_v20, %v18457_v2 }
 0xb42   : > { %v8971_v46 = vadd.f32 %v8970_v12, %v8922_v59 }
 0xb43   : > { %v9022_v16 = vpop.f32.mrf.mxu1  ;;  %v8927_v26 = vadd.f32 %v8926_v8, %v8878_v10 }
 0xb44   : > { %v9020_v44 = vadd.f32 %v9019_v15, %v8971_v46 }
 0xb46   : > { %9124 = vst.msk [vmem:[%s17152_s16 + $0x308] sm:$0xff] %vm2072_vm0, %v9020_v44 }
 0xb49   : > { %v8973_v56 = vpop.f32.mrf.mxu0 }
 0xb4a   : > { %v8974_v62 = vadd.f32 %v8973_v56, %v8925_v0 }
 0xb4b   : > { %v9024_v48 = vpop.f32.mrf.mxu1 }
 0xb4c   : > { %v9023_v4 = vadd.f32 %v9022_v16, %v8974_v62 }
 0xb4e   : > { %9131 = vst.msk [vmem:[%s17152_s16 + $0x340] sm:$0xff] %vm2072_vm0, %v9023_v4 }
 0xb51   : > { %v8975_v35 = vpop.f32.mrf.mxu0 }
 0xb52   : > { %v8976_v3 = vadd.f32 %v8975_v35, %v8927_v26 }
 0xb54   : > { %v9025_v40 = vadd.f32 %v9024_v48, %v8976_v3 }
 0xb56   : > { %9138 = vst.msk [vmem:[%s17152_s16 + $0x378] sm:$0xff] %vm2072_vm0, %v9025_v40 }
 0xb57 PF: > { %s26_s18 = sadd.s32 1, %s12694_s18  }
 0xb58   : > { %p23_p4 = scmp.ge.s32.totalorder %s26_s18, 4  }
 0xb5a   :  { %25 = sbr.rel (!%p23_p4) target bundleno = 1 (0x1), region = 121 }

</bundles_post_ra>
